<compile_context>
chip_gen: v5e
topology: v5e:2x2
jax: 0.10.0
libtpu: 0.0.40
codegen_flags: <defaults>
</compile_context>

<pallas_src>
import jax
import jax.numpy as jnp
from jax.experimental import pallas as pl
from jax.experimental.pallas import tpu as pltpu

B = 2
CHANNELS = 3
IN_FEATURES = CHANNELS * 32 * 32     # 3072
HIDDEN = 1500
HIDDEN_PAD = 1536                    # pad hidden dim to a lane multiple (zero cols are inert)
NUM_CLASSES = 10
C_PAD = 128                          # pad classes to one full lane group (zero cols are inert)


def _select_config():
    """Per-generation tiling: v7x has 2 TensorCores -> 4 parallel tiles + wrapper sum;
    v5e/v6e are single-TC -> 2 tiles on an 'arbitrary' axis with in-kernel accumulation."""
    try:
        kind = jax.devices()[0].device_kind.lower()
    except Exception:
        kind = ""
    multi_tc = "v7" in kind
    tn = 384 if multi_tc else 768
    return tn, multi_tc


TN, MULTI_TC = _select_config()
N_TILES = HIDDEN_PAD // TN


def _mlp_partials_kernel(x_ref, w1_ref, b1_ref, w2_ref, o_ref):
    """Per hidden tile n (v7x / megacore variant):
       h = relu(x @ W1_n + b1_n);  o[n] = h @ W2_n   (sum over n + b2 done in wrapper)."""
    h = jnp.maximum(
        jnp.dot(x_ref[...], w1_ref[0], preferred_element_type=jnp.float32)
        + b1_ref[...],
        0.0,
    )
    o_ref[0] = jnp.dot(h, w2_ref[...].astype(jnp.float32),
                       preferred_element_type=jnp.float32)


def _mlp_acc_kernel(x_ref, w1_ref, b1_ref, w2_ref, b2_ref, o_ref):
    """Per hidden tile n (single-TC variant): revisited (B, C_PAD) accumulator output."""
    n = pl.program_id(0)
    h = jnp.maximum(
        jnp.dot(x_ref[...], w1_ref[0], preferred_element_type=jnp.float32)
        + b1_ref[...],
        0.0,
    )
    partial = jnp.dot(h, w2_ref[...].astype(jnp.float32),
                      preferred_element_type=jnp.float32)

    @pl.when(n == 0)
    def _():
        o_ref[...] = b2_ref[...] + partial

    @pl.when(n > 0)
    def _():
        o_ref[...] = o_ref[...] + partial


def fused_mlp(x_bf16, w1_tiles, b1, w2, b2):
    """x_bf16:(B,K) bf16, w1_tiles:(N_TILES,K,TN) bf16, b1:(1,Hp) f32,
       w2:(Hp,C_PAD) bf16, b2:(1,C_PAD) f32 -> (B, NUM_CLASSES) f32."""
    bsz, K = x_bf16.shape
    n_tiles, _, tn = w1_tiles.shape

    flops = 2 * bsz * K * HIDDEN_PAD + 2 * bsz * HIDDEN_PAD * C_PAD
    bytes_accessed = (w1_tiles.size * 2 + w2.size * 2 + x_bf16.size * 2
                      + b1.size * 4 + b2.size * 4 + 4 * bsz * C_PAD * n_tiles)
    # Double-buffered bf16 W1 block dominates VMEM; add headroom for the small operands
    # and compiler scratch.  Stays well under 64 MiB/TC on v7x.
    vmem_limit = 2 * (K * tn * 2) + (8 << 20)

    common = dict(
        compiler_params=pltpu.CompilerParams(
            dimension_semantics=("parallel",) if MULTI_TC else ("arbitrary",),
            vmem_limit_bytes=vmem_limit,
        ),
        cost_estimate=pl.CostEstimate(
            flops=flops, transcendentals=0, bytes_accessed=bytes_accessed),
    )

    x_spec = pl.BlockSpec((bsz, K), lambda n: (0, 0))          # full K, reused each step
    w1_spec = pl.BlockSpec((1, K, tn), lambda n: (n, 0, 0))    # contiguous bf16 W1 slab
    b1_spec = pl.BlockSpec((1, tn), lambda n: (0, n))          # b1 tile
    w2_spec = pl.BlockSpec((tn, C_PAD), lambda n: (n, 0))      # contiguous W2 row tile

    if MULTI_TC:
        partials = pl.pallas_call(
            _mlp_partials_kernel,
            out_shape=jax.ShapeDtypeStruct((n_tiles, bsz, C_PAD), jnp.float32),
            grid_spec=pltpu.PrefetchScalarGridSpec(
                num_scalar_prefetch=0,
                grid=(n_tiles,),
                in_specs=[x_spec, w1_spec, b1_spec, w2_spec],
                out_specs=pl.BlockSpec((1, bsz, C_PAD), lambda n: (n, 0, 0)),
            ),
            **common,
        )(x_bf16, w1_tiles, b1, w2)
        # Tiny epilogue (n_tiles x B x 128 partial logits): sum over tiles + output bias.
        out = jnp.sum(partials, axis=0) + b2
    else:
        out = pl.pallas_call(
            _mlp_acc_kernel,
            out_shape=jax.ShapeDtypeStruct((bsz, C_PAD), jnp.float32),
            grid_spec=pltpu.PrefetchScalarGridSpec(
                num_scalar_prefetch=0,
                grid=(n_tiles,),
                in_specs=[x_spec, w1_spec, b1_spec, w2_spec,
                          pl.BlockSpec((1, C_PAD), lambda n: (0, 0))],
                out_specs=pl.BlockSpec((bsz, C_PAD), lambda n: (0, 0)),
            ),
            **common,
        )(x_bf16, w1_tiles, b1, w2, b2)

    return out[:, :NUM_CLASSES]


@jax.jit
def net_forward(x, w1_tiles, b1, w2, b2):
    # hidden layer + ReLU + output layer fused in one kernel; dropout (eval) = identity.
    return fused_mlp(x.astype(jnp.bfloat16), w1_tiles, b1, w2, b2)


def init_params(key):
    """PyTorch-style uniform(-1/sqrt(fan_in), 1/sqrt(fan_in)) init, deterministic."""
    k1, k2, k3, k4 = jax.random.split(key, 4)
    lim1 = 1.0 / jnp.sqrt(jnp.float32(IN_FEATURES))
    lim2 = 1.0 / jnp.sqrt(jnp.float32(HIDDEN))
    w1 = jax.random.uniform(k1, (IN_FEATURES, HIDDEN), jnp.float32, -lim1, lim1)
    b1 = jax.random.uniform(k2, (HIDDEN,), jnp.float32, -lim1, lim1)
    w2 = jax.random.uniform(k3, (HIDDEN, NUM_CLASSES), jnp.float32, -lim2, lim2)
    b2 = jax.random.uniform(k4, (NUM_CLASSES,), jnp.float32, -lim2, lim2)

    # Pad hidden 1500 -> 1536 and classes 10 -> 128 with zeros (inert through ReLU / matmul).
    w1p = jnp.zeros((IN_FEATURES, HIDDEN_PAD), jnp.float32).at[:, :HIDDEN].set(w1)
    b1p = jnp.zeros((1, HIDDEN_PAD), jnp.float32).at[0, :HIDDEN].set(b1)
    w2p = jnp.zeros((HIDDEN_PAD, C_PAD), jnp.float32).at[:HIDDEN, :NUM_CLASSES].set(w2)
    b2p = jnp.zeros((1, C_PAD), jnp.float32).at[0, :NUM_CLASSES].set(b2)

    # bf16 weight stream (accumulation stays f32 in-kernel).  W1 is laid out tile-contiguous
    # as (N_TILES, K, TN) so each grid step DMAs one contiguous slab at peak HBM bandwidth.
    w1_tiles = (w1p.astype(jnp.bfloat16)
                .reshape(IN_FEATURES, N_TILES, TN)
                .transpose(1, 0, 2))
    w2_bf16 = w2p.astype(jnp.bfloat16)
    return (w1_tiles, b1p, w2_bf16, b2p), (w1, b1, w2, b2)


if __name__ == "__main__":
    key = jax.random.PRNGKey(0)
    kx, kp = jax.random.split(key)

    # Input: batch of flattened 3x32x32 images.
    x_img = jax.random.normal(kx, (B, CHANNELS, 32, 32), jnp.float32)
    x = x_img.reshape(B, IN_FEATURES)

    (w1_tiles, b1p, w2_bf16, b2p), (w1, b1, w2, b2) = init_params(kp)

    out = net_forward(x, w1_tiles, b1p, w2_bf16, b2p)
    out = jax.block_until_ready(out)
    assert out.shape == (B, NUM_CLASSES), out.shape

    # Reference 1: same bf16-quantized operands, f32 math -> isolates kernel error.
    hp = jax.lax.Precision.HIGHEST
    xq = x.astype(jnp.bfloat16).astype(jnp.float32)
    w1q = w1.astype(jnp.bfloat16).astype(jnp.float32)
    w2q = w2.astype(jnp.bfloat16).astype(jnp.float32)
    hq = jnp.maximum(jnp.dot(xq, w1q, precision=hp) + b1, 0.0)
    ref_q = jnp.dot(hq, w2q, precision=hp) + b2
    # Reference 2: full f32 weights -> includes the bf16 weight-quantization error.
    ref_f = jnp.maximum(jnp.dot(x, w1, precision=hp) + b1, 0.0)
    ref_f = jnp.dot(ref_f, w2, precision=hp) + b2

    err_q = float(jnp.max(jnp.abs(out - ref_q)))
    err_f = float(jnp.max(jnp.abs(out - ref_f)))
    assert err_q < 1e-2, f"max abs err vs bf16-quantized ref {err_q}"
    assert err_f < 5e-2, f"max abs err vs f32 ref {err_f}"
    print("KERNEL_OK")
</pallas_src>

<mosaic_0001>
module attributes {stable_mosaic.version = 11 : i64} {
  func.func @_mlp_acc_kernel(%arg0: i32, %arg1: memref<2x3072xbf16, #tpu.memory_space<vmem>>, %arg2: memref<1x3072x768xbf16, #tpu.memory_space<vmem>>, %arg3: memref<1x768xf32, #tpu.memory_space<vmem>>, %arg4: memref<768x128xbf16, #tpu.memory_space<vmem>>, %arg5: memref<1x128xf32, #tpu.memory_space<vmem>>, %arg6: memref<2x128xf32, #tpu.memory_space<vmem>>) attributes {dimension_semantics = [#tpu.dimension_semantics<arbitrary>], iteration_bounds = array<i64: 2>, scalar_prefetch = 0 : i64, scratch_operands = 0 : i64, tpu.core_type = #tpu.core_type<tc>, window_params = [{pipeline_mode = #tpu.pipeline_mode<synchronous>, transform_indices = @transform_0, window_bounds = array<i64: 2, 3072>}, {transform_indices = @transform_1, window_bounds = array<i64: 1, 3072, 768>}, {transform_indices = @transform_2, window_bounds = array<i64: 1, 768>}, {transform_indices = @transform_3, window_bounds = array<i64: 768, 128>}, {pipeline_mode = #tpu.pipeline_mode<synchronous>, transform_indices = @transform_4, window_bounds = array<i64: 1, 128>}, {pipeline_mode = #tpu.pipeline_mode<synchronous>, transform_indices = @transform_5, window_bounds = array<i64: 2, 128>}]} {
    %c0 = arith.constant 0 : index
    %c0_0 = arith.constant 0 : index
    %0 = vector.load %arg1[%c0, %c0_0] : memref<2x3072xbf16, #tpu.memory_space<vmem>>, vector<2x3072xbf16>
    %c0_1 = arith.constant 0 : index
    %c0_2 = arith.constant 0 : index
    %c0_3 = arith.constant 0 : index
    %1 = vector.load %arg2[%c0_1, %c0_2, %c0_3] : memref<1x3072x768xbf16, #tpu.memory_space<vmem>>, vector<1x3072x768xbf16>
    %2 = vector.shape_cast %1 : vector<1x3072x768xbf16> to vector<3072x768xbf16>
    %cst = arith.constant dense<0.000000e+00> : vector<2x768xf32>
    %3 = tpu.matmul %0, %2, %cst {dimension_numbers = #tpu.dot_dimension_numbers<[1], [0], [0], [1], [0, 0, 1, 1], [], []>} : vector<2x3072xbf16>, vector<3072x768xbf16>, vector<2x768xf32> -> vector<2x768xf32>
    %c0_4 = arith.constant 0 : index
    %c0_5 = arith.constant 0 : index
    %4 = vector.load %arg3[%c0_4, %c0_5] : memref<1x768xf32, #tpu.memory_space<vmem>>, vector<1x768xf32>
    %5 = vector.broadcast %4 : vector<1x768xf32> to vector<2x768xf32>
    %6 = arith.addf %3, %5 : vector<2x768xf32>
    %cst_6 = arith.constant 0.000000e+00 : f32
    %7 = vector.broadcast %cst_6 : f32 to vector<2x768xf32>
    %8 = arith.maximumf %6, %7 : vector<2x768xf32>
    %c0_7 = arith.constant 0 : index
    %c0_8 = arith.constant 0 : index
    %9 = vector.load %arg4[%c0_7, %c0_8] : memref<768x128xbf16, #tpu.memory_space<vmem>>, vector<768x128xbf16>
    %10 = arith.extf %9 : vector<768x128xbf16> to vector<768x128xf32>
    %cst_9 = arith.constant dense<0.000000e+00> : vector<2x128xf32>
    %11 = tpu.matmul %8, %10, %cst_9 {dimension_numbers = #tpu.dot_dimension_numbers<[1], [0], [0], [1], [0, 0, 1, 1], [], []>} : vector<2x768xf32>, vector<768x128xf32>, vector<2x128xf32> -> vector<2x128xf32>
    %c0_i32 = arith.constant 0 : i32
    %12 = arith.cmpi eq, %arg0, %c0_i32 : i32
    %13 = arith.extui %12 : i1 to i32
    %c0_i32_10 = arith.constant 0 : i32
    %14 = arith.cmpi ne, %13, %c0_i32_10 : i32
    scf.if %14 {
      %c0_13 = arith.constant 0 : index
      %c0_14 = arith.constant 0 : index
      %18 = vector.load %arg5[%c0_13, %c0_14] : memref<1x128xf32, #tpu.memory_space<vmem>>, vector<1x128xf32>
      %19 = vector.broadcast %18 : vector<1x128xf32> to vector<2x128xf32>
      %20 = arith.addf %19, %11 : vector<2x128xf32>
      %c0_15 = arith.constant 0 : index
      %c0_16 = arith.constant 0 : index
      %21 = vector.load %arg6[%c0_15, %c0_16] : memref<2x128xf32, #tpu.memory_space<vmem>>, vector<2x128xf32>
      tpu.vector_store %arg6[%c0_15, %c0_16], %20 {strides = array<i32>} : memref<2x128xf32, #tpu.memory_space<vmem>>, vector<2x128xf32>,
    } else {
    }
    %c0_i32_11 = arith.constant 0 : i32
    %15 = arith.cmpi sgt, %arg0, %c0_i32_11 : i32
    %16 = arith.extui %15 : i1 to i32
    %c0_i32_12 = arith.constant 0 : i32
    %17 = arith.cmpi ne, %16, %c0_i32_12 : i32
    scf.if %17 {
      %c0_13 = arith.constant 0 : index
      %c0_14 = arith.constant 0 : index
      %18 = vector.load %arg6[%c0_13, %c0_14] : memref<2x128xf32, #tpu.memory_space<vmem>>, vector<2x128xf32>
      %19 = arith.addf %18, %11 : vector<2x128xf32>
      %c0_15 = arith.constant 0 : index
      %c0_16 = arith.constant 0 : index
      %20 = vector.load %arg6[%c0_15, %c0_16] : memref<2x128xf32, #tpu.memory_space<vmem>>, vector<2x128xf32>
      tpu.vector_store %arg6[%c0_15, %c0_16], %19 {strides = array<i32>} : memref<2x128xf32, #tpu.memory_space<vmem>>, vector<2x128xf32>,
    } else {
    }
    return
  }
  func.func @transform_0(%arg0: i32) -> (i32, i32) {
    %c0_i32 = arith.constant 0 : i32
    %c0_i32_0 = arith.constant 0 : i32
    %c0_i32_1 = arith.constant 0 : i32
    return %c0_i32, %c0_i32_0 : i32, i32
  }
  func.func @transform_1(%arg0: i32) -> (i32, i32, i32) {
    %c0_i32 = arith.constant 0 : i32
    %c0_i32_0 = arith.constant 0 : i32
    %c0_i32_1 = arith.constant 0 : i32
    return %arg0, %c0_i32, %c0_i32_0 : i32, i32, i32
  }
  func.func @transform_2(%arg0: i32) -> (i32, i32) {
    %c0_i32 = arith.constant 0 : i32
    %c0_i32_0 = arith.constant 0 : i32
    return %c0_i32, %arg0 : i32, i32
  }
  func.func @transform_3(%arg0: i32) -> (i32, i32) {
    %c0_i32 = arith.constant 0 : i32
    %c0_i32_0 = arith.constant 0 : i32
    return %arg0, %c0_i32 : i32, i32
  }
  func.func @transform_4(%arg0: i32) -> (i32, i32) {
    %c0_i32 = arith.constant 0 : i32
    %c0_i32_0 = arith.constant 0 : i32
    %c0_i32_1 = arith.constant 0 : i32
    return %c0_i32, %c0_i32_0 : i32, i32
  }
  func.func @transform_5(%arg0: i32) -> (i32, i32) {
    %c0_i32 = arith.constant 0 : i32
    %c0_i32_0 = arith.constant 0 : i32
    %c0_i32_1 = arith.constant 0 : i32
    return %c0_i32, %c0_i32_0 : i32, i32
  }
}

</mosaic_0001>

<bundles_post_ra>
// kernel: net_forward.1
= control target key start
LH: loop header
LB: loop body
LE: loop exit
PB: predicated region body
PF: predicated region fallthrough
CT: control target
= control target key end

     0   :  { %s18766_s0 = inlined_call_operand.vmem [shape: bf16[2,3072], index: 0, kind: input, shape index: {}]   ;;  %s18767_s1 = inlined_call_operand.hbm [shape: bf16[2,3072,768], index: 1, kind: input, shape index: {}]   ;;  %s18768_s2 = inlined_call_operand.hbm [shape: f32[1,1536], index: 2, kind: input, shape index: {}]   ;;  %s18769_s3 = inlined_call_operand.hbm [shape: bf16[1536,128], index: 3, kind: input, shape index: {}]   ;;  %s18770_s4 = inlined_call_operand.hbm [shape: f32[1,128], index: 4, kind: input, shape index: {}]   ;;  %s18771_s5 = inlined_call_operand.hbm [shape: f32[2,128], index: 5, kind: output, shape index: {}]  }
   0x1   :  { %18772 = sst [smem:[#allocation15_spill]] %s18768_s2 }
   0x2   :  { %18773 = sst [smem:[#allocation16_spill]] %s18770_s4 }
   0x3   :  { %10 = vsyncpa [#allocation3], 0 }
   0x4   :  { %12 = vsyncpa [#allocation3 + $0x1], 0 }
   0x5   :  { %13 = vsyncpa [#allocation6], 0 }
   0x6   :  { %15 = vsyncpa [#allocation6 + $0x1], 0 }
   0x7   :  { %16 = vsyncpa [#allocation9], 0 }
   0x8   :  { %17 = vsyncpa [#allocation4], 0  ;;  %s16000_s18 = smov 0   ;;  %s16002_s19 = smov 0  }
   0x9   :  { %s16004_s20 = smov 0   ;;  %s16006_s21 = smov 0  }
   0xa LB: > { %s16021_s22 = sadd.s32 1, %s15962_s21   ;;  %s51_s23 = sadd.s32 1, %s15958_s20  ;;  %s15962_s21 = sphi %s16006_s21, %s18783_s21   ;;  %s15958_s20 = sphi %s16004_s20, %s18782_s20   ;;  %s15954_s19 = sphi %s16002_s19, %s18781_s19   ;;  %s15950_s18 = sphi %s16000_s18, %s18780_s18  }
   0xb   : > { %s48_s24 = ssub.s32 %s15962_s21, %s16021_s22  ;;  %p58_p0 = scmp.ne.s32.totalorder %s15958_s20, %s15954_s19 }
   0xc   : > { %p49_p1 = scmp.eq.s32.totalorder %s48_s24, 0  ;;  %p59_p2 = scmp.eq.s32.totalorder %s15962_s21, 0 }
   0xd   : > { %p15680_p3 = scmp.lt.s32.totalorder %s15962_s21, 2  ;;  %s16034_s26 = sand.u32 1, %s15958_s20  }
   0xe   : > { %s16031_s25 = scalar_select %p49_p1, %s15958_s20, %s51_s23  }
   0xf   : > { %p60_p4 = por %p59_p2, %p58_p0  ;;  %s219_s27 = sand.u32 1, %s15962_s21  }
  0x10   : > { %s15646_s28 = smul.u32 6, %s16034_s26  ;;  %s18775_s2 = sld [smem:[#allocation15_spill]] }
  0x11   : > { %p16038_p5 = pnand %p15680_p3, %p60_p4  ;;  %s224_s30 = smul.u32 6, %s15962_s21 }
  0x12   : > { %s223_s6 = scalar_lea.vmem [#allocation5], %s15646_s28  ;;  %s16047_s13 = scalar_lea.sflag [#allocation6], %s219_s27 }
  0x13   : > { %s231_s7 = sshll.u32 %s223_s6, 4  ;;  %p15772_p7 = pneg %p16038_p5  ;;  %s232_s7 = int_to_ptr.vmem [resolvable:$true] %s231_s7 }
  0x16   : > { %s227_s10 = scalar_lea.hbm %s18775_s2, %s224_s30  ;;  %s15775_s23 = scalar_lea.hbm %s18775_s2, 12 }
  0x17   : > { %s229_s11 = sshll.u32 %s227_s10, 4  ;;  %s230_s11 = int_to_ptr.hbm [resolvable:$true] %s229_s11 }
  0x18   : > { %s15768_s14 = sshra.s32 %s230_s11, 4  ;;  %s15769_s14 = int_to_ptr.hbm [resolvable:$true] %s15768_s14 }
  0x19   : > { %s15770_s15 = scalar_lea.hbm %s15769_s14, 6  ;;  %p15776_p10 = scmp.lt.s32.totalorder %s15769_s14, %s18775_s2 }
  0x1a   : > { %p15771_p6 = scmp.ne.s32.totalorder %s15769_s14, %s15770_s15  ;;  %p15777_p11 = scmp.lt.s32.totalorder %s15775_s23, %s15770_s15 }
  0x1c   : > { %p15773_p8 = pnand %p15772_p7, %p15771_p6  ;;  %p15778_p12 = por %p15777_p11, %p15776_p10 }
  0x1e   : > { %p15774_p9 = pneg %p15773_p8 }
  0x20   : > { %p15779_p13 = pnand %p15778_p12, %p15774_p9 }
  0x22   : > { %15782 = shalt.err (!%p15779_p13)
}
  0x23   : > { %15675 = dma.hbm_to_vmem [thread:$0]  (!%p16038_p5), %s230_s11, 96, %s232_s7, %s16047_s13  }
  0x24   : > { %s16064_s27 = sadd.s32 4294967295, %s15962_s21   ;;  %p64_p0 = scmp.ne.s32.totalorder %s15954_s19, %s15950_s18 }
  0x25   : > { %p65_p1 = scmp.eq.s32.totalorder %s16064_s27, 0  ;;  %p9631_p2 = scmp.ge.s32.totalorder %s15962_s21, 1 }
  0x26   : > { %p169_p3 = scmp.lt.s32.totalorder %s15962_s21, 3  ;;  %p9632_p6 = scmp.ne.s32.totalorder %s16064_s27, 0 }
  0x27   : > { %p16073_p4 = por %p65_p1, %p64_p0  ;;  %s18778_s4 = sld [smem:[#allocation16_spill]] }
  0x28   : > { %p16078_p8 = pnand %p9631_p2, %p169_p3  ;;  %s15964_s18 = smov [#allocation8]  }
  0x29   : > { %s186_s10 = sshll.u32 %s15964_s18, 4  ;;  %s15644_s11 = smul.u32 9216, %s16034_s26  ;;  %s187_s10 = int_to_ptr.vmem [resolvable:$true] %s186_s10 }
  0x2a   : > { %p15665_p9 = pneg %p16078_p8  ;;  %s15645_s14 = smul.u32 9216, %s15962_s21 }
  0x2b   : > { %s201_s23 = scalar_lea.vmem [#allocation2], %s15644_s11  ;;  %s198_s7 = scalar_lea.sflag [#allocation3], %s16034_s26 }
  0x2c   : > { %p15666_p10 = pnand %p15665_p9, %p65_p1  ;;  %s206_s17 = scalar_lea.hbm %s18767_s1, %s15645_s14 }
  0x2d   : > { %s184_s9 = sshll.u32 %s18778_s4, 4  ;;  %s209_s24 = sshll.u32 %s201_s23, 4  ;;  %s185_s9 = int_to_ptr.hbm [resolvable:$true] %s184_s9  ;;  %s210_s24 = int_to_ptr.vmem [resolvable:$true] %s209_s24 }
  0x2e   : > { %15668 = dma.hbm_to_vmem [thread:$0]  (!%p15666_p10), %s185_s9, 16, %s187_s10, [#allocation9]  }
  0x2f   : > { %s207_s28 = sshll.u32 %s206_s17, 4  ;;  %s15835_s10 = scalar_lea.hbm %s18767_s1, 18432  ;;  %s208_s28 = int_to_ptr.hbm [resolvable:$true] %s207_s28 }
  0x30   : > { %s15828_s8 = sshra.s32 %s208_s28, 4  ;;  %s15829_s8 = int_to_ptr.hbm [resolvable:$true] %s15828_s8 }
  0x31   : > { %s15830_s18 = scalar_lea.hbm %s15829_s8, 9216  ;;  %p15836_p0 = scmp.lt.s32.totalorder %s15829_s8, %s18767_s1 }
  0x32   : > { %p15831_p11 = scmp.ne.s32.totalorder %s15829_s8, %s15830_s18  ;;  %p15837_p2 = scmp.lt.s32.totalorder %s15835_s10, %s15830_s18 }
  0x34   : > { %p15833_p12 = pnand %p15831_p11, %p15772_p7  ;;  %p15838_p3 = por %p15837_p2, %p15836_p0 }
  0x36   : > { %p15834_p13 = pneg %p15833_p12 }
  0x38   : > { %p15839_p9 = pnand %p15838_p3, %p15834_p13 }
  0x3a   : > { %15842 = shalt.err (!%p15839_p9)
}
  0x3b   : > { %s15965_s11 = smov 384   ;;  %s15966_s16 = smov 24  }
  0x3c   : > { %15672 = dma.hbm_to_vmem [thread:$0]  (!%p16038_p5), %s208_s28, 147456, %s210_s24, %s198_s7, %s15965_s11, %s15965_s11, %s15966_s16  }
  0x3d   : > { %s14252_s17 = smul.u32 384, %s15962_s21 }
  0x3e   : > { %s18779_s23 = smul.u32 384, %s16034_s26  ;;  %s15865_s26 = scalar_lea.hbm %s18769_s3, 768 }
  0x3f   : > { %s247_s8 = scalar_lea.hbm %s18769_s3, %s14252_s17 }
  0x40   : > { %s242_s12 = scalar_lea.vmem [#allocation7], %s18779_s23  ;;  %s248_s18 = sshll.u32 %s247_s8, 4  ;;  %s249_s18 = int_to_ptr.hbm [resolvable:$true] %s248_s18 }
  0x41   : > { %s250_s9 = sshll.u32 %s242_s12, 4  ;;  %s15858_s10 = sshra.s32 %s249_s18, 4  ;;  %s251_s9 = int_to_ptr.vmem [resolvable:$true] %s250_s9  ;;  %s15859_s10 = int_to_ptr.hbm [resolvable:$true] %s15858_s10 }
  0x42   : > { %s15860_s15 = scalar_lea.hbm %s15859_s10, 384  ;;  %p15866_p13 = scmp.lt.s32.totalorder %s15859_s10, %s18769_s3 }
  0x43   : > { %p15861_p10 = scmp.ne.s32.totalorder %s15859_s10, %s15860_s15  ;;  %p15867_p0 = scmp.lt.s32.totalorder %s15865_s26, %s15860_s15 }
  0x45   : > { %p15863_p11 = pnand %p15861_p10, %p15772_p7  ;;  %p15868_p2 = por %p15867_p0, %p15866_p13 }
  0x47   : > { %p15864_p12 = pneg %p15863_p11 }
  0x49   : > { %p15869_p3 = pnand %p15868_p2, %p15864_p12 }
  0x4b   : > { %15872 = shalt.err (!%p15869_p3)
}
  0x4c   : > { %s15967_s2 = smov 64   ;;  %s15968_s4 = smov 4  }
  0x4d   : > { %15678 = dma.hbm_to_vmem [thread:$0]  (!%p16038_p5), %s249_s18, 6144, %s251_s9, %s16047_s13, %s15967_s2, %s15967_s2, %s15968_s4  }
  0x4e   : > { %262 = sbr.rel (%p16078_p8) target bundleno = 1534 (0x5fe), region = 40  ;;  %s264_s14 = sand.u32 (!%p16078_p8), 1, %s15954_s19  }
  0x4f   : > { %s15648_s11 = smul.u32 (!%p16078_p8), 9216, %s264_s14  ;;  %s265_s16 = scalar_lea.sflag (!%p16078_p8), [#allocation3], %s264_s14 }
  0x51   : > { %s16127_s17 = scalar_lea.vmem (!%p16078_p8), [#allocation2], %s15648_s11 }
  0x53   : > { %15933 = dma.done.wait (%p16073_p4), %s265_s16, 147456  }
  0x54   : > { %15935 = vsyncadd (%p16073_p4), %s265_s16, 4294819840  ;;  %s274_s23 = sand.u32 1, %s16064_s27   ;;  %s15649_s29 = smul.u32 6, %s264_s14 }
  0x55   : > { %s275_s13 = scalar_lea.sflag [#allocation6], %s274_s23 }
  0x56   : > { %s16134_s12 = scalar_lea.vmem [#allocation5], %s15649_s29 }
  0x57   : > { %15937 = dma.done.wait (%p16073_p4), %s275_s13, 6240  }
  0x58   : > { %15939 = vsyncadd (%p16073_p4), %s275_s13, 4294961056  ;;  %s15650_s6 = smul.u32 384, %s264_s14 }
  0x5a   : > { %s16140_s9 = scalar_lea.vmem [#allocation7], %s15650_s6 }
  0x5b   : > { %15941 = dma.done.wait (%p65_p1), [#allocation9], 16  }
  0x5c   : > { %15943 = vsyncadd (%p65_p1), [#allocation9], 4294967280  ;;  %v9808_v0 = vld [vmem:[%s16127_s17 + $0x150] sm:$0xf]  ;;  %v14298_v1 = vld [vmem:[%s16127_s17 + $0x164] sm:$0xf0] }
  0x5d   : > { %v10000_v2 = vld [vmem:[%s16127_s17 + $0x2d0] sm:$0xf]  ;;  %v9809_v3 = vor.u32 %v14298_v1, %v9808_v0  ;;  %v14346_v4 = vld [vmem:[%s16127_s17 + $0x2e4] sm:$0xf0]  ;;  %v9784_v11 = vld [vmem:[%s16127_s17 + $0x120] sm:$0xf] }
  0x5e   : > { %v10192_v5 = vld [vmem:[%s16127_s17 + $0x450] sm:$0xf]  ;;  %v14394_v6 = vld [vmem:[%s16127_s17 + $0x464] sm:$0xf0]  ;;  %v10001_v7 = vor.u32 %v14346_v4, %v10000_v2  ;;  %v14292_v13 = vld [vmem:[%s16127_s17 + $0x134] sm:$0xf0] }
  0x5f   : > { %v10193_v8 = vor.u32 %v14394_v6, %v10192_v5  ;;  %v10384_v9 = vld [vmem:[%s16127_s17 + $0x5d0] sm:$0xf]  ;;  %v14442_v10 = vld [vmem:[%s16127_s17 + $0x5e4] sm:$0xf0]  ;;  %7311 = vmatpush.bf16.msra.mxu0 %v9809_v3  ;;  %v9976_v14 = vld [vmem:[%s16127_s17 + $0x2a0] sm:$0xf]  ;;  %v9785_v16 = vor.u32 %v14292_v13, %v9784_v11 }
  0x60   : > { %v10385_v12 = vor.u32 %v14442_v10, %v10384_v9  ;;  %v14340_v15 = vld [vmem:[%s16127_s17 + $0x2b4] sm:$0xf0]  ;;  %7324 = vmatpush.bf16.msra.mxu1 %v10001_v7  ;;  %v10168_v18 = vld [vmem:[%s16127_s17 + $0x420] sm:$0xf]  ;;  %v9760_v23 = vld [vmem:[%s16127_s17 + $0xf0] sm:$0xf] }
  0x61   : > { %7337 = vmatpush.bf16.msra.mxu2 %v10193_v8  ;;  %v9977_v17 = vor.u32 %v14340_v15, %v9976_v14  ;;  %v14388_v19 = vld [vmem:[%s16127_s17 + $0x434] sm:$0xf0]  ;;  %v10360_v20 = vld [vmem:[%s16127_s17 + $0x5a0] sm:$0xf]  ;;  %v14286_v24 = vld [vmem:[%s16127_s17 + $0x104] sm:$0xf0] }
  0x62   : > { %7350 = vmatpush.bf16.msra.mxu3 %v10385_v12  ;;  %v10169_v21 = vor.u32 %v14388_v19, %v10168_v18  ;;  %v14436_v22 = vld [vmem:[%s16127_s17 + $0x5b4] sm:$0xf0]  ;;  %v9952_v26 = vld [vmem:[%s16127_s17 + $0x270] sm:$0xf]  ;;  %v14334_v27 = vld [vmem:[%s16127_s17 + $0x284] sm:$0xf0]  ;;  %v9761_v29 = vor.u32 %v14286_v24, %v9760_v23 }
  0x63   : > { %v10361_v25 = vor.u32 %v14436_v22, %v10360_v20  ;;  %v10144_v28 = vld [vmem:[%s16127_s17 + $0x3f0] sm:$0xf]  ;;  %7312 = vmatpush.bf16.msra.mxu0 %v9785_v16  ;;  %v14382_v30 = vld [vmem:[%s16127_s17 + $0x404] sm:$0xf0]  ;;  %v9953_v33 = vor.u32 %v14334_v27, %v9952_v26  ;;  %v9736_v35 = vld [vmem:[%s16127_s17 + $0xc0] sm:$0xf] }
  0x64   : > { %v10336_v31 = vld [vmem:[%s16127_s17 + $0x570] sm:$0xf]  ;;  %v14430_v32 = vld [vmem:[%s16127_s17 + $0x584] sm:$0xf0]  ;;  %7325 = vmatpush.bf16.msra.mxu1 %v9977_v17  ;;  %v10145_v34 = vor.u32 %v14382_v30, %v10144_v28  ;;  %v14280_v36 = vld [vmem:[%s16127_s17 + $0xd4] sm:$0xf0] }
  0x65   : > { %7338 = vmatpush.bf16.msra.mxu2 %v10169_v21  ;;  %v9928_v37 = vld [vmem:[%s16127_s17 + $0x240] sm:$0xf]  ;;  %v10337_v38 = vor.u32 %v14430_v32, %v10336_v31  ;;  %v14328_v39 = vld [vmem:[%s16127_s17 + $0x254] sm:$0xf0]  ;;  %v9737_v44 = vor.u32 %v14280_v36, %v9736_v35  ;;  %v9712_v47 = vld [vmem:[%s16127_s17 + $0x90] sm:$0xf] }
  0x66   : > { %7351 = vmatpush.bf16.msra.mxu3 %v10361_v25  ;;  %v10120_v40 = vld [vmem:[%s16127_s17 + $0x3c0] sm:$0xf]  ;;  %v14376_v41 = vld [vmem:[%s16127_s17 + $0x3d4] sm:$0xf0]  ;;  %v9929_v45 = vor.u32 %v14328_v39, %v9928_v37  ;;  %v14274_v48 = vld [vmem:[%s16127_s17 + $0xa4] sm:$0xf0] }
  0x67   : > { %v10312_v42 = vld [vmem:[%s16127_s17 + $0x540] sm:$0xf]  ;;  %v14424_v43 = vld [vmem:[%s16127_s17 + $0x554] sm:$0xf0]  ;;  %7313 = vmatpush.bf16.msra.mxu0 %v9761_v29  ;;  %v10121_v46 = vor.u32 %v14376_v41, %v10120_v40  ;;  %v9904_v49 = vld [vmem:[%s16127_s17 + $0x210] sm:$0xf]  ;;  %v9713_v56 = vor.u32 %v14274_v48, %v9712_v47 }
  0x68   : > { %7326 = vmatpush.bf16.msra.mxu1 %v9953_v33  ;;  %v10313_v50 = vor.u32 %v14424_v43, %v10312_v42  ;;  %v14322_v51 = vld [vmem:[%s16127_s17 + $0x224] sm:$0xf0]  ;;  %v10096_v52 = vld [vmem:[%s16127_s17 + $0x390] sm:$0xf]  ;;  %v9688_v59 = vld [vmem:[%s16127_s17 + $0x60] sm:$0xf] }
  0x69   : > { %7339 = vmatpush.bf16.msra.mxu2 %v10145_v34  ;;  %v14370_v53 = vld [vmem:[%s16127_s17 + $0x3a4] sm:$0xf0]  ;;  %v10288_v54 = vld [vmem:[%s16127_s17 + $0x510] sm:$0xf]  ;;  %v9905_v57 = vor.u32 %v14322_v51, %v9904_v49  ;;  %v14268_v60 = vld [vmem:[%s16127_s17 + $0x74] sm:$0xf0] }
  0x6a   : > { %7352 = vmatpush.bf16.msra.mxu3 %v10337_v38  ;;  %v14418_v55 = vld [vmem:[%s16127_s17 + $0x524] sm:$0xf0]  ;;  %v10097_v58 = vor.u32 %v14370_v53, %v10096_v52  ;;  %v9880_v61 = vld [vmem:[%s16127_s17 + $0x1e0] sm:$0xf]  ;;  %v14316_v63 = vld [vmem:[%s16127_s17 + $0x1f4] sm:$0xf0]  ;;  %v9689_v4 = vor.u32 %v14268_v60, %v9688_v59 }
  0x6b   : > { %7314 = vmatpush.bf16.msra.mxu0 %v9737_v44  ;;  %v10289_v62 = vor.u32 %v14418_v55, %v10288_v54  ;;  %v10072_v0 = vld [vmem:[%s16127_s17 + $0x360] sm:$0xf]  ;;  %v14364_v1 = vld [vmem:[%s16127_s17 + $0x374] sm:$0xf0]  ;;  %v9881_v5 = vor.u32 %v14316_v63, %v9880_v61  ;;  %v9664_v7 = vld [vmem:[%s16127_s17 + $0x30] sm:$0xf] }
  0x6c   : > { %7327 = vmatpush.bf16.msra.mxu1 %v9929_v45  ;;  %v10264_v2 = vld [vmem:[%s16127_s17 + $0x4e0] sm:$0xf]  ;;  %v14412_v3 = vld [vmem:[%s16127_s17 + $0x4f4] sm:$0xf0]  ;;  %v10073_v6 = vor.u32 %v14364_v1, %v10072_v0  ;;  %v14262_v8 = vld [vmem:[%s16127_s17 + $0x44] sm:$0xf0] }
  0x6d   : > { %7340 = vmatpush.bf16.msra.mxu2 %v10121_v46  ;;  %v9856_v9 = vld [vmem:[%s16127_s17 + $0x1b0] sm:$0xf]  ;;  %v10265_v10 = vor.u32 %v14412_v3, %v10264_v2  ;;  %v14310_v11 = vld [vmem:[%s16127_s17 + $0x1c4] sm:$0xf0]  ;;  %v9665_v16 = vor.u32 %v14262_v8, %v9664_v7  ;;  %v9640_v17 = vld [vmem:[%s16127_s17] sm:$0xf] }
  0x6e   : > { %7353 = vmatpush.bf16.msra.mxu3 %v10313_v50  ;;  %v10048_v12 = vld [vmem:[%s16127_s17 + $0x330] sm:$0xf]  ;;  %v14358_v13 = vld [vmem:[%s16127_s17 + $0x344] sm:$0xf0]  ;;  %v14256_v18 = vld [vmem:[%s16127_s17 + $0x14] sm:$0xf0]  ;;  %v9857_v19 = vor.u32 %v14310_v11, %v9856_v9 }
  0x6f   : > { %7315 = vmatpush.bf16.msra.mxu0 %v9713_v56  ;;  %v10240_v14 = vld [vmem:[%s16127_s17 + $0x4b0] sm:$0xf]  ;;  %v14406_v15 = vld [vmem:[%s16127_s17 + $0x4c4] sm:$0xf0]  ;;  %v10049_v20 = vor.u32 %v14358_v13, %v10048_v12  ;;  %v9832_v21 = vld [vmem:[%s16127_s17 + $0x180] sm:$0xf]  ;;  %v9641_v31 = vor.u32 %v14256_v18, %v9640_v17 }
  0x70   : > { %7328 = vmatpush.bf16.msra.mxu1 %v9905_v57  ;;  %v14304_v22 = vld [vmem:[%s16127_s17 + $0x194] sm:$0xf0]  ;;  %v10024_v23 = vld [vmem:[%s16127_s17 + $0x300] sm:$0xf]  ;;  %v10241_v24 = vor.u32 %v14406_v15, %v10240_v14  ;;  %v10576_v28 = vld [vmem:[%s16127_s17 + $0x750] sm:$0xf] }
  0x71   : > { %7341 = vmatpush.bf16.msra.mxu2 %v10097_v58  ;;  %v14352_v25 = vld [vmem:[%s16127_s17 + $0x314] sm:$0xf0]  ;;  %v10216_v26 = vld [vmem:[%s16127_s17 + $0x480] sm:$0xf]  ;;  %v14490_v29 = vld [vmem:[%s16127_s17 + $0x764] sm:$0xf0]  ;;  %v9833_v35 = vor.u32 %v14304_v22, %v9832_v21 }
  0x72   : > { %7354 = vmatpush.bf16.msra.mxu3 %v10289_v62  ;;  %v14400_v27 = vld [vmem:[%s16127_s17 + $0x494] sm:$0xf0]  ;;  %v10768_v30 = vld [vmem:[%s16127_s17 + $0x8d0] sm:$0xf]  ;;  %v14538_v32 = vld [vmem:[%s16127_s17 + $0x8e4] sm:$0xf0]  ;;  %v10025_v36 = vor.u32 %v14352_v25, %v10024_v23  ;;  %v10577_v40 = vor.u32 %v14490_v29, %v10576_v28 }
  0x73   : > { %7316 = vmatpush.bf16.msra.mxu0 %v9689_v4  ;;  %v10960_v33 = vld [vmem:[%s16127_s17 + $0xa50] sm:$0xf]  ;;  %v14586_v34 = vld [vmem:[%s16127_s17 + $0xa64] sm:$0xf0]  ;;  %v10217_v39 = vor.u32 %v14400_v27, %v10216_v26  ;;  %v10769_v41 = vor.u32 %v14538_v32, %v10768_v30  ;;  %v10552_v43 = vld [vmem:[%s16127_s17 + $0x720] sm:$0xf] }
  0x74   : > { %7329 = vmatpush.bf16.msra.mxu1 %v9881_v5  ;;  %v11152_v37 = vld [vmem:[%s16127_s17 + $0xbd0] sm:$0xf]  ;;  %v14634_v38 = vld [vmem:[%s16127_s17 + $0xbe4] sm:$0xf0]  ;;  %v10961_v42 = vor.u32 %v14586_v34, %v10960_v33  ;;  %v14484_v44 = vld [vmem:[%s16127_s17 + $0x734] sm:$0xf0] }
  0x75   : > { %7342 = vmatpush.bf16.msra.mxu2 %v10073_v6  ;;  %v10744_v45 = vld [vmem:[%s16127_s17 + $0x8a0] sm:$0xf]  ;;  %v11153_v46 = vor.u32 %v14634_v38, %v11152_v37  ;;  %v14532_v47 = vld [vmem:[%s16127_s17 + $0x8b4] sm:$0xf0]  ;;  %v10553_v52 = vor.u32 %v14484_v44, %v10552_v43  ;;  %v10528_v55 = vld [vmem:[%s16127_s17 + $0x6f0] sm:$0xf] }
  0x76   : > { %7355 = vmatpush.bf16.msra.mxu3 %v10265_v10  ;;  %v10936_v48 = vld [vmem:[%s16127_s17 + $0xa20] sm:$0xf]  ;;  %v14580_v49 = vld [vmem:[%s16127_s17 + $0xa34] sm:$0xf0]  ;;  %v10745_v53 = vor.u32 %v14532_v47, %v10744_v45  ;;  %v14478_v56 = vld [vmem:[%s16127_s17 + $0x704] sm:$0xf0] }
  0x77   : > { %7317 = vmatpush.bf16.msra.mxu0 %v9665_v16  ;;  %v11128_v50 = vld [vmem:[%s16127_s17 + $0xba0] sm:$0xf]  ;;  %v14628_v51 = vld [vmem:[%s16127_s17 + $0xbb4] sm:$0xf0]  ;;  %v10937_v54 = vor.u32 %v14580_v49, %v10936_v48  ;;  %v10720_v57 = vld [vmem:[%s16127_s17 + $0x870] sm:$0xf]  ;;  %v10529_v0 = vor.u32 %v14478_v56, %v10528_v55 }
  0x78   : > { %7330 = vmatpush.bf16.msra.mxu1 %v9857_v19  ;;  %v11129_v58 = vor.u32 %v14628_v51, %v11128_v50  ;;  %v14526_v59 = vld [vmem:[%s16127_s17 + $0x884] sm:$0xf0]  ;;  %v10912_v60 = vld [vmem:[%s16127_s17 + $0x9f0] sm:$0xf]  ;;  %v10504_v1 = vld [vmem:[%s16127_s17 + $0x6c0] sm:$0xf] }
  0x79   : > { %7343 = vmatpush.bf16.msra.mxu2 %v10049_v20  ;;  %v14574_v61 = vld [vmem:[%s16127_s17 + $0xa04] sm:$0xf0]  ;;  %v11104_v62 = vld [vmem:[%s16127_s17 + $0xb70] sm:$0xf]  ;;  %v328_v2 = vld [vmem:[%s18766_s0] sm:$0xff]  ;;  %v10721_v3 = vor.u32 %v14526_v59, %v10720_v57 }
  0x7a   : > { %7356 = vmatpush.bf16.msra.mxu3 %v10241_v24  ;;  %v14622_v63 = vld [vmem:[%s16127_s17 + $0xb84] sm:$0xf0]  ;;  %v10913_v4 = vor.u32 %v14574_v61, %v10912_v60  ;;  %v14472_v5 = vld [vmem:[%s16127_s17 + $0x6d4] sm:$0xf0]  ;;  %v10696_v6 = vld [vmem:[%s16127_s17 + $0x840] sm:$0xf] }
  0x7b   : > { %7318 = vmatpush.bf16.msra.mxu0 %v9641_v31  ;;  %1498 = vst [vmem:[#allocation1] ss:$9 sm:$0xff] %v328_v2  ;;  %v11105_v7 = vor.u32 %v14622_v63, %v11104_v62  ;;  %v14520_v8 = vld [vmem:[%s16127_s17 + $0x854] sm:$0xf0]  ;;  %v10888_v9 = vld [vmem:[%s16127_s17 + $0x9c0] sm:$0xf]  ;;  %v10505_v13 = vor.u32 %v14472_v5, %v10504_v1 }
  0x7c   : > { %7331 = vmatpush.bf16.msra.mxu1 %v9833_v35  ;;  %v14568_v10 = vld [vmem:[%s16127_s17 + $0x9d4] sm:$0xf0]  ;;  %v11080_v11 = vld [vmem:[%s16127_s17 + $0xb40] sm:$0xf]  ;;  %v10697_v14 = vor.u32 %v14520_v8, %v10696_v6  ;;  %v10480_v16 = vld [vmem:[%s16127_s17 + $0x690] sm:$0xf] }
  0x7d   : > { %7344 = vmatpush.bf16.msra.mxu2 %v10025_v36  ;;  %v14616_v12 = vld [vmem:[%s16127_s17 + $0xb54] sm:$0xf0]  ;;  %v10889_v15 = vor.u32 %v14568_v10, %v10888_v9  ;;  %v14466_v17 = vld [vmem:[%s16127_s17 + $0x6a4] sm:$0xf0]  ;;  %v10672_v18 = vld [vmem:[%s16127_s17 + $0x810] sm:$0xf] }
  0x7e   : > { %7357 = vmatpush.bf16.msra.mxu3 %v10217_v39  ;;  %v11081_v19 = vor.u32 %v14616_v12, %v11080_v11  ;;  %v14514_v20 = vld [vmem:[%s16127_s17 + $0x824] sm:$0xf0]  ;;  %v10864_v21 = vld [vmem:[%s16127_s17 + $0x990] sm:$0xf]  ;;  %v10456_v25 = vld [vmem:[%s16127_s17 + $0x660] sm:$0xf]  ;;  %v10481_v26 = vor.u32 %v14466_v17, %v10480_v16 }
  0x7f   : > { %7363 = vmatpush.bf16.msrb.mxu0 %v10577_v40  ;;  %v14562_v22 = vld [vmem:[%s16127_s17 + $0x9a4] sm:$0xf0]  ;;  %v11056_v23 = vld [vmem:[%s16127_s17 + $0xb10] sm:$0xf]  ;;  %v10673_v30 = vor.u32 %v14514_v20, %v10672_v18  ;;  %v14460_v32 = vld [vmem:[%s16127_s17 + $0x674] sm:$0xf0] }
  0x80   : > { %7376 = vmatpush.bf16.msrb.mxu1 %v10769_v41  ;;  %v14610_v24 = vld [vmem:[%s16127_s17 + $0xb24] sm:$0xf0]  ;;  %v10865_v31 = vor.u32 %v14562_v22, %v10864_v21  ;;  %v10648_v33 = vld [vmem:[%s16127_s17 + $0x7e0] sm:$0xf]  ;;  %v14508_v36 = vld [vmem:[%s16127_s17 + $0x7f4] sm:$0xf0]  ;;  %v10457_v41 = vor.u32 %v14460_v32, %v10456_v25 }
  0x81   : > { %7389 = vmatpush.bf16.msrb.mxu2 %v10961_v42  ;;  %v11057_v35 = vor.u32 %v14610_v24, %v11056_v23  ;;  %v10840_v37 = vld [vmem:[%s16127_s17 + $0x960] sm:$0xf]  ;;  %v14556_v38 = vld [vmem:[%s16127_s17 + $0x974] sm:$0xf0]  ;;  %v10649_v42 = vor.u32 %v14508_v36, %v10648_v33  ;;  %v10432_v44 = vld [vmem:[%s16127_s17 + $0x630] sm:$0xf] }
  0x82   : > { %7402 = vmatpush.bf16.msrb.mxu3 %v11153_v46  ;;  %v16254_v27 = vld [vmem:[#allocation1 + $0x12] sm:$0xff]  ;;  %v16256_v28 = vld [vmem:[#allocation1] sm:$0xff]  ;;  %v16262_v34 = vld [vmem:[#allocation1 + $0x9] sm:$0xff]  ;;  %v10841_v43 = vor.u32 %v14556_v38, %v10840_v37 }
  0x83   : > { %7364 = vmatpush.bf16.msrb.mxu0 %v10553_v52  ;;  %v16258_v29 = vld [vmem:[#allocation1 + $0x1b] sm:$0xff]  ;;  %7345 = vmatmul.bf16.vlgmr.msra.gmra.mxu2 %v16254_v27  ;;  %v11032_v39 = vld [vmem:[%s16127_s17 + $0xae0] sm:$0xf]  ;;  %v14454_v45 = vld [vmem:[%s16127_s17 + $0x644] sm:$0xf0] }
  0x84   : > { %7377 = vmatpush.bf16.msrb.mxu1 %v10745_v53  ;;  %v14604_v40 = vld [vmem:[%s16127_s17 + $0xaf4] sm:$0xf0]  ;;  %7319 = vmatmul.bf16.vlgmr.msra.gmra.mxu0 %v16256_v28  ;;  %v10624_v46 = vld [vmem:[%s16127_s17 + $0x7b0] sm:$0xf]  ;;  %v14502_v48 = vld [vmem:[%s16127_s17 + $0x7c4] sm:$0xf0]  ;;  %v10433_v53 = vor.u32 %v14454_v45, %v10432_v44 }
  0x85   : > { %7390 = vmatpush.bf16.msrb.mxu2 %v10937_v54  ;;  %7358 = vmatmul.bf16.vlgmr.msra.gmra.mxu3 %v16258_v29  ;;  %v11033_v47 = vor.u32 %v14604_v40, %v11032_v39  ;;  %v10816_v49 = vld [vmem:[%s16127_s17 + $0x930] sm:$0xf]  ;;  %v14550_v50 = vld [vmem:[%s16127_s17 + $0x944] sm:$0xf0]  ;;  %v10408_v54 = vld [vmem:[%s16127_s17 + $0x600] sm:$0xf]  ;;  %v10625_v56 = vor.u32 %v14502_v48, %v10624_v46 }
  0x86   : > { %7403 = vmatpush.bf16.msrb.mxu3 %v11129_v58  ;;  %7332 = vmatmul.bf16.vlgmr.msra.gmra.mxu1 %v16262_v34  ;;  %v11008_v51 = vld [vmem:[%s16127_s17 + $0xab0] sm:$0xf]  ;;  %v14598_v52 = vld [vmem:[%s16127_s17 + $0xac4] sm:$0xf0]  ;;  %v14448_v55 = vld [vmem:[%s16127_s17 + $0x614] sm:$0xf0]  ;;  %v10817_v57 = vor.u32 %v14550_v50, %v10816_v49 }
  0x87   : > { %7365 = vmatpush.bf16.msrb.mxu0 %v10529_v0  ;;  %v10600_v58 = vld [vmem:[%s16127_s17 + $0x780] sm:$0xf]  ;;  %v14496_v59 = vld [vmem:[%s16127_s17 + $0x794] sm:$0xf0]  ;;  %v11009_v61 = vor.u32 %v14598_v52, %v11008_v51  ;;  %v11344_v1 = vld [vmem:[%s16127_s17 + $0xd50] sm:$0xf] }
  0x88   : > { %7378 = vmatpush.bf16.msrb.mxu1 %v10721_v3  ;;  %v10792_v60 = vld [vmem:[%s16127_s17 + $0x900] sm:$0xf]  ;;  %v14544_v62 = vld [vmem:[%s16127_s17 + $0x914] sm:$0xf0]  ;;  %v14682_v2 = vld [vmem:[%s16127_s17 + $0xd64] sm:$0xf0]  ;;  %v10601_v8 = vor.u32 %v14496_v59, %v10600_v58 }
  0x89   : > { %7391 = vmatpush.bf16.msrb.mxu2 %v10913_v4  ;;  %v10984_v63 = vld [vmem:[%s16127_s17 + $0xa80] sm:$0xf]  ;;  %v14592_v0 = vld [vmem:[%s16127_s17 + $0xa94] sm:$0xf0]  ;;  %v11536_v3 = vld [vmem:[%s16127_s17 + $0xed0] sm:$0xf]  ;;  %v10409_v4 = vor.u32 %v14448_v55, %v10408_v54  ;;  %v10793_v9 = vor.u32 %v14544_v62, %v10792_v60 }
  0x8a   : > { %7404 = vmatpush.bf16.msrb.mxu3 %v11105_v7  ;;  %v14730_v5 = vld [vmem:[%s16127_s17 + $0xee4] sm:$0xf0]  ;;  %v11728_v6 = vld [vmem:[%s16127_s17 + $0x1050] sm:$0xf]  ;;  %v10985_v12 = vor.u32 %v14592_v0, %v10984_v63  ;;  %v11320_v16 = vld [vmem:[%s16127_s17 + $0xd20] sm:$0xf] }
  0x8b   : > { %7366 = vmatpush.bf16.msrb.mxu0 %v10505_v13  ;;  %v14778_v7 = vld [vmem:[%s16127_s17 + $0x1064] sm:$0xf0]  ;;  %v11920_v10 = vld [vmem:[%s16127_s17 + $0x11d0] sm:$0xf]  ;;  %v11345_v13 = vor.u32 %v14682_v2, %v11344_v1  ;;  %v14676_v17 = vld [vmem:[%s16127_s17 + $0xd34] sm:$0xf0] }
  0x8c   : > { %7379 = vmatpush.bf16.msrb.mxu1 %v10697_v14  ;;  %v14826_v11 = vld [vmem:[%s16127_s17 + $0x11e4] sm:$0xf0]  ;;  %v11537_v14 = vor.u32 %v14730_v5, %v11536_v3  ;;  %v11512_v18 = vld [vmem:[%s16127_s17 + $0xea0] sm:$0xf]  ;;  %v14724_v20 = vld [vmem:[%s16127_s17 + $0xeb4] sm:$0xf0] }
  0x8d   : > { %7392 = vmatpush.bf16.msrb.mxu2 %v10889_v15  ;;  %v11729_v15 = vor.u32 %v14778_v7, %v11728_v6  ;;  %v11704_v21 = vld [vmem:[%s16127_s17 + $0x1020] sm:$0xf]  ;;  %v14772_v22 = vld [vmem:[%s16127_s17 + $0x1034] sm:$0xf0]  ;;  %v16305_v25 = vld [vmem:[#allocation1 + $0x36] sm:$0xff]  ;;  %v11513_v33 = vor.u32 %v14724_v20, %v11512_v18 }
  0x8e   : > { %7405 = vmatpush.bf16.msrb.mxu3 %v11081_v19  ;;  %v11921_v19 = vor.u32 %v14826_v11, %v11920_v10  ;;  %v11896_v23 = vld [vmem:[%s16127_s17 + $0x11a0] sm:$0xf]  ;;  %v14820_v24 = vld [vmem:[%s16127_s17 + $0x11b4] sm:$0xf0]  ;;  %v14670_v36 = vld [vmem:[%s16127_s17 + $0xd04] sm:$0xf0] }
  0x8f   : > { %7367 = vmatpush.bf16.msrb.mxu0 %v10481_v26  ;;  %v11321_v26 = vor.u32 %v14676_v17, %v11320_v16  ;;  %v16310_v32 = vld [vmem:[#allocation1 + $0x3f] sm:$0xff]  ;;  %v11488_v37 = vld [vmem:[%s16127_s17 + $0xe70] sm:$0xf]  ;;  %v16314_v38 = vld [vmem:[#allocation1 + $0x2d] sm:$0xff]  ;;  %v11897_v39 = vor.u32 %v14820_v24, %v11896_v23 }
  0x90   : > { %7380 = vmatpush.bf16.msrb.mxu1 %v10673_v30  ;;  %v11296_v30 = vld [vmem:[%s16127_s17 + $0xcf0] sm:$0xf]  ;;  %v14718_v40 = vld [vmem:[%s16127_s17 + $0xe84] sm:$0xf0]  ;;  %v11272_v48 = vld [vmem:[%s16127_s17 + $0xcc0] sm:$0xf] }
  0x91   : > { %7393 = vmatpush.bf16.msrb.mxu2 %v10865_v31  ;;  %v16308_v31 = vld [vmem:[#allocation1 + $0x24] sm:$0xff]  ;;  %v14814_v44 = vld [vmem:[%s16127_s17 + $0x1184] sm:$0xf0]  ;;  %v11297_v45 = vor.u32 %v14670_v36, %v11296_v30  ;;  %v11489_v46 = vor.u32 %v14718_v40, %v11488_v37  ;;  %v14664_v49 = vld [vmem:[%s16127_s17 + $0xcd4] sm:$0xf0] }
  0x92   : > { %7406 = vmatpush.bf16.msrb.mxu3 %v11057_v35  ;;  %v11705_v35 = vor.u32 %v14772_v22, %v11704_v21  ;;  %v11464_v50 = vld [vmem:[%s16127_s17 + $0xe40] sm:$0xf]  ;;  %v14712_v52 = vld [vmem:[%s16127_s17 + $0xe54] sm:$0xf0]  ;;  %v11273_v58 = vor.u32 %v14664_v49, %v11272_v48  ;;  %v14658_v62 = vld [vmem:[%s16127_s17 + $0xca4] sm:$0xf0] }
  0x93   : > { %7368 = vmatpush.bf16.msrb.mxu0 %v10457_v41  ;;  %v11680_v41 = vld [vmem:[%s16127_s17 + $0xff0] sm:$0xf]  ;;  %v14760_v54 = vld [vmem:[%s16127_s17 + $0xfd4] sm:$0xf0]  ;;  %v11848_v55 = vld [vmem:[%s16127_s17 + $0x1140] sm:$0xf]  ;;  %v11465_v59 = vor.u32 %v14712_v52, %v11464_v50 }
  0x94   : > { %7381 = vmatpush.bf16.msrb.mxu1 %v10649_v42  ;;  %v14766_v42 = vld [vmem:[%s16127_s17 + $0x1004] sm:$0xf0]  ;;  %v11440_v63 = vld [vmem:[%s16127_s17 + $0xe10] sm:$0xf]  ;;  %v14652_v10 = vld [vmem:[%s16127_s17 + $0xc74] sm:$0xf0] }
  0x95   : > { %7394 = vmatpush.bf16.msrb.mxu2 %v10841_v43  ;;  %v11872_v43 = vld [vmem:[%s16127_s17 + $0x1170] sm:$0xf]  ;;  %v14706_v1 = vld [vmem:[%s16127_s17 + $0xe24] sm:$0xf0]  ;;  %v11416_v11 = vld [vmem:[%s16127_s17 + $0xde0] sm:$0xf] }
  0x96   : > { %7407 = vmatpush.bf16.msrb.mxu3 %v11033_v47  ;;  %v11681_v47 = vor.u32 %v14766_v42, %v11680_v41  ;;  %v11873_v51 = vor.u32 %v14814_v44, %v11872_v43  ;;  %v11632_v2 = vld [vmem:[%s16127_s17 + $0xf90] sm:$0xf]  ;;  %v14754_v3 = vld [vmem:[%s16127_s17 + $0xfa4] sm:$0xf0]  ;;  %v11441_v7 = vor.u32 %v14706_v1, %v11440_v63  ;;  %v11800_v16 = vld [vmem:[%s16127_s17 + $0x10e0] sm:$0xf] }
  0x97   : > { %7369 = vmatpush.bf16.msrb.mxu0 %v10433_v53  ;;  %v11656_v53 = vld [vmem:[%s16127_s17 + $0xfc0] sm:$0xf]  ;;  %v14802_v5 = vld [vmem:[%s16127_s17 + $0x1124] sm:$0xf0]  ;;  %v14796_v17 = vld [vmem:[%s16127_s17 + $0x10f4] sm:$0xf0] }
  0x98   : > { %7382 = vmatpush.bf16.msrb.mxu1 %v10625_v56  ;;  %v14808_v56 = vld [vmem:[%s16127_s17 + $0x1154] sm:$0xf0]  ;;  %v11657_v60 = vor.u32 %v14760_v54, %v11656_v53  ;;  %v11200_v21 = vld [vmem:[%s16127_s17 + $0xc30] sm:$0xf]  ;;  %v14646_v22 = vld [vmem:[%s16127_s17 + $0xc44] sm:$0xf0]  ;;  %v11801_v24 = vor.u32 %v14796_v17, %v11800_v16 }
  0x99   : > { %7395 = vmatpush.bf16.msrb.mxu2 %v10817_v57  ;;  %v329_v57 = vld [vmem:[%s18766_s0 + $0x8] sm:$0xff]  ;;  %v11849_v0 = vor.u32 %v14808_v56, %v11848_v55  ;;  %v11392_v23 = vld [vmem:[%s16127_s17 + $0xdb0] sm:$0xf]  ;;  %v14790_v36 = vld [vmem:[%s16127_s17 + $0x10c4] sm:$0xf0]  ;;  %v11201_v37 = vor.u32 %v14646_v22, %v11200_v21 }
  0x9a   : > { %7408 = vmatpush.bf16.msrb.mxu3 %v11009_v61  ;;  %1508 = vst [vmem:[#allocation1] ss:$9 sm:$0xff] %v329_v57  ;;  %v11248_v61 = vld [vmem:[%s16127_s17 + $0xc90] sm:$0xf]  ;;  %v14640_v40 = vld [vmem:[%s16127_s17 + $0xc14] sm:$0xf0] }
  0x9b   : > { %7370 = vmatpush.bf16.msrb.mxu0 %v10409_v4  ;;  %v11824_v4 = vld [vmem:[%s16127_s17 + $0x1110] sm:$0xf]  ;;  %v11249_v6 = vor.u32 %v14658_v62, %v11248_v61  ;;  %v11368_v43 = vld [vmem:[%s16127_s17 + $0xd80] sm:$0xf]  ;;  %v14688_v44 = vld [vmem:[%s16127_s17 + $0xd94] sm:$0xf0] }
  0x9c   : > { %7383 = vmatpush.bf16.msrb.mxu1 %v10601_v8  ;;  %v11633_v8 = vor.u32 %v14754_v3, %v11632_v2  ;;  %v11584_v30 = vld [vmem:[%s16127_s17 + $0xf30] sm:$0xf]  ;;  %v11752_v48 = vld [vmem:[%s16127_s17 + $0x1080] sm:$0xf]  ;;  %v14784_v49 = vld [vmem:[%s16127_s17 + $0x1094] sm:$0xf0]  ;;  %v11369_v57 = vor.u32 %v14688_v44, %v11368_v43 }
  0x9d   : > { %7396 = vmatpush.bf16.msrb.mxu2 %v10793_v9  ;;  %v11224_v9 = vld [vmem:[%s16127_s17 + $0xc60] sm:$0xf]  ;;  %v12112_v50 = vld [vmem:[%s16127_s17 + $0x1350] sm:$0xf]  ;;  %v14922_v54 = vld [vmem:[%s16127_s17 + $0x14e4] sm:$0xf0]  ;;  %v11753_v61 = vor.u32 %v14784_v49, %v11752_v48 }
  0x9e   : > { %7409 = vmatpush.bf16.msrb.mxu3 %v10985_v12  ;;  %7371 = vmatmul.bf16.vlgmr.msrb.gmra.mxu0 %v16308_v31  ;;  %v11825_v12 = vor.u32 %v14802_v5, %v11824_v4  ;;  %v11225_v18 = vor.u32 %v14652_v10, %v11224_v9  ;;  %v12304_v52 = vld [vmem:[%s16127_s17 + $0x14d0] sm:$0xf]  ;;  %v14970_v56 = vld [vmem:[%s16127_s17 + $0x1664] sm:$0xf0]  ;;  %v12088_v1 = vld [vmem:[%s16127_s17 + $0x1320] sm:$0xf] }
  0x9f   : > { %7415 = vmatpush.bf16.msra.mxu0 %v11345_v13  ;;  %7384 = vmatmul.bf16.vlgmr.msrb.gmra.mxu1 %v16314_v38  ;;  %v14700_v13 = vld [vmem:[%s16127_s17 + $0xdf4] sm:$0xf0]  ;;  %v12496_v55 = vld [vmem:[%s16127_s17 + $0x1650] sm:$0xf]  ;;  %v12305_v63 = vor.u32 %v14922_v54, %v12304_v52  ;;  %v12280_v3 = vld [vmem:[%s16127_s17 + $0x14a0] sm:$0xf] }
  0xa0   : > { %7428 = vmatpush.bf16.msra.mxu1 %v11537_v14  ;;  %7397 = vmatmul.bf16.vlgmr.msrb.gmra.mxu2 %v16305_v25  ;;  %v11608_v14 = vld [vmem:[%s16127_s17 + $0xf60] sm:$0xf]  ;;  %v14868_v2 = vld [vmem:[%s16127_s17 + $0x1334] sm:$0xf0]  ;;  %v14910_v21 = vld [vmem:[%s16127_s17 + $0x1484] sm:$0xf0] }
  0xa1   : > { %7441 = vmatpush.bf16.msra.mxu2 %v11729_v15  ;;  %7410 = vmatmul.bf16.vlgmr.msrb.gmra.mxu3 %v16310_v32  ;;  %v14748_v15 = vld [vmem:[%s16127_s17 + $0xf74] sm:$0xf0]  ;;  %v12664_v9 = vld [vmem:[%s16127_s17 + $0x17a0] sm:$0xf]  ;;  %v12448_v22 = vld [vmem:[%s16127_s17 + $0x15f0] sm:$0xf] }
  0xa2   : > { %7454 = vmatpush.bf16.msra.mxu3 %v11921_v19  ;;  %v11417_v19 = vor.u32 %v14700_v13, %v11416_v11  ;;  %v11609_v20 = vor.u32 %v14748_v15, %v11608_v14  ;;  %v14916_v5 = vld [vmem:[%s16127_s17 + $0x14b4] sm:$0xf0]  ;;  %v16386_v11 = vld [vmem:[#allocation1 + $0x12] sm:$0xff]  ;;  %v12089_v13 = vor.u32 %v14868_v2, %v12088_v1  ;;  %v12616_v44 = vld [vmem:[%s16127_s17 + $0x1740] sm:$0xf] }
  0xa3   : > { %7416 = vmatpush.bf16.msra.mxu0 %v11321_v26  ;;  %v14694_v26 = vld [vmem:[%s16127_s17 + $0xdc4] sm:$0xf0]  ;;  %v15012_v10 = vld [vmem:[%s16127_s17 + $0x17b4] sm:$0xf0]  ;;  %v12064_v14 = vld [vmem:[%s16127_s17 + $0x12f0] sm:$0xf]  ;;  %v12281_v16 = vor.u32 %v14916_v5, %v12280_v3 }
  0xa4   : > { %7429 = vmatpush.bf16.msra.mxu1 %v11513_v33  ;;  %v14742_v33 = vld [vmem:[%s16127_s17 + $0xf44] sm:$0xf0]  ;;  %v11393_v41 = vor.u32 %v14694_v26, %v11392_v23  ;;  %v16391_v15 = vld [vmem:[#allocation1 + $0x1b] sm:$0xff]  ;;  %v12376_v2 = vld [vmem:[%s16127_s17 + $0x1560] sm:$0xf] }
  0xa5   : > { %7442 = vmatpush.bf16.msra.mxu2 %v11705_v35  ;;  %v11776_v35 = vld [vmem:[%s16127_s17 + $0x10b0] sm:$0xf]  ;;  %v11585_v42 = vor.u32 %v14742_v33, %v11584_v30  ;;  %v14958_v23 = vld [vmem:[%s16127_s17 + $0x1604] sm:$0xf0]  ;;  %v14952_v43 = vld [vmem:[%s16127_s17 + $0x15d4] sm:$0xf0] }
  0xa6   : > { %7455 = vmatpush.bf16.msra.mxu3 %v11897_v39  ;;  %v11176_v39 = vld [vmem:[%s16127_s17 + $0xc00] sm:$0xf]  ;;  %v15006_v26 = vld [vmem:[%s16127_s17 + $0x1784] sm:$0xf0]  ;;  %v12016_v49 = vld [vmem:[%s16127_s17 + $0x1290] sm:$0xf] }
  0xa7   : > { %7417 = vmatpush.bf16.msra.mxu0 %v11297_v45  ;;  %v11560_v45 = vld [vmem:[%s16127_s17 + $0xf00] sm:$0xf]  ;;  %v11177_v53 = vor.u32 %v14640_v40, %v11176_v39  ;;  %v12400_v54 = vld [vmem:[%s16127_s17 + $0x1590] sm:$0xf]  ;;  %v14892_v1 = vld [vmem:[%s16127_s17 + $0x13f4] sm:$0xf0] }
  0xa8   : > { %7430 = vmatpush.bf16.msra.mxu1 %v11489_v46  ;;  %v11777_v46 = vor.u32 %v14790_v36, %v11776_v35  ;;  %v12449_v35 = vor.u32 %v14958_v23, %v12448_v22  ;;  %v12040_v36 = vld [vmem:[%s16127_s17 + $0x12c0] sm:$0xf]  ;;  %v14940_v3 = vld [vmem:[%s16127_s17 + $0x1574] sm:$0xf0] }
  0xa9   : > { %7443 = vmatpush.bf16.msra.mxu2 %v11681_v47  ;;  %v14736_v47 = vld [vmem:[%s16127_s17 + $0xf14] sm:$0xf0]  ;;  %v12232_v39 = vld [vmem:[%s16127_s17 + $0x1440] sm:$0xf] }
  0xaa   : > { %7456 = vmatpush.bf16.msra.mxu3 %v11873_v51  ;;  %v14874_v51 = vld [vmem:[%s16127_s17 + $0x1364] sm:$0xf0]  ;;  %v14988_v5 = vld [vmem:[%s16127_s17 + $0x16f4] sm:$0xf0]  ;;  %v11944_v22 = vld [vmem:[%s16127_s17 + $0x1200] sm:$0xf] }
  0xab   : > { %7418 = vmatpush.bf16.msra.mxu0 %v11273_v58  ;;  %v11561_v58 = vor.u32 %v14736_v47, %v11560_v45  ;;  %v12113_v62 = vor.u32 %v14874_v51, %v12112_v50  ;;  %v15000_v45 = vld [vmem:[%s16127_s17 + $0x1754] sm:$0xf0]  ;;  %v14850_v50 = vld [vmem:[%s16127_s17 + $0x12a4] sm:$0xf0]  ;;  %v12208_v51 = vld [vmem:[%s16127_s17 + $0x1410] sm:$0xf] }
  0xac   : > { %7431 = vmatpush.bf16.msra.mxu1 %v11465_v59  ;;  %v12688_v59 = vld [vmem:[%s16127_s17 + $0x17d0] sm:$0xf]  ;;  %v12617_v52 = vor.u32 %v15000_v45, %v12616_v44  ;;  %v14832_v23 = vld [vmem:[%s16127_s17 + $0x1214] sm:$0xf0]  ;;  %v15114_v45 = vld [vmem:[%s16127_s17 + $0x1ae4] sm:$0xf0] }
  0xad   : > { %7444 = vmatpush.bf16.msra.mxu2 %v11657_v60  ;;  %v15018_v60 = vld [vmem:[%s16127_s17 + $0x17e4] sm:$0xf0]  ;;  %v13072_v44 = vld [vmem:[%s16127_s17 + $0x1ad0] sm:$0xf] }
  0xae   : > { %7457 = vmatpush.bf16.msra.mxu3 %v11849_v0  ;;  %v12497_v0 = vor.u32 %v14970_v56, %v12496_v55  ;;  %v12689_v4 = vor.u32 %v15018_v60, %v12688_v59  ;;  %v14946_v55 = vld [vmem:[%s16127_s17 + $0x15a4] sm:$0xf0]  ;;  %v12592_v56 = vld [vmem:[%s16127_s17 + $0x1710] sm:$0xf] }
  0xaf   : > { %7419 = vmatpush.bf16.msra.mxu0 %v11249_v6  ;;  %v12472_v6 = vld [vmem:[%s16127_s17 + $0x1620] sm:$0xf]  ;;  %v12401_v60 = vor.u32 %v14946_v55, %v12400_v54 }
  0xb0   : > { %7432 = vmatpush.bf16.msra.mxu1 %v11441_v7  ;;  %v14964_v7 = vld [vmem:[%s16127_s17 + $0x1634] sm:$0xf0] }
  0xb1   : > { %7445 = vmatpush.bf16.msra.mxu2 %v11633_v8  ;;  %v16382_v8 = vld [vmem:[#allocation1] sm:$0xff]  ;;  %v12473_v17 = vor.u32 %v14964_v7, %v12472_v6  ;;  %v11968_v7 = vld [vmem:[%s16127_s17 + $0x1230] sm:$0xf] }
  0xb2   : > { %7458 = vmatpush.bf16.msra.mxu3 %v11825_v12  ;;  %v16388_v12 = vld [vmem:[#allocation1 + $0x9] sm:$0xff] }
  0xb3   : > { %7420 = vmatpush.bf16.msra.mxu0 %v11225_v18  ;;  %v14862_v18 = vld [vmem:[%s16127_s17 + $0x1304] sm:$0xf0] }
  0xb4   : > { %7433 = vmatpush.bf16.msra.mxu1 %v11417_v19  ;;  %v12256_v19 = vld [vmem:[%s16127_s17 + $0x1470] sm:$0xf]  ;;  %v12065_v30 = vor.u32 %v14862_v18, %v12064_v14 }
  0xb5   : > { %7446 = vmatpush.bf16.msra.mxu2 %v11609_v20  ;;  %v12665_v20 = vor.u32 %v15012_v10, %v12664_v9  ;;  %v12257_v33 = vor.u32 %v14910_v21, %v12256_v19  ;;  %v12377_v10 = vor.u32 %v14940_v3, %v12376_v2  ;;  %v12160_v14 = vld [vmem:[%s16127_s17 + $0x13b0] sm:$0xf]  ;;  %v14934_v19 = vld [vmem:[%s16127_s17 + $0x1544] sm:$0xf0]  ;;  %v15108_v2 = vld [vmem:[%s16127_s17 + $0x1ab4] sm:$0xf0] }
  0xb6   : > { %7459 = vmatpush.bf16.msra.mxu3 %v11801_v24  ;;  %v12640_v24 = vld [vmem:[%s16127_s17 + $0x1770] sm:$0xf]  ;;  %v14982_v21 = vld [vmem:[%s16127_s17 + $0x16c4] sm:$0xf0]  ;;  %v13240_v3 = vld [vmem:[%s16127_s17 + $0x1c20] sm:$0xf] }
  0xb7   : > { %7421 = vmatpush.bf16.msra.mxu0 %v11201_v37  ;;  %v14856_v37 = vld [vmem:[%s16127_s17 + $0x12d4] sm:$0xf0]  ;;  %v12641_v40 = vor.u32 %v15006_v26, %v12640_v24  ;;  %v12352_v18 = vld [vmem:[%s16127_s17 + $0x1530] sm:$0xf]  ;;  %v12136_v26 = vld [vmem:[%s16127_s17 + $0x1380] sm:$0xf] }
  0xb8   : > { %7434 = vmatpush.bf16.msra.mxu1 %v11393_v41  ;;  %v14904_v41 = vld [vmem:[%s16127_s17 + $0x1454] sm:$0xf0] }
  0xb9   : > { %7447 = vmatpush.bf16.msra.mxu2 %v11585_v42  ;;  %v12424_v42 = vld [vmem:[%s16127_s17 + $0x15c0] sm:$0xf]  ;;  %v12233_v47 = vor.u32 %v14904_v41, %v12232_v39  ;;  %v12880_v41 = vld [vmem:[%s16127_s17 + $0x1950] sm:$0xf] }
  0xba   : > { %7460 = vmatpush.bf16.msra.mxu3 %v11777_v46  ;;  %v12041_v46 = vor.u32 %v14856_v37, %v12040_v36  ;;  %v12425_v48 = vor.u32 %v14952_v43, %v12424_v42  ;;  %v12353_v37 = vor.u32 %v14934_v19, %v12352_v18  ;;  %v12520_v39 = vld [vmem:[%s16127_s17 + $0x1680] sm:$0xf]  ;;  %v15066_v42 = vld [vmem:[%s16127_s17 + $0x1964] sm:$0xf0]  ;;  %v13216_v19 = vld [vmem:[%s16127_s17 + $0x1bf0] sm:$0xf] }
  0xbb   : > { %7422 = vmatpush.bf16.msra.mxu0 %v11177_v53  ;;  %v14898_v53 = vld [vmem:[%s16127_s17 + $0x1424] sm:$0xf0] }
  0xbc   : > { %7435 = vmatpush.bf16.msra.mxu1 %v11369_v57  ;;  %v14994_v57 = vld [vmem:[%s16127_s17 + $0x1724] sm:$0xf0]  ;;  %v12209_v59 = vor.u32 %v14898_v53, %v12208_v51  ;;  %v11945_v51 = vor.u32 %v14832_v23, %v11944_v22 }
  0xbd   : > { %7448 = vmatpush.bf16.msra.mxu2 %v11561_v58  ;;  %v12017_v58 = vor.u32 %v14850_v50, %v12016_v49  ;;  %v16454_v49 = vld [vmem:[#allocation1 + $0x3f] sm:$0xff]  ;;  %v330_v50 = vld [vmem:[%s18766_s0 + $0x10] sm:$0xff] }
  0xbe   : > { %7461 = vmatpush.bf16.msra.mxu3 %v11753_v61  ;;  %7423 = vmatmul.bf16.vlgmr.msra.gmra.mxu0 %v16382_v8  ;;  %v11992_v61 = vld [vmem:[%s16127_s17 + $0x1260] sm:$0xf]  ;;  %v15162_v53 = vld [vmem:[%s16127_s17 + $0x1c64] sm:$0xf0] }
  0xbf   : > { %7467 = vmatpush.bf16.msrb.mxu0 %v12113_v62  ;;  %7436 = vmatmul.bf16.vlgmr.msra.gmra.mxu1 %v16388_v12  ;;  %v14844_v62 = vld [vmem:[%s16127_s17 + $0x1274] sm:$0xf0]  ;;  %v15102_v18 = vld [vmem:[%s16127_s17 + $0x1a84] sm:$0xf0] }
  0xc0   : > { %7480 = vmatpush.bf16.msrb.mxu1 %v12305_v63  ;;  %7449 = vmatmul.bf16.vlgmr.msra.gmra.mxu2 %v16386_v11  ;;  %v12184_v63 = vld [vmem:[%s16127_s17 + $0x13e0] sm:$0xf]  ;;  %v11993_v6 = vor.u32 %v14844_v62, %v11992_v61  ;;  %v15198_v22 = vld [vmem:[%s16127_s17 + $0x1d84] sm:$0xf0] }
  0xc1   : > { %7493 = vmatpush.bf16.msrb.mxu2 %v12497_v0  ;;  %7462 = vmatmul.bf16.vlgmr.msra.gmra.mxu3 %v16391_v15  ;;  %v12593_v0 = vor.u32 %v14994_v57, %v12592_v56  ;;  %v12185_v9 = vor.u32 %v14892_v1, %v12184_v63  ;;  %v13456_v56 = vld [vmem:[%s16127_s17 + $0x1dd0] sm:$0xf]  ;;  %v15210_v57 = vld [vmem:[%s16127_s17 + $0x1de4] sm:$0xf0]  ;;  %v12856_v62 = vld [vmem:[%s16127_s17 + $0x1920] sm:$0xf] }
  0xc2   : > { %7506 = vmatpush.bf16.msrb.mxu3 %v12689_v4  ;;  %v12568_v4 = vld [vmem:[%s16127_s17 + $0x16e0] sm:$0xf]  ;;  %v15060_v63 = vld [vmem:[%s16127_s17 + $0x1934] sm:$0xf0]  ;;  %v13457_v1 = vor.u32 %v15210_v57, %v13456_v56  ;;  %v15138_v56 = vld [vmem:[%s16127_s17 + $0x1ba4] sm:$0xf0] }
  0xc3   : > { %7468 = vmatpush.bf16.msrb.mxu0 %v12089_v13  ;;  %v14838_v13 = vld [vmem:[%s16127_s17 + $0x1244] sm:$0xf0]  ;;  %v13360_v57 = vld [vmem:[%s16127_s17 + $0x1d10] sm:$0xf] }
  0xc4   : > { %7481 = vmatpush.bf16.msrb.mxu1 %v12281_v16  ;;  %v14886_v16 = vld [vmem:[%s16127_s17 + $0x13c4] sm:$0xf0]  ;;  %v11969_v24 = vor.u32 %v14838_v13, %v11968_v7  ;;  %v12857_v7 = vor.u32 %v15060_v63, %v12856_v62  ;;  %v12832_v13 = vld [vmem:[%s16127_s17 + $0x18f0] sm:$0xf]  ;;  %v12760_v62 = vld [vmem:[%s16127_s17 + $0x1860] sm:$0xf] }
  0xc5   : > { %7494 = vmatpush.bf16.msrb.mxu2 %v12473_v17  ;;  %v12569_v17 = vor.u32 %v14988_v5, %v12568_v4  ;;  %v12161_v36 = vor.u32 %v14886_v16, %v12160_v14  ;;  %v15156_v4 = vld [vmem:[%s16127_s17 + $0x1c34] sm:$0xf0]  ;;  %v13432_v5 = vld [vmem:[%s16127_s17 + $0x1da0] sm:$0xf]  ;;  %v15054_v14 = vld [vmem:[%s16127_s17 + $0x1904] sm:$0xf0] }
  0xc6   : > { %7507 = vmatpush.bf16.msrb.mxu3 %v12665_v20  ;;  %v12544_v20 = vld [vmem:[%s16127_s17 + $0x16b0] sm:$0xf]  ;;  %v12833_v23 = vor.u32 %v15054_v14, %v12832_v13  ;;  %v15036_v63 = vld [vmem:[%s16127_s17 + $0x1874] sm:$0xf0]  ;;  %v15030_v14 = vld [vmem:[%s16127_s17 + $0x1844] sm:$0xf0] }
  0xc7   : > { %7469 = vmatpush.bf16.msrb.mxu0 %v12065_v30  ;;  %v14880_v30 = vld [vmem:[%s16127_s17 + $0x1394] sm:$0xf0]  ;;  %v12545_v43 = vor.u32 %v14982_v21, %v12544_v20  ;;  %v13024_v16 = vld [vmem:[%s16127_s17 + $0x1a70] sm:$0xf]  ;;  %v15150_v20 = vld [vmem:[%s16127_s17 + $0x1c04] sm:$0xf0] }
  0xc8   : > { %7482 = vmatpush.bf16.msrb.mxu1 %v12257_v33  ;;  %v12328_v33 = vld [vmem:[%s16127_s17 + $0x1500] sm:$0xf]  ;;  %v12137_v54 = vor.u32 %v14880_v30, %v12136_v26  ;;  %v13408_v21 = vld [vmem:[%s16127_s17 + $0x1d70] sm:$0xf]  ;;  %v13217_v26 = vor.u32 %v15150_v20, %v13216_v19  ;;  %v15126_v20 = vld [vmem:[%s16127_s17 + $0x1b44] sm:$0xf0] }
  0xc9   : > { %7495 = vmatpush.bf16.msrb.mxu2 %v12449_v35  ;;  %v14928_v35 = vld [vmem:[%s16127_s17 + $0x1514] sm:$0xf0]  ;;  %v12808_v30 = vld [vmem:[%s16127_s17 + $0x18c0] sm:$0xf]  ;;  %v12736_v13 = vld [vmem:[%s16127_s17 + $0x1830] sm:$0xf] }
  0xca   : > { %7508 = vmatpush.bf16.msrb.mxu3 %v12641_v40  ;;  %v14976_v40 = vld [vmem:[%s16127_s17 + $0x1694] sm:$0xf0]  ;;  %v12329_v55 = vor.u32 %v14928_v35, %v12328_v33  ;;  %v13000_v35 = vld [vmem:[%s16127_s17 + $0x1a40] sm:$0xf]  ;;  %v13120_v19 = vld [vmem:[%s16127_s17 + $0x1b30] sm:$0xf] }
  0xcb   : > { %7470 = vmatpush.bf16.msrb.mxu0 %v12041_v46  ;;  %v16448_v46 = vld [vmem:[#allocation1 + $0x24] sm:$0xff]  ;;  %v15048_v33 = vld [vmem:[%s16127_s17 + $0x18d4] sm:$0xf0] }
  0xcc   : > { %7483 = vmatpush.bf16.msrb.mxu1 %v12233_v47  ;;  %v16450_v47 = vld [vmem:[#allocation1 + $0x36] sm:$0xff] }
  0xcd   : > { %7496 = vmatpush.bf16.msrb.mxu2 %v12425_v48  ;;  %v16452_v48 = vld [vmem:[#allocation1 + $0x2d] sm:$0xff] }
  0xce   : > { %7509 = vmatpush.bf16.msrb.mxu3 %v12617_v52  ;;  %v13264_v52 = vld [vmem:[%s16127_s17 + $0x1c50] sm:$0xf]  ;;  %1518 = vst [vmem:[#allocation1] ss:$9 sm:$0xff] %v330_v50 }
  0xcf   : > { %7471 = vmatpush.bf16.msrb.mxu0 %v12017_v58  ;;  %v12521_v58 = vor.u32 %v14976_v40, %v12520_v39  ;;  %v13265_v61 = vor.u32 %v15162_v53, %v13264_v52  ;;  %v13192_v39 = vld [vmem:[%s16127_s17 + $0x1bc0] sm:$0xf]  ;;  %v15144_v40 = vld [vmem:[%s16127_s17 + $0x1bd4] sm:$0xf0]  ;;  %v12784_v50 = vld [vmem:[%s16127_s17 + $0x1890] sm:$0xf] }
  0xd0   : > { %7484 = vmatpush.bf16.msrb.mxu1 %v12209_v59  ;;  %v12881_v59 = vor.u32 %v15066_v42, %v12880_v41  ;;  %v13384_v41 = vld [vmem:[%s16127_s17 + $0x1d40] sm:$0xf]  ;;  %v15192_v42 = vld [vmem:[%s16127_s17 + $0x1d54] sm:$0xf0]  ;;  %v12976_v52 = vld [vmem:[%s16127_s17 + $0x1a10] sm:$0xf] }
  0xd1   : > { %7497 = vmatpush.bf16.msrb.mxu2 %v12401_v60  ;;  %v13073_v60 = vor.u32 %v15114_v45, %v13072_v44  ;;  %v13193_v45 = vor.u32 %v15144_v40, %v13192_v39  ;;  %v13385_v53 = vor.u32 %v15192_v42, %v13384_v41  ;;  %v15120_v40 = vld [vmem:[%s16127_s17 + $0x1b14] sm:$0xf0]  ;;  %v13288_v41 = vld [vmem:[%s16127_s17 + $0x1c80] sm:$0xf] }
  0xd2   : > { %7510 = vmatpush.bf16.msrb.mxu3 %v12593_v0  ;;  %v13048_v0 = vld [vmem:[%s16127_s17 + $0x1aa0] sm:$0xf]  ;;  %v15168_v42 = vld [vmem:[%s16127_s17 + $0x1c94] sm:$0xf0] }
  0xd3   : > { %7472 = vmatpush.bf16.msrb.mxu0 %v11993_v6  ;;  %v15204_v6 = vld [vmem:[%s16127_s17 + $0x1db4] sm:$0xf0] }
  0xd4   : > { %7485 = vmatpush.bf16.msrb.mxu1 %v12185_v9  ;;  %v13049_v9 = vor.u32 %v15108_v2, %v13048_v0  ;;  %v12952_v0 = vld [vmem:[%s16127_s17 + $0x19e0] sm:$0xf]  ;;  %v15084_v2 = vld [vmem:[%s16127_s17 + $0x19f4] sm:$0xf0] }
  0xd5   : > { %7498 = vmatpush.bf16.msrb.mxu2 %v12377_v10  ;;  %v13241_v10 = vor.u32 %v15156_v4, %v13240_v3  ;;  %v13144_v3 = vld [vmem:[%s16127_s17 + $0x1b60] sm:$0xf]  ;;  %v15132_v4 = vld [vmem:[%s16127_s17 + $0x1b74] sm:$0xf0] }
  0xd6   : > { %7511 = vmatpush.bf16.msrb.mxu3 %v12569_v17  ;;  %v13433_v17 = vor.u32 %v15204_v6, %v13432_v5  ;;  %v13336_v5 = vld [vmem:[%s16127_s17 + $0x1ce0] sm:$0xf]  ;;  %v15180_v6 = vld [vmem:[%s16127_s17 + $0x1cf4] sm:$0xf0] }
  0xd7   : > { %7473 = vmatpush.bf16.msrb.mxu0 %v11969_v24  ;;  %v13025_v24 = vor.u32 %v15102_v18, %v13024_v16  ;;  %v12928_v16 = vld [vmem:[%s16127_s17 + $0x19b0] sm:$0xf]  ;;  %v15078_v18 = vld [vmem:[%s16127_s17 + $0x19c4] sm:$0xf0] }
  0xd8   : > { %7486 = vmatpush.bf16.msrb.mxu1 %v12161_v36  ;;  %v13409_v36 = vor.u32 %v15198_v22, %v13408_v21  ;;  %v13312_v21 = vld [vmem:[%s16127_s17 + $0x1cb0] sm:$0xf]  ;;  %v15174_v22 = vld [vmem:[%s16127_s17 + $0x1cc4] sm:$0xf0] }
  0xd9   : > { %7499 = vmatpush.bf16.msrb.mxu2 %v12353_v37  ;;  %v15096_v37 = vld [vmem:[%s16127_s17 + $0x1a54] sm:$0xf0]  ;;  %v13313_v39 = vor.u32 %v15174_v22, %v13312_v21  ;;  %v15294_v22 = vld [vmem:[%s16127_s17 + $0x2084] sm:$0xf0] }
  0xda   : > { %7512 = vmatpush.bf16.msrb.mxu3 %v12545_v43  ;;  %v12809_v43 = vor.u32 %v15048_v33, %v12808_v30  ;;  %v13001_v44 = vor.u32 %v15096_v37, %v13000_v35  ;;  %v12929_v30 = vor.u32 %v15078_v18, %v12928_v16  ;;  %v13121_v33 = vor.u32 %v15126_v20, %v13120_v19  ;;  %v12904_v35 = vld [vmem:[%s16127_s17 + $0x1980] sm:$0xf]  ;;  %v13600_v18 = vld [vmem:[%s16127_s17 + $0x1ef0] sm:$0xf]  ;;  %v15246_v19 = vld [vmem:[%s16127_s17 + $0x1f04] sm:$0xf0] }
  0xdb   : > { %7474 = vmatpush.bf16.msrb.mxu0 %v11945_v51  ;;  %v15042_v51 = vld [vmem:[%s16127_s17 + $0x18a4] sm:$0xf0]  ;;  %v13096_v37 = vld [vmem:[%s16127_s17 + $0x1b00] sm:$0xf]  ;;  %v13792_v20 = vld [vmem:[%s16127_s17 + $0x2070] sm:$0xf] }
  0xdc   : > { %7487 = vmatpush.bf16.msrb.mxu1 %v12137_v54  ;;  %v15090_v54 = vld [vmem:[%s16127_s17 + $0x1a24] sm:$0xf0] }
  0xdd   : > { %7500 = vmatpush.bf16.msrb.mxu2 %v12329_v55  ;;  %v13168_v55 = vld [vmem:[%s16127_s17 + $0x1b90] sm:$0xf] }
  0xde   : > { %7513 = vmatpush.bf16.msrb.mxu3 %v12521_v58  ;;  %7475 = vmatmul.bf16.vlgmr.msrb.gmra.mxu0 %v16448_v46  ;;  %v15186_v58 = vld [vmem:[%s16127_s17 + $0x1d24] sm:$0xf0] }
  0xdf   : > { %7519 = vmatpush.bf16.msra.mxu0 %v12881_v59  ;;  %7488 = vmatmul.bf16.vlgmr.msrb.gmra.mxu1 %v16452_v48  ;;  %v12785_v59 = vor.u32 %v15042_v51, %v12784_v50  ;;  %v15306_v51 = vld [vmem:[%s16127_s17 + $0x20e4] sm:$0xf0] }
  0xe0   : > { %7532 = vmatpush.bf16.msra.mxu1 %v13073_v60  ;;  %7501 = vmatmul.bf16.vlgmr.msrb.gmra.mxu2 %v16450_v47  ;;  %v12977_v60 = vor.u32 %v15090_v54, %v12976_v52  ;;  %v14032_v52 = vld [vmem:[%s16127_s17 + $0x2250] sm:$0xf] }
  0xe1   : > { %7545 = vmatpush.bf16.msra.mxu2 %v13265_v61  ;;  %7514 = vmatmul.bf16.vlgmr.msrb.gmra.mxu3 %v16454_v49  ;;  %v13169_v61 = vor.u32 %v15138_v56, %v13168_v55  ;;  %v13097_v55 = vor.u32 %v15120_v40, %v13096_v37  ;;  %v14224_v56 = vld [vmem:[%s16127_s17 + $0x23d0] sm:$0xf]  ;;  %v13576_v37 = vld [vmem:[%s16127_s17 + $0x1ec0] sm:$0xf] }
  0xe2   : > { %7558 = vmatpush.bf16.msra.mxu3 %v13457_v1  ;;  %v13361_v1 = vor.u32 %v15186_v58, %v13360_v57  ;;  %v15402_v57 = vld [vmem:[%s16127_s17 + $0x23e4] sm:$0xf0]  ;;  %v13289_v58 = vor.u32 %v15168_v42, %v13288_v41  ;;  %v13768_v40 = vld [vmem:[%s16127_s17 + $0x2040] sm:$0xf]  ;;  %v15288_v42 = vld [vmem:[%s16127_s17 + $0x2054] sm:$0xf0] }
  0xe3   : > { %7520 = vmatpush.bf16.msra.mxu0 %v12857_v7  ;;  %v12761_v7 = vor.u32 %v15036_v63, %v12760_v62  ;;  %v13624_v62 = vld [vmem:[%s16127_s17 + $0x1f20] sm:$0xf]  ;;  %v15252_v63 = vld [vmem:[%s16127_s17 + $0x1f34] sm:$0xf0] }
  0xe4   : > { %7533 = vmatpush.bf16.msra.mxu1 %v13049_v9  ;;  %v12953_v9 = vor.u32 %v15084_v2, %v12952_v0  ;;  %v13816_v0 = vld [vmem:[%s16127_s17 + $0x20a0] sm:$0xf]  ;;  %v15300_v2 = vld [vmem:[%s16127_s17 + $0x20b4] sm:$0xf0] }
  0xe5   : > { %7546 = vmatpush.bf16.msra.mxu2 %v13241_v10  ;;  %v13145_v10 = vor.u32 %v15132_v4, %v13144_v3  ;;  %v14008_v3 = vld [vmem:[%s16127_s17 + $0x2220] sm:$0xf]  ;;  %v15348_v4 = vld [vmem:[%s16127_s17 + $0x2234] sm:$0xf0]  ;;  %v13817_v16 = vor.u32 %v15300_v2, %v13816_v0 }
  0xe6   : > { %7559 = vmatpush.bf16.msra.mxu3 %v13433_v17  ;;  %v13337_v17 = vor.u32 %v15180_v6, %v13336_v5  ;;  %v1519_v5 = vld [vmem:[#allocation1] sm:$0xff]  ;;  %v14200_v6 = vld [vmem:[%s16127_s17 + $0x23a0] sm:$0xf] }
  0xe7   : > { %7521 = vmatpush.bf16.msra.mxu0 %v12833_v23  ;;  %v12737_v23 = vor.u32 %v15030_v14, %v12736_v13  ;;  %v1522_v13 = vld [vmem:[#allocation1 + $0x1b] sm:$0xff]  ;;  %v13625_v14 = vor.u32 %v15252_v63, %v13624_v62  ;;  %v15378_v62 = vld [vmem:[%s16127_s17 + $0x2324] sm:$0xf0]  ;;  %v13528_v0 = vld [vmem:[%s16127_s17 + $0x1e60] sm:$0xf] }
  0xe8   : > { %7534 = vmatpush.bf16.msra.mxu1 %v13025_v24  ;;  %v12712_v24 = vld [vmem:[%s16127_s17 + $0x1800] sm:$0xf] }
  0xe9   : > { %7547 = vmatpush.bf16.msra.mxu2 %v13217_v26  ;;  %v15024_v26 = vld [vmem:[%s16127_s17 + $0x1814] sm:$0xf0] }
  0xea   : > { %7560 = vmatpush.bf16.msra.mxu3 %v13409_v36  ;;  %v15072_v36 = vld [vmem:[%s16127_s17 + $0x1994] sm:$0xf0]  ;;  %v12713_v50 = vor.u32 %v15024_v26, %v12712_v24  ;;  %v15342_v24 = vld [vmem:[%s16127_s17 + $0x2204] sm:$0xf0]  ;;  %v14176_v26 = vld [vmem:[%s16127_s17 + $0x2370] sm:$0xf] }
  0xeb   : > { %7522 = vmatpush.bf16.msra.mxu0 %v12809_v43  ;;  %v13648_v43 = vld [vmem:[%s16127_s17 + $0x1f50] sm:$0xf]  ;;  %v12905_v54 = vor.u32 %v15072_v36, %v12904_v35  ;;  %v13793_v35 = vor.u32 %v15294_v22, %v13792_v20  ;;  %v15222_v20 = vld [vmem:[%s16127_s17 + $0x1e44] sm:$0xf0] }
  0xec   : > { %7535 = vmatpush.bf16.msra.mxu1 %v13001_v44  ;;  %v15258_v44 = vld [vmem:[%s16127_s17 + $0x1f64] sm:$0xf0] }
  0xed   : > { %7548 = vmatpush.bf16.msra.mxu2 %v13193_v45  ;;  %v13840_v45 = vld [vmem:[%s16127_s17 + $0x20d0] sm:$0xf] }
  0xee   : > { %7561 = vmatpush.bf16.msra.mxu3 %v13385_v53  ;;  %v15354_v53 = vld [vmem:[%s16127_s17 + $0x2264] sm:$0xf0] }
  0xef   : > { %7523 = vmatpush.bf16.msra.mxu0 %v12785_v59  ;;  %v13649_v59 = vor.u32 %v15258_v44, %v13648_v43  ;;  %v13960_v43 = vld [vmem:[%s16127_s17 + $0x21c0] sm:$0xf]  ;;  %v15336_v44 = vld [vmem:[%s16127_s17 + $0x21d4] sm:$0xf0] }
  0xf0   : > { %7536 = vmatpush.bf16.msra.mxu1 %v12977_v60  ;;  %v13841_v60 = vor.u32 %v15306_v51, %v13840_v45  ;;  %v14152_v45 = vld [vmem:[%s16127_s17 + $0x2340] sm:$0xf] }
  0xf1   : > { %7549 = vmatpush.bf16.msra.mxu2 %v13169_v61  ;;  %v14033_v61 = vor.u32 %v15354_v53, %v14032_v52  ;;  %v13769_v52 = vor.u32 %v15288_v42, %v13768_v40  ;;  %v13961_v53 = vor.u32 %v15336_v44, %v13960_v43  ;;  %v13672_v43 = vld [vmem:[%s16127_s17 + $0x1f80] sm:$0xf]  ;;  %v15264_v44 = vld [vmem:[%s16127_s17 + $0x1f94] sm:$0xf0] }
  0xf2   : > { %7562 = vmatpush.bf16.msra.mxu3 %v13361_v1  ;;  %v14225_v1 = vor.u32 %v15402_v57, %v14224_v56  ;;  %v13744_v56 = vld [vmem:[%s16127_s17 + $0x2010] sm:$0xf] }
  0xf3   : > { %7524 = vmatpush.bf16.msra.mxu0 %v12761_v7  ;;  %v15396_v7 = vld [vmem:[%s16127_s17 + $0x23b4] sm:$0xf0] }
  0xf4   : > { %7537 = vmatpush.bf16.msra.mxu1 %v12953_v9  ;;  %v1521_v9 = vld [vmem:[#allocation1 + $0x12] sm:$0xff]  ;;  %v14201_v21 = vor.u32 %v15396_v7, %v14200_v6  ;;  %v13912_v7 = vld [vmem:[%s16127_s17 + $0x2160] sm:$0xf] }
  0xf5   : > { %7550 = vmatpush.bf16.msra.mxu2 %v13145_v10  ;;  %v1520_v10 = vld [vmem:[#allocation1 + $0x9] sm:$0xff] }
  0xf6   : > { %7563 = vmatpush.bf16.msra.mxu3 %v13337_v17  ;;  %v14009_v17 = vor.u32 %v15348_v4, %v14008_v3  ;;  %v15228_v3 = vld [vmem:[%s16127_s17 + $0x1e74] sm:$0xf0]  ;;  %v13720_v4 = vld [vmem:[%s16127_s17 + $0x1fe0] sm:$0xf] }
  0xf7   : > { %7525 = vmatpush.bf16.msra.mxu0 %v12737_v23  ;;  %v13984_v23 = vld [vmem:[%s16127_s17 + $0x21f0] sm:$0xf] }
  0xf8   : > { %7538 = vmatpush.bf16.msra.mxu1 %v12929_v30  ;;  %v15390_v30 = vld [vmem:[%s16127_s17 + $0x2384] sm:$0xf0]  ;;  %v13985_v36 = vor.u32 %v15342_v24, %v13984_v23 }
  0xf9   : > { %7551 = vmatpush.bf16.msra.mxu2 %v13121_v33  ;;  %v13601_v33 = vor.u32 %v15246_v19, %v13600_v18  ;;  %v14177_v41 = vor.u32 %v15390_v30, %v14176_v26  ;;  %v15270_v24 = vld [vmem:[%s16127_s17 + $0x1fc4] sm:$0xf0]  ;;  %v13888_v26 = vld [vmem:[%s16127_s17 + $0x2130] sm:$0xf] }
  0xfa   : > { %7564 = vmatpush.bf16.msra.mxu3 %v13313_v39  ;;  %v15240_v39 = vld [vmem:[%s16127_s17 + $0x1ed4] sm:$0xf0]  ;;  %v15318_v30 = vld [vmem:[%s16127_s17 + $0x2144] sm:$0xf0] }
  0xfb   : > { %7526 = vmatpush.bf16.msra.mxu0 %v12713_v50  ;;  %v15384_v50 = vld [vmem:[%s16127_s17 + $0x2354] sm:$0xf0]  ;;  %v13577_v51 = vor.u32 %v15240_v39, %v13576_v37  ;;  %v13480_v37 = vld [vmem:[%s16127_s17 + $0x1e00] sm:$0xf]  ;;  %v13889_v42 = vor.u32 %v15318_v30, %v13888_v26  ;;  %v14433_v26 = vld [vmem:[%s16127_s17 + $0x5a4] sm:$0xf] }
  0xfc   : > { %7539 = vmatpush.bf16.msra.mxu1 %v12905_v54  ;;  %v13552_v54 = vld [vmem:[%s16127_s17 + $0x1e90] sm:$0xf]  ;;  %v14153_v57 = vor.u32 %v15384_v50, %v14152_v45  ;;  %v15216_v39 = vld [vmem:[%s16127_s17 + $0x1e14] sm:$0xf0]  ;;  %v13864_v45 = vld [vmem:[%s16127_s17 + $0x2100] sm:$0xf] }
  0xfd   : > { %7552 = vmatpush.bf16.msra.mxu2 %v13097_v55  ;;  %v15234_v55 = vld [vmem:[%s16127_s17 + $0x1ea4] sm:$0xf0]  ;;  %v10362_v30 = vld [vmem:[%s16127_s17 + $0x5b8] sm:$0xf0] }
  0xfe   : > { %7565 = vmatpush.bf16.msra.mxu3 %v13289_v58  ;;  %7527 = vmatmul.bf16.vlgmr.msra.gmra.mxu0 %v1519_v5  ;;  %v15282_v58 = vld [vmem:[%s16127_s17 + $0x2024] sm:$0xf0]  ;;  %v13553_v63 = vor.u32 %v15234_v55, %v13552_v54  ;;  %v15276_v5 = vld [vmem:[%s16127_s17 + $0x1ff4] sm:$0xf0]  ;;  %v14056_v54 = vld [vmem:[%s16127_s17 + $0x2280] sm:$0xf] }
  0xff   : > { %7571 = vmatpush.bf16.msrb.mxu0 %v13649_v59  ;;  %7540 = vmatmul.bf16.vlgmr.msra.gmra.mxu1 %v1520_v10  ;;  %v13936_v59 = vld [vmem:[%s16127_s17 + $0x2190] sm:$0xf]  ;;  %v1483_v10 = vld [vmem:[%s16134_s12] sm:$0x3f]  ;;  %v13721_v18 = vor.u32 %v15276_v5, %v13720_v4  ;;  %v15360_v55 = vld [vmem:[%s16127_s17 + $0x2294] sm:$0xf0] }
 0x100   : > { %7584 = vmatpush.bf16.msrb.mxu1 %v13841_v60  ;;  %7553 = vmatmul.bf16.vlgmr.msra.gmra.mxu2 %v1521_v9  ;;  %v15330_v60 = vld [vmem:[%s16127_s17 + $0x21a4] sm:$0xf0]  ;;  %v15324_v9 = vld [vmem:[%s16127_s17 + $0x2174] sm:$0xf0]  ;;  %v1485_v22 = vperm.slane %v1483_v10, 0  ;;  %v14057_v5 = vor.u32 %v15360_v55, %v14056_v54 }
 0x101   : > { %7597 = vmatpush.bf16.msrb.mxu2 %v14033_v61  ;;  %7566 = vmatmul.bf16.vlgmr.msra.gmra.mxu3 %v1522_v13  ;;  %v14128_v61 = vld [vmem:[%s16127_s17 + $0x2310] sm:$0xf]  ;;  %v13937_v2 = vor.u32 %v15330_v60, %v13936_v59  ;;  %v14104_v13 = vld [vmem:[%s16127_s17 + $0x22e0] sm:$0xf]  ;;  %v13913_v19 = vor.u32 %v15324_v9, %v13912_v7  ;;  %v7320_v40 = vpop.f32.mrf.mxu0  ;;  %v13481_v60 = vor.u32 %v15216_v39, %v13480_v37  ;;  %v1526_v37 = vld [vmem:[#allocation1 + $0x3f] sm:$0xff] }
 0x102   : > { %7610 = vmatpush.bf16.msrb.mxu3 %v14225_v1  ;;  %v13745_v1 = vor.u32 %v15282_v58, %v13744_v56  ;;  %v14129_v6 = vor.u32 %v15378_v62, %v14128_v61  ;;  %v7321_v50 = vadd.f32 %v7320_v40, %v1485_v22  ;;  %v14295_v56 = vld [vmem:[%s16127_s17 + $0x154] sm:$0xf]  ;;  %v10002_v61 = vld [vmem:[%s16127_s17 + $0x2e8] sm:$0xf0] }
 0x103   : > { %7572 = vmatpush.bf16.msrb.mxu0 %v13625_v14  ;;  %v15372_v14 = vld [vmem:[%s16127_s17 + $0x22f4] sm:$0xf0]  ;;  %v14343_v58 = vld [vmem:[%s16127_s17 + $0x2d4] sm:$0xf]  ;;  %v10338_v54 = vld [vmem:[%s16127_s17 + $0x588] sm:$0xf0] }
 0x104   : > { %7585 = vmatpush.bf16.msrb.mxu1 %v13817_v16  ;;  %v13529_v16 = vor.u32 %v15228_v3, %v13528_v0  ;;  %v14105_v23 = vor.u32 %v15372_v14, %v14104_v13  ;;  %v14391_v62 = vld [vmem:[%s16127_s17 + $0x454] sm:$0xf]  ;;  %v13673_v0 = vor.u32 %v15264_v44, %v13672_v43  ;;  %v10386_v3 = vld [vmem:[%s16127_s17 + $0x5e8] sm:$0xf0]  ;;  %v10005_v10 = vor.u32 %v14343_v58, %v10002_v61  ;;  %v14289_v14 = vld [vmem:[%s16127_s17 + $0x124] sm:$0xf] }
 0x105   : > { %7598 = vmatpush.bf16.msrb.mxu2 %v14009_v17  ;;  %v13504_v17 = vld [vmem:[%s16127_s17 + $0x1e30] sm:$0xf]  ;;  %v9762_v43 = vld [vmem:[%s16127_s17 + $0x108] sm:$0xf0]  ;;  %v14331_v44 = vld [vmem:[%s16127_s17 + $0x274] sm:$0xf] }
 0x106   : > { %7611 = vmatpush.bf16.msrb.mxu3 %v14201_v21  ;;  %v13696_v21 = vld [vmem:[%s16127_s17 + $0x1fb0] sm:$0xf]  ;;  %v7346_v4 = vpop.f32.mrf.mxu2  ;;  %v9738_v61 = vld [vmem:[%s16127_s17 + $0xd8] sm:$0xf0] }
 0x107   : > { %7573 = vmatpush.bf16.msrb.mxu0 %v13601_v33  ;;  %v14080_v33 = vld [vmem:[%s16127_s17 + $0x22b0] sm:$0xf] }
 0x108   : > { %7586 = vmatpush.bf16.msrb.mxu1 %v13793_v35  ;;  %v15366_v35 = vld [vmem:[%s16127_s17 + $0x22c4] sm:$0xf0]  ;;  %v7359_v9 = vpop.f32.mrf.mxu3 }
 0x109   : > { %7599 = vmatpush.bf16.msrb.mxu2 %v13985_v36  ;;  %v13505_v36 = vor.u32 %v15222_v20, %v13504_v17  ;;  %v14337_v17 = vld [vmem:[%s16127_s17 + $0x2a4] sm:$0xf] }
 0x10a   : > { %7612 = vmatpush.bf16.msrb.mxu3 %v14177_v41  ;;  %v13697_v41 = vor.u32 %v15270_v24, %v13696_v21  ;;  %v14385_v20 = vld [vmem:[%s16127_s17 + $0x424] sm:$0xf]  ;;  %v10170_v21 = vld [vmem:[%s16127_s17 + $0x438] sm:$0xf0] }
 0x10b   : > { %7574 = vmatpush.bf16.msrb.mxu0 %v13577_v51  ;;  %v7333_v51 = vpop.f32.mrf.mxu1  ;;  %v1523_v24 = vld [vmem:[#allocation1 + $0x24] sm:$0xff] }
 0x10c   : > { %7587 = vmatpush.bf16.msrb.mxu1 %v13769_v52  ;;  %v14081_v52 = vor.u32 %v15366_v35, %v14080_v33  ;;  %v7334_v59 = vadd.f32 %v7333_v51, %v7321_v50  ;;  %v1525_v35 = vld [vmem:[#allocation1 + $0x36] sm:$0xff] }
 0x10d   : > { %7600 = vmatpush.bf16.msrb.mxu2 %v13961_v53  ;;  %v15312_v53 = vld [vmem:[%s16127_s17 + $0x2114] sm:$0xf0]  ;;  %v9954_v50 = vld [vmem:[%s16127_s17 + $0x288] sm:$0xf0]  ;;  %v14379_v51 = vld [vmem:[%s16127_s17 + $0x3f4] sm:$0xf] }
 0x10e   : > { %7613 = vmatpush.bf16.msrb.mxu3 %v14153_v57  ;;  %v9810_v57 = vld [vmem:[%s16127_s17 + $0x168] sm:$0xf0]  ;;  %v7347_v7 = vadd.f32 %v7346_v4, %v7334_v59  ;;  %v7348_v55 = vpop.f32.mrf.mxu2  ;;  %v9957_v58 = vor.u32 %v14331_v44, %v9954_v50  ;;  %v10314_v4 = vld [vmem:[%s16127_s17 + $0x558] sm:$0xf0]  ;;  %v14409_v50 = vld [vmem:[%s16127_s17 + $0x4e4] sm:$0xf] }
 0x10f   : > { %7575 = vmatpush.bf16.msrb.mxu0 %v13553_v63  ;;  %v10194_v63 = vld [vmem:[%s16127_s17 + $0x468] sm:$0xf0] }
 0x110   : > { %7588 = vmatpush.bf16.msrb.mxu1 %v13745_v1  ;;  %v13865_v1 = vor.u32 %v15312_v53, %v13864_v45  ;;  %v10197_v13 = vor.u32 %v14391_v62, %v10194_v63  ;;  %v7360_v22 = vadd.f32 %v7359_v9, %v7347_v7  ;;  %v10365_v45 = vor.u32 %v14433_v26, %v10362_v30  ;;  %v14427_v53 = vld [vmem:[%s16127_s17 + $0x574] sm:$0xf]  ;;  %v14325_v62 = vld [vmem:[%s16127_s17 + $0x244] sm:$0xf] }
 0x111   : > { %7601 = vmatpush.bf16.msrb.mxu2 %v13937_v2  ;;  %v14439_v2 = vld [vmem:[%s16127_s17 + $0x5d4] sm:$0xf]  ;;  %v10341_v63 = vor.u32 %v14427_v53, %v10338_v54 }
 0x112   : > { %7614 = vmatpush.bf16.msrb.mxu3 %v14129_v6  ;;  %v9813_v6 = vor.u32 %v14295_v56, %v9810_v57  ;;  %v7361_v57 = vpop.f32.mrf.mxu3 }
 0x113   : > { %7576 = vmatpush.bf16.msrb.mxu0 %v13529_v16  ;;  %v9786_v16 = vld [vmem:[%s16127_s17 + $0x138] sm:$0xf0]  ;;  %v7335_v33 = vpop.f32.mrf.mxu1  ;;  %v14259_v57 = vld [vmem:[%s16127_s17 + $0x34] sm:$0xf] }
 0x114   : > { %7589 = vmatpush.bf16.msrb.mxu1 %v13721_v18  ;;  %v10389_v18 = vor.u32 %v14439_v2, %v10386_v3  ;;  %v9789_v39 = vor.u32 %v14289_v14, %v9786_v16  ;;  %v10122_v2 = vld [vmem:[%s16127_s17 + $0x3d8] sm:$0xf0]  ;;  %v14421_v3 = vld [vmem:[%s16127_s17 + $0x544] sm:$0xf]  ;;  %v14319_v14 = vld [vmem:[%s16127_s17 + $0x214] sm:$0xf] }
 0x115   : > { %7602 = vmatpush.bf16.msrb.mxu2 %v13913_v19  ;;  %v9978_v19 = vld [vmem:[%s16127_s17 + $0x2b8] sm:$0xf0] }
 0x116   : > { %7615 = vmatpush.bf16.msrb.mxu3 %v14105_v23  ;;  %v7322_v23 = vpop.f32.mrf.mxu0  ;;  %v9981_v40 = vor.u32 %v14337_v17, %v9978_v19  ;;  %v9906_v19 = vld [vmem:[%s16127_s17 + $0x228] sm:$0xf0] }
 0x117   : > { %7577 = vmatpush.bf16.msrb.mxu0 %v13505_v36  ;;  %v1524_v36 = vld [vmem:[#allocation1 + $0x2d] sm:$0xff]  ;;  %v14415_v23 = vld [vmem:[%s16127_s17 + $0x514] sm:$0xf] }
 0x118   : > { %7590 = vmatpush.bf16.msrb.mxu1 %v13697_v41  ;;  %v10173_v41 = vor.u32 %v14385_v20, %v10170_v21  ;;  %v14367_v20 = vld [vmem:[%s16127_s17 + $0x394] sm:$0xf]  ;;  %v10098_v21 = vld [vmem:[%s16127_s17 + $0x3a8] sm:$0xf0] }
 0x119   : > { %7603 = vmatpush.bf16.msrb.mxu2 %v13889_v42  ;;  %v14283_v42 = vld [vmem:[%s16127_s17 + $0xf4] sm:$0xf]  ;;  %v10101_v33 = vor.u32 %v14367_v20, %v10098_v21 }
 0x11a   : > { %7616 = vmatpush.bf16.msrb.mxu3 %v14081_v52  ;;  %v10146_v52 = vld [vmem:[%s16127_s17 + $0x408] sm:$0xf0]  ;;  %v9765_v56 = vor.u32 %v14283_v42, %v9762_v43  ;;  %v14361_v42 = vld [vmem:[%s16127_s17 + $0x364] sm:$0xf]  ;;  %v10074_v43 = vld [vmem:[%s16127_s17 + $0x378] sm:$0xf0] }
 0x11b   : > { %7578 = vmatpush.bf16.msrb.mxu0 %v13481_v60  ;;  %v10149_v59 = vor.u32 %v14379_v51, %v10146_v52  ;;  %v14277_v60 = vld [vmem:[%s16127_s17 + $0xc4] sm:$0xf]  ;;  %v10266_v51 = vld [vmem:[%s16127_s17 + $0x4f8] sm:$0xf0]  ;;  %v14487_v21 = vld [vmem:[%s16127_s17 + $0x754] sm:$0xf] }
 0x11c   : > { %7591 = vmatpush.bf16.msrb.mxu1 %v13673_v0  ;;  %v9930_v0 = vld [vmem:[%s16127_s17 + $0x258] sm:$0xf0]  ;;  %v7385_v17 = vpop.f32.mrf.mxu1 }
 0x11d   : > { %7604 = vmatpush.bf16.msrb.mxu2 %v13865_v1  ;;  %v14373_v1 = vld [vmem:[%s16127_s17 + $0x3c4] sm:$0xf]  ;;  %v9933_v7 = vor.u32 %v14325_v62, %v9930_v0  ;;  %v9858_v62 = vld [vmem:[%s16127_s17 + $0x1c8] sm:$0xf0] }
 0x11e   : > { %7617 = vmatpush.bf16.msrb.mxu3 %v14057_v5  ;;  %7579 = vmatmul.bf16.vlgmr.msrb.gmra.mxu0 %v1523_v24  ;;  %v9741_v5 = vor.u32 %v14277_v60, %v9738_v61  ;;  %v10125_v9 = vor.u32 %v14373_v1, %v10122_v2  ;;  %v10290_v24 = vld [vmem:[%s16127_s17 + $0x528] sm:$0xf0]  ;;  %v10269_v61 = vor.u32 %v14409_v50, %v10266_v51  ;;  %v14403_v1 = vld [vmem:[%s16127_s17 + $0x4b4] sm:$0xf]  ;;  %v14529_v50 = vld [vmem:[%s16127_s17 + $0x8a4] sm:$0xf] }
 0x11f   : > { %7623 = vmatpush.bf16.msra.mxu0 %v9813_v6  ;;  %7592 = vmatmul.bf16.vlgmr.msrb.gmra.mxu1 %v1524_v36  ;;  %v7372_v6 = vpop.f32.mrf.mxu0  ;;  %v9690_v36 = vld [vmem:[%s16127_s17 + $0x78] sm:$0xf0]  ;;  %v10050_v0 = vld [vmem:[%s16127_s17 + $0x348] sm:$0xf0] }
 0x120   : > { %7636 = vmatpush.bf16.msra.mxu1 %v10005_v10  ;;  %7605 = vmatmul.bf16.vlgmr.msrb.gmra.mxu2 %v1525_v35  ;;  %v14271_v10 = vld [vmem:[%s16127_s17 + $0x94] sm:$0xf]  ;;  %v7373_v16 = vadd.f32 %v7372_v6, %v7360_v22  ;;  %v9909_v22 = vor.u32 %v14319_v14, %v9906_v19  ;;  %v14265_v35 = vld [vmem:[%s16127_s17 + $0x64] sm:$0xf]  ;;  %v10242_v2 = vld [vmem:[%s16127_s17 + $0x4c8] sm:$0xf0] }
 0x121   : > { %7649 = vmatpush.bf16.msra.mxu2 %v10197_v13  ;;  %7618 = vmatmul.bf16.vlgmr.msrb.gmra.mxu3 %v1526_v37  ;;  %v9714_v13 = vld [vmem:[%s16127_s17 + $0xa8] sm:$0xf0]  ;;  %v14313_v37 = vld [vmem:[%s16127_s17 + $0x1e4] sm:$0xf]  ;;  %v9693_v52 = vor.u32 %v14265_v35, %v9690_v36  ;;  %v10218_v19 = vld [vmem:[%s16127_s17 + $0x498] sm:$0xf0] }
 0x122   : > { %7662 = vmatpush.bf16.msra.mxu3 %v10389_v18  ;;  %v10317_v18 = vor.u32 %v14421_v3, %v10314_v4  ;;  %v7386_v26 = vadd.f32 %v7385_v17, %v7373_v16  ;;  %v9717_v30 = vor.u32 %v14271_v10, %v9714_v13  ;;  %v14253_v4 = vld [vmem:[%s16127_s17 + $0x4] sm:$0xf]  ;;  %v9834_v10 = vld [vmem:[%s16127_s17 + $0x198] sm:$0xf0]  ;;  %v10245_v16 = vor.u32 %v14403_v1, %v10242_v2  ;;  %v10722_v1 = vld [vmem:[%s16127_s17 + $0x888] sm:$0xf0] }
 0x123   : > { %7624 = vmatpush.bf16.msra.mxu0 %v9789_v39  ;;  %v7398_v39 = vpop.f32.mrf.mxu2  ;;  %v14349_v13 = vld [vmem:[%s16127_s17 + $0x304] sm:$0xf]  ;;  %v10026_v17 = vld [vmem:[%s16127_s17 + $0x318] sm:$0xf0]  ;;  %v14571_v2 = vld [vmem:[%s16127_s17 + $0x9f4] sm:$0xf] }
 0x124   : > { %7637 = vmatpush.bf16.msra.mxu1 %v9981_v40  ;;  %v10293_v40 = vor.u32 %v14415_v23, %v10290_v24  ;;  %v7399_v44 = vadd.f32 %v7398_v39, %v7386_v26  ;;  %v7387_v60 = vpop.f32.mrf.mxu1  ;;  %v10578_v23 = vld [vmem:[%s16127_s17 + $0x768] sm:$0xf0]  ;;  %v14535_v24 = vld [vmem:[%s16127_s17 + $0x8d4] sm:$0xf]  ;;  %v10029_v36 = vor.u32 %v14349_v13, %v10026_v17  ;;  %v10506_v13 = vld [vmem:[%s16127_s17 + $0x6d8] sm:$0xf0] }
 0x125   : > { %7650 = vmatpush.bf16.msra.mxu2 %v10173_v41  ;;  %v9882_v41 = vld [vmem:[%s16127_s17 + $0x1f8] sm:$0xf0]  ;;  %v11154_v39 = vld [vmem:[%s16127_s17 + $0xbe8] sm:$0xf0] }
 0x126   : > { %7663 = vmatpush.bf16.msra.mxu3 %v10365_v45  ;;  %v7411_v45 = vpop.f32.mrf.mxu3  ;;  %v9885_v55 = vor.u32 %v14313_v37, %v9882_v41  ;;  %v14631_v37 = vld [vmem:[%s16127_s17 + $0xbd4] sm:$0xf]  ;;  %v10581_v41 = vor.u32 %v14487_v21, %v10578_v23  ;;  %v10698_v17 = vld [vmem:[%s16127_s17 + $0x858] sm:$0xf0]  ;;  %v14613_v21 = vld [vmem:[%s16127_s17 + $0xb44] sm:$0xf] }
 0x127   : > { %7625 = vmatpush.bf16.msra.mxu0 %v9765_v56  ;;  %v16636_v53 = vadd.f32 %v7411_v45, %v7399_v44  ;;  %v7374_v54 = vpop.f32.mrf.mxu0  ;;  %v10077_v56 = vor.u32 %v14361_v42, %v10074_v43  ;;  %v14481_v44 = vld [vmem:[%s16127_s17 + $0x724] sm:$0xf]  ;;  %v10554_v45 = vld [vmem:[%s16127_s17 + $0x738] sm:$0xf0]  ;;  %v11157_v51 = vor.u32 %v14631_v37, %v11154_v39  ;;  %v14511_v37 = vld [vmem:[%s16127_s17 + $0x814] sm:$0xf] }
 0x128   : > { %7638 = vmatpush.bf16.msra.mxu1 %v9957_v58  ;;  %v9666_v58 = vld [vmem:[%s16127_s17 + $0x48] sm:$0xf0]  ;;  %v14577_v54 = vld [vmem:[%s16127_s17 + $0xa24] sm:$0xf]  ;;  %v11082_v23 = vld [vmem:[%s16127_s17 + $0xb58] sm:$0xf0] }
 0x129   : > { %7651 = vmatpush.bf16.msra.mxu2 %v10149_v59  ;;  %v14307_v59 = vld [vmem:[%s16127_s17 + $0x1b4] sm:$0xf]  ;;  %v9669_v3 = vor.u32 %v14259_v57, %v9666_v58  ;;  %v11130_v57 = vld [vmem:[%s16127_s17 + $0xbb8] sm:$0xf0]  ;;  %v10557_v58 = vor.u32 %v14481_v44, %v10554_v45  ;;  %v11085_v39 = vor.u32 %v14613_v21, %v11082_v23  ;;  %v11058_v44 = vld [vmem:[%s16127_s17 + $0xb28] sm:$0xf0] }
 0x12a   : > { %7664 = vmatpush.bf16.msra.mxu3 %v10341_v63  ;;  %v14355_v63 = vld [vmem:[%s16127_s17 + $0x334] sm:$0xf]  ;;  %v9861_v6 = vor.u32 %v14307_v59, %v9858_v62  ;;  %v10530_v62 = vld [vmem:[%s16127_s17 + $0x708] sm:$0xf0]  ;;  %v14445_v21 = vld [vmem:[%s16127_s17 + $0x604] sm:$0xf] }
 0x12b   : > { %7626 = vmatpush.bf16.msra.mxu0 %v9741_v5  ;;  %v9642_v5 = vld [vmem:[%s16127_s17 + $0x18] sm:$0xf0]  ;;  %v7400_v14 = vpop.f32.mrf.mxu2 }
 0x12c   : > { %7639 = vmatpush.bf16.msra.mxu1 %v9933_v7  ;;  %v10053_v7 = vor.u32 %v14355_v63, %v10050_v0  ;;  %v9645_v26 = vor.u32 %v14253_v4, %v9642_v5  ;;  %v14523_v63 = vld [vmem:[%s16127_s17 + $0x874] sm:$0xf]  ;;  %v11106_v5 = vld [vmem:[%s16127_s17 + $0xb88] sm:$0xf0]  ;;  %v14517_v14 = vld [vmem:[%s16127_s17 + $0x844] sm:$0xf] }
 0x12d   : > { %7652 = vmatpush.bf16.msra.mxu2 %v10125_v9  ;;  %v14301_v9 = vld [vmem:[%s16127_s17 + $0x184] sm:$0xf]  ;;  %v14619_v4 = vld [vmem:[%s16127_s17 + $0xb74] sm:$0xf]  ;;  %v10410_v23 = vld [vmem:[%s16127_s17 + $0x618] sm:$0xf0] }
 0x12e   : > { %7665 = vmatpush.bf16.msra.mxu3 %v10317_v18  ;;  %v14397_v18 = vld [vmem:[%s16127_s17 + $0x484] sm:$0xf]  ;;  %v7413_v20 = vpop.f32.mrf.mxu3  ;;  %v9837_v35 = vor.u32 %v14301_v9, %v9834_v10 }
 0x12f   : > { %7627 = vmatpush.bf16.msra.mxu0 %v9717_v30  ;;  %v10770_v30 = vld [vmem:[%s16127_s17 + $0x8e8] sm:$0xf0]  ;;  %v14469_v10 = vld [vmem:[%s16127_s17 + $0x6c4] sm:$0xf] }
 0x130   : > { %7640 = vmatpush.bf16.msra.mxu1 %v9909_v22  ;;  %v14583_v22 = vld [vmem:[%s16127_s17 + $0xa54] sm:$0xf]  ;;  %v10773_v42 = vor.u32 %v14535_v24, %v10770_v30 }
 0x131   : > { %7653 = vmatpush.bf16.msra.mxu2 %v10101_v33  ;;  %v10962_v33 = vld [vmem:[%s16127_s17 + $0xa68] sm:$0xf0] }
 0x132   : > { %7666 = vmatpush.bf16.msra.mxu3 %v10293_v40  ;;  %v10221_v40 = vor.u32 %v14397_v18, %v10218_v19  ;;  %v10965_v43 = vor.u32 %v14583_v22, %v10962_v33  ;;  %v14565_v18 = vld [vmem:[%s16127_s17 + $0x9c4] sm:$0xf]  ;;  %v10890_v19 = vld [vmem:[%s16127_s17 + $0x9d8] sm:$0xf0]  ;;  %v10701_v22 = vor.u32 %v14517_v14, %v10698_v17  ;;  %v10626_v14 = vld [vmem:[%s16127_s17 + $0x7c8] sm:$0xf0] }
 0x133   : > { %7628 = vmatpush.bf16.msra.mxu0 %v9693_v52  ;;  %v10746_v52 = vld [vmem:[%s16127_s17 + $0x8b8] sm:$0xf0]  ;;  %v10893_v33 = vor.u32 %v14565_v18, %v10890_v19  ;;  %v10818_v17 = vld [vmem:[%s16127_s17 + $0x948] sm:$0xf0]  ;;  %v14595_v18 = vld [vmem:[%s16127_s17 + $0xab4] sm:$0xf] }
 0x134   : > { %7641 = vmatpush.bf16.msra.mxu1 %v9885_v55  ;;  %v10938_v55 = vld [vmem:[%s16127_s17 + $0xa38] sm:$0xf0]  ;;  %v10749_v59 = vor.u32 %v14529_v50, %v10746_v52  ;;  %v14457_v52 = vld [vmem:[%s16127_s17 + $0x664] sm:$0xf]  ;;  %v11010_v19 = vld [vmem:[%s16127_s17 + $0xac8] sm:$0xf0] }
 0x135   : > { %7654 = vmatpush.bf16.msra.mxu2 %v10077_v56  ;;  %v14625_v56 = vld [vmem:[%s16127_s17 + $0xba4] sm:$0xf]  ;;  %v10941_v60 = vor.u32 %v14577_v54, %v10938_v55  ;;  %v10458_v54 = vld [vmem:[%s16127_s17 + $0x678] sm:$0xf0] }
 0x136   : > { %7667 = vmatpush.bf16.msra.mxu3 %v10269_v61  ;;  %v14475_v61 = vld [vmem:[%s16127_s17 + $0x6f4] sm:$0xf]  ;;  %v11133_v0 = vor.u32 %v14625_v56, %v11130_v57  ;;  %v14505_v55 = vld [vmem:[%s16127_s17 + $0x7e4] sm:$0xf] }
 0x137   : > { %7629 = vmatpush.bf16.msra.mxu0 %v9669_v3  ;;  %v10914_v3 = vld [vmem:[%s16127_s17 + $0xa08] sm:$0xf0] }
 0x138   : > { %7642 = vmatpush.bf16.msra.mxu1 %v9861_v6  ;;  %v10533_v6 = vor.u32 %v14475_v61, %v10530_v62  ;;  %v10917_v9 = vor.u32 %v14571_v2, %v10914_v3  ;;  %v10461_v2 = vor.u32 %v14457_v52, %v10458_v54 }
 0x139   : > { %7655 = vmatpush.bf16.msra.mxu2 %v10053_v7  ;;  %v10725_v7 = vor.u32 %v14523_v63, %v10722_v1  ;;  %v14601_v63 = vld [vmem:[%s16127_s17 + $0xae4] sm:$0xf] }
 0x13a   : > { %7668 = vmatpush.bf16.msra.mxu3 %v10245_v16  ;;  %v11109_v16 = vor.u32 %v14619_v4, %v11106_v5 }
 0x13b   : > { %7630 = vmatpush.bf16.msra.mxu0 %v9645_v26  ;;  %v7424_v20 = vpop.f32.mrf.mxu0  ;;  %v10509_v26 = vor.u32 %v14469_v10, %v10506_v13  ;;  %v14499_v10 = vld [vmem:[%s16127_s17 + $0x7b4] sm:$0xf] }
 0x13c   : > { %7643 = vmatpush.bf16.msra.mxu1 %v9837_v35  ;;  %v7425_v24 = vadd.f32 %v7424_v20, %v16636_v53  ;;  %v7437_v30 = vpop.f32.mrf.mxu1  ;;  %v14463_v35 = vld [vmem:[%s16127_s17 + $0x694] sm:$0xf]  ;;  %v10866_v53 = vld [vmem:[%s16127_s17 + $0x9a8] sm:$0xf0] }
 0x13d   : > { %7656 = vmatpush.bf16.msra.mxu2 %v10029_v36  ;;  %v10482_v36 = vld [vmem:[%s16127_s17 + $0x6a8] sm:$0xf0] }
 0x13e   : > { %7669 = vmatpush.bf16.msra.mxu3 %v10221_v40  ;;  %7631 = vmatmul.bf16.vlgmr.msra.gmra.mxu0 %v16256_v28  ;;  %v7438_v40 = vadd.f32 %v7437_v30, %v7425_v24  ;;  %v10485_v45 = vor.u32 %v14463_v35, %v10482_v36  ;;  %v10629_v24 = vor.u32 %v14499_v10, %v10626_v14  ;;  %v14493_v30 = vld [vmem:[%s16127_s17 + $0x784] sm:$0xf]  ;;  %v10794_v36 = vld [vmem:[%s16127_s17 + $0x918] sm:$0xf0]  ;;  %v11298_v14 = vld [vmem:[%s16127_s17 + $0xd08] sm:$0xf0] }
 0x13f   : > { %7675 = vmatpush.bf16.msrb.mxu0 %v10581_v41  ;;  %7644 = vmatmul.bf16.vlgmr.msra.gmra.mxu1 %v16262_v34  ;;  %v10674_v41 = vld [vmem:[%s16127_s17 + $0x828] sm:$0xf0]  ;;  %v11013_v35 = vor.u32 %v14595_v18, %v11010_v19  ;;  %v14763_v19 = vld [vmem:[%s16127_s17 + $0xff4] sm:$0xf] }
 0x140   : > { %7688 = vmatpush.bf16.msrb.mxu1 %v10773_v42  ;;  %7657 = vmatmul.bf16.vlgmr.msra.gmra.mxu2 %v16254_v27  ;;  %v14559_v42 = vld [vmem:[%s16127_s17 + $0x994] sm:$0xf]  ;;  %v10677_v50 = vor.u32 %v14511_v37, %v10674_v41  ;;  %v14589_v37 = vld [vmem:[%s16127_s17 + $0xa84] sm:$0xf]  ;;  %v11490_v18 = vld [vmem:[%s16127_s17 + $0xe88] sm:$0xf0] }
 0x141   : > { %7701 = vmatpush.bf16.msrb.mxu2 %v10965_v43  ;;  %7670 = vmatmul.bf16.vlgmr.msra.gmra.mxu3 %v16258_v29  ;;  %v14607_v43 = vld [vmem:[%s16127_s17 + $0xb14] sm:$0xf] }
 0x142   : > { %7714 = vmatpush.bf16.msrb.mxu3 %v11157_v51  ;;  %v10869_v51 = vor.u32 %v14559_v42, %v10866_v53  ;;  %v11061_v56 = vor.u32 %v14607_v43, %v11058_v44  ;;  %v14679_v41 = vld [vmem:[%s16127_s17 + $0xd54] sm:$0xf]  ;;  %v11346_v42 = vld [vmem:[%s16127_s17 + $0xd68] sm:$0xf0]  ;;  %v10413_v44 = vor.u32 %v14445_v21, %v10410_v23 }
 0x143   : > { %7676 = vmatpush.bf16.msrb.mxu0 %v10557_v58  ;;  %v7450_v57 = vpop.f32.mrf.mxu2  ;;  %v10650_v58 = vld [vmem:[%s16127_s17 + $0x7f8] sm:$0xf0]  ;;  %v7426_v1 = vpop.f32.mrf.mxu0  ;;  %v14727_v53 = vld [vmem:[%s16127_s17 + $0xed4] sm:$0xf]  ;;  %v11874_v23 = vld [vmem:[%s16127_s17 + $0x1188] sm:$0xf0] }
 0x144   : > { %7689 = vmatpush.bf16.msrb.mxu1 %v10749_v59  ;;  %v14553_v59 = vld [vmem:[%s16127_s17 + $0x964] sm:$0xf]  ;;  %v7451_v61 = vadd.f32 %v7450_v57, %v7438_v40  ;;  %v7463_v62 = vpop.f32.mrf.mxu3  ;;  %v7439_v3 = vpop.f32.mrf.mxu1  ;;  %v10653_v5 = vor.u32 %v14505_v55, %v10650_v58  ;;  %v14823_v55 = vld [vmem:[%s16127_s17 + $0x11d4] sm:$0xf]  ;;  %v11349_v58 = vor.u32 %v14679_v41, %v11346_v42  ;;  %v11514_v1 = vld [vmem:[%s16127_s17 + $0xeb8] sm:$0xf0] }
 0x145   : > { %7702 = vmatpush.bf16.msrb.mxu2 %v10941_v60  ;;  %v10842_v60 = vld [vmem:[%s16127_s17 + $0x978] sm:$0xf0]  ;;  %v14811_v21 = vld [vmem:[%s16127_s17 + $0x1174] sm:$0xf]  ;;  %v14805_v42 = vld [vmem:[%s16127_s17 + $0x1144] sm:$0xf] }
 0x146   : > { %7715 = vmatpush.bf16.msrb.mxu3 %v11133_v0  ;;  %v11034_v0 = vld [vmem:[%s16127_s17 + $0xaf8] sm:$0xf0]  ;;  %v16707_v4 = vadd.f32 %v7463_v62, %v7451_v61  ;;  %v14673_v61 = vld [vmem:[%s16127_s17 + $0xd24] sm:$0xf] }
 0x147   : > { %7677 = vmatpush.bf16.msrb.mxu0 %v10533_v6  ;;  %v10845_v6 = vor.u32 %v14553_v59, %v10842_v60  ;;  %v11037_v13 = vor.u32 %v14601_v63, %v11034_v0  ;;  %v11322_v62 = vld [vmem:[%s16127_s17 + $0xd38] sm:$0xf0]  ;;  %v14721_v63 = vld [vmem:[%s16127_s17 + $0xea4] sm:$0xf] }
 0x148   : > { %7690 = vmatpush.bf16.msrb.mxu1 %v10725_v7  ;;  %v14451_v7 = vld [vmem:[%s16127_s17 + $0x634] sm:$0xf]  ;;  %v11706_v3 = vld [vmem:[%s16127_s17 + $0x1038] sm:$0xf0] }
 0x149   : > { %7703 = vmatpush.bf16.msrb.mxu2 %v10917_v9  ;;  %v10434_v9 = vld [vmem:[%s16127_s17 + $0x648] sm:$0xf0] }
 0x14a   : > { %7716 = vmatpush.bf16.msrb.mxu3 %v11109_v16  ;;  %v14547_v16 = vld [vmem:[%s16127_s17 + $0x934] sm:$0xf]  ;;  %v10437_v20 = vor.u32 %v14451_v7, %v10434_v9  ;;  %v11325_v7 = vor.u32 %v14673_v61, %v11322_v62  ;;  %v11517_v9 = vor.u32 %v14721_v63, %v11514_v1  ;;  %v11826_v61 = vld [vmem:[%s16127_s17 + $0x1128] sm:$0xf0]  ;;  %v14649_v1 = vld [vmem:[%s16127_s17 + $0xc64] sm:$0xf] }
 0x14b   : > { %7678 = vmatpush.bf16.msrb.mxu0 %v10509_v26  ;;  %v10821_v26 = vor.u32 %v14547_v16, %v10818_v17  ;;  %v7452_v40 = vpop.f32.mrf.mxu2  ;;  %v14715_v16 = vld [vmem:[%s16127_s17 + $0xe74] sm:$0xf] }
 0x14c   : > { %7691 = vmatpush.bf16.msrb.mxu1 %v10701_v22  ;;  %v10602_v22 = vld [vmem:[%s16127_s17 + $0x798] sm:$0xf0]  ;;  %v7465_v43 = vpop.f32.mrf.mxu3 }
 0x14d   : > { %7704 = vmatpush.bf16.msrb.mxu2 %v10893_v33  ;;  %v14541_v33 = vld [vmem:[%s16127_s17 + $0x904] sm:$0xf]  ;;  %v10605_v52 = vor.u32 %v14493_v30, %v10602_v22  ;;  %v11658_v40 = vld [vmem:[%s16127_s17 + $0xfd8] sm:$0xf0] }
 0x14e   : > { %7717 = vmatpush.bf16.msrb.mxu3 %v11085_v39  ;;  %v10986_v39 = vld [vmem:[%s16127_s17 + $0xa98] sm:$0xf0]  ;;  %v10797_v54 = vor.u32 %v14541_v33, %v10794_v36  ;;  %v14661_v22 = vld [vmem:[%s16127_s17 + $0xcc4] sm:$0xf]  ;;  %v11877_v36 = vor.u32 %v14811_v21, %v11874_v23 }
 0x14f   : > { %7679 = vmatpush.bf16.msrb.mxu0 %v10485_v45  ;;  %v11538_v45 = vld [vmem:[%s16127_s17 + $0xee8] sm:$0xf0]  ;;  %v10989_v57 = vor.u32 %v14589_v37, %v10986_v39  ;;  %v11274_v33 = vld [vmem:[%s16127_s17 + $0xcd8] sm:$0xf0]  ;;  %v14757_v39 = vld [vmem:[%s16127_s17 + $0xfc4] sm:$0xf] }
 0x150   : > { %7692 = vmatpush.bf16.msrb.mxu1 %v10677_v50  ;;  %v14775_v50 = vld [vmem:[%s16127_s17 + $0x1054] sm:$0xf]  ;;  %v11541_v59 = vor.u32 %v14727_v53, %v11538_v45  ;;  %v11466_v37 = vld [vmem:[%s16127_s17 + $0xe58] sm:$0xf0] }
 0x151   : > { %7705 = vmatpush.bf16.msrb.mxu2 %v10869_v51  ;;  %v11730_v51 = vld [vmem:[%s16127_s17 + $0x1068] sm:$0xf0]  ;;  %v11850_v53 = vld [vmem:[%s16127_s17 + $0x1158] sm:$0xf0] }
 0x152   : > { %7718 = vmatpush.bf16.msrb.mxu3 %v11061_v56  ;;  %v11922_v56 = vld [vmem:[%s16127_s17 + $0x11e8] sm:$0xf0]  ;;  %v11733_v60 = vor.u32 %v14775_v50, %v11730_v51  ;;  %v11661_v51 = vor.u32 %v14757_v39, %v11658_v40  ;;  %v14787_v39 = vld [vmem:[%s16127_s17 + $0x10b4] sm:$0xf] }
 0x153   : > { %7680 = vmatpush.bf16.msrb.mxu0 %v10461_v2  ;;  %v11925_v0 = vor.u32 %v14823_v55, %v11922_v56  ;;  %v14769_v2 = vld [vmem:[%s16127_s17 + $0x1024] sm:$0xf]  ;;  %v14703_v55 = vld [vmem:[%s16127_s17 + $0xe14] sm:$0xf]  ;;  %v11853_v56 = vor.u32 %v14805_v42, %v11850_v53  ;;  %v11778_v40 = vld [vmem:[%s16127_s17 + $0x10c8] sm:$0xf0] }
 0x154   : > { %7693 = vmatpush.bf16.msrb.mxu1 %v10653_v5  ;;  %v14817_v5 = vld [vmem:[%s16127_s17 + $0x11a4] sm:$0xf]  ;;  %v11709_v10 = vor.u32 %v14769_v2, %v11706_v3  ;;  %v11226_v2 = vld [vmem:[%s16127_s17 + $0xc78] sm:$0xf0] }
 0x155   : > { %7706 = vmatpush.bf16.msrb.mxu2 %v10845_v6  ;;  %v11898_v6 = vld [vmem:[%s16127_s17 + $0x11b8] sm:$0xf0]  ;;  %v14697_v3 = vld [vmem:[%s16127_s17 + $0xde4] sm:$0xf] }
 0x156   : > { %7719 = vmatpush.bf16.msrb.mxu3 %v11037_v13  ;;  %v14667_v13 = vld [vmem:[%s16127_s17 + $0xcf4] sm:$0xf]  ;;  %v11901_v17 = vor.u32 %v14817_v5, %v11898_v6  ;;  %v14637_v42 = vld [vmem:[%s16127_s17 + $0xc04] sm:$0xf]  ;;  %v11178_v53 = vld [vmem:[%s16127_s17 + $0xc18] sm:$0xf0] }
 0x157   : > { %7681 = vmatpush.bf16.msrb.mxu0 %v10437_v20  ;;  %v11682_v20 = vld [vmem:[%s16127_s17 + $0x1008] sm:$0xf0] }
 0x158   : > { %7694 = vmatpush.bf16.msrb.mxu1 %v10629_v24  ;;  %v11301_v24 = vor.u32 %v14667_v13, %v11298_v14  ;;  %v11685_v30 = vor.u32 %v14763_v19, %v11682_v20  ;;  %v11229_v19 = vor.u32 %v14649_v1, %v11226_v2 }
 0x159   : > { %7707 = vmatpush.bf16.msrb.mxu2 %v10821_v26  ;;  %v11493_v26 = vor.u32 %v14715_v16, %v11490_v18  ;;  %v14793_v16 = vld [vmem:[%s16127_s17 + $0x10e4] sm:$0xf] }
 0x15a   : > { %7720 = vmatpush.bf16.msrb.mxu3 %v11013_v35  ;;  %v14709_v35 = vld [vmem:[%s16127_s17 + $0xe44] sm:$0xf] }
 0x15b   : > { %7682 = vmatpush.bf16.msrb.mxu0 %v10413_v44  ;;  %v7476_v41 = vpop.f32.mrf.mxu0  ;;  %v11277_v44 = vor.u32 %v14661_v22, %v11274_v33  ;;  %v11469_v50 = vor.u32 %v14709_v35, %v11466_v37  ;;  %v14691_v22 = vld [vmem:[%s16127_s17 + $0xdb4] sm:$0xf]  ;;  %v11394_v35 = vld [vmem:[%s16127_s17 + $0xdc8] sm:$0xf0] }
 0x15c   : > { %7695 = vmatpush.bf16.msrb.mxu1 %v10605_v52  ;;  %v7477_v43 = vadd.f32 %v7476_v41, %v16707_v4  ;;  %v7489_v45 = vpop.f32.mrf.mxu1  ;;  %v14655_v52 = vld [vmem:[%s16127_s17 + $0xc94] sm:$0xf]  ;;  %v11634_v4 = vld [vmem:[%s16127_s17 + $0xfa8] sm:$0xf0] }
 0x15d   : > { %7708 = vmatpush.bf16.msrb.mxu2 %v10797_v54  ;;  %v11250_v54 = vld [vmem:[%s16127_s17 + $0xca8] sm:$0xf0] }
 0x15e   : > { %7721 = vmatpush.bf16.msrb.mxu3 %v10989_v57  ;;  %7683 = vmatmul.bf16.vlgmr.msrb.gmra.mxu0 %v16308_v31  ;;  %v7490_v57 = vadd.f32 %v7489_v45, %v7477_v43  ;;  %v11253_v62 = vor.u32 %v14655_v52, %v11250_v54  ;;  %v11586_v37 = vld [vmem:[%s16127_s17 + $0xf48] sm:$0xf0]  ;;  %v11397_v43 = vor.u32 %v14691_v22, %v11394_v35  ;;  %v14685_v45 = vld [vmem:[%s16127_s17 + $0xd84] sm:$0xf]  ;;  %v11562_v54 = vld [vmem:[%s16127_s17 + $0xf18] sm:$0xf0] }
 0x15f   : > { %7727 = vmatpush.bf16.msra.mxu0 %v11349_v58  ;;  %7696 = vmatmul.bf16.vlgmr.msrb.gmra.mxu1 %v16314_v38  ;;  %v11442_v58 = vld [vmem:[%s16127_s17 + $0xe28] sm:$0xf0]  ;;  %v11781_v52 = vor.u32 %v14787_v39, %v11778_v40  ;;  %v14955_v40 = vld [vmem:[%s16127_s17 + $0x15f4] sm:$0xf] }
 0x160   : > { %7740 = vmatpush.bf16.msra.mxu1 %v11541_v59  ;;  %7709 = vmatmul.bf16.vlgmr.msrb.gmra.mxu2 %v16305_v25  ;;  %v14751_v59 = vld [vmem:[%s16127_s17 + $0xf94] sm:$0xf]  ;;  %v11445_v63 = vor.u32 %v14703_v55, %v11442_v58  ;;  %v14781_v55 = vld [vmem:[%s16127_s17 + $0x1084] sm:$0xf]  ;;  %v12066_v35 = vld [vmem:[%s16127_s17 + $0x1308] sm:$0xf0] }
 0x161   : > { %7753 = vmatpush.bf16.msra.mxu2 %v11733_v60  ;;  %7722 = vmatmul.bf16.vlgmr.msrb.gmra.mxu3 %v16310_v32  ;;  %v14799_v60 = vld [vmem:[%s16127_s17 + $0x1114] sm:$0xf]  ;;  %v12258_v39 = vld [vmem:[%s16127_s17 + $0x1488] sm:$0xf0] }
 0x162   : > { %7766 = vmatpush.bf16.msra.mxu3 %v11925_v0  ;;  %v11637_v0 = vor.u32 %v14751_v59, %v11634_v4  ;;  %v11829_v5 = vor.u32 %v14799_v60, %v11826_v61  ;;  %v14871_v58 = vld [vmem:[%s16127_s17 + $0x1354] sm:$0xf]  ;;  %v12114_v59 = vld [vmem:[%s16127_s17 + $0x1368] sm:$0xf0]  ;;  %v11181_v61 = vor.u32 %v14637_v42, %v11178_v53 }
 0x163   : > { %7728 = vmatpush.bf16.msra.mxu0 %v11325_v7  ;;  %v7502_v6 = vpop.f32.mrf.mxu2  ;;  %v11418_v7 = vld [vmem:[%s16127_s17 + $0xdf8] sm:$0xf0]  ;;  %v7478_v18 = vpop.f32.mrf.mxu0  ;;  %v14919_v4 = vld [vmem:[%s16127_s17 + $0x14d4] sm:$0xf]  ;;  %v12642_v53 = vld [vmem:[%s16127_s17 + $0x1788] sm:$0xf0] }
 0x164   : > { %7741 = vmatpush.bf16.msra.mxu1 %v11517_v9  ;;  %v14745_v9 = vld [vmem:[%s16127_s17 + $0xf64] sm:$0xf]  ;;  %v7503_v13 = vadd.f32 %v7502_v6, %v7490_v57  ;;  %v7515_v14 = vpop.f32.mrf.mxu3  ;;  %v7491_v20 = vpop.f32.mrf.mxu1  ;;  %v11421_v23 = vor.u32 %v14697_v3, %v11418_v7  ;;  %v15015_v3 = vld [vmem:[%s16127_s17 + $0x17d4] sm:$0xf]  ;;  %v12117_v7 = vor.u32 %v14871_v58, %v12114_v59  ;;  %v12282_v18 = vld [vmem:[%s16127_s17 + $0x14b8] sm:$0xf0] }
 0x165   : > { %7754 = vmatpush.bf16.msra.mxu2 %v11709_v10  ;;  %v11610_v10 = vld [vmem:[%s16127_s17 + $0xf78] sm:$0xf0]  ;;  %v15003_v42 = vld [vmem:[%s16127_s17 + $0x1774] sm:$0xf]  ;;  %v14997_v59 = vld [vmem:[%s16127_s17 + $0x1744] sm:$0xf] }
 0x166   : > { %7767 = vmatpush.bf16.msra.mxu3 %v11901_v17  ;;  %v11802_v17 = vld [vmem:[%s16127_s17 + $0x10f8] sm:$0xf0]  ;;  %v16778_v21 = vadd.f32 %v7515_v14, %v7503_v13  ;;  %v14865_v13 = vld [vmem:[%s16127_s17 + $0x1324] sm:$0xf] }
 0x167   : > { %7729 = vmatpush.bf16.msra.mxu0 %v11301_v24  ;;  %v11613_v24 = vor.u32 %v14745_v9, %v11610_v10  ;;  %v11805_v33 = vor.u32 %v14793_v16, %v11802_v17  ;;  %v12090_v14 = vld [vmem:[%s16127_s17 + $0x1338] sm:$0xf0]  ;;  %v14913_v16 = vld [vmem:[%s16127_s17 + $0x14a4] sm:$0xf] }
 0x168   : > { %7742 = vmatpush.bf16.msra.mxu1 %v11493_v26  ;;  %v14643_v26 = vld [vmem:[%s16127_s17 + $0xc34] sm:$0xf]  ;;  %v12474_v20 = vld [vmem:[%s16127_s17 + $0x1638] sm:$0xf0] }
 0x169   : > { %7755 = vmatpush.bf16.msra.mxu2 %v11685_v30  ;;  %v11202_v30 = vld [vmem:[%s16127_s17 + $0xc48] sm:$0xf0] }
 0x16a   : > { %7768 = vmatpush.bf16.msra.mxu3 %v11877_v36  ;;  %v14739_v36 = vld [vmem:[%s16127_s17 + $0xf34] sm:$0xf]  ;;  %v11205_v41 = vor.u32 %v14643_v26, %v11202_v30  ;;  %v12093_v26 = vor.u32 %v14865_v13, %v12090_v14  ;;  %v12285_v30 = vor.u32 %v14913_v16, %v12282_v18  ;;  %v12594_v13 = vld [vmem:[%s16127_s17 + $0x1728] sm:$0xf0]  ;;  %v14841_v18 = vld [vmem:[%s16127_s17 + $0x1264] sm:$0xf] }
 0x16b   : > { %7730 = vmatpush.bf16.msra.mxu0 %v11277_v44  ;;  %v11589_v44 = vor.u32 %v14739_v36, %v11586_v37  ;;  %v7504_v57 = vpop.f32.mrf.mxu2  ;;  %v14907_v36 = vld [vmem:[%s16127_s17 + $0x1474] sm:$0xf] }
 0x16c   : > { %7743 = vmatpush.bf16.msra.mxu1 %v11469_v50  ;;  %v11370_v50 = vld [vmem:[%s16127_s17 + $0xd98] sm:$0xf0]  ;;  %v7517_v60 = vpop.f32.mrf.mxu3 }
 0x16d   : > { %7756 = vmatpush.bf16.msra.mxu2 %v11661_v51  ;;  %v14733_v51 = vld [vmem:[%s16127_s17 + $0xf04] sm:$0xf]  ;;  %v11373_v1 = vor.u32 %v14685_v45, %v11370_v50  ;;  %v12426_v57 = vld [vmem:[%s16127_s17 + $0x15d8] sm:$0xf0] }
 0x16e   : > { %7769 = vmatpush.bf16.msra.mxu3 %v11853_v56  ;;  %v11754_v56 = vld [vmem:[%s16127_s17 + $0x1098] sm:$0xf0]  ;;  %v11565_v2 = vor.u32 %v14733_v51, %v11562_v54  ;;  %v14853_v50 = vld [vmem:[%s16127_s17 + $0x12c4] sm:$0xf]  ;;  %v12645_v54 = vor.u32 %v15003_v42, %v12642_v53 }
 0x16f   : > { %7731 = vmatpush.bf16.msra.mxu0 %v11253_v62  ;;  %v12306_v62 = vld [vmem:[%s16127_s17 + $0x14e8] sm:$0xf0]  ;;  %v11757_v6 = vor.u32 %v14781_v55, %v11754_v56  ;;  %v12042_v51 = vld [vmem:[%s16127_s17 + $0x12d8] sm:$0xf0]  ;;  %v14949_v56 = vld [vmem:[%s16127_s17 + $0x15c4] sm:$0xf] }
 0x170   : > { %7744 = vmatpush.bf16.msra.mxu1 %v11445_v63  ;;  %v14967_v63 = vld [vmem:[%s16127_s17 + $0x1654] sm:$0xf]  ;;  %v12309_v9 = vor.u32 %v14919_v4, %v12306_v62  ;;  %v12234_v55 = vld [vmem:[%s16127_s17 + $0x1458] sm:$0xf0] }
 0x171   : > { %7757 = vmatpush.bf16.msra.mxu2 %v11637_v0  ;;  %v12498_v0 = vld [vmem:[%s16127_s17 + $0x1668] sm:$0xf0]  ;;  %v12618_v4 = vld [vmem:[%s16127_s17 + $0x1758] sm:$0xf0] }
 0x172   : > { %7770 = vmatpush.bf16.msra.mxu3 %v11829_v5  ;;  %v12690_v5 = vld [vmem:[%s16127_s17 + $0x17e8] sm:$0xf0]  ;;  %v12501_v10 = vor.u32 %v14967_v63, %v12498_v0  ;;  %v12429_v0 = vor.u32 %v14949_v56, %v12426_v57  ;;  %v14979_v56 = vld [vmem:[%s16127_s17 + $0x16b4] sm:$0xf] }
 0x173   : > { %7732 = vmatpush.bf16.msra.mxu0 %v11229_v19  ;;  %v12693_v17 = vor.u32 %v15015_v3, %v12690_v5  ;;  %v14961_v19 = vld [vmem:[%s16127_s17 + $0x1624] sm:$0xf]  ;;  %v14895_v3 = vld [vmem:[%s16127_s17 + $0x1414] sm:$0xf]  ;;  %v12621_v5 = vor.u32 %v14997_v59, %v12618_v4  ;;  %v12546_v57 = vld [vmem:[%s16127_s17 + $0x16c8] sm:$0xf0] }
 0x174   : > { %7745 = vmatpush.bf16.msra.mxu1 %v11421_v23  ;;  %v15009_v23 = vld [vmem:[%s16127_s17 + $0x17a4] sm:$0xf]  ;;  %v12477_v22 = vor.u32 %v14961_v19, %v12474_v20  ;;  %v11994_v19 = vld [vmem:[%s16127_s17 + $0x1278] sm:$0xf0] }
 0x175   : > { %7758 = vmatpush.bf16.msra.mxu2 %v11613_v24  ;;  %v12666_v24 = vld [vmem:[%s16127_s17 + $0x17b8] sm:$0xf0]  ;;  %v14889_v20 = vld [vmem:[%s16127_s17 + $0x13e4] sm:$0xf] }
 0x176   : > { %7771 = vmatpush.bf16.msra.mxu3 %v11805_v33  ;;  %v14859_v33 = vld [vmem:[%s16127_s17 + $0x12f4] sm:$0xf]  ;;  %v12669_v37 = vor.u32 %v15009_v23, %v12666_v24  ;;  %v14829_v59 = vld [vmem:[%s16127_s17 + $0x1204] sm:$0xf]  ;;  %v11946_v4 = vld [vmem:[%s16127_s17 + $0x1218] sm:$0xf0] }
 0x177   : > { %7733 = vmatpush.bf16.msra.mxu0 %v11205_v41  ;;  %v12450_v41 = vld [vmem:[%s16127_s17 + $0x1608] sm:$0xf0] }
 0x178   : > { %7746 = vmatpush.bf16.msra.mxu1 %v11397_v43  ;;  %v12069_v43 = vor.u32 %v14859_v33, %v12066_v35  ;;  %v12453_v45 = vor.u32 %v14955_v40, %v12450_v41  ;;  %v11997_v40 = vor.u32 %v14841_v18, %v11994_v19 }
 0x179   : > { %7759 = vmatpush.bf16.msra.mxu2 %v11589_v44  ;;  %v12261_v44 = vor.u32 %v14907_v36, %v12258_v39  ;;  %v14985_v36 = vld [vmem:[%s16127_s17 + $0x16e4] sm:$0xf] }
 0x17a   : > { %7772 = vmatpush.bf16.msra.mxu3 %v11781_v52  ;;  %v14901_v52 = vld [vmem:[%s16127_s17 + $0x1444] sm:$0xf] }
 0x17b   : > { %7734 = vmatpush.bf16.msra.mxu0 %v11181_v61  ;;  %v7528_v58 = vpop.f32.mrf.mxu0  ;;  %v12045_v61 = vor.u32 %v14853_v50, %v12042_v51  ;;  %v12237_v63 = vor.u32 %v14901_v52, %v12234_v55  ;;  %v14883_v50 = vld [vmem:[%s16127_s17 + $0x13b4] sm:$0xf]  ;;  %v12162_v52 = vld [vmem:[%s16127_s17 + $0x13c8] sm:$0xf0] }
 0x17c   : > { %7747 = vmatpush.bf16.msra.mxu1 %v11373_v1  ;;  %v7529_v60 = vadd.f32 %v7528_v58, %v16778_v21  ;;  %v7541_v62 = vpop.f32.mrf.mxu1  ;;  %v14847_v1 = vld [vmem:[%s16127_s17 + $0x1294] sm:$0xf]  ;;  %v12402_v21 = vld [vmem:[%s16127_s17 + $0x15a8] sm:$0xf0] }
 0x17d   : > { %7760 = vmatpush.bf16.msra.mxu2 %v11565_v2  ;;  %v12018_v2 = vld [vmem:[%s16127_s17 + $0x12a8] sm:$0xf0] }
 0x17e   : > { %7773 = vmatpush.bf16.msra.mxu3 %v11757_v6  ;;  %7735 = vmatmul.bf16.vlgmr.msra.gmra.mxu0 %v16382_v8  ;;  %v7542_v6 = vadd.f32 %v7541_v62, %v7529_v60  ;;  %v12021_v14 = vor.u32 %v14847_v1, %v12018_v2  ;;  %v12354_v55 = vld [vmem:[%s16127_s17 + $0x1548] sm:$0xf0]  ;;  %v12165_v60 = vor.u32 %v14883_v50, %v12162_v52  ;;  %v14877_v62 = vld [vmem:[%s16127_s17 + $0x1384] sm:$0xf]  ;;  %v12330_v2 = vld [vmem:[%s16127_s17 + $0x1518] sm:$0xf0] }
 0x17f   : > { %7779 = vmatpush.bf16.msrb.mxu0 %v12117_v7  ;;  %7748 = vmatmul.bf16.vlgmr.msra.gmra.mxu1 %v16388_v12  ;;  %v12210_v7 = vld [vmem:[%s16127_s17 + $0x1428] sm:$0xf0]  ;;  %v12549_v1 = vor.u32 %v14979_v56, %v12546_v57  ;;  %v15147_v57 = vld [vmem:[%s16127_s17 + $0x1bf4] sm:$0xf] }
 0x180   : > { %7792 = vmatpush.bf16.msrb.mxu1 %v12309_v9  ;;  %7761 = vmatmul.bf16.vlgmr.msra.gmra.mxu2 %v16386_v11  ;;  %v14943_v9 = vld [vmem:[%s16127_s17 + $0x1594] sm:$0xf]  ;;  %v12213_v16 = vor.u32 %v14895_v3, %v12210_v7  ;;  %v14973_v3 = vld [vmem:[%s16127_s17 + $0x1684] sm:$0xf]  ;;  %v12834_v52 = vld [vmem:[%s16127_s17 + $0x1908] sm:$0xf0] }
 0x181   : > { %7805 = vmatpush.bf16.msrb.mxu2 %v12501_v10  ;;  %7774 = vmatmul.bf16.vlgmr.msra.gmra.mxu3 %v16391_v15  ;;  %v14991_v10 = vld [vmem:[%s16127_s17 + $0x1714] sm:$0xf]  ;;  %v13026_v56 = vld [vmem:[%s16127_s17 + $0x1a88] sm:$0xf0] }
 0x182   : > { %7818 = vmatpush.bf16.msrb.mxu3 %v12693_v17  ;;  %v12405_v17 = vor.u32 %v14943_v9, %v12402_v21  ;;  %v12597_v23 = vor.u32 %v14991_v10, %v12594_v13  ;;  %v15063_v7 = vld [vmem:[%s16127_s17 + $0x1954] sm:$0xf]  ;;  %v12882_v9 = vld [vmem:[%s16127_s17 + $0x1968] sm:$0xf0]  ;;  %v11949_v13 = vor.u32 %v14829_v59, %v11946_v4 }
 0x183   : > { %7780 = vmatpush.bf16.msrb.mxu0 %v12093_v26  ;;  %v7554_v24 = vpop.f32.mrf.mxu2  ;;  %v12186_v26 = vld [vmem:[%s16127_s17 + $0x13f8] sm:$0xf0]  ;;  %v7530_v39 = vpop.f32.mrf.mxu0  ;;  %v15111_v21 = vld [vmem:[%s16127_s17 + $0x1ad4] sm:$0xf]  ;;  %v13410_v4 = vld [vmem:[%s16127_s17 + $0x1d88] sm:$0xf0] }
 0x184   : > { %7793 = vmatpush.bf16.msrb.mxu1 %v12285_v30  ;;  %v14937_v30 = vld [vmem:[%s16127_s17 + $0x1564] sm:$0xf]  ;;  %v7555_v33 = vadd.f32 %v7554_v24, %v7542_v6  ;;  %v7567_v35 = vpop.f32.mrf.mxu3  ;;  %v7543_v41 = vpop.f32.mrf.mxu1  ;;  %v12189_v53 = vor.u32 %v14889_v20, %v12186_v26  ;;  %v15207_v20 = vld [vmem:[%s16127_s17 + $0x1dd4] sm:$0xf]  ;;  %v12885_v26 = vor.u32 %v15063_v7, %v12882_v9  ;;  %v13050_v39 = vld [vmem:[%s16127_s17 + $0x1ab8] sm:$0xf0] }
 0x185   : > { %7806 = vmatpush.bf16.msrb.mxu2 %v12477_v22  ;;  %v12378_v22 = vld [vmem:[%s16127_s17 + $0x1578] sm:$0xf0]  ;;  %v15195_v59 = vld [vmem:[%s16127_s17 + $0x1d74] sm:$0xf]  ;;  %v15189_v9 = vld [vmem:[%s16127_s17 + $0x1d44] sm:$0xf] }
 0x186   : > { %7819 = vmatpush.bf16.msrb.mxu3 %v12669_v37  ;;  %v12570_v37 = vld [vmem:[%s16127_s17 + $0x16f8] sm:$0xf0]  ;;  %v16849_v42 = vadd.f32 %v7567_v35, %v7555_v33  ;;  %v15057_v33 = vld [vmem:[%s16127_s17 + $0x1924] sm:$0xf] }
 0x187   : > { %7781 = vmatpush.bf16.msrb.mxu0 %v12069_v43  ;;  %v12381_v43 = vor.u32 %v14937_v30, %v12378_v22  ;;  %v12573_v51 = vor.u32 %v14985_v36, %v12570_v37  ;;  %v12858_v35 = vld [vmem:[%s16127_s17 + $0x1938] sm:$0xf0]  ;;  %v15105_v36 = vld [vmem:[%s16127_s17 + $0x1aa4] sm:$0xf] }
 0x188   : > { %7794 = vmatpush.bf16.msrb.mxu1 %v12261_v44  ;;  %v14835_v44 = vld [vmem:[%s16127_s17 + $0x1234] sm:$0xf]  ;;  %v13242_v41 = vld [vmem:[%s16127_s17 + $0x1c38] sm:$0xf0] }
 0x189   : > { %7807 = vmatpush.bf16.msrb.mxu2 %v12453_v45  ;;  %v11970_v45 = vld [vmem:[%s16127_s17 + $0x1248] sm:$0xf0] }
 0x18a   : > { %7820 = vmatpush.bf16.msrb.mxu3 %v12645_v54  ;;  %v14931_v54 = vld [vmem:[%s16127_s17 + $0x1534] sm:$0xf]  ;;  %v11973_v58 = vor.u32 %v14835_v44, %v11970_v45  ;;  %v12861_v44 = vor.u32 %v15057_v33, %v12858_v35  ;;  %v13053_v45 = vor.u32 %v15105_v36, %v13050_v39  ;;  %v13362_v33 = vld [vmem:[%s16127_s17 + $0x1d28] sm:$0xf0]  ;;  %v15033_v39 = vld [vmem:[%s16127_s17 + $0x1864] sm:$0xf] }
 0x18b   : > { %7782 = vmatpush.bf16.msrb.mxu0 %v12045_v61  ;;  %v12357_v61 = vor.u32 %v14931_v54, %v12354_v55  ;;  %v7556_v6 = vpop.f32.mrf.mxu2  ;;  %v15099_v54 = vld [vmem:[%s16127_s17 + $0x1a74] sm:$0xf] }
 0x18c   : > { %7795 = vmatpush.bf16.msrb.mxu1 %v12237_v63  ;;  %v12138_v63 = vld [vmem:[%s16127_s17 + $0x1398] sm:$0xf0]  ;;  %v7569_v10 = vpop.f32.mrf.mxu3 }
 0x18d   : > { %7808 = vmatpush.bf16.msrb.mxu2 %v12429_v0  ;;  %v14925_v0 = vld [vmem:[%s16127_s17 + $0x1504] sm:$0xf]  ;;  %v12141_v18 = vor.u32 %v14877_v62, %v12138_v63  ;;  %v13194_v6 = vld [vmem:[%s16127_s17 + $0x1bd8] sm:$0xf0] }
 0x18e   : > { %7821 = vmatpush.bf16.msrb.mxu3 %v12621_v5  ;;  %v12522_v5 = vld [vmem:[%s16127_s17 + $0x1698] sm:$0xf0]  ;;  %v12333_v19 = vor.u32 %v14925_v0, %v12330_v2  ;;  %v15045_v63 = vld [vmem:[%s16127_s17 + $0x18c4] sm:$0xf]  ;;  %v13413_v2 = vor.u32 %v15195_v59, %v13410_v4 }
 0x18f   : > { %7783 = vmatpush.bf16.msrb.mxu0 %v12021_v14  ;;  %v13074_v14 = vld [vmem:[%s16127_s17 + $0x1ae8] sm:$0xf0]  ;;  %v12525_v24 = vor.u32 %v14973_v3, %v12522_v5  ;;  %v12810_v0 = vld [vmem:[%s16127_s17 + $0x18d8] sm:$0xf0]  ;;  %v15141_v5 = vld [vmem:[%s16127_s17 + $0x1bc4] sm:$0xf] }
 0x190   : > { %7796 = vmatpush.bf16.msrb.mxu1 %v12213_v16  ;;  %v15159_v16 = vld [vmem:[%s16127_s17 + $0x1c54] sm:$0xf]  ;;  %v13077_v30 = vor.u32 %v15111_v21, %v13074_v14  ;;  %v13002_v3 = vld [vmem:[%s16127_s17 + $0x1a58] sm:$0xf0] }
 0x191   : > { %7809 = vmatpush.bf16.msrb.mxu2 %v12405_v17  ;;  %v13266_v17 = vld [vmem:[%s16127_s17 + $0x1c68] sm:$0xf0]  ;;  %v13386_v21 = vld [vmem:[%s16127_s17 + $0x1d58] sm:$0xf0] }
 0x192   : > { %7822 = vmatpush.bf16.msrb.mxu3 %v12597_v23  ;;  %v13458_v23 = vld [vmem:[%s16127_s17 + $0x1de8] sm:$0xf0]  ;;  %v13269_v22 = vor.u32 %v15159_v16, %v13266_v17  ;;  %v13197_v17 = vor.u32 %v15141_v5, %v13194_v6  ;;  %v15171_v5 = vld [vmem:[%s16127_s17 + $0x1cb4] sm:$0xf] }
 0x193   : > { %7784 = vmatpush.bf16.msrb.mxu0 %v11997_v40  ;;  %v13461_v37 = vor.u32 %v15207_v20, %v13458_v23  ;;  %v15153_v40 = vld [vmem:[%s16127_s17 + $0x1c24] sm:$0xf]  ;;  %v15087_v20 = vld [vmem:[%s16127_s17 + $0x1a14] sm:$0xf]  ;;  %v13389_v23 = vor.u32 %v15189_v9, %v13386_v21  ;;  %v13314_v6 = vld [vmem:[%s16127_s17 + $0x1cc8] sm:$0xf0] }
 0x194   : > { %7797 = vmatpush.bf16.msrb.mxu1 %v12189_v53  ;;  %v15201_v53 = vld [vmem:[%s16127_s17 + $0x1da4] sm:$0xf]  ;;  %v13245_v50 = vor.u32 %v15153_v40, %v13242_v41  ;;  %v12762_v40 = vld [vmem:[%s16127_s17 + $0x1878] sm:$0xf0] }
 0x195   : > { %7810 = vmatpush.bf16.msrb.mxu2 %v12381_v43  ;;  %v13434_v43 = vld [vmem:[%s16127_s17 + $0x1db8] sm:$0xf0]  ;;  %v15081_v41 = vld [vmem:[%s16127_s17 + $0x19e4] sm:$0xf] }
 0x196   : > { %7823 = vmatpush.bf16.msrb.mxu3 %v12573_v51  ;;  %v15051_v51 = vld [vmem:[%s16127_s17 + $0x18f4] sm:$0xf]  ;;  %v13437_v55 = vor.u32 %v15201_v53, %v13434_v43  ;;  %v15021_v9 = vld [vmem:[%s16127_s17 + $0x1804] sm:$0xf]  ;;  %v12714_v21 = vld [vmem:[%s16127_s17 + $0x1818] sm:$0xf0] }
 0x197   : > { %7785 = vmatpush.bf16.msrb.mxu0 %v11973_v58  ;;  %v13218_v58 = vld [vmem:[%s16127_s17 + $0x1c08] sm:$0xf0] }
 0x198   : > { %7798 = vmatpush.bf16.msrb.mxu1 %v12165_v60  ;;  %v12837_v60 = vor.u32 %v15051_v51, %v12834_v52  ;;  %v13221_v62 = vor.u32 %v15147_v57, %v13218_v58  ;;  %v12765_v57 = vor.u32 %v15033_v39, %v12762_v40 }
 0x199   : > { %7811 = vmatpush.bf16.msrb.mxu2 %v12357_v61  ;;  %v13029_v61 = vor.u32 %v15099_v54, %v13026_v56  ;;  %v15177_v54 = vld [vmem:[%s16127_s17 + $0x1ce4] sm:$0xf] }
 0x19a   : > { %7824 = vmatpush.bf16.msrb.mxu3 %v12549_v1  ;;  %v15093_v1 = vld [vmem:[%s16127_s17 + $0x1a44] sm:$0xf] }
 0x19b   : > { %7786 = vmatpush.bf16.msrb.mxu0 %v11949_v13  ;;  %v7580_v7 = vpop.f32.mrf.mxu0  ;;  %v12813_v13 = vor.u32 %v15045_v63, %v12810_v0  ;;  %v13005_v16 = vor.u32 %v15093_v1, %v13002_v3  ;;  %v15075_v63 = vld [vmem:[%s16127_s17 + $0x19b4] sm:$0xf]  ;;  %v12930_v1 = vld [vmem:[%s16127_s17 + $0x19c8] sm:$0xf0] }
 0x19c   : > { %7799 = vmatpush.bf16.msrb.mxu1 %v12141_v18  ;;  %v7581_v10 = vadd.f32 %v7580_v7, %v16849_v42  ;;  %v7593_v14 = vpop.f32.mrf.mxu1  ;;  %v15039_v18 = vld [vmem:[%s16127_s17 + $0x1894] sm:$0xf]  ;;  %v13170_v42 = vld [vmem:[%s16127_s17 + $0x1ba8] sm:$0xf0] }
 0x19d   : > { %7812 = vmatpush.bf16.msrb.mxu2 %v12333_v19  ;;  %v12786_v19 = vld [vmem:[%s16127_s17 + $0x18a8] sm:$0xf0] }
 0x19e   : > { %7825 = vmatpush.bf16.msrb.mxu3 %v12525_v24  ;;  %7787 = vmatmul.bf16.vlgmr.msrb.gmra.mxu0 %v16448_v46  ;;  %v7594_v24 = vadd.f32 %v7593_v14, %v7581_v10  ;;  %v12789_v35 = vor.u32 %v15039_v18, %v12786_v19  ;;  %v13122_v3 = vld [vmem:[%s16127_s17 + $0x1b48] sm:$0xf0]  ;;  %v12933_v10 = vor.u32 %v15075_v63, %v12930_v1  ;;  %v15069_v14 = vld [vmem:[%s16127_s17 + $0x1984] sm:$0xf]  ;;  %v13098_v19 = vld [vmem:[%s16127_s17 + $0x1b18] sm:$0xf0] }
 0x19f   : > { %7831 = vmatpush.bf16.msra.mxu0 %v12885_v26  ;;  %7800 = vmatmul.bf16.vlgmr.msrb.gmra.mxu1 %v16452_v48  ;;  %v12978_v26 = vld [vmem:[%s16127_s17 + $0x1a28] sm:$0xf0]  ;;  %v13317_v18 = vor.u32 %v15171_v5, %v13314_v6 }
 0x1a0   : > { %7844 = vmatpush.bf16.msra.mxu1 %v13077_v30  ;;  %7813 = vmatmul.bf16.vlgmr.msrb.gmra.mxu2 %v16450_v47  ;;  %v15135_v30 = vld [vmem:[%s16127_s17 + $0x1b94] sm:$0xf]  ;;  %v12981_v36 = vor.u32 %v15087_v20, %v12978_v26  ;;  %v15165_v20 = vld [vmem:[%s16127_s17 + $0x1c84] sm:$0xf]  ;;  %v13602_v1 = vld [vmem:[%s16127_s17 + $0x1f08] sm:$0xf0] }
 0x1a1   : > { %7857 = vmatpush.bf16.msra.mxu2 %v13269_v22  ;;  %7826 = vmatmul.bf16.vlgmr.msrb.gmra.mxu3 %v16454_v49  ;;  %v15183_v22 = vld [vmem:[%s16127_s17 + $0x1d14] sm:$0xf]  ;;  %v13794_v6 = vld [vmem:[%s16127_s17 + $0x2088] sm:$0xf0] }
 0x1a2   : > { %7870 = vmatpush.bf16.msra.mxu3 %v13461_v37  ;;  %v13173_v37 = vor.u32 %v15135_v30, %v13170_v42  ;;  %v13365_v53 = vor.u32 %v15183_v22, %v13362_v33  ;;  %v15255_v26 = vld [vmem:[%s16127_s17 + $0x1f54] sm:$0xf]  ;;  %v13650_v30 = vld [vmem:[%s16127_s17 + $0x1f68] sm:$0xf0]  ;;  %v12717_v33 = vor.u32 %v15021_v9, %v12714_v21 }
 0x1a3   : > { %7832 = vmatpush.bf16.msra.mxu0 %v12861_v44  ;;  %v7606_v43 = vpop.f32.mrf.mxu2  ;;  %v12954_v44 = vld [vmem:[%s16127_s17 + $0x19f8] sm:$0xf0]  ;;  %v7582_v56 = vpop.f32.mrf.mxu0  ;;  %v15303_v42 = vld [vmem:[%s16127_s17 + $0x20d4] sm:$0xf]  ;;  %v13986_v9 = vld [vmem:[%s16127_s17 + $0x2208] sm:$0xf0] }
 0x1a4   : > { %7845 = vmatpush.bf16.msra.mxu1 %v13053_v45  ;;  %v15129_v45 = vld [vmem:[%s16127_s17 + $0x1b64] sm:$0xf]  ;;  %v7607_v51 = vadd.f32 %v7606_v43, %v7594_v24  ;;  %v7619_v52 = vpop.f32.mrf.mxu3  ;;  %v7595_v58 = vpop.f32.mrf.mxu1  ;;  %v12957_v4 = vor.u32 %v15081_v41, %v12954_v44  ;;  %v15399_v41 = vld [vmem:[%s16127_s17 + $0x23d4] sm:$0xf]  ;;  %v13653_v44 = vor.u32 %v15255_v26, %v13650_v30  ;;  %v13818_v56 = vld [vmem:[%s16127_s17 + $0x20b8] sm:$0xf0] }
 0x1a5   : > { %7858 = vmatpush.bf16.msra.mxu2 %v13245_v50  ;;  %v13146_v50 = vld [vmem:[%s16127_s17 + $0x1b78] sm:$0xf0]  ;;  %v15723_v21 = vld [vmem:[#allocation1 + $0x12] sm:$0xff] }
 0x1a6   : > { %7871 = vmatpush.bf16.msra.mxu3 %v13437_v55  ;;  %v13338_v55 = vld [vmem:[%s16127_s17 + $0x1cf8] sm:$0xf0]  ;;  %v16920_v59 = vadd.f32 %v7619_v52, %v7607_v51  ;;  %v15249_v51 = vld [vmem:[%s16127_s17 + $0x1f24] sm:$0xf] }
 0x1a7   : > { %7833 = vmatpush.bf16.msra.mxu0 %v12837_v60  ;;  %v13149_v60 = vor.u32 %v15129_v45, %v13146_v50  ;;  %v13341_v0 = vor.u32 %v15177_v54, %v13338_v55  ;;  %v13626_v52 = vld [vmem:[%s16127_s17 + $0x1f38] sm:$0xf0]  ;;  %v15297_v54 = vld [vmem:[%s16127_s17 + $0x20a4] sm:$0xf] }
 0x1a8   : > { %7846 = vmatpush.bf16.msra.mxu1 %v13029_v61  ;;  %v15027_v61 = vld [vmem:[%s16127_s17 + $0x1834] sm:$0xf]  ;;  %v14010_v58 = vld [vmem:[%s16127_s17 + $0x2238] sm:$0xf0]  ;;  %v15726_v26 = vld [vmem:[%s16134_s12] sm:$0x3f] }
 0x1a9   : > { %7859 = vmatpush.bf16.msra.mxu2 %v13221_v62  ;;  %v12738_v62 = vld [vmem:[%s16127_s17 + $0x1848] sm:$0xf0]  ;;  %v1486_v30 = vperm.slane %v15726_v26, 1 }
 0x1aa   : > { %7872 = vmatpush.bf16.msra.mxu3 %v13413_v2  ;;  %v15123_v2 = vld [vmem:[%s16127_s17 + $0x1b34] sm:$0xf]  ;;  %v12741_v7 = vor.u32 %v15027_v61, %v12738_v62  ;;  %v13629_v61 = vor.u32 %v15249_v51, %v13626_v52  ;;  %v13821_v62 = vor.u32 %v15297_v54, %v13818_v56  ;;  %v13746_v54 = vld [vmem:[%s16127_s17 + $0x2028] sm:$0xf0] }
 0x1ab   : > { %7834 = vmatpush.bf16.msra.mxu0 %v12813_v13  ;;  %v13125_v13 = vor.u32 %v15123_v2, %v13122_v3  ;;  %v7608_v24 = vpop.f32.mrf.mxu2  ;;  %v15291_v2 = vld [vmem:[%s16127_s17 + $0x2074] sm:$0xf]  ;;  %v15722_v3 = vld [vmem:[#allocation1] sm:$0xff]  ;;  %v13938_v56 = vld [vmem:[%s16127_s17 + $0x21a8] sm:$0xf0] }
 0x1ac   : > { %7847 = vmatpush.bf16.msra.mxu1 %v13005_v16  ;;  %v12906_v16 = vld [vmem:[%s16127_s17 + $0x1998] sm:$0xf0]  ;;  %v7621_v22 = vpop.f32.mrf.mxu3  ;;  %v15285_v24 = vld [vmem:[%s16127_s17 + $0x2044] sm:$0xf] }
 0x1ad   : > { %7860 = vmatpush.bf16.msra.mxu2 %v13197_v17  ;;  %v15117_v17 = vld [vmem:[%s16127_s17 + $0x1b04] sm:$0xf]  ;;  %v12909_v39 = vor.u32 %v15069_v14, %v12906_v16  ;;  %v14178_v14 = vld [vmem:[%s16127_s17 + $0x2388] sm:$0xf0]  ;;  %v15725_v16 = vld [vmem:[#allocation1 + $0x1b] sm:$0xff] }
 0x1ae   : > { %7873 = vmatpush.bf16.msra.mxu3 %v13389_v23  ;;  %v13290_v23 = vld [vmem:[%s16127_s17 + $0x1c98] sm:$0xf0]  ;;  %v13101_v40 = vor.u32 %v15117_v17, %v13098_v19  ;;  %v13797_v19 = vor.u32 %v15291_v2, %v13794_v6  ;;  %v15321_v6 = vld [vmem:[%s16127_s17 + $0x2164] sm:$0xf] }
 0x1af   : > { %7835 = vmatpush.bf16.msra.mxu0 %v12789_v35  ;;  %v13842_v35 = vld [vmem:[%s16127_s17 + $0x20e8] sm:$0xf0]  ;;  %v13293_v43 = vor.u32 %v15165_v20, %v13290_v23  ;;  %v13578_v23 = vld [vmem:[%s16127_s17 + $0x1ed8] sm:$0xf0] }
 0x1b0   : > { %7848 = vmatpush.bf16.msra.mxu1 %v12981_v36  ;;  %v15351_v36 = vld [vmem:[%s16127_s17 + $0x2254] sm:$0xf]  ;;  %v13845_v45 = vor.u32 %v15303_v42, %v13842_v35  ;;  %v13770_v22 = vld [vmem:[%s16127_s17 + $0x2058] sm:$0xf0] }
 0x1b1   : > { %7861 = vmatpush.bf16.msra.mxu2 %v13173_v37  ;;  %v14034_v37 = vld [vmem:[%s16127_s17 + $0x2268] sm:$0xf0]  ;;  %v13962_v35 = vld [vmem:[%s16127_s17 + $0x21d8] sm:$0xf0] }
 0x1b2   : > { %7874 = vmatpush.bf16.msra.mxu3 %v13365_v53  ;;  %v14226_v53 = vld [vmem:[%s16127_s17 + $0x23e8] sm:$0xf0]  ;;  %v14037_v50 = vor.u32 %v15351_v36, %v14034_v37  ;;  %v15381_v36 = vld [vmem:[%s16127_s17 + $0x2344] sm:$0xf]  ;;  %v14154_v37 = vld [vmem:[%s16127_s17 + $0x2358] sm:$0xf0] }
 0x1b3   : > { %7836 = vmatpush.bf16.msra.mxu0 %v12765_v57  ;;  %v14229_v55 = vor.u32 %v15399_v41, %v14226_v53  ;;  %v15345_v57 = vld [vmem:[%s16127_s17 + $0x2224] sm:$0xf]  ;;  %v13773_v41 = vor.u32 %v15285_v24, %v13770_v22  ;;  %v14157_v52 = vor.u32 %v15381_v36, %v14154_v37  ;;  %v15267_v24 = vld [vmem:[%s16127_s17 + $0x1fb4] sm:$0xf]  ;;  %v14082_v36 = vld [vmem:[%s16127_s17 + $0x22c8] sm:$0xf0] }
 0x1b4   : > { %7849 = vmatpush.bf16.msra.mxu1 %v12957_v4  ;;  %v15393_v4 = vld [vmem:[%s16127_s17 + $0x23a4] sm:$0xf]  ;;  %v14013_v63 = vor.u32 %v15345_v57, %v14010_v58  ;;  %v15375_v57 = vld [vmem:[%s16127_s17 + $0x2314] sm:$0xf]  ;;  %v14130_v58 = vld [vmem:[%s16127_s17 + $0x2328] sm:$0xf0] }
 0x1b5   : > { %7862 = vmatpush.bf16.msra.mxu2 %v13149_v60  ;;  %v14202_v60 = vld [vmem:[%s16127_s17 + $0x23b8] sm:$0xf0]  ;;  %v15315_v22 = vld [vmem:[%s16127_s17 + $0x2134] sm:$0xf] }
 0x1b6   : > { %7875 = vmatpush.bf16.msra.mxu3 %v13341_v0  ;;  %v15243_v0 = vld [vmem:[%s16127_s17 + $0x1ef4] sm:$0xf]  ;;  %v14205_v5 = vor.u32 %v15393_v4, %v14202_v60 }
 0x1b7   : > { %7837 = vmatpush.bf16.msra.mxu0 %v12741_v7  ;;  %v15339_v7 = vld [vmem:[%s16127_s17 + $0x21f4] sm:$0xf]  ;;  %v13605_v17 = vor.u32 %v15243_v0, %v13602_v1  ;;  %v13530_v0 = vld [vmem:[%s16127_s17 + $0x1e78] sm:$0xf0]  ;;  %v15273_v1 = vld [vmem:[%s16127_s17 + $0x1fe4] sm:$0xf] }
 0x1b8   : > { %7850 = vmatpush.bf16.msra.mxu1 %v12933_v10  ;;  %v15724_v10 = vld [vmem:[#allocation1 + $0x9] sm:$0xff]  ;;  %v13989_v20 = vor.u32 %v15339_v7, %v13986_v9  ;;  %v13914_v7 = vld [vmem:[%s16127_s17 + $0x2178] sm:$0xf0] }
 0x1b9   : > { %7863 = vmatpush.bf16.msra.mxu2 %v13125_v13  ;;  %v15387_v13 = vld [vmem:[%s16127_s17 + $0x2374] sm:$0xf] }
 0x1ba   : > { %7876 = vmatpush.bf16.msra.mxu3 %v13317_v18  ;;  %v15237_v18 = vld [vmem:[%s16127_s17 + $0x1ec4] sm:$0xf]  ;;  %v14181_v42 = vor.u32 %v15387_v13, %v14178_v14  ;;  %v14106_v13 = vld [vmem:[%s16127_s17 + $0x22f8] sm:$0xf0] }
 0x1bb   : > { %7838 = vmatpush.bf16.msra.mxu0 %v12717_v33  ;;  %v15333_v33 = vld [vmem:[%s16127_s17 + $0x21c4] sm:$0xf] }
 0x1bc   : > { %7851 = vmatpush.bf16.msra.mxu1 %v12909_v39  ;;  %v13581_v39 = vor.u32 %v15237_v18, %v13578_v23  ;;  %v13965_v53 = vor.u32 %v15333_v33, %v13962_v35  ;;  %v7645_v51 = vpop.f32.mrf.mxu1  ;;  %v13506_v23 = vld [vmem:[%s16127_s17 + $0x1e48] sm:$0xf0]  ;;  %v15363_v35 = vld [vmem:[%s16127_s17 + $0x22b4] sm:$0xf] }
 0x1bd   : > { %7864 = vmatpush.bf16.msra.mxu2 %v13101_v40  ;;  %v7632_v40 = vpop.f32.mrf.mxu0  ;;  %v13890_v33 = vld [vmem:[%s16127_s17 + $0x2148] sm:$0xf0] }
 0x1be   : > { %7877 = vmatpush.bf16.msra.mxu3 %v13293_v43  ;;  %7839 = vmatmul.bf16.vlgmr.msra.gmra.mxu0 %v15722_v3  ;;  %v15231_v43 = vld [vmem:[%s16127_s17 + $0x1e94] sm:$0xf]  ;;  %v14133_v3 = vor.u32 %v15375_v57, %v14130_v58  ;;  %v9816_v57 = vld [vmem:[%s16127_s17 + $0x158] sm:$0xf]  ;;  %v14299_v58 = vld [vmem:[%s16127_s17 + $0x16c] sm:$0xf0] }
 0x1bf   : > { %7883 = vmatpush.bf16.msrb.mxu0 %v13653_v44  ;;  %7852 = vmatmul.bf16.vlgmr.msra.gmra.mxu1 %v15724_v10  ;;  %v13554_v44 = vld [vmem:[%s16127_s17 + $0x1ea8] sm:$0xf0]  ;;  %v15369_v10 = vld [vmem:[%s16127_s17 + $0x22e4] sm:$0xf] }
 0x1c0   : > { %7896 = vmatpush.bf16.msrb.mxu1 %v13845_v45  ;;  %7865 = vmatmul.bf16.vlgmr.msra.gmra.mxu2 %v15723_v21  ;;  %v15279_v45 = vld [vmem:[%s16127_s17 + $0x2014] sm:$0xf]  ;;  %v13557_v60 = vor.u32 %v15231_v43, %v13554_v44  ;;  %v15261_v43 = vld [vmem:[%s16127_s17 + $0x1f84] sm:$0xf]  ;;  %v13674_v44 = vld [vmem:[%s16127_s17 + $0x1f98] sm:$0xf0] }
 0x1c1   : > { %7909 = vmatpush.bf16.msrb.mxu2 %v14037_v50  ;;  %7878 = vmatmul.bf16.vlgmr.msra.gmra.mxu3 %v15725_v16  ;;  %v7633_v50 = vadd.f32 %v7632_v40, %v1486_v30  ;;  %v14109_v30 = vor.u32 %v15369_v10, %v14106_v13  ;;  %v13482_v40 = vld [vmem:[%s16127_s17 + $0x1e18] sm:$0xf0]  ;;  %v14293_v10 = vld [vmem:[%s16127_s17 + $0x13c] sm:$0xf0]  ;;  %v9984_v13 = vld [vmem:[%s16127_s17 + $0x2a8] sm:$0xf] }
 0x1c2   : > { %7922 = vmatpush.bf16.msrb.mxu3 %v14229_v55  ;;  %v15327_v55 = vld [vmem:[%s16127_s17 + $0x2194] sm:$0xf] }
 0x1c3   : > { %7884 = vmatpush.bf16.msrb.mxu0 %v13629_v61  ;;  %v7646_v4 = vadd.f32 %v7645_v51, %v7633_v50  ;;  %v13749_v61 = vor.u32 %v15279_v45, %v13746_v54  ;;  %v7658_v2 = vpop.f32.mrf.mxu2  ;;  %v15309_v45 = vld [vmem:[%s16127_s17 + $0x2104] sm:$0xf]  ;;  %v14085_v51 = vor.u32 %v15363_v35, %v14082_v36  ;;  %v15727_v35 = vld [vmem:[#allocation1 + $0x24] sm:$0xff] }
 0x1c4   : > { %7897 = vmatpush.bf16.msrb.mxu1 %v13821_v62  ;;  %v13941_v62 = vor.u32 %v15327_v55, %v13938_v56  ;;  %v7671_v21 = vpop.f32.mrf.mxu3  ;;  %v7647_v26 = vpop.f32.mrf.mxu1  ;;  %v15357_v54 = vld [vmem:[%s16127_s17 + $0x2284] sm:$0xf]  ;;  %v14058_v55 = vld [vmem:[%s16127_s17 + $0x2298] sm:$0xf0] }
 0x1c5   : > { %7910 = vmatpush.bf16.msrb.mxu2 %v14013_v63  ;;  %v15225_v63 = vld [vmem:[%s16127_s17 + $0x1e64] sm:$0xf]  ;;  %v7659_v9 = vadd.f32 %v7658_v2, %v7646_v4  ;;  %v10008_v4 = vld [vmem:[%s16127_s17 + $0x2d8] sm:$0xf] }
 0x1c6   : > { %7923 = vmatpush.bf16.msrb.mxu3 %v14205_v5  ;;  %v13722_v5 = vld [vmem:[%s16127_s17 + $0x1ff8] sm:$0xf0]  ;;  %v13533_v14 = vor.u32 %v15225_v63, %v13530_v0  ;;  %v14395_v63 = vld [vmem:[%s16127_s17 + $0x46c] sm:$0xf0]  ;;  %v13677_v0 = vor.u32 %v15261_v43, %v13674_v44  ;;  %v10392_v2 = vld [vmem:[%s16127_s17 + $0x5d8] sm:$0xf] }
 0x1c7   : > { %7885 = vmatpush.bf16.msrb.mxu0 %v13605_v17  ;;  %v16987_v16 = vadd.f32 %v7671_v21, %v7659_v9  ;;  %v7634_v17 = vpop.f32.mrf.mxu0  ;;  %v13725_v18 = vor.u32 %v15273_v1, %v13722_v5  ;;  %v14061_v5 = vor.u32 %v15357_v54, %v14058_v55  ;;  %v9792_v21 = vld [vmem:[%s16127_s17 + $0x128] sm:$0xf]  ;;  %v10344_v43 = vld [vmem:[%s16127_s17 + $0x578] sm:$0xf]  ;;  %v14431_v44 = vld [vmem:[%s16127_s17 + $0x58c] sm:$0xf0] }
 0x1c8   : > { %7898 = vmatpush.bf16.msrb.mxu1 %v13797_v19  ;;  %v13917_v19 = vor.u32 %v15321_v6, %v13914_v7  ;;  %v9817_v6 = vor.u32 %v14299_v58, %v9816_v57  ;;  %v14341_v17 = vld [vmem:[%s16127_s17 + $0x2bc] sm:$0xf0]  ;;  %v9744_v54 = vld [vmem:[%s16127_s17 + $0xc8] sm:$0xf]  ;;  %v10345_v57 = vor.u32 %v14431_v44, %v10344_v43 }
 0x1c9   : > { %7911 = vmatpush.bf16.msrb.mxu2 %v13989_v20  ;;  %v15219_v20 = vld [vmem:[%s16127_s17 + $0x1e34] sm:$0xf]  ;;  %v9985_v26 = vor.u32 %v14341_v17, %v9984_v13  ;;  %v14281_v55 = vld [vmem:[%s16127_s17 + $0xdc] sm:$0xf0]  ;;  %v10104_v13 = vld [vmem:[%s16127_s17 + $0x398] sm:$0xf] }
 0x1ca   : > { %7924 = vmatpush.bf16.msrb.mxu3 %v14181_v42  ;;  %v13698_v42 = vld [vmem:[%s16127_s17 + $0x1fc8] sm:$0xf0]  ;;  %v13509_v37 = vor.u32 %v15219_v20, %v13506_v23  ;;  %v10368_v20 = vld [vmem:[%s16127_s17 + $0x5a8] sm:$0xf]  ;;  %v14437_v23 = vld [vmem:[%s16127_s17 + $0x5bc] sm:$0xf0] }
 0x1cb   : > { %7886 = vmatpush.bf16.msrb.mxu0 %v13581_v39  ;;  %v15213_v39 = vld [vmem:[%s16127_s17 + $0x1e04] sm:$0xf]  ;;  %v7660_v50 = vpop.f32.mrf.mxu2  ;;  %v10369_v36 = vor.u32 %v14437_v23, %v10368_v20  ;;  %v14329_v58 = vld [vmem:[%s16127_s17 + $0x25c] sm:$0xf0]  ;;  %v10296_v17 = vld [vmem:[%s16127_s17 + $0x518] sm:$0xf] }
 0x1cc   : > { %7899 = vmatpush.bf16.msrb.mxu1 %v13773_v41  ;;  %v13701_v41 = vor.u32 %v15267_v24, %v13698_v42  ;;  %v7673_v56 = vpop.f32.mrf.mxu3  ;;  %v9793_v24 = vor.u32 %v14293_v10, %v9792_v21  ;;  %v9768_v42 = vld [vmem:[%s16127_s17 + $0xf8] sm:$0xf]  ;;  %v14323_v10 = vld [vmem:[%s16127_s17 + $0x22c] sm:$0xf0] }
 0x1cd   : > { %7912 = vmatpush.bf16.msrb.mxu2 %v13965_v53  ;;  %v13893_v53 = vor.u32 %v15315_v22, %v13890_v33  ;;  %v14287_v22 = vld [vmem:[%s16127_s17 + $0x10c] sm:$0xf0]  ;;  %v9960_v33 = vld [vmem:[%s16127_s17 + $0x278] sm:$0xf]  ;;  %v9936_v56 = vld [vmem:[%s16127_s17 + $0x248] sm:$0xf] }
 0x1ce   : > { %7925 = vmatpush.bf16.msrb.mxu3 %v14157_v52  ;;  %v13866_v52 = vld [vmem:[%s16127_s17 + $0x2118] sm:$0xf0]  ;;  %v9769_v50 = vor.u32 %v14287_v22, %v9768_v42 }
 0x1cf   : > { %7887 = vmatpush.bf16.msrb.mxu0 %v13557_v60  ;;  %v13485_v60 = vor.u32 %v15213_v39, %v13482_v40  ;;  %v13869_v1 = vor.u32 %v15309_v45, %v13866_v52  ;;  %v10152_v39 = vld [vmem:[%s16127_s17 + $0x3f8] sm:$0xf]  ;;  %v14383_v40 = vld [vmem:[%s16127_s17 + $0x40c] sm:$0xf0] }
 0x1d0   : > { %7900 = vmatpush.bf16.msrb.mxu1 %v13749_v61  ;;  %v14347_v61 = vld [vmem:[%s16127_s17 + $0x2ec] sm:$0xf0]  ;;  %v15730_v45 = vld [vmem:[#allocation1 + $0x3f] sm:$0xff]  ;;  %v10153_v52 = vor.u32 %v14383_v40, %v10152_v39  ;;  %v10272_v40 = vld [vmem:[%s16127_s17 + $0x4e8] sm:$0xf] }
 0x1d1   : > { %7913 = vmatpush.bf16.msrb.mxu2 %v13941_v62  ;;  %v10200_v62 = vld [vmem:[%s16127_s17 + $0x458] sm:$0xf]  ;;  %v10009_v7 = vor.u32 %v14347_v61, %v10008_v4  ;;  %v10128_v4 = vld [vmem:[%s16127_s17 + $0x3c8] sm:$0xf] }
 0x1d2   : > { %7926 = vmatpush.bf16.msrb.mxu3 %v14133_v3  ;;  %v14443_v3 = vld [vmem:[%s16127_s17 + $0x5ec] sm:$0xf0]  ;;  %v10201_v9 = vor.u32 %v14395_v63, %v10200_v62  ;;  %v10320_v61 = vld [vmem:[%s16127_s17 + $0x548] sm:$0xf]  ;;  %v14425_v62 = vld [vmem:[%s16127_s17 + $0x55c] sm:$0xf0]  ;;  %v9745_v63 = vor.u32 %v14281_v55, %v9744_v54 }
 0x1d3   : > { %7888 = vmatpush.bf16.msrb.mxu0 %v13533_v14  ;;  %v10393_v14 = vor.u32 %v14443_v3, %v10392_v2  ;;  %v9720_v3 = vld [vmem:[%s16127_s17 + $0x98] sm:$0xf]  ;;  %v10321_v21 = vor.u32 %v14425_v62, %v10320_v61  ;;  %v14407_v61 = vld [vmem:[%s16127_s17 + $0x4cc] sm:$0xf0] }
 0x1d4   : > { %7901 = vmatpush.bf16.msrb.mxu1 %v13725_v18  ;;  %v10176_v18 = vld [vmem:[%s16127_s17 + $0x428] sm:$0xf]  ;;  %v9864_v54 = vld [vmem:[%s16127_s17 + $0x1b8] sm:$0xf] }
 0x1d5   : > { %7914 = vmatpush.bf16.msrb.mxu2 %v13917_v19  ;;  %v14389_v19 = vld [vmem:[%s16127_s17 + $0x43c] sm:$0xf0] }
 0x1d6   : > { %7927 = vmatpush.bf16.msrb.mxu3 %v14109_v30  ;;  %v10177_v30 = vor.u32 %v14389_v19, %v10176_v18  ;;  %v14419_v18 = vld [vmem:[%s16127_s17 + $0x52c] sm:$0xf0] }
 0x1d7   : > { %7889 = vmatpush.bf16.msrb.mxu0 %v13509_v37  ;;  %v14335_v37 = vld [vmem:[%s16127_s17 + $0x28c] sm:$0xf0]  ;;  %v10297_v22 = vor.u32 %v14419_v18, %v10296_v17  ;;  %v10584_v17 = vld [vmem:[%s16127_s17 + $0x758] sm:$0xf] }
 0x1d8   : > { %7902 = vmatpush.bf16.msrb.mxu1 %v13701_v41  ;;  %v15728_v41 = vld [vmem:[#allocation1 + $0x36] sm:$0xff] }
 0x1d9   : > { %7915 = vmatpush.bf16.msrb.mxu2 %v13893_v53  ;;  %v15729_v53 = vld [vmem:[#allocation1 + $0x2d] sm:$0xff]  ;;  %v14491_v18 = vld [vmem:[%s16127_s17 + $0x76c] sm:$0xf0] }
 0x1da   : > { %7928 = vmatpush.bf16.msrb.mxu3 %v14085_v51  ;;  %v9961_v51 = vor.u32 %v14335_v37, %v9960_v33  ;;  %v14317_v33 = vld [vmem:[%s16127_s17 + $0x1fc] sm:$0xf0] }
 0x1db   : > { %7890 = vmatpush.bf16.msrb.mxu0 %v13485_v60  ;;  %v14377_v60 = vld [vmem:[%s16127_s17 + $0x3dc] sm:$0xf0] }
 0x1dc   : > { %7903 = vmatpush.bf16.msrb.mxu1 %v13677_v0  ;;  %v7684_v0 = vpop.f32.mrf.mxu0  ;;  %v10129_v2 = vor.u32 %v14377_v60, %v10128_v4  ;;  %v14359_v4 = vld [vmem:[%s16127_s17 + $0x34c] sm:$0xf0]  ;;  %v10248_v60 = vld [vmem:[%s16127_s17 + $0x4b8] sm:$0xf] }
 0x1dd   : > { %7916 = vmatpush.bf16.msrb.mxu2 %v13869_v1  ;;  %v9937_v1 = vor.u32 %v14329_v58, %v9936_v56  ;;  %v10056_v58 = vld [vmem:[%s16127_s17 + $0x338] sm:$0xf] }
 0x1de   : > { %7929 = vmatpush.bf16.msrb.mxu3 %v14061_v5  ;;  %7891 = vmatmul.bf16.vlgmr.msrb.gmra.mxu0 %v15727_v35  ;;  %v14275_v5 = vld [vmem:[%s16127_s17 + $0xac] sm:$0xf0]  ;;  %v10080_v35 = vld [vmem:[%s16127_s17 + $0x368] sm:$0xf] }
 0x1df   : > { %7935 = vmatpush.bf16.msra.mxu0 %v9817_v6  ;;  %7904 = vmatmul.bf16.vlgmr.msrb.gmra.mxu1 %v15729_v53  ;;  %v9912_v6 = vld [vmem:[%s16127_s17 + $0x218] sm:$0xf]  ;;  %v9721_v20 = vor.u32 %v14275_v5, %v9720_v3  ;;  %v9840_v3 = vld [vmem:[%s16127_s17 + $0x188] sm:$0xf]  ;;  %v14305_v5 = vld [vmem:[%s16127_s17 + $0x19c] sm:$0xf0] }
 0x1e0   : > { %7948 = vmatpush.bf16.msra.mxu1 %v10009_v7  ;;  %7917 = vmatmul.bf16.vlgmr.msrb.gmra.mxu2 %v15728_v41  ;;  %v7685_v7 = vadd.f32 %v7684_v0, %v16987_v16  ;;  %v9913_v16 = vor.u32 %v14323_v10, %v9912_v6  ;;  %v14413_v41 = vld [vmem:[%s16127_s17 + $0x4fc] sm:$0xf0]  ;;  %v10032_v6 = vld [vmem:[%s16127_s17 + $0x308] sm:$0xf] }
 0x1e1   : > { %7961 = vmatpush.bf16.msra.mxu2 %v10201_v9  ;;  %7930 = vmatmul.bf16.vlgmr.msrb.gmra.mxu3 %v15730_v45  ;;  %v7697_v9 = vpop.f32.mrf.mxu1  ;;  %v10273_v56 = vor.u32 %v14413_v41, %v10272_v40  ;;  %v14257_v0 = vld [vmem:[%s16127_s17 + $0x1c] sm:$0xf0]  ;;  %v10224_v10 = vld [vmem:[%s16127_s17 + $0x488] sm:$0xf] }
 0x1e2   : > { %7974 = vmatpush.bf16.msra.mxu3 %v10393_v14  ;;  %v14371_v14 = vld [vmem:[%s16127_s17 + $0x3ac] sm:$0xf0]  ;;  %v7698_v19 = vadd.f32 %v7697_v9, %v7685_v7  ;;  %v10249_v9 = vor.u32 %v14407_v61, %v10248_v60  ;;  %v14485_v40 = vld [vmem:[%s16127_s17 + $0x73c] sm:$0xf0]  ;;  %v10752_v41 = vld [vmem:[%s16127_s17 + $0x8a8] sm:$0xf] }
 0x1e3   : > { %7936 = vmatpush.bf16.msra.mxu0 %v9793_v24  ;;  %v10105_v23 = vor.u32 %v14371_v14, %v10104_v13  ;;  %v9696_v24 = vld [vmem:[%s16127_s17 + $0x68] sm:$0xf]  ;;  %v7710_v42 = vpop.f32.mrf.mxu2  ;;  %v14401_v13 = vld [vmem:[%s16127_s17 + $0x49c] sm:$0xf0]  ;;  %v14527_v61 = vld [vmem:[%s16127_s17 + $0x88c] sm:$0xf0] }
 0x1e4   : > { %7949 = vmatpush.bf16.msra.mxu1 %v9985_v26  ;;  %v14269_v26 = vld [vmem:[%s16127_s17 + $0x7c] sm:$0xf0]  ;;  %v7711_v37 = vadd.f32 %v7710_v42, %v7698_v19  ;;  %v7723_v39 = vpop.f32.mrf.mxu3  ;;  %v7686_v44 = vpop.f32.mrf.mxu0  ;;  %v10776_v19 = vld [vmem:[%s16127_s17 + $0x8d8] sm:$0xf] }
 0x1e5   : > { %7962 = vmatpush.bf16.msra.mxu2 %v10177_v30  ;;  %v9888_v30 = vld [vmem:[%s16127_s17 + $0x1e8] sm:$0xf]  ;;  %v9697_v53 = vor.u32 %v14269_v26, %v9696_v24  ;;  %v14587_v24 = vld [vmem:[%s16127_s17 + $0xa6c] sm:$0xf0]  ;;  %v9841_v26 = vor.u32 %v14305_v5, %v9840_v3  ;;  %v11160_v42 = vld [vmem:[%s16127_s17 + $0xbd8] sm:$0xf] }
 0x1e6   : > { %7975 = vmatpush.bf16.msra.mxu3 %v10369_v36  ;;  %v14365_v36 = vld [vmem:[%s16127_s17 + $0x37c] sm:$0xf0]  ;;  %v17054_v43 = vadd.f32 %v7723_v39, %v7711_v37  ;;  %v9889_v45 = vor.u32 %v14317_v33, %v9888_v30  ;;  %v10225_v33 = vor.u32 %v14401_v13, %v10224_v10  ;;  %v10560_v39 = vld [vmem:[%s16127_s17 + $0x728] sm:$0xf] }
 0x1e7   : > { %7937 = vmatpush.bf16.msra.mxu0 %v9769_v50  ;;  %v10081_v50 = vor.u32 %v14365_v36, %v10080_v35  ;;  %v10585_v35 = vor.u32 %v14491_v18, %v10584_v17  ;;  %v14533_v44 = vld [vmem:[%s16127_s17 + $0x8bc] sm:$0xf0]  ;;  %v10896_v13 = vld [vmem:[%s16127_s17 + $0x9c8] sm:$0xf] }
 0x1e8   : > { %7950 = vmatpush.bf16.msra.mxu1 %v9961_v51  ;;  %v9672_v51 = vld [vmem:[%s16127_s17 + $0x38] sm:$0xf]  ;;  %v14521_v10 = vld [vmem:[%s16127_s17 + $0x85c] sm:$0xf0]  ;;  %v11088_v18 = vld [vmem:[%s16127_s17 + $0xb48] sm:$0xf] }
 0x1e9   : > { %7963 = vmatpush.bf16.msra.mxu2 %v10153_v52  ;;  %v14263_v52 = vld [vmem:[%s16127_s17 + $0x4c] sm:$0xf0]  ;;  %v7699_v55 = vpop.f32.mrf.mxu1 }
 0x1ea   : > { %7976 = vmatpush.bf16.msra.mxu3 %v10345_v57  ;;  %v14311_v57 = vld [vmem:[%s16127_s17 + $0x1cc] sm:$0xf0]  ;;  %v9673_v62 = vor.u32 %v14263_v52, %v9672_v51  ;;  %v11136_v51 = vld [vmem:[%s16127_s17 + $0xba8] sm:$0xf]  ;;  %v14629_v52 = vld [vmem:[%s16127_s17 + $0xbbc] sm:$0xf0]  ;;  %v10753_v55 = vor.u32 %v14533_v44, %v10752_v41 }
 0x1eb   : > { %7938 = vmatpush.bf16.msra.mxu0 %v9745_v63  ;;  %v9648_v63 = vld [vmem:[%s16127_s17 + $0x8] sm:$0xf]  ;;  %v7712_v7 = vpop.f32.mrf.mxu2  ;;  %v11137_v60 = vor.u32 %v14629_v52, %v11136_v51 }
 0x1ec   : > { %7951 = vmatpush.bf16.msra.mxu1 %v9937_v1  ;;  %v9865_v1 = vor.u32 %v14311_v57, %v9864_v54  ;;  %v7725_v14 = vpop.f32.mrf.mxu3  ;;  %v10561_v54 = vor.u32 %v14485_v40, %v10560_v39  ;;  %v10536_v57 = vld [vmem:[%s16127_s17 + $0x6f8] sm:$0xf]  ;;  %v14473_v7 = vld [vmem:[%s16127_s17 + $0x6dc] sm:$0xf0]  ;;  %v14611_v40 = vld [vmem:[%s16127_s17 + $0xb2c] sm:$0xf0] }
 0x1ed   : > { %7964 = vmatpush.bf16.msra.mxu2 %v10129_v2  ;;  %v10057_v2 = vor.u32 %v14359_v4, %v10056_v58  ;;  %v14479_v58 = vld [vmem:[%s16127_s17 + $0x70c] sm:$0xf0]  ;;  %v10728_v4 = vld [vmem:[%s16127_s17 + $0x878] sm:$0xf]  ;;  %v14569_v14 = vld [vmem:[%s16127_s17 + $0x9dc] sm:$0xf0] }
 0x1ee   : > { %7977 = vmatpush.bf16.msra.mxu3 %v10321_v21  ;;  %v14353_v21 = vld [vmem:[%s16127_s17 + $0x31c] sm:$0xf0]  ;;  %v10729_v3 = vor.u32 %v14527_v61, %v10728_v4  ;;  %v11064_v39 = vld [vmem:[%s16127_s17 + $0xb18] sm:$0xf]  ;;  %v10656_v51 = vld [vmem:[%s16127_s17 + $0x7e8] sm:$0xf] }
 0x1ef   : > { %7939 = vmatpush.bf16.msra.mxu0 %v9721_v20  ;;  %v9649_v20 = vor.u32 %v14257_v0, %v9648_v63  ;;  %v10033_v30 = vor.u32 %v14353_v21, %v10032_v6  ;;  %v14575_v63 = vld [vmem:[%s16127_s17 + $0xa0c] sm:$0xf0]  ;;  %v11112_v0 = vld [vmem:[%s16127_s17 + $0xb78] sm:$0xf]  ;;  %v10512_v6 = vld [vmem:[%s16127_s17 + $0x6c8] sm:$0xf]  ;;  %v11065_v52 = vor.u32 %v14611_v40, %v11064_v39 }
 0x1f0   : > { %7952 = vmatpush.bf16.msra.mxu1 %v9913_v16  ;;  %v14539_v16 = vld [vmem:[%s16127_s17 + $0x8ec] sm:$0xf0]  ;;  %v14605_v61 = vld [vmem:[%s16127_s17 + $0xafc] sm:$0xf0]  ;;  %v11544_v39 = vld [vmem:[%s16127_s17 + $0xed8] sm:$0xf] }
 0x1f1   : > { %7965 = vmatpush.bf16.msra.mxu2 %v10105_v23  ;;  %v10968_v23 = vld [vmem:[%s16127_s17 + $0xa58] sm:$0xf]  ;;  %v10777_v36 = vor.u32 %v14539_v16, %v10776_v19  ;;  %v14617_v19 = vld [vmem:[%s16127_s17 + $0xb5c] sm:$0xf0]  ;;  %v10513_v16 = vor.u32 %v14473_v7, %v10512_v6  ;;  %v14455_v6 = vld [vmem:[%s16127_s17 + $0x64c] sm:$0xf0] }
 0x1f2   : > { %7978 = vmatpush.bf16.msra.mxu3 %v10297_v22  ;;  %v14635_v22 = vld [vmem:[%s16127_s17 + $0xbec] sm:$0xf0]  ;;  %v10969_v37 = vor.u32 %v14587_v24, %v10968_v23  ;;  %v10632_v7 = vld [vmem:[%s16127_s17 + $0x7b8] sm:$0xf] }
 0x1f3   : > { %7940 = vmatpush.bf16.msra.mxu0 %v9697_v53  ;;  %v11161_v53 = vor.u32 %v14635_v22, %v11160_v42  ;;  %v14467_v42 = vld [vmem:[%s16127_s17 + $0x6ac] sm:$0xf0]  ;;  %v10680_v22 = vld [vmem:[%s16127_s17 + $0x818] sm:$0xf] }
 0x1f4   : > { %7953 = vmatpush.bf16.msra.mxu1 %v9889_v45  ;;  %v10944_v45 = vld [vmem:[%s16127_s17 + $0xa28] sm:$0xf] }
 0x1f5   : > { %7966 = vmatpush.bf16.msra.mxu2 %v10081_v50  ;;  %v14581_v50 = vld [vmem:[%s16127_s17 + $0xa3c] sm:$0xf0] }
 0x1f6   : > { %7979 = vmatpush.bf16.msra.mxu3 %v10273_v56  ;;  %v10945_v56 = vor.u32 %v14581_v50, %v10944_v45  ;;  %v10464_v45 = vld [vmem:[%s16127_s17 + $0x668] sm:$0xf]  ;;  %v14461_v50 = vld [vmem:[%s16127_s17 + $0x67c] sm:$0xf0] }
 0x1f7   : > { %7941 = vmatpush.bf16.msra.mxu0 %v9673_v62  ;;  %v10920_v62 = vld [vmem:[%s16127_s17 + $0x9f8] sm:$0xf] }
 0x1f8   : > { %7954 = vmatpush.bf16.msra.mxu1 %v9865_v1  ;;  %v14623_v1 = vld [vmem:[%s16127_s17 + $0xb8c] sm:$0xf0]  ;;  %v10921_v5 = vor.u32 %v14575_v63, %v10920_v62  ;;  %v10465_v63 = vor.u32 %v14461_v50, %v10464_v45 }
 0x1f9   : > { %7967 = vmatpush.bf16.msra.mxu2 %v10057_v2  ;;  %v10537_v2 = vor.u32 %v14479_v58, %v10536_v57  ;;  %v11113_v21 = vor.u32 %v14623_v1, %v11112_v0  ;;  %v14557_v57 = vld [vmem:[%s16127_s17 + $0x97c] sm:$0xf0]  ;;  %v14779_v45 = vld [vmem:[%s16127_s17 + $0x106c] sm:$0xf0] }
 0x1fa   : > { %7980 = vmatpush.bf16.msra.mxu3 %v10249_v9  ;;  %v10704_v9 = vld [vmem:[%s16127_s17 + $0x848] sm:$0xf] }
 0x1fb   : > { %7942 = vmatpush.bf16.msra.mxu0 %v9649_v20  ;;  %v7736_v17 = vpop.f32.mrf.mxu0  ;;  %v10705_v24 = vor.u32 %v14521_v10, %v10704_v9  ;;  %v10824_v10 = vld [vmem:[%s16127_s17 + $0x938] sm:$0xf] }
 0x1fc   : > { %7955 = vmatpush.bf16.msra.mxu1 %v9841_v26  ;;  %v7737_v20 = vadd.f32 %v7736_v17, %v17054_v43  ;;  %v7749_v23 = vpop.f32.mrf.mxu1  ;;  %v10897_v26 = vor.u32 %v14569_v14, %v10896_v13  ;;  %v14563_v43 = vld [vmem:[%s16127_s17 + $0x9ac] sm:$0xf0]  ;;  %v11016_v14 = vld [vmem:[%s16127_s17 + $0xab8] sm:$0xf] }
 0x1fd   : > { %7968 = vmatpush.bf16.msra.mxu2 %v10033_v30  ;;  %v10488_v30 = vld [vmem:[%s16127_s17 + $0x698] sm:$0xf]  ;;  %v14551_v13 = vld [vmem:[%s16127_s17 + $0x94c] sm:$0xf0] }
 0x1fe   : > { %7981 = vmatpush.bf16.msra.mxu3 %v10225_v33  ;;  %7943 = vmatmul.bf16.vlgmr.msra.gmra.mxu0 %v16256_v28  ;;  %v11089_v33 = vor.u32 %v14617_v19, %v11088_v18  ;;  %v10489_v41 = vor.u32 %v14467_v42, %v10488_v30  ;;  %v14599_v17 = vld [vmem:[%s16127_s17 + $0xacc] sm:$0xf0]  ;;  %v10416_v19 = vld [vmem:[%s16127_s17 + $0x608] sm:$0xf] }
 0x1ff   : > { %7987 = vmatpush.bf16.msrb.mxu0 %v10585_v35  ;;  %7956 = vmatmul.bf16.vlgmr.msra.gmra.mxu1 %v16262_v34  ;;  %v7750_v35 = vadd.f32 %v7749_v23, %v7737_v20  ;;  %v14449_v20 = vld [vmem:[%s16127_s17 + $0x61c] sm:$0xf0]  ;;  %v10825_v23 = vor.u32 %v14551_v13, %v10824_v10  ;;  %v10800_v30 = vld [vmem:[%s16127_s17 + $0x908] sm:$0xf]  ;;  %v11017_v42 = vor.u32 %v14599_v17, %v11016_v14  ;;  %v14671_v10 = vld [vmem:[%s16127_s17 + $0xd0c] sm:$0xf0] }
 0x200   : > { %8000 = vmatpush.bf16.msrb.mxu1 %v10777_v36  ;;  %7969 = vmatmul.bf16.vlgmr.msra.gmra.mxu2 %v16254_v27  ;;  %v14515_v36 = vld [vmem:[%s16127_s17 + $0x82c] sm:$0xf0]  ;;  %v11496_v13 = vld [vmem:[%s16127_s17 + $0xe78] sm:$0xf] }
 0x201   : > { %8013 = vmatpush.bf16.msrb.mxu2 %v10969_v37  ;;  %7982 = vmatmul.bf16.vlgmr.msra.gmra.mxu3 %v16258_v29  ;;  %v10872_v37 = vld [vmem:[%s16127_s17 + $0x998] sm:$0xf]  ;;  %v14719_v17 = vld [vmem:[%s16127_s17 + $0xe8c] sm:$0xf0] }
 0x202   : > { %8026 = vmatpush.bf16.msrb.mxu3 %v11161_v53  ;;  %v10681_v53 = vor.u32 %v14515_v36, %v10680_v22  ;;  %v10873_v44 = vor.u32 %v14563_v43, %v10872_v37  ;;  %v14545_v22 = vld [vmem:[%s16127_s17 + $0x91c] sm:$0xf0]  ;;  %v11352_v37 = vld [vmem:[%s16127_s17 + $0xd58] sm:$0xf]  ;;  %v14683_v43 = vld [vmem:[%s16127_s17 + $0xd6c] sm:$0xf0] }
 0x203   : > { %7988 = vmatpush.bf16.msrb.mxu0 %v10561_v54  ;;  %v7762_v54 = vpop.f32.mrf.mxu2  ;;  %v7738_v62 = vpop.f32.mrf.mxu0 }
 0x204   : > { %8001 = vmatpush.bf16.msrb.mxu1 %v10753_v55  ;;  %v14509_v55 = vld [vmem:[%s16127_s17 + $0x7fc] sm:$0xf0]  ;;  %v7763_v58 = vadd.f32 %v7762_v54, %v7750_v35  ;;  %v7775_v4 = vpop.f32.mrf.mxu3  ;;  %v7751_v0 = vpop.f32.mrf.mxu1  ;;  %v14827_v54 = vld [vmem:[%s16127_s17 + $0x11ec] sm:$0xf0] }
 0x205   : > { %8014 = vmatpush.bf16.msrb.mxu2 %v10945_v56  ;;  %v10848_v56 = vld [vmem:[%s16127_s17 + $0x968] sm:$0xf]  ;;  %v14593_v35 = vld [vmem:[%s16127_s17 + $0xa9c] sm:$0xf0] }
 0x206   : > { %8027 = vmatpush.bf16.msrb.mxu3 %v11137_v60  ;;  %v11040_v60 = vld [vmem:[%s16127_s17 + $0xae8] sm:$0xf]  ;;  %v17125_v1 = vadd.f32 %v7775_v4, %v7763_v58 }
 0x207   : > { %7989 = vmatpush.bf16.msrb.mxu0 %v10537_v2  ;;  %v10657_v2 = vor.u32 %v14509_v55, %v10656_v51  ;;  %v11041_v9 = vor.u32 %v14605_v61, %v11040_v60  ;;  %v10801_v51 = vor.u32 %v14545_v22, %v10800_v30  ;;  %v11328_v4 = vld [vmem:[%s16127_s17 + $0xd28] sm:$0xf]  ;;  %v14677_v60 = vld [vmem:[%s16127_s17 + $0xd3c] sm:$0xf0] }
 0x208   : > { %8002 = vmatpush.bf16.msrb.mxu1 %v10729_v3  ;;  %v10849_v3 = vor.u32 %v14557_v57, %v10848_v56  ;;  %v11353_v56 = vor.u32 %v14683_v43, %v11352_v37  ;;  %v11520_v61 = vld [vmem:[%s16127_s17 + $0xea8] sm:$0xf]  ;;  %v14761_v37 = vld [vmem:[%s16127_s17 + $0xfdc] sm:$0xf0] }
 0x209   : > { %8015 = vmatpush.bf16.msrb.mxu2 %v10921_v5  ;;  %v10440_v5 = vld [vmem:[%s16127_s17 + $0x638] sm:$0xf]  ;;  %v11712_v0 = vld [vmem:[%s16127_s17 + $0x1028] sm:$0xf] }
 0x20a   : > { %8028 = vmatpush.bf16.msrb.mxu3 %v11113_v21  ;;  %v14503_v21 = vld [vmem:[%s16127_s17 + $0x7cc] sm:$0xf0]  ;;  %v10441_v18 = vor.u32 %v14455_v6, %v10440_v5  ;;  %v14821_v5 = vld [vmem:[%s16127_s17 + $0x11bc] sm:$0xf0]  ;;  %v11329_v6 = vor.u32 %v14677_v60, %v11328_v4  ;;  %v11280_v30 = vld [vmem:[%s16127_s17 + $0xcc8] sm:$0xf] }
 0x20b   : > { %7990 = vmatpush.bf16.msrb.mxu0 %v10513_v16  ;;  %v10633_v16 = vor.u32 %v14503_v21, %v10632_v7  ;;  %v7764_v36 = vpop.f32.mrf.mxu2  ;;  %v11304_v21 = vld [vmem:[%s16127_s17 + $0xcf8] sm:$0xf]  ;;  %v11472_v22 = vld [vmem:[%s16127_s17 + $0xe48] sm:$0xf]  ;;  %v14803_v60 = vld [vmem:[%s16127_s17 + $0x112c] sm:$0xf0] }
 0x20c   : > { %8003 = vmatpush.bf16.msrb.mxu1 %v10705_v24  ;;  %v10608_v24 = vld [vmem:[%s16127_s17 + $0x788] sm:$0xf]  ;;  %v7777_v40 = vpop.f32.mrf.mxu3  ;;  %v11832_v4 = vld [vmem:[%s16127_s17 + $0x1118] sm:$0xf] }
 0x20d   : > { %8016 = vmatpush.bf16.msrb.mxu2 %v10897_v26  ;;  %v14497_v26 = vld [vmem:[%s16127_s17 + $0x79c] sm:$0xf0]  ;;  %v11664_v36 = vld [vmem:[%s16127_s17 + $0xfc8] sm:$0xf] }
 0x20e   : > { %8029 = vmatpush.bf16.msrb.mxu3 %v11089_v33  ;;  %v10992_v33 = vld [vmem:[%s16127_s17 + $0xa88] sm:$0xf]  ;;  %v10609_v50 = vor.u32 %v14497_v26, %v10608_v24  ;;  %v11497_v24 = vor.u32 %v14719_v17, %v11496_v13  ;;  %v14809_v40 = vld [vmem:[%s16127_s17 + $0x115c] sm:$0xf0] }
 0x20f   : > { %7991 = vmatpush.bf16.msrb.mxu0 %v10489_v41  ;;  %v10417_v41 = vor.u32 %v14449_v20, %v10416_v19  ;;  %v10993_v55 = vor.u32 %v14593_v35, %v10992_v33  ;;  %v14767_v19 = vld [vmem:[%s16127_s17 + $0x100c] sm:$0xf0]  ;;  %v11880_v20 = vld [vmem:[%s16127_s17 + $0x1178] sm:$0xf]  ;;  %v14713_v35 = vld [vmem:[%s16127_s17 + $0xe5c] sm:$0xf0] }
 0x210   : > { %8004 = vmatpush.bf16.msrb.mxu1 %v10681_v53  ;;  %v14731_v53 = vld [vmem:[%s16127_s17 + $0xeec] sm:$0xf0]  ;;  %v14797_v17 = vld [vmem:[%s16127_s17 + $0x10fc] sm:$0xf0] }
 0x211   : > { %8017 = vmatpush.bf16.msrb.mxu2 %v10873_v44  ;;  %v11736_v44 = vld [vmem:[%s16127_s17 + $0x1058] sm:$0xf]  ;;  %v11545_v57 = vor.u32 %v14731_v53, %v11544_v39  ;;  %v11856_v39 = vld [vmem:[%s16127_s17 + $0x1148] sm:$0xf] }
 0x212   : > { %8030 = vmatpush.bf16.msrb.mxu3 %v11065_v52  ;;  %v11928_v52 = vld [vmem:[%s16127_s17 + $0x11d8] sm:$0xf]  ;;  %v11737_v58 = vor.u32 %v14779_v45, %v11736_v44  ;;  %v11473_v45 = vor.u32 %v14713_v35, %v11472_v22 }
 0x213   : > { %7992 = vmatpush.bf16.msrb.mxu0 %v10465_v63  ;;  %v11929_v62 = vor.u32 %v14827_v54, %v11928_v52  ;;  %v14725_v63 = vld [vmem:[%s16127_s17 + $0xebc] sm:$0xf0]  ;;  %v14659_v52 = vld [vmem:[%s16127_s17 + $0xcac] sm:$0xf0]  ;;  %v11448_v54 = vld [vmem:[%s16127_s17 + $0xe18] sm:$0xf] }
 0x214   : > { %8005 = vmatpush.bf16.msrb.mxu1 %v10657_v2  ;;  %v14773_v2 = vld [vmem:[%s16127_s17 + $0x103c] sm:$0xf0]  ;;  %v11521_v7 = vor.u32 %v14725_v63, %v11520_v61  ;;  %v11592_v35 = vld [vmem:[%s16127_s17 + $0xf38] sm:$0xf] }
 0x215   : > { %8018 = vmatpush.bf16.msrb.mxu2 %v10849_v3  ;;  %v11904_v3 = vld [vmem:[%s16127_s17 + $0x11a8] sm:$0xf] }
 0x216   : > { %8031 = vmatpush.bf16.msrb.mxu3 %v11041_v9  ;;  %v11713_v9 = vor.u32 %v14773_v2, %v11712_v0  ;;  %v11905_v14 = vor.u32 %v14821_v5, %v11904_v3  ;;  %v11232_v0 = vld [vmem:[%s16127_s17 + $0xc68] sm:$0xf]  ;;  %v14653_v2 = vld [vmem:[%s16127_s17 + $0xc7c] sm:$0xf0]  ;;  %v11833_v5 = vor.u32 %v14803_v60, %v11832_v4  ;;  %v12312_v4 = vld [vmem:[%s16127_s17 + $0x14d8] sm:$0xf] }
 0x217   : > { %7993 = vmatpush.bf16.msrb.mxu0 %v10441_v18  ;;  %v11688_v18 = vld [vmem:[%s16127_s17 + $0xff8] sm:$0xf]  ;;  %v11424_v3 = vld [vmem:[%s16127_s17 + $0xde8] sm:$0xf] }
 0x218   : > { %8006 = vmatpush.bf16.msrb.mxu1 %v10633_v16  ;;  %v14815_v16 = vld [vmem:[%s16127_s17 + $0x118c] sm:$0xf0]  ;;  %v11689_v26 = vor.u32 %v14767_v19, %v11688_v18  ;;  %v11233_v19 = vor.u32 %v14653_v2, %v11232_v0 }
 0x219   : > { %8019 = vmatpush.bf16.msrb.mxu2 %v10825_v23  ;;  %v11305_v23 = vor.u32 %v14671_v10, %v11304_v21  ;;  %v11881_v33 = vor.u32 %v14815_v16, %v11880_v20  ;;  %v14749_v21 = vld [vmem:[%s16127_s17 + $0xf7c] sm:$0xf0]  ;;  %v14971_v0 = vld [vmem:[%s16127_s17 + $0x166c] sm:$0xf0] }
 0x21a   : > { %8032 = vmatpush.bf16.msrb.mxu3 %v11017_v42  ;;  %v14665_v42 = vld [vmem:[%s16127_s17 + $0xcdc] sm:$0xf0] }
 0x21b   : > { %7994 = vmatpush.bf16.msrb.mxu0 %v10417_v41  ;;  %v7788_v43 = vpop.f32.mrf.mxu0  ;;  %v11281_v53 = vor.u32 %v14665_v42, %v11280_v30  ;;  %v14647_v30 = vld [vmem:[%s16127_s17 + $0xc4c] sm:$0xf0]  ;;  %v11400_v42 = vld [vmem:[%s16127_s17 + $0xdb8] sm:$0xf] }
 0x21c   : > { %8007 = vmatpush.bf16.msrb.mxu1 %v10609_v50  ;;  %v7789_v41 = vadd.f32 %v7788_v43, %v17125_v1  ;;  %v7801_v44 = vpop.f32.mrf.mxu1  ;;  %v11665_v50 = vor.u32 %v14761_v37, %v11664_v36  ;;  %v14755_v1 = vld [vmem:[%s16127_s17 + $0xfac] sm:$0xf0]  ;;  %v11784_v37 = vld [vmem:[%s16127_s17 + $0x10b8] sm:$0xf] }
 0x21d   : > { %8020 = vmatpush.bf16.msrb.mxu2 %v10801_v51  ;;  %v11256_v51 = vld [vmem:[%s16127_s17 + $0xc98] sm:$0xf]  ;;  %v14743_v36 = vld [vmem:[%s16127_s17 + $0xf4c] sm:$0xf0] }
 0x21e   : > { %8033 = vmatpush.bf16.msrb.mxu3 %v10993_v55  ;;  %7995 = vmatmul.bf16.vlgmr.msrb.gmra.mxu0 %v16308_v31  ;;  %v11857_v55 = vor.u32 %v14809_v40, %v11856_v39  ;;  %v11257_v61 = vor.u32 %v14659_v52, %v11256_v51  ;;  %v14791_v43 = vld [vmem:[%s16127_s17 + $0x10cc] sm:$0xf0]  ;;  %v11184_v40 = vld [vmem:[%s16127_s17 + $0xc08] sm:$0xf] }
 0x21f   : > { %8039 = vmatpush.bf16.msra.mxu0 %v11353_v56  ;;  %8008 = vmatmul.bf16.vlgmr.msrb.gmra.mxu1 %v16314_v38  ;;  %v7802_v56 = vadd.f32 %v7801_v44, %v7789_v41  ;;  %v14641_v41 = vld [vmem:[%s16127_s17 + $0xc1c] sm:$0xf0]  ;;  %v11593_v44 = vor.u32 %v14743_v36, %v11592_v35  ;;  %v11568_v51 = vld [vmem:[%s16127_s17 + $0xf08] sm:$0xf]  ;;  %v11785_v52 = vor.u32 %v14791_v43, %v11784_v37  ;;  %v14863_v35 = vld [vmem:[%s16127_s17 + $0x130c] sm:$0xf0] }
 0x220   : > { %8052 = vmatpush.bf16.msra.mxu1 %v11545_v57  ;;  %8021 = vmatmul.bf16.vlgmr.msrb.gmra.mxu2 %v16305_v25  ;;  %v14707_v57 = vld [vmem:[%s16127_s17 + $0xe2c] sm:$0xf0]  ;;  %v12264_v36 = vld [vmem:[%s16127_s17 + $0x1478] sm:$0xf] }
 0x221   : > { %8065 = vmatpush.bf16.msra.mxu2 %v11737_v58  ;;  %8034 = vmatmul.bf16.vlgmr.msrb.gmra.mxu3 %v16310_v32  ;;  %v11640_v58 = vld [vmem:[%s16127_s17 + $0xf98] sm:$0xf]  ;;  %v14911_v43 = vld [vmem:[%s16127_s17 + $0x148c] sm:$0xf0] }
 0x222   : > { %8078 = vmatpush.bf16.msra.mxu3 %v11929_v62  ;;  %v11449_v62 = vor.u32 %v14707_v57, %v11448_v54  ;;  %v11641_v63 = vor.u32 %v14755_v1, %v11640_v58  ;;  %v14737_v54 = vld [vmem:[%s16127_s17 + $0xf1c] sm:$0xf0]  ;;  %v12120_v58 = vld [vmem:[%s16127_s17 + $0x1358] sm:$0xf]  ;;  %v14875_v1 = vld [vmem:[%s16127_s17 + $0x136c] sm:$0xf0] }
 0x223   : > { %8040 = vmatpush.bf16.msra.mxu0 %v11329_v6  ;;  %v7814_v6 = vpop.f32.mrf.mxu2  ;;  %v7790_v18 = vpop.f32.mrf.mxu0 }
 0x224   : > { %8053 = vmatpush.bf16.msra.mxu1 %v11521_v7  ;;  %v14701_v7 = vld [vmem:[%s16127_s17 + $0xdfc] sm:$0xf0]  ;;  %v7815_v10 = vadd.f32 %v7814_v6, %v7802_v56  ;;  %v7827_v13 = vpop.f32.mrf.mxu3  ;;  %v7803_v20 = vpop.f32.mrf.mxu1  ;;  %v15019_v6 = vld [vmem:[%s16127_s17 + $0x17ec] sm:$0xf0] }
 0x225   : > { %8066 = vmatpush.bf16.msra.mxu2 %v11713_v9  ;;  %v11616_v9 = vld [vmem:[%s16127_s17 + $0xf68] sm:$0xf]  ;;  %v14785_v56 = vld [vmem:[%s16127_s17 + $0x109c] sm:$0xf0] }
 0x226   : > { %8079 = vmatpush.bf16.msra.mxu3 %v11905_v14  ;;  %v11808_v14 = vld [vmem:[%s16127_s17 + $0x10e8] sm:$0xf]  ;;  %v17196_v16 = vadd.f32 %v7827_v13, %v7815_v10 }
 0x227   : > { %8041 = vmatpush.bf16.msra.mxu0 %v11305_v23  ;;  %v11425_v23 = vor.u32 %v14701_v7, %v11424_v3  ;;  %v11809_v22 = vor.u32 %v14797_v17, %v11808_v14  ;;  %v11569_v3 = vor.u32 %v14737_v54, %v11568_v51  ;;  %v12096_v13 = vld [vmem:[%s16127_s17 + $0x1328] sm:$0xf]  ;;  %v14869_v14 = vld [vmem:[%s16127_s17 + $0x133c] sm:$0xf0] }
 0x228   : > { %8054 = vmatpush.bf16.msra.mxu1 %v11497_v24  ;;  %v11617_v24 = vor.u32 %v14749_v21, %v11616_v9  ;;  %v12121_v9 = vor.u32 %v14875_v1, %v12120_v58  ;;  %v12288_v17 = vld [vmem:[%s16127_s17 + $0x14a8] sm:$0xf]  ;;  %v14953_v58 = vld [vmem:[%s16127_s17 + $0x15dc] sm:$0xf0] }
 0x229   : > { %8067 = vmatpush.bf16.msra.mxu2 %v11689_v26  ;;  %v11208_v26 = vld [vmem:[%s16127_s17 + $0xc38] sm:$0xf]  ;;  %v12480_v20 = vld [vmem:[%s16127_s17 + $0x1628] sm:$0xf] }
 0x22a   : > { %8080 = vmatpush.bf16.msra.mxu3 %v11881_v33  ;;  %v14695_v33 = vld [vmem:[%s16127_s17 + $0xdcc] sm:$0xf0]  ;;  %v11209_v39 = vor.u32 %v14647_v30, %v11208_v26  ;;  %v15013_v26 = vld [vmem:[%s16127_s17 + $0x17bc] sm:$0xf0]  ;;  %v12097_v30 = vor.u32 %v14869_v14, %v12096_v13  ;;  %v12048_v51 = vld [vmem:[%s16127_s17 + $0x12c8] sm:$0xf] }
 0x22b   : > { %8042 = vmatpush.bf16.msra.mxu0 %v11281_v53  ;;  %v11401_v53 = vor.u32 %v14695_v33, %v11400_v42  ;;  %v7816_v57 = vpop.f32.mrf.mxu2  ;;  %v12072_v33 = vld [vmem:[%s16127_s17 + $0x12f8] sm:$0xf]  ;;  %v12240_v54 = vld [vmem:[%s16127_s17 + $0x1448] sm:$0xf]  ;;  %v14995_v14 = vld [vmem:[%s16127_s17 + $0x172c] sm:$0xf0] }
 0x22c   : > { %8055 = vmatpush.bf16.msra.mxu1 %v11473_v45  ;;  %v11376_v45 = vld [vmem:[%s16127_s17 + $0xd88] sm:$0xf]  ;;  %v7829_v60 = vpop.f32.mrf.mxu3  ;;  %v12600_v13 = vld [vmem:[%s16127_s17 + $0x1718] sm:$0xf] }
 0x22d   : > { %8068 = vmatpush.bf16.msra.mxu2 %v11665_v50  ;;  %v14689_v50 = vld [vmem:[%s16127_s17 + $0xd9c] sm:$0xf0]  ;;  %v12432_v57 = vld [vmem:[%s16127_s17 + $0x15c8] sm:$0xf] }
 0x22e   : > { %8081 = vmatpush.bf16.msra.mxu3 %v11857_v55  ;;  %v11760_v55 = vld [vmem:[%s16127_s17 + $0x1088] sm:$0xf]  ;;  %v11377_v2 = vor.u32 %v14689_v50, %v11376_v45  ;;  %v12265_v45 = vor.u32 %v14911_v43, %v12264_v36  ;;  %v15001_v60 = vld [vmem:[%s16127_s17 + $0x175c] sm:$0xf0] }
 0x22f   : > { %8043 = vmatpush.bf16.msra.mxu0 %v11257_v61  ;;  %v11185_v61 = vor.u32 %v14641_v41, %v11184_v40  ;;  %v11761_v7 = vor.u32 %v14785_v56, %v11760_v55  ;;  %v14959_v40 = vld [vmem:[%s16127_s17 + $0x160c] sm:$0xf0]  ;;  %v12648_v41 = vld [vmem:[%s16127_s17 + $0x1778] sm:$0xf]  ;;  %v14905_v56 = vld [vmem:[%s16127_s17 + $0x145c] sm:$0xf0] }
 0x230   : > { %8056 = vmatpush.bf16.msra.mxu1 %v11449_v62  ;;  %v14923_v62 = vld [vmem:[%s16127_s17 + $0x14ec] sm:$0xf0]  ;;  %v14989_v43 = vld [vmem:[%s16127_s17 + $0x16fc] sm:$0xf0] }
 0x231   : > { %8069 = vmatpush.bf16.msra.mxu2 %v11641_v63  ;;  %v12504_v63 = vld [vmem:[%s16127_s17 + $0x1658] sm:$0xf]  ;;  %v12313_v21 = vor.u32 %v14923_v62, %v12312_v4  ;;  %v12624_v4 = vld [vmem:[%s16127_s17 + $0x1748] sm:$0xf] }
 0x232   : > { %8082 = vmatpush.bf16.msra.mxu3 %v11833_v5  ;;  %v12696_v5 = vld [vmem:[%s16127_s17 + $0x17d8] sm:$0xf]  ;;  %v12505_v10 = vor.u32 %v14971_v0, %v12504_v63  ;;  %v12241_v0 = vor.u32 %v14905_v56, %v12240_v54 }
 0x233   : > { %8044 = vmatpush.bf16.msra.mxu0 %v11233_v19  ;;  %v12697_v18 = vor.u32 %v15019_v6, %v12696_v5  ;;  %v14917_v19 = vld [vmem:[%s16127_s17 + $0x14bc] sm:$0xf0]  ;;  %v14851_v5 = vld [vmem:[%s16127_s17 + $0x12ac] sm:$0xf0]  ;;  %v12216_v6 = vld [vmem:[%s16127_s17 + $0x1418] sm:$0xf] }
 0x234   : > { %8057 = vmatpush.bf16.msra.mxu1 %v11425_v23  ;;  %v14965_v23 = vld [vmem:[%s16127_s17 + $0x163c] sm:$0xf0]  ;;  %v12289_v42 = vor.u32 %v14917_v19, %v12288_v17  ;;  %v12360_v56 = vld [vmem:[%s16127_s17 + $0x1538] sm:$0xf] }
 0x235   : > { %8070 = vmatpush.bf16.msra.mxu2 %v11617_v24  ;;  %v12672_v24 = vld [vmem:[%s16127_s17 + $0x17a8] sm:$0xf] }
 0x236   : > { %8083 = vmatpush.bf16.msra.mxu3 %v11809_v22  ;;  %v12481_v22 = vor.u32 %v14965_v23, %v12480_v20  ;;  %v12673_v37 = vor.u32 %v15013_v26, %v12672_v24  ;;  %v12000_v20 = vld [vmem:[%s16127_s17 + $0x1268] sm:$0xf]  ;;  %v14845_v23 = vld [vmem:[%s16127_s17 + $0x127c] sm:$0xf0]  ;;  %v12601_v26 = vor.u32 %v14995_v14, %v12600_v13  ;;  %v13080_v13 = vld [vmem:[%s16127_s17 + $0x1ad8] sm:$0xf] }
 0x237   : > { %8045 = vmatpush.bf16.msra.mxu0 %v11209_v39  ;;  %v12456_v39 = vld [vmem:[%s16127_s17 + $0x15f8] sm:$0xf]  ;;  %v12192_v24 = vld [vmem:[%s16127_s17 + $0x13e8] sm:$0xf] }
 0x238   : > { %8058 = vmatpush.bf16.msra.mxu1 %v11401_v53  ;;  %v15007_v53 = vld [vmem:[%s16127_s17 + $0x178c] sm:$0xf0]  ;;  %v12457_v50 = vor.u32 %v14959_v40, %v12456_v39  ;;  %v12001_v40 = vor.u32 %v14845_v23, %v12000_v20 }
 0x239   : > { %8071 = vmatpush.bf16.msra.mxu2 %v11593_v44  ;;  %v12073_v44 = vor.u32 %v14863_v35, %v12072_v33  ;;  %v12649_v55 = vor.u32 %v15007_v53, %v12648_v41  ;;  %v14941_v33 = vld [vmem:[%s16127_s17 + $0x157c] sm:$0xf0]  ;;  %v15163_v20 = vld [vmem:[%s16127_s17 + $0x1c6c] sm:$0xf0] }
 0x23a   : > { %8084 = vmatpush.bf16.msra.mxu3 %v11785_v52  ;;  %v14857_v52 = vld [vmem:[%s16127_s17 + $0x12dc] sm:$0xf0] }
 0x23b   : > { %8046 = vmatpush.bf16.msra.mxu0 %v11185_v61  ;;  %v7840_v1 = vpop.f32.mrf.mxu0  ;;  %v12049_v62 = vor.u32 %v14857_v52, %v12048_v51  ;;  %v14839_v51 = vld [vmem:[%s16127_s17 + $0x124c] sm:$0xf0]  ;;  %v12168_v52 = vld [vmem:[%s16127_s17 + $0x13b8] sm:$0xf] }
 0x23c   : > { %8059 = vmatpush.bf16.msra.mxu1 %v11377_v2  ;;  %v7841_v61 = vadd.f32 %v7840_v1, %v17196_v16  ;;  %v7853_v63 = vpop.f32.mrf.mxu1  ;;  %v12433_v2 = vor.u32 %v14953_v58, %v12432_v57  ;;  %v14947_v16 = vld [vmem:[%s16127_s17 + $0x15ac] sm:$0xf0]  ;;  %v12552_v58 = vld [vmem:[%s16127_s17 + $0x16b8] sm:$0xf] }
 0x23d   : > { %8072 = vmatpush.bf16.msra.mxu2 %v11569_v3  ;;  %v12024_v3 = vld [vmem:[%s16127_s17 + $0x1298] sm:$0xf]  ;;  %v14935_v57 = vld [vmem:[%s16127_s17 + $0x154c] sm:$0xf0] }
 0x23e   : > { %8085 = vmatpush.bf16.msra.mxu3 %v11761_v7  ;;  %8047 = vmatmul.bf16.vlgmr.msra.gmra.mxu0 %v16382_v8  ;;  %v12625_v7 = vor.u32 %v15001_v60, %v12624_v4  ;;  %v12025_v17 = vor.u32 %v14851_v5, %v12024_v3  ;;  %v14983_v1 = vld [vmem:[%s16127_s17 + $0x16cc] sm:$0xf0]  ;;  %v11952_v60 = vld [vmem:[%s16127_s17 + $0x1208] sm:$0xf] }
 0x23f   : > { %8091 = vmatpush.bf16.msrb.mxu0 %v12121_v9  ;;  %8060 = vmatmul.bf16.vlgmr.msra.gmra.mxu1 %v16388_v12  ;;  %v7854_v9 = vadd.f32 %v7853_v63, %v7841_v61  ;;  %v14833_v61 = vld [vmem:[%s16127_s17 + $0x121c] sm:$0xf0]  ;;  %v12361_v63 = vor.u32 %v14935_v57, %v12360_v56  ;;  %v12336_v3 = vld [vmem:[%s16127_s17 + $0x1508] sm:$0xf]  ;;  %v12553_v5 = vor.u32 %v14983_v1, %v12552_v58  ;;  %v15055_v56 = vld [vmem:[%s16127_s17 + $0x190c] sm:$0xf0] }
 0x240   : > { %8104 = vmatpush.bf16.msrb.mxu1 %v12313_v21  ;;  %8073 = vmatmul.bf16.vlgmr.msra.gmra.mxu2 %v16386_v11  ;;  %v14899_v21 = vld [vmem:[%s16127_s17 + $0x142c] sm:$0xf0]  ;;  %v13032_v57 = vld [vmem:[%s16127_s17 + $0x1a78] sm:$0xf] }
 0x241   : > { %8117 = vmatpush.bf16.msrb.mxu2 %v12505_v10  ;;  %8086 = vmatmul.bf16.vlgmr.msra.gmra.mxu3 %v16391_v15  ;;  %v12408_v10 = vld [vmem:[%s16127_s17 + $0x1598] sm:$0xf]  ;;  %v15103_v1 = vld [vmem:[%s16127_s17 + $0x1a8c] sm:$0xf0] }
 0x242   : > { %8130 = vmatpush.bf16.msrb.mxu3 %v12697_v18  ;;  %v12217_v18 = vor.u32 %v14899_v21, %v12216_v6  ;;  %v12409_v19 = vor.u32 %v14947_v16, %v12408_v10  ;;  %v14929_v6 = vld [vmem:[%s16127_s17 + $0x151c] sm:$0xf0]  ;;  %v12888_v10 = vld [vmem:[%s16127_s17 + $0x1958] sm:$0xf]  ;;  %v15067_v16 = vld [vmem:[%s16127_s17 + $0x196c] sm:$0xf0] }
 0x243   : > { %8092 = vmatpush.bf16.msrb.mxu0 %v12097_v30  ;;  %v7866_v30 = vpop.f32.mrf.mxu2  ;;  %v7842_v39 = vpop.f32.mrf.mxu0 }
 0x244   : > { %8105 = vmatpush.bf16.msrb.mxu1 %v12289_v42  ;;  %v14893_v42 = vld [vmem:[%s16127_s17 + $0x13fc] sm:$0xf0]  ;;  %v7867_v35 = vadd.f32 %v7866_v30, %v7854_v9  ;;  %v7879_v36 = vpop.f32.mrf.mxu3  ;;  %v7855_v41 = vpop.f32.mrf.mxu1  ;;  %v15211_v30 = vld [vmem:[%s16127_s17 + $0x1dec] sm:$0xf0] }
 0x245   : > { %8118 = vmatpush.bf16.msrb.mxu2 %v12481_v22  ;;  %v12384_v22 = vld [vmem:[%s16127_s17 + $0x1568] sm:$0xf]  ;;  %v14977_v9 = vld [vmem:[%s16127_s17 + $0x169c] sm:$0xf0] }
 0x246   : > { %8131 = vmatpush.bf16.msrb.mxu3 %v12673_v37  ;;  %v12576_v37 = vld [vmem:[%s16127_s17 + $0x16e8] sm:$0xf]  ;;  %v17267_v53 = vadd.f32 %v7879_v36, %v7867_v35 }
 0x247   : > { %8093 = vmatpush.bf16.msrb.mxu0 %v12073_v44  ;;  %v12193_v44 = vor.u32 %v14893_v42, %v12192_v24  ;;  %v12577_v54 = vor.u32 %v14989_v43, %v12576_v37  ;;  %v12337_v24 = vor.u32 %v14929_v6, %v12336_v3  ;;  %v12864_v36 = vld [vmem:[%s16127_s17 + $0x1928] sm:$0xf]  ;;  %v15061_v37 = vld [vmem:[%s16127_s17 + $0x193c] sm:$0xf0] }
 0x248   : > { %8106 = vmatpush.bf16.msrb.mxu1 %v12265_v45  ;;  %v12385_v45 = vor.u32 %v14941_v33, %v12384_v22  ;;  %v12889_v22 = vor.u32 %v15067_v16, %v12888_v10  ;;  %v13056_v43 = vld [vmem:[%s16127_s17 + $0x1aa8] sm:$0xf]  ;;  %v15145_v10 = vld [vmem:[%s16127_s17 + $0x1bdc] sm:$0xf0] }
 0x249   : > { %8119 = vmatpush.bf16.msrb.mxu2 %v12457_v50  ;;  %v11976_v50 = vld [vmem:[%s16127_s17 + $0x1238] sm:$0xf]  ;;  %v13248_v41 = vld [vmem:[%s16127_s17 + $0x1c28] sm:$0xf] }
 0x24a   : > { %8132 = vmatpush.bf16.msrb.mxu3 %v12649_v55  ;;  %v14887_v55 = vld [vmem:[%s16127_s17 + $0x13cc] sm:$0xf0]  ;;  %v11977_v4 = vor.u32 %v14839_v51, %v11976_v50  ;;  %v15205_v50 = vld [vmem:[%s16127_s17 + $0x1dbc] sm:$0xf0]  ;;  %v12865_v51 = vor.u32 %v15061_v37, %v12864_v36  ;;  %v12816_v3 = vld [vmem:[%s16127_s17 + $0x18c8] sm:$0xf] }
 0x24b   : > { %8094 = vmatpush.bf16.msrb.mxu0 %v12049_v62  ;;  %v12169_v62 = vor.u32 %v14887_v55, %v12168_v52  ;;  %v7868_v21 = vpop.f32.mrf.mxu2  ;;  %v12840_v55 = vld [vmem:[%s16127_s17 + $0x18f8] sm:$0xf]  ;;  %v13008_v6 = vld [vmem:[%s16127_s17 + $0x1a48] sm:$0xf]  ;;  %v15187_v37 = vld [vmem:[%s16127_s17 + $0x1d2c] sm:$0xf0] }
 0x24c   : > { %8107 = vmatpush.bf16.msrb.mxu1 %v12241_v0  ;;  %v12144_v0 = vld [vmem:[%s16127_s17 + $0x1388] sm:$0xf]  ;;  %v7881_v14 = vpop.f32.mrf.mxu3  ;;  %v13368_v36 = vld [vmem:[%s16127_s17 + $0x1d18] sm:$0xf] }
 0x24d   : > { %8120 = vmatpush.bf16.msrb.mxu2 %v12433_v2  ;;  %v14881_v2 = vld [vmem:[%s16127_s17 + $0x139c] sm:$0xf0]  ;;  %v13200_v21 = vld [vmem:[%s16127_s17 + $0x1bc8] sm:$0xf] }
 0x24e   : > { %8133 = vmatpush.bf16.msrb.mxu3 %v12625_v7  ;;  %v12528_v7 = vld [vmem:[%s16127_s17 + $0x1688] sm:$0xf]  ;;  %v12145_v23 = vor.u32 %v14881_v2, %v12144_v0  ;;  %v13033_v0 = vor.u32 %v15103_v1, %v13032_v57  ;;  %v15193_v14 = vld [vmem:[%s16127_s17 + $0x1d5c] sm:$0xf0] }
 0x24f   : > { %8095 = vmatpush.bf16.msrb.mxu0 %v12025_v17  ;;  %v11953_v17 = vor.u32 %v14833_v61, %v11952_v60  ;;  %v12529_v42 = vor.u32 %v14977_v9, %v12528_v7  ;;  %v15151_v60 = vld [vmem:[%s16127_s17 + $0x1c0c] sm:$0xf0]  ;;  %v13416_v61 = vld [vmem:[%s16127_s17 + $0x1d78] sm:$0xf]  ;;  %v15097_v9 = vld [vmem:[%s16127_s17 + $0x1a5c] sm:$0xf0] }
 0x250   : > { %8108 = vmatpush.bf16.msrb.mxu1 %v12217_v18  ;;  %v15115_v18 = vld [vmem:[%s16127_s17 + $0x1aec] sm:$0xf0]  ;;  %v15181_v1 = vld [vmem:[%s16127_s17 + $0x1cfc] sm:$0xf0] }
 0x251   : > { %8121 = vmatpush.bf16.msrb.mxu2 %v12409_v19  ;;  %v13272_v19 = vld [vmem:[%s16127_s17 + $0x1c58] sm:$0xf]  ;;  %v13081_v33 = vor.u32 %v15115_v18, %v13080_v13  ;;  %v13392_v13 = vld [vmem:[%s16127_s17 + $0x1d48] sm:$0xf] }
 0x252   : > { %8134 = vmatpush.bf16.msrb.mxu3 %v12601_v26  ;;  %v13464_v26 = vld [vmem:[%s16127_s17 + $0x1dd8] sm:$0xf]  ;;  %v13273_v35 = vor.u32 %v15163_v20, %v13272_v19  ;;  %v13009_v20 = vor.u32 %v15097_v9, %v13008_v6 }
 0x253   : > { %8096 = vmatpush.bf16.msrb.mxu0 %v12001_v40  ;;  %v13465_v39 = vor.u32 %v15211_v30, %v13464_v26  ;;  %v15109_v40 = vld [vmem:[%s16127_s17 + $0x1abc] sm:$0xf0]  ;;  %v15043_v26 = vld [vmem:[%s16127_s17 + $0x18ac] sm:$0xf0]  ;;  %v12984_v30 = vld [vmem:[%s16127_s17 + $0x1a18] sm:$0xf] }
 0x254   : > { %8109 = vmatpush.bf16.msrb.mxu1 %v12193_v44  ;;  %v15157_v44 = vld [vmem:[%s16127_s17 + $0x1c3c] sm:$0xf0]  ;;  %v13057_v52 = vor.u32 %v15109_v40, %v13056_v43  ;;  %v13128_v9 = vld [vmem:[%s16127_s17 + $0x1b38] sm:$0xf] }
 0x255   : > { %8122 = vmatpush.bf16.msrb.mxu2 %v12385_v45  ;;  %v13440_v45 = vld [vmem:[%s16127_s17 + $0x1da8] sm:$0xf] }
 0x256   : > { %8135 = vmatpush.bf16.msrb.mxu3 %v12577_v54  ;;  %v13249_v54 = vor.u32 %v15157_v44, %v13248_v41  ;;  %v13441_v58 = vor.u32 %v15205_v50, %v13440_v45  ;;  %v12768_v41 = vld [vmem:[%s16127_s17 + $0x1868] sm:$0xf]  ;;  %v15037_v44 = vld [vmem:[%s16127_s17 + $0x187c] sm:$0xf0]  ;;  %v13369_v50 = vor.u32 %v15187_v37, %v13368_v36  ;;  %v13848_v36 = vld [vmem:[%s16127_s17 + $0x20d8] sm:$0xf] }
 0x257   : > { %8097 = vmatpush.bf16.msrb.mxu0 %v11977_v4  ;;  %v13224_v4 = vld [vmem:[%s16127_s17 + $0x1bf8] sm:$0xf]  ;;  %v12960_v45 = vld [vmem:[%s16127_s17 + $0x19e8] sm:$0xf] }
 0x258   : > { %8110 = vmatpush.bf16.msrb.mxu1 %v12169_v62  ;;  %v15199_v62 = vld [vmem:[%s16127_s17 + $0x1d8c] sm:$0xf0]  ;;  %v13225_v2 = vor.u32 %v15151_v60, %v13224_v4  ;;  %v12769_v60 = vor.u32 %v15037_v44, %v12768_v41 }
 0x259   : > { %8123 = vmatpush.bf16.msrb.mxu2 %v12361_v63  ;;  %v12841_v63 = vor.u32 %v15055_v56, %v12840_v55  ;;  %v13417_v7 = vor.u32 %v15199_v62, %v13416_v61  ;;  %v15133_v55 = vld [vmem:[%s16127_s17 + $0x1b7c] sm:$0xf0]  ;;  %v15355_v41 = vld [vmem:[%s16127_s17 + $0x226c] sm:$0xf0] }
 0x25a   : > { %8136 = vmatpush.bf16.msrb.mxu3 %v12553_v5  ;;  %v15049_v5 = vld [vmem:[%s16127_s17 + $0x18dc] sm:$0xf0] }
 0x25b   : > { %8098 = vmatpush.bf16.msrb.mxu0 %v11953_v17  ;;  %v7892_v16 = vpop.f32.mrf.mxu0  ;;  %v12817_v18 = vor.u32 %v15049_v5, %v12816_v3  ;;  %v15031_v3 = vld [vmem:[%s16127_s17 + $0x184c] sm:$0xf0]  ;;  %v12936_v5 = vld [vmem:[%s16127_s17 + $0x19b8] sm:$0xf] }
 0x25c   : > { %8111 = vmatpush.bf16.msrb.mxu1 %v12145_v23  ;;  %v7893_v17 = vadd.f32 %v7892_v16, %v17267_v53  ;;  %v7905_v19 = vpop.f32.mrf.mxu1  ;;  %v13201_v23 = vor.u32 %v15145_v10, %v13200_v21  ;;  %v15139_v53 = vld [vmem:[%s16127_s17 + $0x1bac] sm:$0xf0]  ;;  %v13320_v10 = vld [vmem:[%s16127_s17 + $0x1cb8] sm:$0xf] }
 0x25d   : > { %8124 = vmatpush.bf16.msrb.mxu2 %v12337_v24  ;;  %v12792_v24 = vld [vmem:[%s16127_s17 + $0x1898] sm:$0xf]  ;;  %v15127_v21 = vld [vmem:[%s16127_s17 + $0x1b4c] sm:$0xf0] }
 0x25e   : > { %8137 = vmatpush.bf16.msrb.mxu3 %v12529_v42  ;;  %8099 = vmatmul.bf16.vlgmr.msrb.gmra.mxu0 %v16448_v46  ;;  %v13393_v42 = vor.u32 %v15193_v14, %v13392_v13  ;;  %v12793_v43 = vor.u32 %v15043_v26, %v12792_v24  ;;  %v15175_v16 = vld [vmem:[%s16127_s17 + $0x1ccc] sm:$0xf0]  ;;  %v12720_v14 = vld [vmem:[%s16127_s17 + $0x1808] sm:$0xf] }
 0x25f   : > { %8143 = vmatpush.bf16.msra.mxu0 %v12889_v22  ;;  %8112 = vmatmul.bf16.vlgmr.msrb.gmra.mxu1 %v16452_v48  ;;  %v7906_v22 = vadd.f32 %v7905_v19, %v7893_v17  ;;  %v15025_v17 = vld [vmem:[%s16127_s17 + $0x181c] sm:$0xf0]  ;;  %v13129_v19 = vor.u32 %v15127_v21, %v13128_v9  ;;  %v13104_v24 = vld [vmem:[%s16127_s17 + $0x1b08] sm:$0xf]  ;;  %v13321_v26 = vor.u32 %v15175_v16, %v13320_v10  ;;  %v15247_v9 = vld [vmem:[%s16127_s17 + $0x1f0c] sm:$0xf0] }
 0x260   : > { %8156 = vmatpush.bf16.msra.mxu1 %v13081_v33  ;;  %8125 = vmatmul.bf16.vlgmr.msrb.gmra.mxu2 %v16450_v47  ;;  %v15091_v33 = vld [vmem:[%s16127_s17 + $0x1a2c] sm:$0xf0]  ;;  %v13800_v21 = vld [vmem:[%s16127_s17 + $0x2078] sm:$0xf] }
 0x261   : > { %8169 = vmatpush.bf16.msra.mxu2 %v13273_v35  ;;  %8138 = vmatmul.bf16.vlgmr.msrb.gmra.mxu3 %v16454_v49  ;;  %v13176_v35 = vld [vmem:[%s16127_s17 + $0x1b98] sm:$0xf] }
 0x262   : > { %8182 = vmatpush.bf16.msra.mxu3 %v13465_v39  ;;  %v12985_v39 = vor.u32 %v15091_v33, %v12984_v30  ;;  %v13177_v40 = vor.u32 %v15139_v53, %v13176_v35  ;;  %v15121_v30 = vld [vmem:[%s16127_s17 + $0x1b1c] sm:$0xf0]  ;;  %v13656_v35 = vld [vmem:[%s16127_s17 + $0x1f58] sm:$0xf]  ;;  %v15259_v53 = vld [vmem:[%s16127_s17 + $0x1f6c] sm:$0xf0] }
 0x263   : > { %8144 = vmatpush.bf16.msra.mxu0 %v12865_v51  ;;  %v7918_v51 = vpop.f32.mrf.mxu2  ;;  %v7894_v4 = vpop.f32.mrf.mxu0  ;;  %v15731_v10 = vld [vmem:[#allocation1] sm:$0xff] }
 0x264   : > { %8157 = vmatpush.bf16.msra.mxu1 %v13057_v52  ;;  %v15085_v52 = vld [vmem:[%s16127_s17 + $0x19fc] sm:$0xf0]  ;;  %v7919_v56 = vadd.f32 %v7918_v51, %v7906_v22  ;;  %v7931_v57 = vpop.f32.mrf.mxu3  ;;  %v7907_v61 = vpop.f32.mrf.mxu1  ;;  %v15403_v51 = vld [vmem:[%s16127_s17 + $0x23ec] sm:$0xf0] }
 0x265   : > { %8170 = vmatpush.bf16.msra.mxu2 %v13249_v54  ;;  %v13152_v54 = vld [vmem:[%s16127_s17 + $0x1b68] sm:$0xf]  ;;  %v15169_v22 = vld [vmem:[%s16127_s17 + $0x1c9c] sm:$0xf0] }
 0x266   : > { %8183 = vmatpush.bf16.msra.mxu3 %v13441_v58  ;;  %v13344_v58 = vld [vmem:[%s16127_s17 + $0x1ce8] sm:$0xf]  ;;  %v17338_v62 = vadd.f32 %v7931_v57, %v7919_v56 }
 0x267   : > { %8145 = vmatpush.bf16.msra.mxu0 %v12841_v63  ;;  %v12961_v63 = vor.u32 %v15085_v52, %v12960_v45  ;;  %v13345_v6 = vor.u32 %v15181_v1, %v13344_v58  ;;  %v13105_v45 = vor.u32 %v15121_v30, %v13104_v24  ;;  %v13632_v57 = vld [vmem:[%s16127_s17 + $0x1f28] sm:$0xf]  ;;  %v15253_v58 = vld [vmem:[%s16127_s17 + $0x1f3c] sm:$0xf0]  ;;  %v15734_v24 = vld [vmem:[#allocation1 + $0x1b] sm:$0xff] }
 0x268   : > { %8158 = vmatpush.bf16.msra.mxu1 %v13033_v0  ;;  %v13153_v0 = vor.u32 %v15133_v55, %v13152_v54  ;;  %v13657_v54 = vor.u32 %v15259_v53, %v13656_v35  ;;  %v13824_v1 = vld [vmem:[%s16127_s17 + $0x20a8] sm:$0xf] }
 0x269   : > { %8171 = vmatpush.bf16.msra.mxu2 %v13225_v2  ;;  %v12744_v2 = vld [vmem:[%s16127_s17 + $0x1838] sm:$0xf]  ;;  %v14016_v61 = vld [vmem:[%s16127_s17 + $0x2228] sm:$0xf] }
 0x26a   : > { %8184 = vmatpush.bf16.msra.mxu3 %v13417_v7  ;;  %v15079_v7 = vld [vmem:[%s16127_s17 + $0x19cc] sm:$0xf0]  ;;  %v12745_v13 = vor.u32 %v15031_v3, %v12744_v2  ;;  %v15397_v2 = vld [vmem:[%s16127_s17 + $0x23bc] sm:$0xf0]  ;;  %v13633_v3 = vor.u32 %v15253_v58, %v13632_v57  ;;  %v13584_v30 = vld [vmem:[%s16127_s17 + $0x1ec8] sm:$0xf] }
 0x26b   : > { %8146 = vmatpush.bf16.msra.mxu0 %v12817_v18  ;;  %v12937_v18 = vor.u32 %v15079_v7, %v12936_v5  ;;  %v7920_v33 = vpop.f32.mrf.mxu2  ;;  %v13608_v7 = vld [vmem:[%s16127_s17 + $0x1ef8] sm:$0xf]  ;;  %v13776_v35 = vld [vmem:[%s16127_s17 + $0x2048] sm:$0xf] }
 0x26c   : > { %8159 = vmatpush.bf16.msra.mxu1 %v13009_v20  ;;  %v12912_v20 = vld [vmem:[%s16127_s17 + $0x1988] sm:$0xf]  ;;  %v7933_v37 = vpop.f32.mrf.mxu3  ;;  %v15241_v33 = vld [vmem:[%s16127_s17 + $0x1edc] sm:$0xf0] }
 0x26d   : > { %8172 = vmatpush.bf16.msra.mxu2 %v13201_v23  ;;  %v15073_v23 = vld [vmem:[%s16127_s17 + $0x199c] sm:$0xf0] }
 0x26e   : > { %8185 = vmatpush.bf16.msra.mxu3 %v13393_v42  ;;  %v13296_v42 = vld [vmem:[%s16127_s17 + $0x1c88] sm:$0xf]  ;;  %v12913_v44 = vor.u32 %v15073_v23, %v12912_v20  ;;  %v14184_v20 = vld [vmem:[%s16127_s17 + $0x2378] sm:$0xf]  ;;  %v15391_v23 = vld [vmem:[%s16127_s17 + $0x238c] sm:$0xf0] }
 0x26f   : > { %8147 = vmatpush.bf16.msra.mxu0 %v12793_v43  ;;  %v12721_v43 = vor.u32 %v15025_v17, %v12720_v14  ;;  %v13297_v52 = vor.u32 %v15169_v22, %v13296_v42  ;;  %v13992_v14 = vld [vmem:[%s16127_s17 + $0x21f8] sm:$0xf]  ;;  %v15343_v17 = vld [vmem:[%s16127_s17 + $0x220c] sm:$0xf0]  ;;  %v15735_v53 = vld [vmem:[%s16134_s12] sm:$0x3f]  ;;  %v14185_v37 = vor.u32 %v15391_v23, %v14184_v20 }
 0x270   : > { %8160 = vmatpush.bf16.msra.mxu1 %v12985_v39  ;;  %v15307_v39 = vld [vmem:[%s16127_s17 + $0x20ec] sm:$0xf0]  ;;  %v13993_v22 = vor.u32 %v15343_v17, %v13992_v14  ;;  %v13920_v14 = vld [vmem:[%s16127_s17 + $0x2168] sm:$0xf]  ;;  %v15325_v17 = vld [vmem:[%s16127_s17 + $0x217c] sm:$0xf0] }
 0x271   : > { %8173 = vmatpush.bf16.msra.mxu2 %v13177_v40  ;;  %v14040_v40 = vld [vmem:[%s16127_s17 + $0x2258] sm:$0xf]  ;;  %v13849_v55 = vor.u32 %v15307_v39, %v13848_v36  ;;  %v1487_v36 = vperm.slane %v15735_v53, 2  ;;  %v13968_v39 = vld [vmem:[%s16127_s17 + $0x21c8] sm:$0xf] }
 0x272   : > { %8186 = vmatpush.bf16.msra.mxu3 %v13369_v50  ;;  %v14232_v50 = vld [vmem:[%s16127_s17 + $0x23d8] sm:$0xf]  ;;  %v14041_v56 = vor.u32 %v15355_v41, %v14040_v40  ;;  %v15337_v40 = vld [vmem:[%s16127_s17 + $0x21dc] sm:$0xf0]  ;;  %v14160_v41 = vld [vmem:[%s16127_s17 + $0x2348] sm:$0xf] }
 0x273   : > { %8148 = vmatpush.bf16.msra.mxu0 %v12769_v60  ;;  %v14233_v4 = vor.u32 %v15403_v51, %v14232_v50  ;;  %v15301_v60 = vld [vmem:[%s16127_s17 + $0x20bc] sm:$0xf0]  ;;  %v14112_v20 = vld [vmem:[%s16127_s17 + $0x22e8] sm:$0xf]  ;;  %v13704_v53 = vld [vmem:[%s16127_s17 + $0x1fb8] sm:$0xf] }
 0x274   : > { %8161 = vmatpush.bf16.msra.mxu1 %v12961_v63  ;;  %v15349_v63 = vld [vmem:[%s16127_s17 + $0x223c] sm:$0xf0]  ;;  %v13825_v5 = vor.u32 %v15301_v60, %v13824_v1  ;;  %v13944_v60 = vld [vmem:[%s16127_s17 + $0x2198] sm:$0xf] }
 0x275   : > { %8174 = vmatpush.bf16.msra.mxu2 %v13153_v0  ;;  %v14208_v0 = vld [vmem:[%s16127_s17 + $0x23a8] sm:$0xf]  ;;  %v15373_v23 = vld [vmem:[%s16127_s17 + $0x22fc] sm:$0xf0] }
 0x276   : > { %8187 = vmatpush.bf16.msra.mxu3 %v13345_v6  ;;  %v14017_v6 = vor.u32 %v15349_v63, %v14016_v61  ;;  %v14209_v16 = vor.u32 %v15397_v2, %v14208_v0  ;;  %v15331_v61 = vld [vmem:[%s16127_s17 + $0x21ac] sm:$0xf0]  ;;  %v14136_v63 = vld [vmem:[%s16127_s17 + $0x2318] sm:$0xf] }
 0x277   : > { %8149 = vmatpush.bf16.msra.mxu0 %v12745_v13  ;;  %v15295_v13 = vld [vmem:[%s16127_s17 + $0x208c] sm:$0xf0] }
 0x278   : > { %8162 = vmatpush.bf16.msra.mxu1 %v12937_v18  ;;  %v15732_v18 = vld [vmem:[#allocation1 + $0x12] sm:$0xff]  ;;  %v13801_v42 = vor.u32 %v15295_v13, %v13800_v21  ;;  %v15277_v13 = vld [vmem:[%s16127_s17 + $0x1ffc] sm:$0xf0] }
 0x279   : > { %8175 = vmatpush.bf16.msra.mxu2 %v13129_v19  ;;  %v15733_v19 = vld [vmem:[#allocation1 + $0x9] sm:$0xff]  ;;  %v15379_v0 = vld [vmem:[%s16127_s17 + $0x232c] sm:$0xf0] }
 0x27a   : > { %8188 = vmatpush.bf16.msra.mxu3 %v13321_v26  ;;  %v13609_v26 = vor.u32 %v15247_v9, %v13608_v7  ;;  %v13536_v7 = vld [vmem:[%s16127_s17 + $0x1e68] sm:$0xf]  ;;  %v15229_v9 = vld [vmem:[%s16127_s17 + $0x1e7c] sm:$0xf0] }
 0x27b   : > { %8150 = vmatpush.bf16.msra.mxu0 %v12721_v43  ;;  %v15289_v43 = vld [vmem:[%s16127_s17 + $0x205c] sm:$0xf0]  ;;  %v7944_v50 = vpop.f32.mrf.mxu0  ;;  %v13728_v21 = vld [vmem:[%s16127_s17 + $0x1fe8] sm:$0xf] }
 0x27c   : > { %8163 = vmatpush.bf16.msra.mxu1 %v12913_v44  ;;  %v15385_v44 = vld [vmem:[%s16127_s17 + $0x235c] sm:$0xf0]  ;;  %v13777_v51 = vor.u32 %v15289_v43, %v13776_v35  ;;  %v7945_v57 = vadd.f32 %v7944_v50, %v1487_v36  ;;  %v7957_v58 = vpop.f32.mrf.mxu1  ;;  %v15223_v35 = vld [vmem:[%s16127_s17 + $0x1e4c] sm:$0xf0]  ;;  %v13488_v50 = vld [vmem:[%s16127_s17 + $0x1e08] sm:$0xf] }
 0x27d   : > { %8176 = vmatpush.bf16.msra.mxu2 %v13105_v45  ;;  %v13585_v45 = vor.u32 %v15241_v33, %v13584_v30  ;;  %v14161_v1 = vor.u32 %v15385_v44, %v14160_v41  ;;  %v13512_v33 = vld [vmem:[%s16127_s17 + $0x1e38] sm:$0xf]  ;;  %v15271_v43 = vld [vmem:[%s16127_s17 + $0x1fcc] sm:$0xf0] }
 0x27e   : > { %8189 = vmatpush.bf16.msra.mxu3 %v13297_v52  ;;  %8151 = vmatmul.bf16.vlgmr.msra.gmra.mxu0 %v15731_v10  ;;  %v13969_v52 = vor.u32 %v15337_v40, %v13968_v39  ;;  %v7958_v2 = vadd.f32 %v7957_v58, %v7945_v57  ;;  %v13896_v39 = vld [vmem:[%s16127_s17 + $0x2138] sm:$0xf]  ;;  %v15319_v40 = vld [vmem:[%s16127_s17 + $0x214c] sm:$0xf0]  ;;  %v13872_v57 = vld [vmem:[%s16127_s17 + $0x2108] sm:$0xf] }
 0x27f   : > { %8195 = vmatpush.bf16.msrb.mxu0 %v13657_v54  ;;  %8164 = vmatmul.bf16.vlgmr.msra.gmra.mxu1 %v15733_v19  ;;  %v13560_v54 = vld [vmem:[%s16127_s17 + $0x1e98] sm:$0xf]  ;;  %v15367_v44 = vld [vmem:[%s16127_s17 + $0x22cc] sm:$0xf0] }
 0x280   : > { %8208 = vmatpush.bf16.msrb.mxu1 %v13849_v55  ;;  %8177 = vmatmul.bf16.vlgmr.msra.gmra.mxu2 %v15732_v18  ;;  %v15235_v55 = vld [vmem:[%s16127_s17 + $0x1eac] sm:$0xf0]  ;;  %v14088_v41 = vld [vmem:[%s16127_s17 + $0x22b8] sm:$0xf] }
 0x281   : > { %8221 = vmatpush.bf16.msrb.mxu2 %v14041_v56  ;;  %8190 = vmatmul.bf16.vlgmr.msra.gmra.mxu3 %v15734_v24  ;;  %v13752_v56 = vld [vmem:[%s16127_s17 + $0x2018] sm:$0xf]  ;;  %v13537_v24 = vor.u32 %v15229_v9, %v13536_v7  ;;  %v14392_v7 = vld [vmem:[%s16127_s17 + $0x45c] sm:$0xf]  ;;  %v10202_v9 = vld [vmem:[%s16127_s17 + $0x470] sm:$0xf0] }
 0x282   : > { %8234 = vmatpush.bf16.msrb.mxu3 %v14233_v4  ;;  %v15283_v4 = vld [vmem:[%s16127_s17 + $0x202c] sm:$0xf0] }
 0x283   : > { %8196 = vmatpush.bf16.msrb.mxu0 %v13633_v3  ;;  %v13561_v3 = vor.u32 %v15235_v55, %v13560_v54  ;;  %v7970_v10 = vpop.f32.mrf.mxu2  ;;  %v7946_v30 = vpop.f32.mrf.mxu0  ;;  %v13897_v54 = vor.u32 %v15319_v40, %v13896_v39  ;;  %v13680_v55 = vld [vmem:[%s16127_s17 + $0x1f88] sm:$0xf]  ;;  %v14284_v39 = vld [vmem:[%s16127_s17 + $0xfc] sm:$0xf]  ;;  %v9770_v40 = vld [vmem:[%s16127_s17 + $0x110] sm:$0xf0] }
 0x284   : > { %8209 = vmatpush.bf16.msrb.mxu1 %v13825_v5  ;;  %v13753_v5 = vor.u32 %v15283_v4, %v13752_v56  ;;  %v7971_v18 = vadd.f32 %v7970_v10, %v7958_v2  ;;  %v7983_v19 = vpop.f32.mrf.mxu3  ;;  %v7959_v36 = vpop.f32.mrf.mxu1  ;;  %v15265_v56 = vld [vmem:[%s16127_s17 + $0x1f9c] sm:$0xf0]  ;;  %v9818_v2 = vld [vmem:[%s16127_s17 + $0x170] sm:$0xf0] }
 0x285   : > { %8222 = vmatpush.bf16.msrb.mxu2 %v14017_v6  ;;  %v13945_v6 = vor.u32 %v15331_v61, %v13944_v60  ;;  %v15313_v4 = vld [vmem:[%s16127_s17 + $0x211c] sm:$0xf0]  ;;  %v14064_v60 = vld [vmem:[%s16127_s17 + $0x2288] sm:$0xf] }
 0x286   : > { %8235 = vmatpush.bf16.msrb.mxu3 %v14209_v16  ;;  %v14137_v16 = vor.u32 %v15379_v0, %v14136_v63  ;;  %v15361_v61 = vld [vmem:[%s16127_s17 + $0x229c] sm:$0xf0]  ;;  %v14296_v0 = vld [vmem:[%s16127_s17 + $0x15c] sm:$0xf]  ;;  %v13873_v10 = vor.u32 %v15313_v4, %v13872_v57  ;;  %v10346_v57 = vld [vmem:[%s16127_s17 + $0x590] sm:$0xf0] }
 0x287   : > { %8197 = vmatpush.bf16.msrb.mxu0 %v13609_v26  ;;  %v17405_v26 = vadd.f32 %v7983_v19, %v7971_v18  ;;  %v10205_v19 = vor.u32 %v14392_v7, %v10202_v9  ;;  %v14422_v7 = vld [vmem:[%s16127_s17 + $0x54c] sm:$0xf]  ;;  %v10322_v9 = vld [vmem:[%s16127_s17 + $0x560] sm:$0xf0] }
 0x288   : > { %8210 = vmatpush.bf16.msrb.mxu1 %v13801_v42  ;;  %v13729_v42 = vor.u32 %v15277_v13, %v13728_v21  ;;  %v13681_v21 = vor.u32 %v15265_v56, %v13680_v55  ;;  %v10394_v13 = vld [vmem:[%s16127_s17 + $0x5f0] sm:$0xf0]  ;;  %v15738_v55 = vld [vmem:[#allocation1 + $0x2d] sm:$0xff]  ;;  %v14428_v56 = vld [vmem:[%s16127_s17 + $0x57c] sm:$0xf] }
 0x289   : > { %8223 = vmatpush.bf16.msrb.mxu2 %v13993_v22  ;;  %v13921_v22 = vor.u32 %v15325_v17, %v13920_v14  ;;  %v14065_v14 = vor.u32 %v15361_v61, %v14064_v60  ;;  %v9821_v17 = vor.u32 %v14296_v0, %v9818_v2  ;;  %v14278_v61 = vld [vmem:[%s16127_s17 + $0xcc] sm:$0xf]  ;;  %v10349_v2 = vor.u32 %v14428_v56, %v10346_v57 }
 0x28a   : > { %8236 = vmatpush.bf16.msrb.mxu3 %v14185_v37  ;;  %v14113_v37 = vor.u32 %v15373_v23, %v14112_v20  ;;  %v14290_v20 = vld [vmem:[%s16127_s17 + $0x12c] sm:$0xf]  ;;  %v9794_v23 = vld [vmem:[%s16127_s17 + $0x140] sm:$0xf0] }
 0x28b   : > { %8198 = vmatpush.bf16.msrb.mxu0 %v13585_v45  ;;  %v13513_v45 = vor.u32 %v15223_v35, %v13512_v33  ;;  %v7972_v58 = vpop.f32.mrf.mxu2  ;;  %v10178_v33 = vld [vmem:[%s16127_s17 + $0x440] sm:$0xf0]  ;;  %v14434_v35 = vld [vmem:[%s16127_s17 + $0x5ac] sm:$0xf]  ;;  %v9797_v36 = vor.u32 %v14290_v20, %v9794_v23  ;;  %v10325_v23 = vor.u32 %v14422_v7, %v10322_v9  ;;  %v14404_v7 = vld [vmem:[%s16127_s17 + $0x4bc] sm:$0xf] }
 0x28c   : > { %8211 = vmatpush.bf16.msrb.mxu1 %v13777_v51  ;;  %v15217_v51 = vld [vmem:[%s16127_s17 + $0x1e1c] sm:$0xf0]  ;;  %v7985_v63 = vpop.f32.mrf.mxu3  ;;  %v15739_v58 = vld [vmem:[#allocation1 + $0x3f] sm:$0xff]  ;;  %v14326_v0 = vld [vmem:[%s16127_s17 + $0x24c] sm:$0xf] }
 0x28d   : > { %8224 = vmatpush.bf16.msrb.mxu2 %v13969_v52  ;;  %v13705_v52 = vor.u32 %v15271_v43, %v13704_v53  ;;  %v10370_v53 = vld [vmem:[%s16127_s17 + $0x5c0] sm:$0xf0]  ;;  %v10250_v9 = vld [vmem:[%s16127_s17 + $0x4d0] sm:$0xf0] }
 0x28e   : > { %8237 = vmatpush.bf16.msrb.mxu3 %v14161_v1  ;;  %v14089_v1 = vor.u32 %v15367_v44, %v14088_v41  ;;  %v14332_v41 = vld [vmem:[%s16127_s17 + $0x27c] sm:$0xf]  ;;  %v9746_v63 = vld [vmem:[%s16127_s17 + $0xe0] sm:$0xf0] }
 0x28f   : > { %8199 = vmatpush.bf16.msrb.mxu0 %v13561_v3  ;;  %v14344_v3 = vld [vmem:[%s16127_s17 + $0x2dc] sm:$0xf] }
 0x290   : > { %8212 = vmatpush.bf16.msrb.mxu1 %v13753_v5  ;;  %v13489_v5 = vor.u32 %v15217_v51, %v13488_v50  ;;  %v15736_v44 = vld [vmem:[#allocation1 + $0x24] sm:$0xff]  ;;  %v9962_v50 = vld [vmem:[%s16127_s17 + $0x290] sm:$0xf0] }
 0x291   : > { %8225 = vmatpush.bf16.msrb.mxu2 %v13945_v6  ;;  %v10010_v6 = vld [vmem:[%s16127_s17 + $0x2f0] sm:$0xf0]  ;;  %v14380_v51 = vld [vmem:[%s16127_s17 + $0x3fc] sm:$0xf]  ;;  %v9965_v4 = vor.u32 %v14332_v41, %v9962_v50  ;;  %v10082_v50 = vld [vmem:[%s16127_s17 + $0x380] sm:$0xf0] }
 0x292   : > { %8238 = vmatpush.bf16.msrb.mxu3 %v14137_v16  ;;  %v14440_v16 = vld [vmem:[%s16127_s17 + $0x5dc] sm:$0xf]  ;;  %v10013_v18 = vor.u32 %v14344_v3, %v10010_v6  ;;  %v9938_v3 = vld [vmem:[%s16127_s17 + $0x260] sm:$0xf0] }
 0x293   : > { %8200 = vmatpush.bf16.msrb.mxu0 %v13537_v24  ;;  %v14338_v24 = vld [vmem:[%s16127_s17 + $0x2ac] sm:$0xf]  ;;  %v10397_v30 = vor.u32 %v14440_v16, %v10394_v13  ;;  %v10130_v6 = vld [vmem:[%s16127_s17 + $0x3e0] sm:$0xf0]  ;;  %v9941_v16 = vor.u32 %v14326_v0, %v9938_v3  ;;  %v9866_v3 = vld [vmem:[%s16127_s17 + $0x1d0] sm:$0xf0] }
 0x294   : > { %8213 = vmatpush.bf16.msrb.mxu1 %v13729_v42  ;;  %v9986_v42 = vld [vmem:[%s16127_s17 + $0x2c0] sm:$0xf0] }
 0x295   : > { %8226 = vmatpush.bf16.msrb.mxu2 %v13921_v22  ;;  %v14386_v22 = vld [vmem:[%s16127_s17 + $0x42c] sm:$0xf] }
 0x296   : > { %8239 = vmatpush.bf16.msrb.mxu3 %v14113_v37  ;;  %v9989_v37 = vor.u32 %v14338_v24, %v9986_v42  ;;  %v10181_v43 = vor.u32 %v14386_v22, %v10178_v33  ;;  %v9914_v24 = vld [vmem:[%s16127_s17 + $0x230] sm:$0xf0]  ;;  %v14416_v22 = vld [vmem:[%s16127_s17 + $0x51c] sm:$0xf] }
 0x297   : > { %8201 = vmatpush.bf16.msrb.mxu0 %v13513_v45  ;;  %v10373_v45 = vor.u32 %v14434_v35, %v10370_v53  ;;  %v10106_v42 = vld [vmem:[%s16127_s17 + $0x3b0] sm:$0xf0] }
 0x298   : > { %8214 = vmatpush.bf16.msrb.mxu1 %v13705_v52  ;;  %v10154_v52 = vld [vmem:[%s16127_s17 + $0x410] sm:$0xf0] }
 0x299   : > { %8227 = vmatpush.bf16.msrb.mxu2 %v13897_v54  ;;  %v15737_v54 = vld [vmem:[#allocation1 + $0x36] sm:$0xff]  ;;  %v10157_v60 = vor.u32 %v14380_v51, %v10154_v52 }
 0x29a   : > { %8240 = vmatpush.bf16.msrb.mxu3 %v14089_v1  ;;  %v9773_v1 = vor.u32 %v14284_v39, %v9770_v40  ;;  %v10298_v33 = vld [vmem:[%s16127_s17 + $0x530] sm:$0xf0]  ;;  %v14314_v39 = vld [vmem:[%s16127_s17 + $0x1ec] sm:$0xf] }
 0x29b   : > { %8202 = vmatpush.bf16.msrb.mxu0 %v13489_v5  ;;  %v14374_v5 = vld [vmem:[%s16127_s17 + $0x3cc] sm:$0xf]  ;;  %v10301_v41 = vor.u32 %v14416_v22, %v10298_v33  ;;  %v14488_v33 = vld [vmem:[%s16127_s17 + $0x75c] sm:$0xf] }
 0x29c   : > { %8215 = vmatpush.bf16.msrb.mxu1 %v13681_v21  ;;  %v9749_v21 = vor.u32 %v14278_v61, %v9746_v63  ;;  %v10133_v13 = vor.u32 %v14374_v5, %v10130_v6  ;;  %v8009_v20 = vpop.f32.mrf.mxu1  ;;  %v9674_v61 = vld [vmem:[%s16127_s17 + $0x50] sm:$0xf0]  ;;  %v14308_v63 = vld [vmem:[%s16127_s17 + $0x1bc] sm:$0xf] }
 0x29d   : > { %8228 = vmatpush.bf16.msrb.mxu2 %v13873_v10  ;;  %v7996_v10 = vpop.f32.mrf.mxu0  ;;  %v14356_v5 = vld [vmem:[%s16127_s17 + $0x33c] sm:$0xf]  ;;  %v10058_v6 = vld [vmem:[%s16127_s17 + $0x350] sm:$0xf0] }
 0x29e   : > { %8241 = vmatpush.bf16.msrb.mxu3 %v14065_v14  ;;  %8203 = vmatmul.bf16.vlgmr.msrb.gmra.mxu0 %v15736_v44  ;;  %v14272_v14 = vld [vmem:[%s16127_s17 + $0x9c] sm:$0xf]  ;;  %v9890_v44 = vld [vmem:[%s16127_s17 + $0x200] sm:$0xf0] }
 0x29f   : > { %8247 = vmatpush.bf16.msra.mxu0 %v9821_v17  ;;  %8216 = vmatmul.bf16.vlgmr.msrb.gmra.mxu1 %v15738_v55  ;;  %v9722_v17 = vld [vmem:[%s16127_s17 + $0xb0] sm:$0xf0]  ;;  %v10274_v55 = vld [vmem:[%s16127_s17 + $0x500] sm:$0xf0] }
 0x2a0   : > { %8260 = vmatpush.bf16.msra.mxu1 %v10013_v18  ;;  %8229 = vmatmul.bf16.vlgmr.msrb.gmra.mxu2 %v15737_v54  ;;  %v14320_v18 = vld [vmem:[%s16127_s17 + $0x21c] sm:$0xf]  ;;  %v9725_v53 = vor.u32 %v14272_v14, %v9722_v17  ;;  %v14410_v54 = vld [vmem:[%s16127_s17 + $0x4ec] sm:$0xf]  ;;  %v10061_v14 = vor.u32 %v14356_v5, %v10058_v6  ;;  %v10538_v6 = vld [vmem:[%s16127_s17 + $0x710] sm:$0xf0] }
 0x2a1   : > { %8273 = vmatpush.bf16.msra.mxu2 %v10205_v19  ;;  %8242 = vmatmul.bf16.vlgmr.msrb.gmra.mxu3 %v15739_v58  ;;  %v7997_v19 = vadd.f32 %v7996_v10, %v17405_v26  ;;  %v9917_v26 = vor.u32 %v14320_v18, %v9914_v24  ;;  %v14254_v10 = vld [vmem:[%s16127_s17 + $0xc] sm:$0xf]  ;;  %v9842_v18 = vld [vmem:[%s16127_s17 + $0x1a0] sm:$0xf0]  ;;  %v14476_v5 = vld [vmem:[%s16127_s17 + $0x6fc] sm:$0xf] }
 0x2a2   : > { %8286 = vmatpush.bf16.msra.mxu3 %v10397_v30  ;;  %v14368_v30 = vld [vmem:[%s16127_s17 + $0x39c] sm:$0xf]  ;;  %v14302_v17 = vld [vmem:[%s16127_s17 + $0x18c] sm:$0xf]  ;;  %v10034_v24 = vld [vmem:[%s16127_s17 + $0x320] sm:$0xf0] }
 0x2a3   : > { %8248 = vmatpush.bf16.msra.mxu0 %v9797_v36  ;;  %v8010_v35 = vadd.f32 %v8009_v20, %v7997_v19  ;;  %v10109_v36 = vor.u32 %v14368_v30, %v10106_v42  ;;  %v8022_v40 = vpop.f32.mrf.mxu2  ;;  %v14350_v19 = vld [vmem:[%s16127_s17 + $0x30c] sm:$0xf]  ;;  %v10226_v42 = vld [vmem:[%s16127_s17 + $0x4a0] sm:$0xf0] }
 0x2a4   : > { %8261 = vmatpush.bf16.msra.mxu1 %v9989_v37  ;;  %v14266_v37 = vld [vmem:[%s16127_s17 + $0x6c] sm:$0xf]  ;;  %v8035_v52 = vpop.f32.mrf.mxu3  ;;  %v8011_v0 = vpop.f32.mrf.mxu1 }
 0x2a5   : > { %8274 = vmatpush.bf16.msra.mxu2 %v10181_v43  ;;  %v9698_v43 = vld [vmem:[%s16127_s17 + $0x80] sm:$0xf0]  ;;  %v8023_v51 = vadd.f32 %v8022_v40, %v8010_v35  ;;  %v7998_v58 = vpop.f32.mrf.mxu0  ;;  %v14398_v30 = vld [vmem:[%s16127_s17 + $0x48c] sm:$0xf]  ;;  %v10586_v35 = vld [vmem:[%s16127_s17 + $0x770] sm:$0xf0]  ;;  %v10037_v40 = vor.u32 %v14350_v19, %v10034_v24 }
 0x2a6   : > { %8287 = vmatpush.bf16.msra.mxu3 %v10373_v45  ;;  %v14362_v45 = vld [vmem:[%s16127_s17 + $0x36c] sm:$0xf]  ;;  %v9701_v56 = vor.u32 %v14266_v37, %v9698_v43  ;;  %v14584_v37 = vld [vmem:[%s16127_s17 + $0xa5c] sm:$0xf]  ;;  %v10970_v43 = vld [vmem:[%s16127_s17 + $0xa70] sm:$0xf0] }
 0x2a7   : > { %8249 = vmatpush.bf16.msra.mxu0 %v9773_v1  ;;  %v17472_v57 = vadd.f32 %v8035_v52, %v8023_v51  ;;  %v9893_v1 = vor.u32 %v14314_v39, %v9890_v44  ;;  %v9845_v39 = vor.u32 %v14302_v17, %v9842_v18  ;;  %v11162_v44 = vld [vmem:[%s16127_s17 + $0xbf0] sm:$0xf0]  ;;  %v10973_v52 = vor.u32 %v14584_v37, %v10970_v43  ;;  %v14518_v24 = vld [vmem:[%s16127_s17 + $0x84c] sm:$0xf] }
 0x2a8   : > { %8262 = vmatpush.bf16.msra.mxu1 %v9965_v4  ;;  %v10085_v4 = vor.u32 %v14362_v45, %v10082_v50  ;;  %v10229_v45 = vor.u32 %v14398_v30, %v10226_v42  ;;  %v10589_v50 = vor.u32 %v14488_v33, %v10586_v35  ;;  %v10541_v17 = vor.u32 %v14476_v5, %v10538_v6  ;;  %v10706_v42 = vld [vmem:[%s16127_s17 + $0x860] sm:$0xf0]  ;;  %v14554_v5 = vld [vmem:[%s16127_s17 + $0x96c] sm:$0xf] }
 0x2a9   : > { %8275 = vmatpush.bf16.msra.mxu2 %v10157_v60  ;;  %v14260_v60 = vld [vmem:[%s16127_s17 + $0x3c] sm:$0xf]  ;;  %v10898_v33 = vld [vmem:[%s16127_s17 + $0x9e0] sm:$0xf0] }
 0x2aa   : > { %8288 = vmatpush.bf16.msra.mxu3 %v10349_v2  ;;  %v10277_v2 = vor.u32 %v14410_v54, %v10274_v55  ;;  %v14482_v54 = vld [vmem:[%s16127_s17 + $0x72c] sm:$0xf]  ;;  %v10562_v55 = vld [vmem:[%s16127_s17 + $0x740] sm:$0xf0] }
 0x2ab   : > { %8250 = vmatpush.bf16.msra.mxu0 %v9749_v21  ;;  %v9677_v21 = vor.u32 %v14260_v60, %v9674_v61  ;;  %v8024_v20 = vpop.f32.mrf.mxu2  ;;  %v10946_v60 = vld [vmem:[%s16127_s17 + $0xa40] sm:$0xf0]  ;;  %v14626_v61 = vld [vmem:[%s16127_s17 + $0xbac] sm:$0xf]  ;;  %v10565_v0 = vor.u32 %v14482_v54, %v10562_v55  ;;  %v14560_v54 = vld [vmem:[%s16127_s17 + $0x99c] sm:$0xf] }
 0x2ac   : > { %8263 = vmatpush.bf16.msra.mxu1 %v9941_v16  ;;  %v9650_v16 = vld [vmem:[%s16127_s17 + $0x20] sm:$0xf0]  ;;  %v8037_v22 = vpop.f32.mrf.mxu3  ;;  %v14470_v20 = vld [vmem:[%s16127_s17 + $0x6cc] sm:$0xf]  ;;  %v14608_v55 = vld [vmem:[%s16127_s17 + $0xb1c] sm:$0xf] }
 0x2ad   : > { %8276 = vmatpush.bf16.msra.mxu2 %v10133_v13  ;;  %v9869_v13 = vor.u32 %v14308_v63, %v9866_v3  ;;  %v11138_v63 = vld [vmem:[%s16127_s17 + $0xbc0] sm:$0xf0]  ;;  %v14566_v22 = vld [vmem:[%s16127_s17 + $0x9cc] sm:$0xf] }
 0x2ae   : > { %8289 = vmatpush.bf16.msra.mxu3 %v10325_v23  ;;  %v10253_v23 = vor.u32 %v14404_v7, %v10250_v9  ;;  %v14524_v7 = vld [vmem:[%s16127_s17 + $0x87c] sm:$0xf]  ;;  %v11141_v9 = vor.u32 %v14626_v61, %v11138_v63  ;;  %v10466_v61 = vld [vmem:[%s16127_s17 + $0x680] sm:$0xf0]  ;;  %v14506_v63 = vld [vmem:[%s16127_s17 + $0x7ec] sm:$0xf] }
 0x2af   : > { %8251 = vmatpush.bf16.msra.mxu0 %v9725_v53  ;;  %v14536_v53 = vld [vmem:[%s16127_s17 + $0x8dc] sm:$0xf]  ;;  %v10850_v6 = vld [vmem:[%s16127_s17 + $0x980] sm:$0xf0] }
 0x2b0   : > { %8264 = vmatpush.bf16.msra.mxu1 %v9917_v26  ;;  %v9653_v26 = vor.u32 %v14254_v10, %v9650_v16  ;;  %v14572_v10 = vld [vmem:[%s16127_s17 + $0x9fc] sm:$0xf]  ;;  %v10922_v16 = vld [vmem:[%s16127_s17 + $0xa10] sm:$0xf0] }
 0x2b1   : > { %8277 = vmatpush.bf16.msra.mxu2 %v10109_v36  ;;  %v10778_v36 = vld [vmem:[%s16127_s17 + $0x8f0] sm:$0xf0]  ;;  %v10925_v19 = vor.u32 %v14572_v10, %v10922_v16  ;;  %v11042_v10 = vld [vmem:[%s16127_s17 + $0xb00] sm:$0xf0] }
 0x2b2   : > { %8290 = vmatpush.bf16.msra.mxu3 %v10301_v41  ;;  %v14632_v41 = vld [vmem:[%s16127_s17 + $0xbdc] sm:$0xf]  ;;  %v10781_v51 = vor.u32 %v14536_v53, %v10778_v36  ;;  %v14614_v53 = vld [vmem:[%s16127_s17 + $0xb4c] sm:$0xf] }
 0x2b3   : > { %8252 = vmatpush.bf16.msra.mxu0 %v9701_v56  ;;  %v14530_v56 = vld [vmem:[%s16127_s17 + $0x8ac] sm:$0xf]  ;;  %v11165_v58 = vor.u32 %v14632_v41, %v11162_v44  ;;  %v14464_v41 = vld [vmem:[%s16127_s17 + $0x69c] sm:$0xf]  ;;  %v10490_v44 = vld [vmem:[%s16127_s17 + $0x6b0] sm:$0xf0] }
 0x2b4   : > { %8265 = vmatpush.bf16.msra.mxu1 %v9893_v1  ;;  %v10754_v1 = vld [vmem:[%s16127_s17 + $0x8c0] sm:$0xf0] }
 0x2b5   : > { %8278 = vmatpush.bf16.msra.mxu2 %v10085_v4  ;;  %v14578_v4 = vld [vmem:[%s16127_s17 + $0xa2c] sm:$0xf] }
 0x2b6   : > { %8291 = vmatpush.bf16.msra.mxu3 %v10277_v2  ;;  %v10757_v2 = vor.u32 %v14530_v56, %v10754_v1  ;;  %v10949_v3 = vor.u32 %v14578_v4, %v10946_v60  ;;  %v11066_v56 = vld [vmem:[%s16127_s17 + $0xb30] sm:$0xf0]  ;;  %v14458_v60 = vld [vmem:[%s16127_s17 + $0x66c] sm:$0xf] }
 0x2b7   : > { %8253 = vmatpush.bf16.msra.mxu0 %v9677_v21  ;;  %v10730_v21 = vld [vmem:[%s16127_s17 + $0x890] sm:$0xf0] }
 0x2b8   : > { %8266 = vmatpush.bf16.msra.mxu1 %v9869_v13  ;;  %v14620_v13 = vld [vmem:[%s16127_s17 + $0xb7c] sm:$0xf]  ;;  %v10733_v18 = vor.u32 %v14524_v7, %v10730_v21  ;;  %v14602_v21 = vld [vmem:[%s16127_s17 + $0xaec] sm:$0xf] }
 0x2b9   : > { %8279 = vmatpush.bf16.msra.mxu2 %v10061_v14  ;;  %v11114_v14 = vld [vmem:[%s16127_s17 + $0xb90] sm:$0xf0] }
 0x2ba   : > { %8292 = vmatpush.bf16.msra.mxu3 %v10253_v23  ;;  %v10514_v23 = vld [vmem:[%s16127_s17 + $0x6e0] sm:$0xf0]  ;;  %v11117_v30 = vor.u32 %v14620_v13, %v11114_v14  ;;  %v10469_v13 = vor.u32 %v14458_v60, %v10466_v61  ;;  %v14776_v60 = vld [vmem:[%s16127_s17 + $0x105c] sm:$0xf]  ;;  %v11738_v61 = vld [vmem:[%s16127_s17 + $0x1070] sm:$0xf0] }
 0x2bb   : > { %8254 = vmatpush.bf16.msra.mxu0 %v9653_v26  ;;  %v8048_v35 = vpop.f32.mrf.mxu0  ;;  %v11090_v26 = vld [vmem:[%s16127_s17 + $0xb60] sm:$0xf0]  ;;  %v10517_v37 = vor.u32 %v14470_v20, %v10514_v23  ;;  %v14452_v20 = vld [vmem:[%s16127_s17 + $0x63c] sm:$0xf]  ;;  %v10442_v23 = vld [vmem:[%s16127_s17 + $0x650] sm:$0xf0] }
 0x2bc   : > { %8267 = vmatpush.bf16.msra.mxu1 %v9845_v39  ;;  %v8049_v36 = vadd.f32 %v8048_v35, %v17472_v57  ;;  %v8061_v43 = vpop.f32.mrf.mxu1  ;;  %v10709_v39 = vor.u32 %v14518_v24, %v10706_v42  ;;  %v10874_v57 = vld [vmem:[%s16127_s17 + $0x9b0] sm:$0xf0]  ;;  %v14500_v24 = vld [vmem:[%s16127_s17 + $0x7bc] sm:$0xf] }
 0x2bd   : > { %8280 = vmatpush.bf16.msra.mxu2 %v10037_v40  ;;  %v10901_v40 = vor.u32 %v14566_v22, %v10898_v33  ;;  %v10877_v4 = vor.u32 %v14560_v54, %v10874_v57  ;;  %v10634_v42 = vld [vmem:[%s16127_s17 + $0x7d0] sm:$0xf0]  ;;  %v14548_v22 = vld [vmem:[%s16127_s17 + $0x93c] sm:$0xf] }
 0x2be   : > { %8293 = vmatpush.bf16.msra.mxu3 %v10229_v45  ;;  %8255 = vmatmul.bf16.vlgmr.msra.gmra.mxu0 %v16256_v28  ;;  %v14512_v45 = vld [vmem:[%s16127_s17 + $0x81c] sm:$0xf]  ;;  %v10826_v33 = vld [vmem:[%s16127_s17 + $0x950] sm:$0xf0] }
 0x2bf   : > { %8299 = vmatpush.bf16.msrb.mxu0 %v10589_v50  ;;  %8268 = vmatmul.bf16.vlgmr.msra.gmra.mxu1 %v16262_v34  ;;  %v11093_v50 = vor.u32 %v14614_v53, %v11090_v26  ;;  %v14596_v35 = vld [vmem:[%s16127_s17 + $0xabc] sm:$0xf]  ;;  %v11018_v53 = vld [vmem:[%s16127_s17 + $0xad0] sm:$0xf0]  ;;  %v10445_v26 = vor.u32 %v14452_v20, %v10442_v23  ;;  %v14818_v20 = vld [vmem:[%s16127_s17 + $0x11ac] sm:$0xf] }
 0x2c0   : > { %8312 = vmatpush.bf16.msrb.mxu1 %v10781_v51  ;;  %8281 = vmatmul.bf16.vlgmr.msra.gmra.mxu2 %v16254_v27  ;;  %v8062_v51 = vadd.f32 %v8061_v43, %v8049_v36  ;;  %v14446_v36 = vld [vmem:[%s16127_s17 + $0x60c] sm:$0xf]  ;;  %v10637_v43 = vor.u32 %v14500_v24, %v10634_v42  ;;  %v14680_v57 = vld [vmem:[%s16127_s17 + $0xd5c] sm:$0xf]  ;;  %v11906_v23 = vld [vmem:[%s16127_s17 + $0x11c0] sm:$0xf0] }
 0x2c1   : > { %8325 = vmatpush.bf16.msrb.mxu2 %v10973_v52  ;;  %8294 = vmatmul.bf16.vlgmr.msra.gmra.mxu3 %v16258_v29  ;;  %v10682_v52 = vld [vmem:[%s16127_s17 + $0x830] sm:$0xf0] }
 0x2c2   : > { %8338 = vmatpush.bf16.msrb.mxu3 %v11165_v58  ;;  %v10493_v58 = vor.u32 %v14464_v41, %v10490_v44  ;;  %v10685_v1 = vor.u32 %v14512_v45, %v10682_v52  ;;  %v10610_v41 = vld [vmem:[%s16127_s17 + $0x7a0] sm:$0xf0]  ;;  %v14542_v44 = vld [vmem:[%s16127_s17 + $0x90c] sm:$0xf]  ;;  %v11021_v45 = vor.u32 %v14596_v35, %v11018_v53  ;;  %v14716_v35 = vld [vmem:[%s16127_s17 + $0xe7c] sm:$0xf]  ;;  %v11909_v53 = vor.u32 %v14818_v20, %v11906_v23 }
 0x2c3   : > { %8300 = vmatpush.bf16.msrb.mxu0 %v10565_v0  ;;  %v11069_v0 = vor.u32 %v14608_v55, %v11066_v56  ;;  %v8050_v16 = vpop.f32.mrf.mxu0  ;;  %v10994_v52 = vld [vmem:[%s16127_s17 + $0xaa0] sm:$0xf0]  ;;  %v11354_v55 = vld [vmem:[%s16127_s17 + $0xd70] sm:$0xf0]  ;;  %v14728_v56 = vld [vmem:[%s16127_s17 + $0xedc] sm:$0xf] }
 0x2c4   : > { %8313 = vmatpush.bf16.msrb.mxu1 %v10757_v2  ;;  %v8074_v2 = vpop.f32.mrf.mxu2  ;;  %v8063_v14 = vpop.f32.mrf.mxu1  ;;  %v14722_v16 = vld [vmem:[%s16127_s17 + $0xeac] sm:$0xf]  ;;  %v11234_v20 = vld [vmem:[%s16127_s17 + $0xc80] sm:$0xf0] }
 0x2c5   : > { %8326 = vmatpush.bf16.msrb.mxu2 %v10949_v3  ;;  %v10658_v3 = vld [vmem:[%s16127_s17 + $0x800] sm:$0xf0]  ;;  %v8075_v7 = vadd.f32 %v8074_v2, %v8062_v51  ;;  %v14590_v51 = vld [vmem:[%s16127_s17 + $0xa8c] sm:$0xf]  ;;  %v14824_v2 = vld [vmem:[%s16127_s17 + $0x11dc] sm:$0xf] }
 0x2c6   : > { %8339 = vmatpush.bf16.msrb.mxu3 %v11141_v9  ;;  %v8087_v9 = vpop.f32.mrf.mxu3  ;;  %v11522_v14 = vld [vmem:[%s16127_s17 + $0xec0] sm:$0xf0]  ;;  %v14698_v23 = vld [vmem:[%s16127_s17 + $0xdec] sm:$0xf] }
 0x2c7   : > { %8301 = vmatpush.bf16.msrb.mxu0 %v10541_v17  ;;  %v17543_v17 = vadd.f32 %v8087_v9, %v8075_v7  ;;  %v11741_v9 = vor.u32 %v14776_v60, %v11738_v61 }
 0x2c8   : > { %8314 = vmatpush.bf16.msrb.mxu1 %v10733_v18  ;;  %v10661_v18 = vor.u32 %v14506_v63, %v10658_v3  ;;  %v11930_v3 = vld [vmem:[%s16127_s17 + $0x11f0] sm:$0xf0] }
 0x2c9   : > { %8327 = vmatpush.bf16.msrb.mxu2 %v10925_v19  ;;  %v10853_v19 = vor.u32 %v14554_v5, %v10850_v6  ;;  %v10997_v5 = vor.u32 %v14590_v51, %v10994_v52  ;;  %v11357_v6 = vor.u32 %v14680_v57, %v11354_v55  ;;  %v14710_v51 = vld [vmem:[%s16127_s17 + $0xe4c] sm:$0xf]  ;;  %v11666_v55 = vld [vmem:[%s16127_s17 + $0xfe0] sm:$0xf0] }
 0x2ca   : > { %8340 = vmatpush.bf16.msrb.mxu3 %v11117_v30  ;;  %v11045_v30 = vor.u32 %v14602_v21, %v11042_v10  ;;  %v14674_v21 = vld [vmem:[%s16127_s17 + $0xd2c] sm:$0xf]  ;;  %v11330_v10 = vld [vmem:[%s16127_s17 + $0xd40] sm:$0xf0] }
 0x2cb   : > { %8302 = vmatpush.bf16.msrb.mxu0 %v10517_v37  ;;  %v10418_v37 = vld [vmem:[%s16127_s17 + $0x620] sm:$0xf0]  ;;  %v11333_v24 = vor.u32 %v14674_v21, %v11330_v10  ;;  %v14758_v57 = vld [vmem:[%s16127_s17 + $0xfcc] sm:$0xf]  ;;  %v14752_v21 = vld [vmem:[%s16127_s17 + $0xf9c] sm:$0xf] }
 0x2cc   : > { %8315 = vmatpush.bf16.msrb.mxu1 %v10709_v39  ;;  %v10829_v39 = vor.u32 %v14548_v22, %v10826_v33  ;;  %v8076_v54 = vpop.f32.mrf.mxu2  ;;  %v14668_v22 = vld [vmem:[%s16127_s17 + $0xcfc] sm:$0xf]  ;;  %v11306_v33 = vld [vmem:[%s16127_s17 + $0xd10] sm:$0xf0] }
 0x2cd   : > { %8328 = vmatpush.bf16.msrb.mxu2 %v10901_v40  ;;  %v14494_v40 = vld [vmem:[%s16127_s17 + $0x78c] sm:$0xf]  ;;  %v11474_v54 = vld [vmem:[%s16127_s17 + $0xe60] sm:$0xf0]  ;;  %v14800_v10 = vld [vmem:[%s16127_s17 + $0x111c] sm:$0xf] }
 0x2ce   : > { %8341 = vmatpush.bf16.msrb.mxu3 %v11093_v50  ;;  %v10802_v50 = vld [vmem:[%s16127_s17 + $0x920] sm:$0xf0]  ;;  %v10613_v63 = vor.u32 %v14494_v40, %v10610_v41  ;;  %v11309_v40 = vor.u32 %v14668_v22, %v11306_v33  ;;  %v14746_v22 = vld [vmem:[%s16127_s17 + $0xf6c] sm:$0xf] }
 0x2cf   : > { %8303 = vmatpush.bf16.msrb.mxu0 %v10493_v58  ;;  %v8089_v58 = vpop.f32.mrf.mxu3  ;;  %v11618_v33 = vld [vmem:[%s16127_s17 + $0xf80] sm:$0xf0] }
 0x2d0   : > { %8316 = vmatpush.bf16.msrb.mxu1 %v10685_v1  ;;  %v10421_v1 = vor.u32 %v14446_v36, %v10418_v37  ;;  %v14764_v36 = vld [vmem:[%s16127_s17 + $0xffc] sm:$0xf]  ;;  %v11690_v37 = vld [vmem:[%s16127_s17 + $0x1010] sm:$0xf0]  ;;  %v14806_v58 = vld [vmem:[%s16127_s17 + $0x114c] sm:$0xf] }
 0x2d1   : > { %8329 = vmatpush.bf16.msrb.mxu2 %v10877_v4  ;;  %v11546_v4 = vld [vmem:[%s16127_s17 + $0xef0] sm:$0xf0] }
 0x2d2   : > { %8342 = vmatpush.bf16.msrb.mxu3 %v11069_v0  ;;  %v10805_v0 = vor.u32 %v14542_v44, %v10802_v50  ;;  %v11549_v7 = vor.u32 %v14728_v56, %v11546_v4  ;;  %v11693_v44 = vor.u32 %v14764_v36, %v11690_v37  ;;  %v11282_v50 = vld [vmem:[%s16127_s17 + $0xce0] sm:$0xf0] }
 0x2d3   : > { %8304 = vmatpush.bf16.msrb.mxu0 %v10469_v13  ;;  %v11933_v13 = vor.u32 %v14824_v2, %v11930_v3  ;;  %v14656_v2 = vld [vmem:[%s16127_s17 + $0xc9c] sm:$0xf]  ;;  %v11258_v3 = vld [vmem:[%s16127_s17 + $0xcb0] sm:$0xf0]  ;;  %v11810_v36 = vld [vmem:[%s16127_s17 + $0x1100] sm:$0xf0] }
 0x2d4   : > { %8317 = vmatpush.bf16.msrb.mxu1 %v10661_v18  ;;  %v14770_v18 = vld [vmem:[%s16127_s17 + $0x102c] sm:$0xf] }
 0x2d5   : > { %8330 = vmatpush.bf16.msrb.mxu2 %v10853_v19  ;;  %v11714_v19 = vld [vmem:[%s16127_s17 + $0x1040] sm:$0xf0] }
 0x2d6   : > { %8343 = vmatpush.bf16.msrb.mxu3 %v11045_v30  ;;  %v11525_v30 = vor.u32 %v14722_v16, %v11522_v14  ;;  %v11717_v42 = vor.u32 %v14770_v18, %v11714_v19  ;;  %v11834_v16 = vld [vmem:[%s16127_s17 + $0x1130] sm:$0xf0]  ;;  %v14650_v19 = vld [vmem:[%s16127_s17 + $0xc6c] sm:$0xf] }
 0x2d7   : > { %8305 = vmatpush.bf16.msrb.mxu0 %v10445_v26  ;;  %v11498_v26 = vld [vmem:[%s16127_s17 + $0xe90] sm:$0xf0] }
 0x2d8   : > { %8318 = vmatpush.bf16.msrb.mxu1 %v10637_v43  ;;  %v14812_v43 = vld [vmem:[%s16127_s17 + $0x117c] sm:$0xf]  ;;  %v11501_v41 = vor.u32 %v14716_v35, %v11498_v26  ;;  %v14794_v26 = vld [vmem:[%s16127_s17 + $0x10ec] sm:$0xf] }
 0x2d9   : > { %8331 = vmatpush.bf16.msrb.mxu2 %v10829_v39  ;;  %v11882_v39 = vld [vmem:[%s16127_s17 + $0x1190] sm:$0xf0] }
 0x2da   : > { %8344 = vmatpush.bf16.msrb.mxu3 %v11021_v45  ;;  %v14662_v45 = vld [vmem:[%s16127_s17 + $0xccc] sm:$0xf]  ;;  %v11885_v52 = vor.u32 %v14812_v43, %v11882_v39  ;;  %v11237_v43 = vor.u32 %v14650_v19, %v11234_v20  ;;  %v14968_v19 = vld [vmem:[%s16127_s17 + $0x165c] sm:$0xf]  ;;  %v12506_v20 = vld [vmem:[%s16127_s17 + $0x1670] sm:$0xf0] }
 0x2db   : > { %8306 = vmatpush.bf16.msrb.mxu0 %v10421_v1  ;;  %v8100_v56 = vpop.f32.mrf.mxu0  ;;  %v11858_v1 = vld [vmem:[%s16127_s17 + $0x1160] sm:$0xf0]  ;;  %v11285_v60 = vor.u32 %v14662_v45, %v11282_v50  ;;  %v14644_v45 = vld [vmem:[%s16127_s17 + $0xc3c] sm:$0xf]  ;;  %v11210_v50 = vld [vmem:[%s16127_s17 + $0xc50] sm:$0xf0] }
 0x2dc   : > { %8319 = vmatpush.bf16.msrb.mxu1 %v10613_v63  ;;  %v8101_v4 = vadd.f32 %v8100_v56, %v17543_v17  ;;  %v8113_v61 = vpop.f32.mrf.mxu1  ;;  %v11477_v63 = vor.u32 %v14710_v51, %v11474_v54  ;;  %v11642_v17 = vld [vmem:[%s16127_s17 + $0xfb0] sm:$0xf0]  ;;  %v14692_v51 = vld [vmem:[%s16127_s17 + $0xdbc] sm:$0xf] }
 0x2dd   : > { %8332 = vmatpush.bf16.msrb.mxu2 %v10805_v0  ;;  %v11669_v0 = vor.u32 %v14758_v57, %v11666_v55  ;;  %v11645_v18 = vor.u32 %v14752_v21, %v11642_v17  ;;  %v11402_v54 = vld [vmem:[%s16127_s17 + $0xdd0] sm:$0xf0]  ;;  %v14740_v57 = vld [vmem:[%s16127_s17 + $0xf3c] sm:$0xf] }
 0x2de   : > { %8345 = vmatpush.bf16.msrb.mxu3 %v10997_v5  ;;  %8307 = vmatmul.bf16.vlgmr.msrb.gmra.mxu0 %v16308_v31  ;;  %v14704_v5 = vld [vmem:[%s16127_s17 + $0xe1c] sm:$0xf]  ;;  %v11594_v55 = vld [vmem:[%s16127_s17 + $0xf50] sm:$0xf0] }
 0x2df   : > { %8351 = vmatpush.bf16.msra.mxu0 %v11357_v6  ;;  %8320 = vmatmul.bf16.vlgmr.msrb.gmra.mxu1 %v16314_v38  ;;  %v11861_v6 = vor.u32 %v14806_v58, %v11858_v1  ;;  %v14788_v56 = vld [vmem:[%s16127_s17 + $0x10bc] sm:$0xf]  ;;  %v11786_v58 = vld [vmem:[%s16127_s17 + $0x10d0] sm:$0xf0]  ;;  %v11213_v1 = vor.u32 %v14644_v45, %v11210_v50  ;;  %v15010_v45 = vld [vmem:[%s16127_s17 + $0x17ac] sm:$0xf] }
 0x2e0   : > { %8364 = vmatpush.bf16.msra.mxu1 %v11549_v7  ;;  %8333 = vmatmul.bf16.vlgmr.msrb.gmra.mxu2 %v16305_v25  ;;  %v8114_v7 = vadd.f32 %v8113_v61, %v8101_v4  ;;  %v14638_v4 = vld [vmem:[%s16127_s17 + $0xc0c] sm:$0xf]  ;;  %v11405_v61 = vor.u32 %v14692_v51, %v11402_v54  ;;  %v14872_v17 = vld [vmem:[%s16127_s17 + $0x135c] sm:$0xf]  ;;  %v12674_v50 = vld [vmem:[%s16127_s17 + $0x17c0] sm:$0xf0] }
 0x2e1   : > { %8377 = vmatpush.bf16.msra.mxu2 %v11741_v9  ;;  %8346 = vmatmul.bf16.vlgmr.msrb.gmra.mxu3 %v16310_v32  ;;  %v11450_v9 = vld [vmem:[%s16127_s17 + $0xe30] sm:$0xf0] }
 0x2e2   : > { %8390 = vmatpush.bf16.msra.mxu3 %v11933_v13  ;;  %v11261_v13 = vor.u32 %v14656_v2, %v11258_v3  ;;  %v11453_v14 = vor.u32 %v14704_v5, %v11450_v9  ;;  %v11378_v2 = vld [vmem:[%s16127_s17 + $0xda0] sm:$0xf0]  ;;  %v14734_v3 = vld [vmem:[%s16127_s17 + $0xf0c] sm:$0xf]  ;;  %v11789_v5 = vor.u32 %v14788_v56, %v11786_v58  ;;  %v14908_v56 = vld [vmem:[%s16127_s17 + $0x147c] sm:$0xf]  ;;  %v12677_v58 = vor.u32 %v15010_v45, %v12674_v50 }
 0x2e3   : > { %8352 = vmatpush.bf16.msra.mxu0 %v11333_v24  ;;  %v11837_v24 = vor.u32 %v14800_v10, %v11834_v16  ;;  %v8102_v37 = vpop.f32.mrf.mxu0  ;;  %v11762_v9 = vld [vmem:[%s16127_s17 + $0x10a0] sm:$0xf0]  ;;  %v12122_v10 = vld [vmem:[%s16127_s17 + $0x1370] sm:$0xf0]  ;;  %v14920_v16 = vld [vmem:[%s16127_s17 + $0x14dc] sm:$0xf] }
 0x2e4   : > { %8365 = vmatpush.bf16.msra.mxu1 %v11525_v30  ;;  %v8126_v30 = vpop.f32.mrf.mxu2  ;;  %v8115_v39 = vpop.f32.mrf.mxu1  ;;  %v14914_v37 = vld [vmem:[%s16127_s17 + $0x14ac] sm:$0xf]  ;;  %v12002_v45 = vld [vmem:[%s16127_s17 + $0x1280] sm:$0xf0] }
 0x2e5   : > { %8378 = vmatpush.bf16.msra.mxu2 %v11717_v42  ;;  %v11426_v42 = vld [vmem:[%s16127_s17 + $0xe00] sm:$0xf0]  ;;  %v8127_v35 = vadd.f32 %v8126_v30, %v8114_v7  ;;  %v14782_v7 = vld [vmem:[%s16127_s17 + $0x108c] sm:$0xf]  ;;  %v15016_v30 = vld [vmem:[%s16127_s17 + $0x17dc] sm:$0xf] }
 0x2e6   : > { %8391 = vmatpush.bf16.msra.mxu3 %v11909_v53  ;;  %v8139_v53 = vpop.f32.mrf.mxu3  ;;  %v12290_v39 = vld [vmem:[%s16127_s17 + $0x14c0] sm:$0xf0]  ;;  %v14890_v50 = vld [vmem:[%s16127_s17 + $0x13ec] sm:$0xf] }
 0x2e7   : > { %8353 = vmatpush.bf16.msra.mxu0 %v11309_v40  ;;  %v17614_v40 = vadd.f32 %v8139_v53, %v8127_v35  ;;  %v12509_v53 = vor.u32 %v14968_v19, %v12506_v20 }
 0x2e8   : > { %8366 = vmatpush.bf16.msra.mxu1 %v11501_v41  ;;  %v11429_v41 = vor.u32 %v14698_v23, %v11426_v42  ;;  %v12698_v42 = vld [vmem:[%s16127_s17 + $0x17f0] sm:$0xf0] }
 0x2e9   : > { %8379 = vmatpush.bf16.msra.mxu2 %v11693_v44  ;;  %v11621_v44 = vor.u32 %v14746_v22, %v11618_v33  ;;  %v11765_v22 = vor.u32 %v14782_v7, %v11762_v9  ;;  %v12125_v33 = vor.u32 %v14872_v17, %v12122_v10  ;;  %v14902_v7 = vld [vmem:[%s16127_s17 + $0x144c] sm:$0xf]  ;;  %v12434_v10 = vld [vmem:[%s16127_s17 + $0x15e0] sm:$0xf0] }
 0x2ea   : > { %8392 = vmatpush.bf16.msra.mxu3 %v11885_v52  ;;  %v11813_v52 = vor.u32 %v14794_v26, %v11810_v36  ;;  %v14866_v26 = vld [vmem:[%s16127_s17 + $0x132c] sm:$0xf]  ;;  %v12098_v36 = vld [vmem:[%s16127_s17 + $0x1340] sm:$0xf0] }
 0x2eb   : > { %8354 = vmatpush.bf16.msra.mxu0 %v11285_v60  ;;  %v11186_v60 = vld [vmem:[%s16127_s17 + $0xc20] sm:$0xf0]  ;;  %v12101_v51 = vor.u32 %v14866_v26, %v12098_v36  ;;  %v14950_v17 = vld [vmem:[%s16127_s17 + $0x15cc] sm:$0xf]  ;;  %v14944_v26 = vld [vmem:[%s16127_s17 + $0x159c] sm:$0xf] }
 0x2ec   : > { %8367 = vmatpush.bf16.msra.mxu1 %v11477_v63  ;;  %v11597_v63 = vor.u32 %v14740_v57, %v11594_v55  ;;  %v8128_v21 = vpop.f32.mrf.mxu2  ;;  %v14860_v57 = vld [vmem:[%s16127_s17 + $0x12fc] sm:$0xf]  ;;  %v12074_v55 = vld [vmem:[%s16127_s17 + $0x1310] sm:$0xf0] }
 0x2ed   : > { %8380 = vmatpush.bf16.msra.mxu2 %v11669_v0  ;;  %v14686_v0 = vld [vmem:[%s16127_s17 + $0xd8c] sm:$0xf]  ;;  %v12242_v21 = vld [vmem:[%s16127_s17 + $0x1460] sm:$0xf0]  ;;  %v14992_v36 = vld [vmem:[%s16127_s17 + $0x171c] sm:$0xf] }
 0x2ee   : > { %8393 = vmatpush.bf16.msra.mxu3 %v11861_v6  ;;  %v11570_v6 = vld [vmem:[%s16127_s17 + $0xf20] sm:$0xf0]  ;;  %v11381_v23 = vor.u32 %v14686_v0, %v11378_v2  ;;  %v12077_v0 = vor.u32 %v14860_v57, %v12074_v55  ;;  %v14938_v57 = vld [vmem:[%s16127_s17 + $0x156c] sm:$0xf] }
 0x2ef   : > { %8355 = vmatpush.bf16.msra.mxu0 %v11261_v13  ;;  %v8141_v13 = vpop.f32.mrf.mxu3  ;;  %v12386_v55 = vld [vmem:[%s16127_s17 + $0x1580] sm:$0xf0] }
 0x2f0   : > { %8368 = vmatpush.bf16.msra.mxu1 %v11453_v14  ;;  %v11189_v14 = vor.u32 %v14638_v4, %v11186_v60  ;;  %v14956_v4 = vld [vmem:[%s16127_s17 + $0x15fc] sm:$0xf]  ;;  %v12458_v60 = vld [vmem:[%s16127_s17 + $0x1610] sm:$0xf0]  ;;  %v14998_v13 = vld [vmem:[%s16127_s17 + $0x174c] sm:$0xf] }
 0x2f1   : > { %8381 = vmatpush.bf16.msra.mxu2 %v11645_v18  ;;  %v12314_v18 = vld [vmem:[%s16127_s17 + $0x14f0] sm:$0xf0] }
 0x2f2   : > { %8394 = vmatpush.bf16.msra.mxu3 %v11837_v24  ;;  %v11573_v24 = vor.u32 %v14734_v3, %v11570_v6  ;;  %v12317_v35 = vor.u32 %v14920_v16, %v12314_v18  ;;  %v12461_v3 = vor.u32 %v14956_v4, %v12458_v60  ;;  %v12050_v6 = vld [vmem:[%s16127_s17 + $0x12e0] sm:$0xf0] }
 0x2f3   : > { %8356 = vmatpush.bf16.msra.mxu0 %v11237_v43  ;;  %v12701_v43 = vor.u32 %v15016_v30, %v12698_v42  ;;  %v14848_v30 = vld [vmem:[%s16127_s17 + $0x129c] sm:$0xf]  ;;  %v12026_v42 = vld [vmem:[%s16127_s17 + $0x12b0] sm:$0xf0]  ;;  %v12578_v4 = vld [vmem:[%s16127_s17 + $0x1700] sm:$0xf0] }
 0x2f4   : > { %8369 = vmatpush.bf16.msra.mxu1 %v11429_v41  ;;  %v14962_v41 = vld [vmem:[%s16127_s17 + $0x162c] sm:$0xf] }
 0x2f5   : > { %8382 = vmatpush.bf16.msra.mxu2 %v11621_v44  ;;  %v12482_v44 = vld [vmem:[%s16127_s17 + $0x1640] sm:$0xf0] }
 0x2f6   : > { %8395 = vmatpush.bf16.msra.mxu3 %v11813_v52  ;;  %v12293_v52 = vor.u32 %v14914_v37, %v12290_v39  ;;  %v12485_v54 = vor.u32 %v14962_v41, %v12482_v44  ;;  %v12602_v37 = vld [vmem:[%s16127_s17 + $0x1730] sm:$0xf0]  ;;  %v14842_v44 = vld [vmem:[%s16127_s17 + $0x126c] sm:$0xf] }
 0x2f7   : > { %8357 = vmatpush.bf16.msra.mxu0 %v11213_v1  ;;  %v12266_v1 = vld [vmem:[%s16127_s17 + $0x1490] sm:$0xf0] }
 0x2f8   : > { %8370 = vmatpush.bf16.msra.mxu1 %v11405_v61  ;;  %v15004_v61 = vld [vmem:[%s16127_s17 + $0x177c] sm:$0xf]  ;;  %v12269_v2 = vor.u32 %v14908_v56, %v12266_v1  ;;  %v14986_v1 = vld [vmem:[%s16127_s17 + $0x16ec] sm:$0xf] }
 0x2f9   : > { %8383 = vmatpush.bf16.msra.mxu2 %v11597_v63  ;;  %v12650_v63 = vld [vmem:[%s16127_s17 + $0x1790] sm:$0xf0] }
 0x2fa   : > { %8396 = vmatpush.bf16.msra.mxu3 %v11789_v5  ;;  %v14854_v5 = vld [vmem:[%s16127_s17 + $0x12cc] sm:$0xf]  ;;  %v12653_v9 = vor.u32 %v15004_v61, %v12650_v63  ;;  %v12005_v61 = vor.u32 %v14842_v44, %v12002_v45  ;;  %v15160_v44 = vld [vmem:[%s16127_s17 + $0x1c5c] sm:$0xf]  ;;  %v13274_v45 = vld [vmem:[%s16127_s17 + $0x1c70] sm:$0xf0] }
 0x2fb   : > { %8358 = vmatpush.bf16.msra.mxu0 %v11189_v14  ;;  %v8152_v16 = vpop.f32.mrf.mxu0  ;;  %v12626_v14 = vld [vmem:[%s16127_s17 + $0x1760] sm:$0xf0]  ;;  %v12053_v19 = vor.u32 %v14854_v5, %v12050_v6  ;;  %v14836_v5 = vld [vmem:[%s16127_s17 + $0x123c] sm:$0xf]  ;;  %v11978_v6 = vld [vmem:[%s16127_s17 + $0x1250] sm:$0xf0] }
 0x2fc   : > { %8371 = vmatpush.bf16.msra.mxu1 %v11381_v23  ;;  %v8153_v18 = vadd.f32 %v8152_v16, %v17614_v40  ;;  %v8165_v20 = vpop.f32.mrf.mxu1  ;;  %v12245_v23 = vor.u32 %v14902_v7, %v12242_v21  ;;  %v12410_v40 = vld [vmem:[%s16127_s17 + $0x15b0] sm:$0xf0]  ;;  %v14884_v7 = vld [vmem:[%s16127_s17 + $0x13bc] sm:$0xf] }
 0x2fd   : > { %8384 = vmatpush.bf16.msra.mxu2 %v11573_v24  ;;  %v12437_v24 = vor.u32 %v14950_v17, %v12434_v10  ;;  %v12413_v41 = vor.u32 %v14944_v26, %v12410_v40  ;;  %v12170_v21 = vld [vmem:[%s16127_s17 + $0x13d0] sm:$0xf0]  ;;  %v14932_v17 = vld [vmem:[%s16127_s17 + $0x153c] sm:$0xf] }
 0x2fe   : > { %8397 = vmatpush.bf16.msra.mxu3 %v11765_v22  ;;  %8359 = vmatmul.bf16.vlgmr.msra.gmra.mxu0 %v16382_v8  ;;  %v14896_v22 = vld [vmem:[%s16127_s17 + $0x141c] sm:$0xf]  ;;  %v12362_v10 = vld [vmem:[%s16127_s17 + $0x1550] sm:$0xf0] }
 0x2ff   : > { %8403 = vmatpush.bf16.msrb.mxu0 %v12125_v33  ;;  %8372 = vmatmul.bf16.vlgmr.msra.gmra.mxu1 %v16388_v12  ;;  %v12629_v33 = vor.u32 %v14998_v13, %v12626_v14  ;;  %v14980_v16 = vld [vmem:[%s16127_s17 + $0x16bc] sm:$0xf]  ;;  %v12554_v13 = vld [vmem:[%s16127_s17 + $0x16d0] sm:$0xf0]  ;;  %v11981_v14 = vor.u32 %v14836_v5, %v11978_v6  ;;  %v15202_v5 = vld [vmem:[%s16127_s17 + $0x1dac] sm:$0xf] }
 0x300   : > { %8416 = vmatpush.bf16.msrb.mxu1 %v12317_v35  ;;  %8385 = vmatmul.bf16.vlgmr.msra.gmra.mxu2 %v16386_v11  ;;  %v8166_v35 = vadd.f32 %v8165_v20, %v8153_v18  ;;  %v14830_v18 = vld [vmem:[%s16127_s17 + $0x120c] sm:$0xf]  ;;  %v12173_v20 = vor.u32 %v14884_v7, %v12170_v21  ;;  %v15064_v40 = vld [vmem:[%s16127_s17 + $0x195c] sm:$0xf]  ;;  %v13442_v6 = vld [vmem:[%s16127_s17 + $0x1dc0] sm:$0xf0] }
 0x301   : > { %8429 = vmatpush.bf16.msrb.mxu2 %v12509_v53  ;;  %8398 = vmatmul.bf16.vlgmr.msra.gmra.mxu3 %v16391_v15  ;;  %v12218_v53 = vld [vmem:[%s16127_s17 + $0x1430] sm:$0xf0] }
 0x302   : > { %8442 = vmatpush.bf16.msrb.mxu3 %v12701_v43  ;;  %v12029_v43 = vor.u32 %v14848_v30, %v12026_v42  ;;  %v12221_v39 = vor.u32 %v14896_v22, %v12218_v53  ;;  %v12146_v30 = vld [vmem:[%s16127_s17 + $0x13a0] sm:$0xf0]  ;;  %v14926_v42 = vld [vmem:[%s16127_s17 + $0x150c] sm:$0xf]  ;;  %v12557_v22 = vor.u32 %v14980_v16, %v12554_v13  ;;  %v15100_v16 = vld [vmem:[%s16127_s17 + $0x1a7c] sm:$0xf]  ;;  %v13445_v13 = vor.u32 %v15202_v5, %v13442_v6 }
 0x303   : > { %8404 = vmatpush.bf16.msrb.mxu0 %v12101_v51  ;;  %v12605_v51 = vor.u32 %v14992_v36, %v12602_v37  ;;  %v8154_v60 = vpop.f32.mrf.mxu0  ;;  %v12530_v53 = vld [vmem:[%s16127_s17 + $0x16a0] sm:$0xf0]  ;;  %v12890_v36 = vld [vmem:[%s16127_s17 + $0x1970] sm:$0xf0]  ;;  %v15112_v37 = vld [vmem:[%s16127_s17 + $0x1adc] sm:$0xf] }
 0x304   : > { %8417 = vmatpush.bf16.msrb.mxu1 %v12293_v52  ;;  %v8178_v52 = vpop.f32.mrf.mxu2  ;;  %v8167_v63 = vpop.f32.mrf.mxu1  ;;  %v15106_v60 = vld [vmem:[%s16127_s17 + $0x1aac] sm:$0xf]  ;;  %v12770_v5 = vld [vmem:[%s16127_s17 + $0x1880] sm:$0xf0] }
 0x305   : > { %8430 = vmatpush.bf16.msrb.mxu2 %v12485_v54  ;;  %v12194_v54 = vld [vmem:[%s16127_s17 + $0x1400] sm:$0xf0]  ;;  %v8179_v56 = vadd.f32 %v8178_v52, %v8166_v35  ;;  %v14974_v35 = vld [vmem:[%s16127_s17 + $0x168c] sm:$0xf]  ;;  %v15208_v52 = vld [vmem:[%s16127_s17 + $0x1ddc] sm:$0xf] }
 0x306   : > { %8443 = vmatpush.bf16.msrb.mxu3 %v12677_v58  ;;  %v8191_v58 = vpop.f32.mrf.mxu3  ;;  %v13058_v63 = vld [vmem:[%s16127_s17 + $0x1ac0] sm:$0xf0]  ;;  %v15082_v6 = vld [vmem:[%s16127_s17 + $0x19ec] sm:$0xf] }
 0x307   : > { %8405 = vmatpush.bf16.msrb.mxu0 %v12077_v0  ;;  %v17685_v0 = vadd.f32 %v8191_v58, %v8179_v56  ;;  %v13277_v58 = vor.u32 %v15160_v44, %v13274_v45 }
 0x308   : > { %8418 = vmatpush.bf16.msrb.mxu1 %v12269_v2  ;;  %v12197_v2 = vor.u32 %v14890_v50, %v12194_v54  ;;  %v13466_v54 = vld [vmem:[%s16127_s17 + $0x1df0] sm:$0xf0] }
 0x309   : > { %8431 = vmatpush.bf16.msrb.mxu2 %v12461_v3  ;;  %v12389_v3 = vor.u32 %v14938_v57, %v12386_v55  ;;  %v12533_v57 = vor.u32 %v14974_v35, %v12530_v53  ;;  %v12893_v55 = vor.u32 %v15064_v40, %v12890_v36  ;;  %v15094_v35 = vld [vmem:[%s16127_s17 + $0x1a4c] sm:$0xf]  ;;  %v13202_v36 = vld [vmem:[%s16127_s17 + $0x1be0] sm:$0xf0] }
 0x30a   : > { %8444 = vmatpush.bf16.msrb.mxu3 %v12653_v9  ;;  %v12581_v9 = vor.u32 %v14986_v1, %v12578_v4  ;;  %v15058_v1 = vld [vmem:[%s16127_s17 + $0x192c] sm:$0xf]  ;;  %v12866_v4 = vld [vmem:[%s16127_s17 + $0x1940] sm:$0xf0] }
 0x30b   : > { %8406 = vmatpush.bf16.msrb.mxu0 %v12053_v19  ;;  %v11954_v19 = vld [vmem:[%s16127_s17 + $0x1220] sm:$0xf0]  ;;  %v12869_v7 = vor.u32 %v15058_v1, %v12866_v4  ;;  %v15142_v40 = vld [vmem:[%s16127_s17 + $0x1bcc] sm:$0xf]  ;;  %v15136_v1 = vld [vmem:[%s16127_s17 + $0x1b9c] sm:$0xf] }
 0x30c   : > { %8419 = vmatpush.bf16.msrb.mxu1 %v12245_v23  ;;  %v12365_v23 = vor.u32 %v14932_v17, %v12362_v10  ;;  %v8180_v26 = vpop.f32.mrf.mxu2  ;;  %v15052_v17 = vld [vmem:[%s16127_s17 + $0x18fc] sm:$0xf]  ;;  %v12842_v10 = vld [vmem:[%s16127_s17 + $0x1910] sm:$0xf0] }
 0x30d   : > { %8432 = vmatpush.bf16.msrb.mxu2 %v12437_v24  ;;  %v14878_v24 = vld [vmem:[%s16127_s17 + $0x138c] sm:$0xf]  ;;  %v13010_v26 = vld [vmem:[%s16127_s17 + $0x1a60] sm:$0xf0]  ;;  %v15184_v4 = vld [vmem:[%s16127_s17 + $0x1d1c] sm:$0xf] }
 0x30e   : > { %8445 = vmatpush.bf16.msrb.mxu3 %v12629_v33  ;;  %v12338_v33 = vld [vmem:[%s16127_s17 + $0x1520] sm:$0xf0]  ;;  %v12149_v50 = vor.u32 %v14878_v24, %v12146_v30  ;;  %v12845_v24 = vor.u32 %v15052_v17, %v12842_v10  ;;  %v15130_v17 = vld [vmem:[%s16127_s17 + $0x1b6c] sm:$0xf] }
 0x30f   : > { %8407 = vmatpush.bf16.msrb.mxu0 %v12029_v43  ;;  %v8193_v43 = vpop.f32.mrf.mxu3  ;;  %v13154_v10 = vld [vmem:[%s16127_s17 + $0x1b80] sm:$0xf0] }
 0x310   : > { %8420 = vmatpush.bf16.msrb.mxu1 %v12221_v39  ;;  %v11957_v39 = vor.u32 %v14830_v18, %v11954_v19  ;;  %v15148_v18 = vld [vmem:[%s16127_s17 + $0x1bfc] sm:$0xf]  ;;  %v13226_v19 = vld [vmem:[%s16127_s17 + $0x1c10] sm:$0xf0]  ;;  %v15190_v43 = vld [vmem:[%s16127_s17 + $0x1d4c] sm:$0xf] }
 0x311   : > { %8433 = vmatpush.bf16.msrb.mxu2 %v12413_v41  ;;  %v13082_v41 = vld [vmem:[%s16127_s17 + $0x1af0] sm:$0xf0] }
 0x312   : > { %8446 = vmatpush.bf16.msrb.mxu3 %v12605_v51  ;;  %v12341_v51 = vor.u32 %v14926_v42, %v12338_v33  ;;  %v13085_v56 = vor.u32 %v15112_v37, %v13082_v41  ;;  %v13229_v42 = vor.u32 %v15148_v18, %v13226_v19  ;;  %v12818_v33 = vld [vmem:[%s16127_s17 + $0x18e0] sm:$0xf0] }
 0x313   : > { %8408 = vmatpush.bf16.msrb.mxu0 %v12005_v61  ;;  %v13469_v61 = vor.u32 %v15208_v52, %v13466_v54  ;;  %v15040_v52 = vld [vmem:[%s16127_s17 + $0x189c] sm:$0xf]  ;;  %v12794_v54 = vld [vmem:[%s16127_s17 + $0x18b0] sm:$0xf0]  ;;  %v13346_v18 = vld [vmem:[%s16127_s17 + $0x1d00] sm:$0xf0] }
 0x314   : > { %8421 = vmatpush.bf16.msrb.mxu1 %v12197_v2  ;;  %v15154_v2 = vld [vmem:[%s16127_s17 + $0x1c2c] sm:$0xf] }
 0x315   : > { %8434 = vmatpush.bf16.msrb.mxu2 %v12389_v3  ;;  %v13250_v3 = vld [vmem:[%s16127_s17 + $0x1c40] sm:$0xf0] }
 0x316   : > { %8447 = vmatpush.bf16.msrb.mxu3 %v12581_v9  ;;  %v13061_v9 = vor.u32 %v15106_v60, %v13058_v63  ;;  %v13253_v21 = vor.u32 %v15154_v2, %v13250_v3  ;;  %v13370_v60 = vld [vmem:[%s16127_s17 + $0x1d30] sm:$0xf0]  ;;  %v15034_v3 = vld [vmem:[%s16127_s17 + $0x186c] sm:$0xf] }
 0x317   : > { %8409 = vmatpush.bf16.msrb.mxu0 %v11981_v14  ;;  %v13034_v14 = vld [vmem:[%s16127_s17 + $0x1a90] sm:$0xf0] }
 0x318   : > { %8422 = vmatpush.bf16.msrb.mxu1 %v12173_v20  ;;  %v15196_v20 = vld [vmem:[%s16127_s17 + $0x1d7c] sm:$0xf]  ;;  %v13037_v30 = vor.u32 %v15100_v16, %v13034_v14  ;;  %v15178_v14 = vld [vmem:[%s16127_s17 + $0x1cec] sm:$0xf] }
 0x319   : > { %8435 = vmatpush.bf16.msrb.mxu2 %v12365_v23  ;;  %v13418_v23 = vld [vmem:[%s16127_s17 + $0x1d90] sm:$0xf0] }
 0x31a   : > { %8448 = vmatpush.bf16.msrb.mxu3 %v12557_v22  ;;  %v15046_v22 = vld [vmem:[%s16127_s17 + $0x18cc] sm:$0xf]  ;;  %v13421_v53 = vor.u32 %v15196_v20, %v13418_v23  ;;  %v12773_v20 = vor.u32 %v15034_v3, %v12770_v5  ;;  %v15352_v3 = vld [vmem:[%s16127_s17 + $0x225c] sm:$0xf]  ;;  %v14042_v5 = vld [vmem:[%s16127_s17 + $0x2270] sm:$0xf0] }
 0x31b   : > { %8410 = vmatpush.bf16.msrb.mxu0 %v11957_v39  ;;  %v8204_v37 = vpop.f32.mrf.mxu0  ;;  %v13394_v39 = vld [vmem:[%s16127_s17 + $0x1d60] sm:$0xf0]  ;;  %v12821_v44 = vor.u32 %v15046_v22, %v12818_v33  ;;  %v15028_v22 = vld [vmem:[%s16127_s17 + $0x183c] sm:$0xf]  ;;  %v12746_v33 = vld [vmem:[%s16127_s17 + $0x1850] sm:$0xf0] }
 0x31c   : > { %8423 = vmatpush.bf16.msrb.mxu1 %v12149_v50  ;;  %v8205_v41 = vadd.f32 %v8204_v37, %v17685_v0  ;;  %v8217_v45 = vpop.f32.mrf.mxu1  ;;  %v13013_v50 = vor.u32 %v15094_v35, %v13010_v26  ;;  %v13178_v0 = vld [vmem:[%s16127_s17 + $0x1bb0] sm:$0xf0]  ;;  %v15076_v35 = vld [vmem:[%s16127_s17 + $0x19bc] sm:$0xf] }
 0x31d   : > { %8436 = vmatpush.bf16.msrb.mxu2 %v12341_v51  ;;  %v13205_v51 = vor.u32 %v15142_v40, %v13202_v36  ;;  %v13181_v2 = vor.u32 %v15136_v1, %v13178_v0  ;;  %v12938_v26 = vld [vmem:[%s16127_s17 + $0x19d0] sm:$0xf0]  ;;  %v15124_v40 = vld [vmem:[%s16127_s17 + $0x1b3c] sm:$0xf] }
 0x31e   : > { %8449 = vmatpush.bf16.msrb.mxu3 %v12533_v57  ;;  %8411 = vmatmul.bf16.vlgmr.msrb.gmra.mxu0 %v16448_v46  ;;  %v15088_v57 = vld [vmem:[%s16127_s17 + $0x1a1c] sm:$0xf]  ;;  %v13130_v36 = vld [vmem:[%s16127_s17 + $0x1b50] sm:$0xf0] }
 0x31f   : > { %8455 = vmatpush.bf16.msra.mxu0 %v12893_v55  ;;  %8424 = vmatmul.bf16.vlgmr.msrb.gmra.mxu1 %v16452_v48  ;;  %v13397_v55 = vor.u32 %v15190_v43, %v13394_v39  ;;  %v15172_v37 = vld [vmem:[%s16127_s17 + $0x1cbc] sm:$0xf]  ;;  %v13322_v43 = vld [vmem:[%s16127_s17 + $0x1cd0] sm:$0xf0]  ;;  %v12749_v39 = vor.u32 %v15028_v22, %v12746_v33  ;;  %v15394_v22 = vld [vmem:[%s16127_s17 + $0x23ac] sm:$0xf] }
 0x320   : > { %8468 = vmatpush.bf16.msra.mxu1 %v13085_v56  ;;  %8437 = vmatmul.bf16.vlgmr.msrb.gmra.mxu2 %v16450_v47  ;;  %v8218_v56 = vadd.f32 %v8217_v45, %v8205_v41  ;;  %v15022_v41 = vld [vmem:[%s16127_s17 + $0x180c] sm:$0xf]  ;;  %v12941_v45 = vor.u32 %v15076_v35, %v12938_v26  ;;  %v15256_v0 = vld [vmem:[%s16127_s17 + $0x1f5c] sm:$0xf]  ;;  %v14210_v33 = vld [vmem:[%s16127_s17 + $0x23c0] sm:$0xf0] }
 0x321   : > { %8481 = vmatpush.bf16.msra.mxu2 %v13277_v58  ;;  %8450 = vmatmul.bf16.vlgmr.msrb.gmra.mxu3 %v16454_v49  ;;  %v12986_v58 = vld [vmem:[%s16127_s17 + $0x1a30] sm:$0xf0] }
 0x322   : > { %8494 = vmatpush.bf16.msra.mxu3 %v13469_v61  ;;  %v12797_v61 = vor.u32 %v15040_v52, %v12794_v54  ;;  %v12989_v63 = vor.u32 %v15088_v57, %v12986_v58  ;;  %v12914_v52 = vld [vmem:[%s16127_s17 + $0x19a0] sm:$0xf0]  ;;  %v15118_v54 = vld [vmem:[%s16127_s17 + $0x1b0c] sm:$0xf]  ;;  %v13325_v57 = vor.u32 %v15172_v37, %v13322_v43  ;;  %v15292_v37 = vld [vmem:[%s16127_s17 + $0x207c] sm:$0xf] }
 0x323   : > { %8456 = vmatpush.bf16.msra.mxu0 %v12869_v7  ;;  %v13373_v7 = vor.u32 %v15184_v4, %v13370_v60  ;;  %v8206_v19 = vpop.f32.mrf.mxu0  ;;  %v13298_v58 = vld [vmem:[%s16127_s17 + $0x1ca0] sm:$0xf0]  ;;  %v13658_v4 = vld [vmem:[%s16127_s17 + $0x1f70] sm:$0xf0]  ;;  %v15304_v60 = vld [vmem:[%s16127_s17 + $0x20dc] sm:$0xf] }
 0x324   : > { %8469 = vmatpush.bf16.msra.mxu1 %v13061_v9  ;;  %v8230_v9 = vpop.f32.mrf.mxu2  ;;  %v8219_v23 = vpop.f32.mrf.mxu1  ;;  %v15298_v19 = vld [vmem:[%s16127_s17 + $0x20ac] sm:$0xf]  ;;  %v15740_v43 = vld [vmem:[#allocation1] sm:$0xff] }
 0x325   : > { %8482 = vmatpush.bf16.msra.mxu2 %v13253_v21  ;;  %v12962_v21 = vld [vmem:[%s16127_s17 + $0x1a00] sm:$0xf0]  ;;  %v8231_v16 = vadd.f32 %v8230_v9, %v8218_v56  ;;  %v15166_v56 = vld [vmem:[%s16127_s17 + $0x1c8c] sm:$0xf]  ;;  %v15400_v9 = vld [vmem:[%s16127_s17 + $0x23dc] sm:$0xf] }
 0x326   : > { %8495 = vmatpush.bf16.msra.mxu3 %v13445_v13  ;;  %v8243_v13 = vpop.f32.mrf.mxu3  ;;  %v13826_v23 = vld [vmem:[%s16127_s17 + $0x20c0] sm:$0xf0] }
 0x327   : > { %8457 = vmatpush.bf16.msra.mxu0 %v12845_v24  ;;  %v17756_v24 = vadd.f32 %v8243_v13, %v8231_v16  ;;  %v14045_v13 = vor.u32 %v15352_v3, %v14042_v5  ;;  %v15334_v3 = vld [vmem:[%s16127_s17 + $0x21cc] sm:$0xf]  ;;  %v13970_v5 = vld [vmem:[%s16127_s17 + $0x21e0] sm:$0xf0] }
 0x328   : > { %8470 = vmatpush.bf16.msra.mxu1 %v13037_v30  ;;  %v12965_v30 = vor.u32 %v15082_v6, %v12962_v21  ;;  %v14234_v21 = vld [vmem:[%s16127_s17 + $0x23f0] sm:$0xf0] }
 0x329   : > { %8483 = vmatpush.bf16.msra.mxu2 %v13229_v42  ;;  %v13157_v42 = vor.u32 %v15130_v17, %v13154_v10  ;;  %v13301_v17 = vor.u32 %v15166_v56, %v13298_v58  ;;  %v13661_v10 = vor.u32 %v15256_v0, %v13658_v4  ;;  %v15238_v56 = vld [vmem:[%s16127_s17 + $0x1ecc] sm:$0xf]  ;;  %v13586_v0 = vld [vmem:[%s16127_s17 + $0x1ee0] sm:$0xf0] }
 0x32a   : > { %8496 = vmatpush.bf16.msra.mxu3 %v13421_v53  ;;  %v13349_v53 = vor.u32 %v15178_v14, %v13346_v18  ;;  %v15250_v14 = vld [vmem:[%s16127_s17 + $0x1f2c] sm:$0xf]  ;;  %v13634_v18 = vld [vmem:[%s16127_s17 + $0x1f40] sm:$0xf0] }
 0x32b   : > { %8458 = vmatpush.bf16.msra.mxu0 %v12821_v44  ;;  %v12722_v44 = vld [vmem:[%s16127_s17 + $0x1820] sm:$0xf0]  ;;  %v13637_v35 = vor.u32 %v15250_v14, %v13634_v18  ;;  %v15286_v4 = vld [vmem:[%s16127_s17 + $0x204c] sm:$0xf]  ;;  %v15280_v14 = vld [vmem:[%s16127_s17 + $0x201c] sm:$0xf] }
 0x32c   : > { %8471 = vmatpush.bf16.msra.mxu1 %v13013_v50  ;;  %v13133_v50 = vor.u32 %v15124_v40, %v13130_v36  ;;  %v8232_v1 = vpop.f32.mrf.mxu2  ;;  %v15244_v40 = vld [vmem:[%s16127_s17 + $0x1efc] sm:$0xf]  ;;  %v13610_v36 = vld [vmem:[%s16127_s17 + $0x1f10] sm:$0xf0] }
 0x32d   : > { %8484 = vmatpush.bf16.msra.mxu2 %v13205_v51  ;;  %v15070_v51 = vld [vmem:[%s16127_s17 + $0x198c] sm:$0xf] }
 0x32e   : > { %8497 = vmatpush.bf16.msra.mxu3 %v13397_v55  ;;  %v13106_v55 = vld [vmem:[%s16127_s17 + $0x1b20] sm:$0xf0]  ;;  %v12917_v6 = vor.u32 %v15070_v51, %v12914_v52  ;;  %v15388_v52 = vld [vmem:[%s16127_s17 + $0x237c] sm:$0xf] }
 0x32f   : > { %8459 = vmatpush.bf16.msra.mxu0 %v12797_v61  ;;  %v8245_v61 = vpop.f32.mrf.mxu3  ;;  %v15742_v51 = vld [vmem:[#allocation1 + $0x9] sm:$0xff] }
 0x330   : > { %8472 = vmatpush.bf16.msra.mxu1 %v12989_v63  ;;  %v12725_v63 = vor.u32 %v15022_v41, %v12722_v44  ;;  %v13802_v41 = vld [vmem:[%s16127_s17 + $0x2090] sm:$0xf0]  ;;  %v15340_v44 = vld [vmem:[%s16127_s17 + $0x21fc] sm:$0xf] }
 0x331   : > { %8485 = vmatpush.bf16.msra.mxu2 %v13181_v2  ;;  %v13850_v2 = vld [vmem:[%s16127_s17 + $0x20f0] sm:$0xf0]  ;;  %v13805_v58 = vor.u32 %v15292_v37, %v13802_v41  ;;  %v13538_v37 = vld [vmem:[%s16127_s17 + $0x1e80] sm:$0xf0] }
 0x332   : > { %8498 = vmatpush.bf16.msra.mxu3 %v13373_v7  ;;  %v13109_v7 = vor.u32 %v15118_v54, %v13106_v55  ;;  %v13853_v16 = vor.u32 %v15304_v60, %v13850_v2  ;;  %v14186_v54 = vld [vmem:[%s16127_s17 + $0x2390] sm:$0xf0]  ;;  %v13613_v55 = vor.u32 %v15244_v40, %v13610_v36  ;;  %v15744_v60 = vld [vmem:[%s16134_s12] sm:$0x3f]  ;;  %v15226_v36 = vld [vmem:[%s16127_s17 + $0x1e6c] sm:$0xf] }
 0x333   : > { %8460 = vmatpush.bf16.msra.mxu0 %v12773_v20  ;;  %v14237_v20 = vor.u32 %v15400_v9, %v14234_v21  ;;  %v1488_v61 = vperm.slane %v15744_v60, 3  ;;  %v13778_v2 = vld [vmem:[%s16127_s17 + $0x2060] sm:$0xf0]  ;;  %v13589_v9 = vor.u32 %v15238_v56, %v13586_v0  ;;  %v13514_v60 = vld [vmem:[%s16127_s17 + $0x1e50] sm:$0xf0] }
 0x334   : > { %8473 = vmatpush.bf16.msra.mxu1 %v12965_v30  ;;  %v15346_v30 = vld [vmem:[%s16127_s17 + $0x222c] sm:$0xf] }
 0x335   : > { %8486 = vmatpush.bf16.msra.mxu2 %v13157_v42  ;;  %v14018_v42 = vld [vmem:[%s16127_s17 + $0x2240] sm:$0xf0] }
 0x336   : > { %8499 = vmatpush.bf16.msra.mxu3 %v13349_v53  ;;  %v13829_v53 = vor.u32 %v15298_v19, %v13826_v23  ;;  %v14021_v26 = vor.u32 %v15346_v30, %v14018_v42  ;;  %v13754_v23 = vld [vmem:[%s16127_s17 + $0x2030] sm:$0xf0]  ;;  %v15328_v30 = vld [vmem:[%s16127_s17 + $0x219c] sm:$0xf] }
 0x337   : > { %8461 = vmatpush.bf16.msra.mxu0 %v12749_v39  ;;  %v14213_v39 = vor.u32 %v15394_v22, %v14210_v33  ;;  %v13946_v42 = vld [vmem:[%s16127_s17 + $0x21b0] sm:$0xf0]  ;;  %v15376_v22 = vld [vmem:[%s16127_s17 + $0x231c] sm:$0xf] }
 0x338   : > { %8474 = vmatpush.bf16.msra.mxu1 %v12941_v45  ;;  %v13994_v45 = vld [vmem:[%s16127_s17 + $0x2210] sm:$0xf0]  ;;  %v13949_v40 = vor.u32 %v15328_v30, %v13946_v42  ;;  %v13874_v30 = vld [vmem:[%s16127_s17 + $0x2120] sm:$0xf0]  ;;  %v15358_v42 = vld [vmem:[%s16127_s17 + $0x228c] sm:$0xf] }
 0x339   : > { %8487 = vmatpush.bf16.msra.mxu2 %v13133_v50  ;;  %v15741_v50 = vld [vmem:[#allocation1 + $0x12] sm:$0xff]  ;;  %v13997_v1 = vor.u32 %v15340_v44, %v13994_v45  ;;  %v14138_v33 = vld [vmem:[%s16127_s17 + $0x2330] sm:$0xf0]  ;;  %v13730_v44 = vld [vmem:[%s16127_s17 + $0x2000] sm:$0xf0] }
 0x33a   : > { %8500 = vmatpush.bf16.msra.mxu3 %v13325_v57  ;;  %v15743_v57 = vld [vmem:[#allocation1 + $0x1b] sm:$0xff]  ;;  %v14141_v41 = vor.u32 %v15376_v22, %v14138_v33  ;;  %v15322_v45 = vld [vmem:[%s16127_s17 + $0x216c] sm:$0xf]  ;;  %v14066_v22 = vld [vmem:[%s16127_s17 + $0x22a0] sm:$0xf0] }
 0x33b   : > { %8462 = vmatpush.bf16.msra.mxu0 %v12725_v63  ;;  %v14189_v63 = vor.u32 %v15388_v52, %v14186_v54  ;;  %v8256_v21 = vpop.f32.mrf.mxu0  ;;  %v15370_v54 = vld [vmem:[%s16127_s17 + $0x22ec] sm:$0xf] }
 0x33c   : > { %8475 = vmatpush.bf16.msra.mxu1 %v12917_v6  ;;  %v15382_v6 = vld [vmem:[%s16127_s17 + $0x234c] sm:$0xf]  ;;  %v8257_v18 = vadd.f32 %v8256_v21, %v1488_v61  ;;  %v8269_v19 = vpop.f32.mrf.mxu1  ;;  %v15268_v61 = vld [vmem:[%s16127_s17 + $0x1fbc] sm:$0xf] }
 0x33d   : > { %8488 = vmatpush.bf16.msra.mxu2 %v13109_v7  ;;  %v14162_v7 = vld [vmem:[%s16127_s17 + $0x2360] sm:$0xf0] }
 0x33e   : > { %8501 = vmatpush.bf16.msra.mxu3 %v13301_v17  ;;  %8463 = vmatmul.bf16.vlgmr.msra.gmra.mxu0 %v15740_v43  ;;  %v13781_v17 = vor.u32 %v15286_v4, %v13778_v2  ;;  %v15274_v43 = vld [vmem:[%s16127_s17 + $0x1fec] sm:$0xf]  ;;  %v15220_v4 = vld [vmem:[%s16127_s17 + $0x1e3c] sm:$0xf] }
 0x33f   : > { %8507 = vmatpush.bf16.msrb.mxu0 %v13661_v10  ;;  %8476 = vmatmul.bf16.vlgmr.msra.gmra.mxu1 %v15742_v51  ;;  %v13973_v10 = vor.u32 %v15334_v3, %v13970_v5  ;;  %v13706_v3 = vld [vmem:[%s16127_s17 + $0x1fd0] sm:$0xf0]  ;;  %v15316_v5 = vld [vmem:[%s16127_s17 + $0x213c] sm:$0xf]  ;;  %v13517_v21 = vor.u32 %v15220_v4, %v13514_v60  ;;  %v10184_v4 = vld [vmem:[%s16127_s17 + $0x430] sm:$0xf] }
 0x340   : > { %8520 = vmatpush.bf16.msrb.mxu1 %v13853_v16  ;;  %8489 = vmatmul.bf16.vlgmr.msra.gmra.mxu2 %v15741_v50  ;;  %v15232_v16 = vld [vmem:[%s16127_s17 + $0x1e9c] sm:$0xf]  ;;  %v13922_v50 = vld [vmem:[%s16127_s17 + $0x2180] sm:$0xf0]  ;;  %v14390_v60 = vld [vmem:[%s16127_s17 + $0x444] sm:$0xf0] }
 0x341   : > { %8533 = vmatpush.bf16.msrb.mxu2 %v14045_v13  ;;  %8502 = vmatmul.bf16.vlgmr.msra.gmra.mxu3 %v15743_v57  ;;  %v13562_v13 = vld [vmem:[%s16127_s17 + $0x1eb0] sm:$0xf0]  ;;  %v14114_v57 = vld [vmem:[%s16127_s17 + $0x2300] sm:$0xf0]  ;;  %v13925_v0 = vor.u32 %v15322_v45, %v13922_v50  ;;  %v14444_v45 = vld [vmem:[%s16127_s17 + $0x5f4] sm:$0xf0]  ;;  %v14069_v50 = vor.u32 %v15358_v42, %v14066_v22 }
 0x342   : > { %8546 = vmatpush.bf16.msrb.mxu3 %v14237_v20  ;;  %v14165_v20 = vor.u32 %v15382_v6, %v14162_v7  ;;  %v14117_v2 = vor.u32 %v15370_v54, %v14114_v57  ;;  %v13898_v6 = vld [vmem:[%s16127_s17 + $0x2150] sm:$0xf0]  ;;  %v15364_v7 = vld [vmem:[%s16127_s17 + $0x22bc] sm:$0xf]  ;;  %v9800_v57 = vld [vmem:[%s16127_s17 + $0x130] sm:$0xf] }
 0x343   : > { %8508 = vmatpush.bf16.msrb.mxu0 %v13637_v35  ;;  %v8270_v35 = vadd.f32 %v8269_v19, %v8257_v18  ;;  %v13682_v18 = vld [vmem:[%s16127_s17 + $0x1fa0] sm:$0xf0]  ;;  %v15310_v19 = vld [vmem:[%s16127_s17 + $0x210c] sm:$0xf] }
 0x344   : > { %8521 = vmatpush.bf16.msrb.mxu1 %v13829_v53  ;;  %v13565_v53 = vor.u32 %v15232_v16, %v13562_v13  ;;  %v8295_v52 = vpop.f32.mrf.mxu3  ;;  %v13709_v16 = vor.u32 %v15268_v61, %v13706_v3  ;;  %v13901_v13 = vor.u32 %v15316_v5, %v13898_v6  ;;  %v10376_v61 = vld [vmem:[%s16127_s17 + $0x5b0] sm:$0xf]  ;;  %v10185_v5 = vor.u32 %v14390_v60, %v10184_v4  ;;  %v9776_v6 = vld [vmem:[%s16127_s17 + $0x100] sm:$0xf]  ;;  %v14372_v4 = vld [vmem:[%s16127_s17 + $0x3b4] sm:$0xf0] }
 0x345   : > { %8534 = vmatpush.bf16.msrb.mxu2 %v14021_v26  ;;  %v13757_v26 = vor.u32 %v15280_v14, %v13754_v23  ;;  %v15262_v14 = vld [vmem:[%s16127_s17 + $0x1f8c] sm:$0xf]  ;;  %v10304_v60 = vld [vmem:[%s16127_s17 + $0x520] sm:$0xf] }
 0x346   : > { %8547 = vmatpush.bf16.msrb.mxu3 %v14213_v39  ;;  %v8282_v39 = vpop.f32.mrf.mxu2 }
 0x347   : > { %8509 = vmatpush.bf16.msrb.mxu0 %v13613_v55  ;;  %v8283_v51 = vadd.f32 %v8282_v39, %v8270_v35  ;;  %v13541_v55 = vor.u32 %v15226_v36, %v13538_v37  ;;  %v9824_v35 = vld [vmem:[%s16127_s17 + $0x160] sm:$0xf]  ;;  %v14348_v36 = vld [vmem:[%s16127_s17 + $0x2f4] sm:$0xf0]  ;;  %v13685_v39 = vor.u32 %v15262_v14, %v13682_v18  ;;  %v15746_v14 = vld [vmem:[#allocation1 + $0x36] sm:$0xff] }
 0x348   : > { %8522 = vmatpush.bf16.msrb.mxu1 %v13805_v58  ;;  %v8258_v58 = vpop.f32.mrf.mxu0  ;;  %v10208_v37 = vld [vmem:[%s16127_s17 + $0x460] sm:$0xf]  ;;  %v15747_v18 = vld [vmem:[#allocation1 + $0x2d] sm:$0xff] }
 0x349   : > { %8535 = vmatpush.bf16.msrb.mxu2 %v13997_v1  ;;  %v17823_v56 = vadd.f32 %v8295_v52, %v8283_v51  ;;  %v13733_v1 = vor.u32 %v15274_v43, %v13730_v44  ;;  %v14396_v43 = vld [vmem:[%s16127_s17 + $0x474] sm:$0xf0]  ;;  %v10400_v44 = vld [vmem:[%s16127_s17 + $0x5e0] sm:$0xf]  ;;  %v9992_v58 = vld [vmem:[%s16127_s17 + $0x2b0] sm:$0xf] }
 0x34a   : > { %8548 = vmatpush.bf16.msrb.mxu3 %v14189_v63  ;;  %v8271_v63 = vpop.f32.mrf.mxu1  ;;  %v10209_v54 = vor.u32 %v14396_v43, %v10208_v37  ;;  %v14378_v37 = vld [vmem:[%s16127_s17 + $0x3e4] sm:$0xf0]  ;;  %v10328_v43 = vld [vmem:[%s16127_s17 + $0x550] sm:$0xf] }
 0x34b   : > { %8510 = vmatpush.bf16.msrb.mxu0 %v13589_v9  ;;  %v14090_v9 = vld [vmem:[%s16127_s17 + $0x22d0] sm:$0xf0]  ;;  %v14438_v63 = vld [vmem:[%s16127_s17 + $0x5c4] sm:$0xf0] }
 0x34c   : > { %8523 = vmatpush.bf16.msrb.mxu1 %v13781_v17  ;;  %v15214_v17 = vld [vmem:[%s16127_s17 + $0x1e0c] sm:$0xf]  ;;  %v14093_v23 = vor.u32 %v15364_v7, %v14090_v9  ;;  %v8297_v33 = vpop.f32.mrf.mxu3  ;;  %v14288_v7 = vld [vmem:[%s16127_s17 + $0x114] sm:$0xf0]  ;;  %v9968_v9 = vld [vmem:[%s16127_s17 + $0x280] sm:$0xf] }
 0x34d   : > { %8536 = vmatpush.bf16.msrb.mxu2 %v13973_v10  ;;  %v13490_v10 = vld [vmem:[%s16127_s17 + $0x1e20] sm:$0xf0]  ;;  %v9752_v33 = vld [vmem:[%s16127_s17 + $0xd0] sm:$0xf] }
 0x34e   : > { %8549 = vmatpush.bf16.msrb.mxu3 %v14165_v20  ;;  %v8284_v20 = vpop.f32.mrf.mxu2 }
 0x34f   : > { %8511 = vmatpush.bf16.msrb.mxu0 %v13565_v53  ;;  %v14300_v53 = vld [vmem:[%s16127_s17 + $0x174] sm:$0xf0] }
 0x350   : > { %8524 = vmatpush.bf16.msrb.mxu1 %v13757_v26  ;;  %v10016_v26 = vld [vmem:[%s16127_s17 + $0x2e0] sm:$0xf]  ;;  %v9825_v51 = vor.u32 %v14300_v53, %v9824_v35  ;;  %v14432_v20 = vld [vmem:[%s16127_s17 + $0x594] sm:$0xf0]  ;;  %v14282_v35 = vld [vmem:[%s16127_s17 + $0xe4] sm:$0xf0] }
 0x351   : > { %8537 = vmatpush.bf16.msrb.mxu2 %v13949_v40  ;;  %v13493_v40 = vor.u32 %v15214_v17, %v13490_v10  ;;  %v10017_v52 = vor.u32 %v14348_v36, %v10016_v26  ;;  %v10377_v17 = vor.u32 %v14438_v63, %v10376_v61  ;;  %v14336_v10 = vld [vmem:[%s16127_s17 + $0x294] sm:$0xf0]  ;;  %v9944_v53 = vld [vmem:[%s16127_s17 + $0x250] sm:$0xf] }
 0x352   : > { %8550 = vmatpush.bf16.msrb.mxu3 %v14141_v41  ;;  %v13877_v41 = vor.u32 %v15310_v19, %v13874_v30  ;;  %v10352_v19 = vld [vmem:[%s16127_s17 + $0x580] sm:$0xf]  ;;  %v9777_v30 = vor.u32 %v14288_v7, %v9776_v6  ;;  %v9969_v42 = vor.u32 %v14336_v10, %v9968_v9  ;;  %v10136_v36 = vld [vmem:[%s16127_s17 + $0x3d0] sm:$0xf]  ;;  %v14420_v61 = vld [vmem:[%s16127_s17 + $0x534] sm:$0xf0] }
 0x353   : > { %8512 = vmatpush.bf16.msrb.mxu0 %v13541_v55  ;;  %v14294_v55 = vld [vmem:[%s16127_s17 + $0x144] sm:$0xf0]  ;;  %v10353_v26 = vor.u32 %v14432_v20, %v10352_v19  ;;  %v9896_v7 = vld [vmem:[%s16127_s17 + $0x1f0] sm:$0xf] }
 0x354   : > { %8525 = vmatpush.bf16.msrb.mxu1 %v13733_v1  ;;  %v10401_v1 = vor.u32 %v14444_v45, %v10400_v44  ;;  %v14270_v6 = vld [vmem:[%s16127_s17 + $0x84] sm:$0xf0]  ;;  %v10088_v10 = vld [vmem:[%s16127_s17 + $0x370] sm:$0xf] }
 0x355   : > { %8538 = vmatpush.bf16.msrb.mxu2 %v13925_v0  ;;  %v14342_v0 = vld [vmem:[%s16127_s17 + $0x2c4] sm:$0xf0] }
 0x356   : > { %8551 = vmatpush.bf16.msrb.mxu3 %v14117_v2  ;;  %v9801_v2 = vor.u32 %v14294_v55, %v9800_v57  ;;  %v9993_v3 = vor.u32 %v14342_v0, %v9992_v58  ;;  %v10112_v0 = vld [vmem:[%s16127_s17 + $0x3a0] sm:$0xf]  ;;  %v14414_v19 = vld [vmem:[%s16127_s17 + $0x504] sm:$0xf0] }
 0x357   : > { %8513 = vmatpush.bf16.msrb.mxu0 %v13517_v21  ;;  %v15745_v21 = vld [vmem:[#allocation1 + $0x24] sm:$0xff] }
 0x358   : > { %8526 = vmatpush.bf16.msrb.mxu1 %v13709_v16  ;;  %v10160_v16 = vld [vmem:[%s16127_s17 + $0x400] sm:$0xf] }
 0x359   : > { %8539 = vmatpush.bf16.msrb.mxu2 %v13901_v13  ;;  %v14384_v13 = vld [vmem:[%s16127_s17 + $0x414] sm:$0xf0] }
 0x35a   : > { %8552 = vmatpush.bf16.msrb.mxu3 %v14093_v23  ;;  %v15748_v23 = vld [vmem:[#allocation1 + $0x3f] sm:$0xff]  ;;  %v10161_v22 = vor.u32 %v14384_v13, %v10160_v16  ;;  %v14366_v16 = vld [vmem:[%s16127_s17 + $0x384] sm:$0xf0] }
 0x35b   : > { %8514 = vmatpush.bf16.msrb.mxu0 %v13493_v40  ;;  %v14330_v40 = vld [vmem:[%s16127_s17 + $0x264] sm:$0xf0]  ;;  %v8308_v44 = vpop.f32.mrf.mxu0 }
 0x35c   : > { %8527 = vmatpush.bf16.msrb.mxu1 %v13685_v39  ;;  %v14426_v39 = vld [vmem:[%s16127_s17 + $0x564] sm:$0xf0]  ;;  %v9945_v45 = vor.u32 %v14330_v40, %v9944_v53  ;;  %v8309_v57 = vadd.f32 %v8308_v44, %v17823_v56  ;;  %v8321_v55 = vpop.f32.mrf.mxu1  ;;  %v9872_v53 = vld [vmem:[%s16127_s17 + $0x1c0] sm:$0xf] }
 0x35d   : > { %8540 = vmatpush.bf16.msrb.mxu2 %v13877_v41  ;;  %v9753_v41 = vor.u32 %v14282_v35, %v9752_v33  ;;  %v10329_v58 = vor.u32 %v14426_v39, %v10328_v43  ;;  %v9680_v33 = vld [vmem:[%s16127_s17 + $0x40] sm:$0xf]  ;;  %v14264_v35 = vld [vmem:[%s16127_s17 + $0x54] sm:$0xf0] }
 0x35e   : > { %8553 = vmatpush.bf16.msrb.mxu3 %v14069_v50  ;;  %8515 = vmatmul.bf16.vlgmr.msrb.gmra.mxu0 %v15745_v21  ;;  %v10137_v50 = vor.u32 %v14378_v37, %v10136_v36  ;;  %v8322_v63 = vadd.f32 %v8321_v55, %v8309_v57  ;;  %v10305_v21 = vor.u32 %v14420_v61, %v10304_v60  ;;  %v14312_v36 = vld [vmem:[%s16127_s17 + $0x1d4] sm:$0xf0]  ;;  %v10064_v37 = vld [vmem:[%s16127_s17 + $0x340] sm:$0xf]  ;;  %v14306_v57 = vld [vmem:[%s16127_s17 + $0x1a4] sm:$0xf0] }
 0x35f   : > { %8559 = vmatpush.bf16.msra.mxu0 %v9825_v51  ;;  %8528 = vmatmul.bf16.vlgmr.msrb.gmra.mxu1 %v15747_v18  ;;  %v9728_v51 = vld [vmem:[%s16127_s17 + $0xa0] sm:$0xf]  ;;  %v10280_v18 = vld [vmem:[%s16127_s17 + $0x4f0] sm:$0xf]  ;;  %v14360_v43 = vld [vmem:[%s16127_s17 + $0x354] sm:$0xf0]  ;;  %v9681_v44 = vor.u32 %v14264_v35, %v9680_v33 }
 0x360   : > { %8572 = vmatpush.bf16.msra.mxu1 %v10017_v52  ;;  %8541 = vmatmul.bf16.vlgmr.msrb.gmra.mxu2 %v15746_v14  ;;  %v14276_v52 = vld [vmem:[%s16127_s17 + $0xb4] sm:$0xf0]  ;;  %v10281_v40 = vor.u32 %v14414_v19, %v10280_v18  ;;  %v10256_v39 = vld [vmem:[%s16127_s17 + $0x4c0] sm:$0xf]  ;;  %v10040_v55 = vld [vmem:[%s16127_s17 + $0x310] sm:$0xf] }
 0x361   : > { %8585 = vmatpush.bf16.msra.mxu2 %v10209_v54  ;;  %8554 = vmatmul.bf16.vlgmr.msrb.gmra.mxu3 %v15748_v23  ;;  %v9920_v54 = vld [vmem:[%s16127_s17 + $0x220] sm:$0xf]  ;;  %v14402_v60 = vld [vmem:[%s16127_s17 + $0x4a4] sm:$0xf0]  ;;  %v10568_v19 = vld [vmem:[%s16127_s17 + $0x730] sm:$0xf] }
 0x362   : > { %8598 = vmatpush.bf16.msra.mxu3 %v10401_v1  ;;  %v14324_v1 = vld [vmem:[%s16127_s17 + $0x234] sm:$0xf0]  ;;  %v10952_v33 = vld [vmem:[%s16127_s17 + $0xa30] sm:$0xf]  ;;  %v14582_v35 = vld [vmem:[%s16127_s17 + $0xa44] sm:$0xf0] }
 0x363   : > { %8560 = vmatpush.bf16.msra.mxu0 %v9801_v2  ;;  %v9729_v2 = vor.u32 %v14276_v52, %v9728_v51  ;;  %v9921_v56 = vor.u32 %v14324_v1, %v9920_v54  ;;  %v8334_v9 = vpop.f32.mrf.mxu2  ;;  %v9873_v51 = vor.u32 %v14312_v36, %v9872_v53  ;;  %v10065_v52 = vor.u32 %v14360_v43, %v10064_v37  ;;  %v9848_v54 = vld [vmem:[%s16127_s17 + $0x190] sm:$0xf]  ;;  %v10544_v43 = vld [vmem:[%s16127_s17 + $0x700] sm:$0xf] }
 0x364   : > { %8573 = vmatpush.bf16.msra.mxu1 %v9993_v3  ;;  %v10113_v3 = vor.u32 %v14372_v4, %v10112_v0  ;;  %v8335_v13 = vadd.f32 %v8334_v9, %v8322_v63  ;;  %v8347_v14 = vpop.f32.mrf.mxu3  ;;  %v14354_v0 = vld [vmem:[%s16127_s17 + $0x324] sm:$0xf0]  ;;  %v10232_v4 = vld [vmem:[%s16127_s17 + $0x490] sm:$0xf]  ;;  %v10592_v63 = vld [vmem:[%s16127_s17 + $0x760] sm:$0xf]  ;;  %v9849_v9 = vor.u32 %v14306_v57, %v9848_v54  ;;  %v10953_v37 = vor.u32 %v14582_v35, %v10952_v33 }
 0x365   : > { %8586 = vmatpush.bf16.msra.mxu2 %v10185_v5  ;;  %v9704_v5 = vld [vmem:[%s16127_s17 + $0x70] sm:$0xf]  ;;  %v14624_v54 = vld [vmem:[%s16127_s17 + $0xb94] sm:$0xf0] }
 0x366   : > { %8599 = vmatpush.bf16.msra.mxu3 %v10377_v17  ;;  %v14318_v17 = vld [vmem:[%s16127_s17 + $0x204] sm:$0xf0]  ;;  %v9705_v20 = vor.u32 %v14270_v6, %v9704_v5  ;;  %v17890_v23 = vadd.f32 %v8347_v14, %v8335_v13  ;;  %v14540_v5 = vld [vmem:[%s16127_s17 + $0x8f4] sm:$0xf0]  ;;  %v10976_v6 = vld [vmem:[%s16127_s17 + $0xa60] sm:$0xf] }
 0x367   : > { %8561 = vmatpush.bf16.msra.mxu0 %v9777_v30  ;;  %v8310_v30 = vpop.f32.mrf.mxu0  ;;  %v11144_v53 = vld [vmem:[%s16127_s17 + $0xbb0] sm:$0xf] }
 0x368   : > { %8574 = vmatpush.bf16.msra.mxu1 %v9969_v42  ;;  %v9897_v42 = vor.u32 %v14318_v17, %v9896_v7  ;;  %v14588_v7 = vld [vmem:[%s16127_s17 + $0xa74] sm:$0xf0]  ;;  %v11168_v17 = vld [vmem:[%s16127_s17 + $0xbe0] sm:$0xf]  ;;  %v10760_v30 = vld [vmem:[%s16127_s17 + $0x8b0] sm:$0xf] }
 0x369   : > { %8587 = vmatpush.bf16.msra.mxu2 %v10161_v22  ;;  %v10089_v22 = vor.u32 %v14366_v16, %v10088_v10  ;;  %v14636_v10 = vld [vmem:[%s16127_s17 + $0xbf4] sm:$0xf0]  ;;  %v10233_v16 = vor.u32 %v14402_v60, %v10232_v4  ;;  %v10977_v18 = vor.u32 %v14588_v7, %v10976_v6  ;;  %v10712_v4 = vld [vmem:[%s16127_s17 + $0x850] sm:$0xf] }
 0x36a   : > { %8600 = vmatpush.bf16.msra.mxu3 %v10353_v26  ;;  %v8323_v26 = vpop.f32.mrf.mxu1 }
 0x36b   : > { %8562 = vmatpush.bf16.msra.mxu0 %v9753_v41  ;;  %v14408_v41 = vld [vmem:[%s16127_s17 + $0x4d4] sm:$0xf0]  ;;  %v14630_v26 = vld [vmem:[%s16127_s17 + $0xbc4] sm:$0xf0] }
 0x36c   : > { %8575 = vmatpush.bf16.msra.mxu1 %v9945_v45  ;;  %v9656_v45 = vld [vmem:[%s16127_s17 + $0x10] sm:$0xf]  ;;  %v10257_v1 = vor.u32 %v14408_v41, %v10256_v39  ;;  %v8349_v61 = vpop.f32.mrf.mxu3  ;;  %v14480_v39 = vld [vmem:[%s16127_s17 + $0x714] sm:$0xf0]  ;;  %v10736_v41 = vld [vmem:[%s16127_s17 + $0x880] sm:$0xf] }
 0x36d   : > { %8588 = vmatpush.bf16.msra.mxu2 %v10137_v50  ;;  %v14258_v50 = vld [vmem:[%s16127_s17 + $0x24] sm:$0xf0]  ;;  %v10545_v57 = vor.u32 %v14480_v39, %v10544_v43  ;;  %v10856_v39 = vld [vmem:[%s16127_s17 + $0x970] sm:$0xf] }
 0x36e   : > { %8601 = vmatpush.bf16.msra.mxu3 %v10329_v58  ;;  %v8336_v58 = vpop.f32.mrf.mxu2  ;;  %v14522_v61 = vld [vmem:[%s16127_s17 + $0x864] sm:$0xf0] }
 0x36f   : > { %8563 = vmatpush.bf16.msra.mxu0 %v9729_v2  ;;  %v14492_v2 = vld [vmem:[%s16127_s17 + $0x774] sm:$0xf0]  ;;  %v14510_v43 = vld [vmem:[%s16127_s17 + $0x804] sm:$0xf0] }
 0x370   : > { %8576 = vmatpush.bf16.msra.mxu1 %v9921_v56  ;;  %v10784_v56 = vld [vmem:[%s16127_s17 + $0x8e0] sm:$0xf]  ;;  %v10593_v13 = vor.u32 %v14492_v2, %v10592_v63  ;;  %v10904_v63 = vld [vmem:[%s16127_s17 + $0x9d0] sm:$0xf]  ;;  %v14570_v2 = vld [vmem:[%s16127_s17 + $0x9e4] sm:$0xf0] }
 0x371   : > { %8589 = vmatpush.bf16.msra.mxu2 %v10113_v3  ;;  %v9657_v3 = vor.u32 %v14258_v50, %v9656_v45  ;;  %v10785_v14 = vor.u32 %v14540_v5, %v10784_v56  ;;  %v14528_v45 = vld [vmem:[%s16127_s17 + $0x894] sm:$0xf0]  ;;  %v10928_v50 = vld [vmem:[%s16127_s17 + $0xa00] sm:$0xf]  ;;  %v14618_v5 = vld [vmem:[%s16127_s17 + $0xb64] sm:$0xf0] }
 0x372   : > { %8602 = vmatpush.bf16.msra.mxu3 %v10305_v21  ;;  %v10041_v21 = vor.u32 %v14354_v0, %v10040_v55  ;;  %v10737_v55 = vor.u32 %v14528_v45, %v10736_v41  ;;  %v14474_v0 = vld [vmem:[%s16127_s17 + $0x6e4] sm:$0xf0] }
 0x373   : > { %8564 = vmatpush.bf16.msra.mxu0 %v9705_v20  ;;  %v14486_v20 = vld [vmem:[%s16127_s17 + $0x744] sm:$0xf0] }
 0x374   : > { %8577 = vmatpush.bf16.msra.mxu1 %v9897_v42  ;;  %v11169_v42 = vor.u32 %v14636_v10, %v11168_v17  ;;  %v10905_v17 = vor.u32 %v14570_v2, %v10904_v63  ;;  %v10496_v10 = vld [vmem:[%s16127_s17 + $0x6a0] sm:$0xf]  ;;  %v14558_v41 = vld [vmem:[%s16127_s17 + $0x984] sm:$0xf0]  ;;  %v14504_v63 = vld [vmem:[%s16127_s17 + $0x7d4] sm:$0xf0] }
 0x375   : > { %8590 = vmatpush.bf16.msra.mxu2 %v10089_v22  ;;  %v14534_v22 = vld [vmem:[%s16127_s17 + $0x8c4] sm:$0xf0]  ;;  %v10832_v2 = vld [vmem:[%s16127_s17 + $0x940] sm:$0xf] }
 0x376   : > { %8603 = vmatpush.bf16.msra.mxu3 %v10281_v40  ;;  %v10569_v40 = vor.u32 %v14486_v20, %v10568_v19  ;;  %v10761_v36 = vor.u32 %v14534_v22, %v10760_v30  ;;  %v14516_v19 = vld [vmem:[%s16127_s17 + $0x834] sm:$0xf0]  ;;  %v10880_v20 = vld [vmem:[%s16127_s17 + $0x9a0] sm:$0xf] }
 0x377   : > { %8565 = vmatpush.bf16.msra.mxu0 %v9681_v44  ;;  %v11145_v44 = vor.u32 %v14630_v26, %v11144_v53  ;;  %v11072_v30 = vld [vmem:[%s16127_s17 + $0xb20] sm:$0xf]  ;;  %v10472_v53 = vld [vmem:[%s16127_s17 + $0x670] sm:$0xf]  ;;  %v14462_v26 = vld [vmem:[%s16127_s17 + $0x684] sm:$0xf0] }
 0x378   : > { %8578 = vmatpush.bf16.msra.mxu1 %v9873_v51  ;;  %v14576_v51 = vld [vmem:[%s16127_s17 + $0xa14] sm:$0xf0] }
 0x379   : > { %8591 = vmatpush.bf16.msra.mxu2 %v10065_v52  ;;  %v11120_v52 = vld [vmem:[%s16127_s17 + $0xb80] sm:$0xf]  ;;  %v10929_v58 = vor.u32 %v14576_v51, %v10928_v50  ;;  %v11048_v50 = vld [vmem:[%s16127_s17 + $0xaf0] sm:$0xf]  ;;  %v14606_v51 = vld [vmem:[%s16127_s17 + $0xb04] sm:$0xf0] }
 0x37a   : > { %8604 = vmatpush.bf16.msra.mxu3 %v10257_v1  ;;  %v10520_v1 = vld [vmem:[%s16127_s17 + $0x6d0] sm:$0xf]  ;;  %v11121_v60 = vor.u32 %v14624_v54, %v11120_v52  ;;  %v10473_v54 = vor.u32 %v14462_v26, %v10472_v53  ;;  %v14732_v53 = vld [vmem:[%s16127_s17 + $0xef4] sm:$0xf0]  ;;  %v11744_v26 = vld [vmem:[%s16127_s17 + $0x1060] sm:$0xf] }
 0x37b   : > { %8566 = vmatpush.bf16.msra.mxu0 %v9657_v3  ;;  %v8360_v56 = vpop.f32.mrf.mxu0  ;;  %v11096_v3 = vld [vmem:[%s16127_s17 + $0xb50] sm:$0xf]  ;;  %v10521_v7 = vor.u32 %v14474_v0, %v10520_v1  ;;  %v10857_v1 = vor.u32 %v14558_v41, %v10856_v39  ;;  %v10448_v0 = vld [vmem:[%s16127_s17 + $0x640] sm:$0xf]  ;;  %v14828_v39 = vld [vmem:[%s16127_s17 + $0x11f4] sm:$0xf0] }
 0x37c   : > { %8579 = vmatpush.bf16.msra.mxu1 %v9849_v9  ;;  %v8361_v6 = vadd.f32 %v8360_v56, %v17890_v23  ;;  %v8373_v9 = vpop.f32.mrf.mxu1  ;;  %v14564_v23 = vld [vmem:[%s16127_s17 + $0x9b4] sm:$0xf0] }
 0x37d   : > { %8592 = vmatpush.bf16.msra.mxu2 %v10041_v21  ;;  %v10713_v21 = vor.u32 %v14522_v61, %v10712_v4  ;;  %v10881_v35 = vor.u32 %v14564_v23, %v10880_v20  ;;  %v14456_v4 = vld [vmem:[%s16127_s17 + $0x654] sm:$0xf0]  ;;  %v11049_v61 = vor.u32 %v14606_v51, %v11048_v50  ;;  %v14594_v20 = vld [vmem:[%s16127_s17 + $0xaa4] sm:$0xf0]  ;;  %v11336_v51 = vld [vmem:[%s16127_s17 + $0xd30] sm:$0xf] }
 0x37e   : > { %8605 = vmatpush.bf16.msra.mxu3 %v10233_v16  ;;  %8567 = vmatmul.bf16.vlgmr.msra.gmra.mxu0 %v16256_v28  ;;  %v14468_v16 = vld [vmem:[%s16127_s17 + $0x6b4] sm:$0xf0] }
 0x37f   : > { %8611 = vmatpush.bf16.msrb.mxu0 %v10593_v13  ;;  %8580 = vmatmul.bf16.vlgmr.msra.gmra.mxu1 %v16262_v34  ;;  %v10688_v13 = vld [vmem:[%s16127_s17 + $0x820] sm:$0xf]  ;;  %v10497_v22 = vor.u32 %v14468_v16, %v10496_v10  ;;  %v14552_v56 = vld [vmem:[%s16127_s17 + $0x954] sm:$0xf0]  ;;  %v10616_v10 = vld [vmem:[%s16127_s17 + $0x790] sm:$0xf] }
 0x380   : > { %8624 = vmatpush.bf16.msrb.mxu1 %v10785_v14  ;;  %8593 = vmatmul.bf16.vlgmr.msra.gmra.mxu2 %v16254_v27  ;;  %v11097_v14 = vor.u32 %v14618_v5, %v11096_v3  ;;  %v10689_v33 = vor.u32 %v14516_v19, %v10688_v13  ;;  %v11024_v3 = vld [vmem:[%s16127_s17 + $0xac0] sm:$0xf]  ;;  %v14600_v5 = vld [vmem:[%s16127_s17 + $0xad4] sm:$0xf0]  ;;  %v14498_v16 = vld [vmem:[%s16127_s17 + $0x7a4] sm:$0xf0] }
 0x381   : > { %8637 = vmatpush.bf16.msrb.mxu2 %v10977_v18  ;;  %8606 = vmatmul.bf16.vlgmr.msra.gmra.mxu3 %v16258_v29  ;;  %v8374_v18 = vadd.f32 %v8373_v9, %v8361_v6  ;;  %v10449_v6 = vor.u32 %v14456_v4, %v10448_v0  ;;  %v14450_v9 = vld [vmem:[%s16127_s17 + $0x624] sm:$0xf0]  ;;  %v10808_v13 = vld [vmem:[%s16127_s17 + $0x910] sm:$0xf] }
 0x382   : > { %8650 = vmatpush.bf16.msrb.mxu3 %v11169_v42  ;;  %v14612_v42 = vld [vmem:[%s16127_s17 + $0xb34] sm:$0xf0]  ;;  %v11000_v19 = vld [vmem:[%s16127_s17 + $0xa90] sm:$0xf]  ;;  %v14774_v0 = vld [vmem:[%s16127_s17 + $0x1044] sm:$0xf0] }
 0x383   : > { %8612 = vmatpush.bf16.msrb.mxu0 %v10569_v40  ;;  %v10664_v40 = vld [vmem:[%s16127_s17 + $0x7f0] sm:$0xf]  ;;  %v8362_v52 = vpop.f32.mrf.mxu0  ;;  %v11001_v41 = vor.u32 %v14594_v20, %v11000_v19  ;;  %v14666_v19 = vld [vmem:[%s16127_s17 + $0xce4] sm:$0xf0] }
 0x384   : > { %8625 = vmatpush.bf16.msrb.mxu1 %v10761_v36  ;;  %v11073_v36 = vor.u32 %v14612_v42, %v11072_v30  ;;  %v8399_v45 = vpop.f32.mrf.mxu3  ;;  %v11360_v30 = vld [vmem:[%s16127_s17 + $0xd60] sm:$0xf]  ;;  %v14684_v42 = vld [vmem:[%s16127_s17 + $0xd74] sm:$0xf0]  ;;  %v14678_v52 = vld [vmem:[%s16127_s17 + $0xd44] sm:$0xf0] }
 0x385   : > { %8638 = vmatpush.bf16.msrb.mxu2 %v10953_v37  ;;  %v8386_v37 = vpop.f32.mrf.mxu2  ;;  %v11912_v4 = vld [vmem:[%s16127_s17 + $0x11b0] sm:$0xf] }
 0x386   : > { %8651 = vmatpush.bf16.msrb.mxu3 %v11145_v44  ;;  %v8387_v44 = vadd.f32 %v8386_v37, %v8374_v18  ;;  %v14546_v18 = vld [vmem:[%s16127_s17 + $0x924] sm:$0xf0]  ;;  %v11480_v20 = vld [vmem:[%s16127_s17 + $0xe50] sm:$0xf] }
 0x387   : > { %8613 = vmatpush.bf16.msrb.mxu0 %v10545_v57  ;;  %v8375_v57 = vpop.f32.mrf.mxu1  ;;  %v10809_v37 = vor.u32 %v14546_v18, %v10808_v13  ;;  %v11288_v18 = vld [vmem:[%s16127_s17 + $0xcd0] sm:$0xf] }
 0x388   : > { %8626 = vmatpush.bf16.msrb.mxu1 %v10737_v55  ;;  %v17961_v55 = vadd.f32 %v8399_v45, %v8387_v44  ;;  %v11361_v44 = vor.u32 %v14684_v42, %v11360_v30  ;;  %v14714_v30 = vld [vmem:[%s16127_s17 + $0xe64] sm:$0xf0]  ;;  %v11672_v42 = vld [vmem:[%s16127_s17 + $0xfd0] sm:$0xf] }
 0x389   : > { %8639 = vmatpush.bf16.msrb.mxu2 %v10929_v58  ;;  %v10665_v58 = vor.u32 %v14510_v43, %v10664_v40  ;;  %v14780_v40 = vld [vmem:[%s16127_s17 + $0x1074] sm:$0xf0]  ;;  %v11936_v43 = vld [vmem:[%s16127_s17 + $0x11e0] sm:$0xf] }
 0x38a   : > { %8652 = vmatpush.bf16.msrb.mxu3 %v11121_v60  ;;  %v10640_v60 = vld [vmem:[%s16127_s17 + $0x7c0] sm:$0xf]  ;;  %v11745_v50 = vor.u32 %v14780_v40, %v11744_v26  ;;  %v11937_v57 = vor.u32 %v14828_v39, %v11936_v43  ;;  %v11289_v40 = vor.u32 %v14666_v19, %v11288_v18 }
 0x38b   : > { %8614 = vmatpush.bf16.msrb.mxu0 %v10521_v7  ;;  %v10424_v7 = vld [vmem:[%s16127_s17 + $0x610] sm:$0xf]  ;;  %v11264_v39 = vld [vmem:[%s16127_s17 + $0xca0] sm:$0xf] }
 0x38c   : > { %8627 = vmatpush.bf16.msrb.mxu1 %v10713_v21  ;;  %v10641_v21 = vor.u32 %v14504_v63, %v10640_v60  ;;  %v14822_v60 = vld [vmem:[%s16127_s17 + $0x11c4] sm:$0xf0]  ;;  %v11216_v19 = vld [vmem:[%s16127_s17 + $0xc40] sm:$0xf] }
 0x38d   : > { %8640 = vmatpush.bf16.msrb.mxu2 %v10905_v17  ;;  %v10833_v17 = vor.u32 %v14552_v56, %v10832_v2  ;;  %v8388_v23 = vpop.f32.mrf.mxu2  ;;  %v11312_v56 = vld [vmem:[%s16127_s17 + $0xd00] sm:$0xf] }
 0x38e   : > { %8653 = vmatpush.bf16.msrb.mxu3 %v11097_v14  ;;  %v11025_v14 = vor.u32 %v14600_v5, %v11024_v3  ;;  %v14672_v3 = vld [vmem:[%s16127_s17 + $0xd14] sm:$0xf0]  ;;  %v11504_v5 = vld [vmem:[%s16127_s17 + $0xe80] sm:$0xf] }
 0x38f   : > { %8615 = vmatpush.bf16.msrb.mxu0 %v10497_v22  ;;  %v11552_v22 = vld [vmem:[%s16127_s17 + $0xee0] sm:$0xf] }
 0x390   : > { %8628 = vmatpush.bf16.msrb.mxu1 %v10689_v33  ;;  %v8401_v33 = vpop.f32.mrf.mxu3  ;;  %v11553_v45 = vor.u32 %v14732_v53, %v11552_v22  ;;  %v14762_v22 = vld [vmem:[%s16127_s17 + $0xfe4] sm:$0xf0] }
 0x391   : > { %8641 = vmatpush.bf16.msrb.mxu2 %v10881_v35  ;;  %v10425_v35 = vor.u32 %v14450_v9, %v10424_v7  ;;  %v14720_v7 = vld [vmem:[%s16127_s17 + $0xe94] sm:$0xf0]  ;;  %v11696_v9 = vld [vmem:[%s16127_s17 + $0x1000] sm:$0xf]  ;;  %v14810_v53 = vld [vmem:[%s16127_s17 + $0x1164] sm:$0xf0]  ;;  %v11673_v43 = vor.u32 %v14762_v22, %v11672_v42 }
 0x392   : > { %8654 = vmatpush.bf16.msrb.mxu3 %v11073_v36  ;;  %v10617_v36 = vor.u32 %v14498_v16, %v10616_v10  ;;  %v14816_v10 = vld [vmem:[%s16127_s17 + $0x1194] sm:$0xf0]  ;;  %v11313_v16 = vor.u32 %v14672_v3, %v11312_v56  ;;  %v11505_v13 = vor.u32 %v14720_v7, %v11504_v5  ;;  %v14702_v56 = vld [vmem:[%s16127_s17 + $0xe04] sm:$0xf0]  ;;  %v11624_v3 = vld [vmem:[%s16127_s17 + $0xf70] sm:$0xf] }
 0x393   : > { %8616 = vmatpush.bf16.msrb.mxu0 %v10473_v54  ;;  %v11528_v54 = vld [vmem:[%s16127_s17 + $0xeb0] sm:$0xf]  ;;  %v14750_v5 = vld [vmem:[%s16127_s17 + $0xf84] sm:$0xf0]  ;;  %v14696_v42 = vld [vmem:[%s16127_s17 + $0xdd4] sm:$0xf0] }
 0x394   : > { %8629 = vmatpush.bf16.msrb.mxu1 %v10665_v58  ;;  %v14726_v58 = vld [vmem:[%s16127_s17 + $0xec4] sm:$0xf0]  ;;  %v11625_v18 = vor.u32 %v14750_v5, %v11624_v3  ;;  %v11600_v22 = vld [vmem:[%s16127_s17 + $0xf40] sm:$0xf]  ;;  %v15020_v3 = vld [vmem:[%s16127_s17 + $0x17f4] sm:$0xf0] }
 0x395   : > { %8642 = vmatpush.bf16.msrb.mxu2 %v10857_v1  ;;  %v11720_v1 = vld [vmem:[%s16127_s17 + $0x1030] sm:$0xf]  ;;  %v11529_v63 = vor.u32 %v14726_v58, %v11528_v54  ;;  %v11840_v54 = vld [vmem:[%s16127_s17 + $0x1120] sm:$0xf] }
 0x396   : > { %8655 = vmatpush.bf16.msrb.mxu3 %v11049_v61  ;;  %v11337_v61 = vor.u32 %v14678_v52, %v11336_v51  ;;  %v11721_v2 = vor.u32 %v14774_v0, %v11720_v1  ;;  %v14708_v51 = vld [vmem:[%s16127_s17 + $0xe34] sm:$0xf0]  ;;  %v11648_v52 = vld [vmem:[%s16127_s17 + $0xfa0] sm:$0xf] }
 0x397   : > { %8617 = vmatpush.bf16.msrb.mxu0 %v10449_v6  ;;  %v11913_v6 = vor.u32 %v14822_v60, %v11912_v4  ;;  %v11240_v4 = vld [vmem:[%s16127_s17 + $0xc70] sm:$0xf]  ;;  %v14654_v60 = vld [vmem:[%s16127_s17 + $0xc84] sm:$0xf0] }
 0x398   : > { %8630 = vmatpush.bf16.msrb.mxu1 %v10641_v21  ;;  %v14768_v21 = vld [vmem:[%s16127_s17 + $0x1014] sm:$0xf0] }
 0x399   : > { %8643 = vmatpush.bf16.msrb.mxu2 %v10833_v17  ;;  %v11888_v17 = vld [vmem:[%s16127_s17 + $0x1180] sm:$0xf] }
 0x39a   : > { %8656 = vmatpush.bf16.msrb.mxu3 %v11025_v14  ;;  %v11697_v14 = vor.u32 %v14768_v21, %v11696_v9  ;;  %v11889_v23 = vor.u32 %v14816_v10, %v11888_v17  ;;  %v11816_v9 = vld [vmem:[%s16127_s17 + $0x10f0] sm:$0xf]  ;;  %v14798_v21 = vld [vmem:[%s16127_s17 + $0x1104] sm:$0xf0]  ;;  %v11241_v10 = vor.u32 %v14654_v60, %v11240_v4  ;;  %v14924_v4 = vld [vmem:[%s16127_s17 + $0x14f4] sm:$0xf0] }
 0x39b   : > { %8618 = vmatpush.bf16.msrb.mxu0 %v10425_v35  ;;  %v8412_v33 = vpop.f32.mrf.mxu0  ;;  %v11864_v35 = vld [vmem:[%s16127_s17 + $0x1150] sm:$0xf]  ;;  %v12512_v60 = vld [vmem:[%s16127_s17 + $0x1660] sm:$0xf] }
 0x39c   : > { %8631 = vmatpush.bf16.msrb.mxu1 %v10617_v36  ;;  %v8413_v26 = vadd.f32 %v8412_v33, %v17961_v55  ;;  %v8425_v36 = vpop.f32.mrf.mxu1  ;;  %v14756_v55 = vld [vmem:[%s16127_s17 + $0xfb4] sm:$0xf0] }
 0x39d   : > { %8644 = vmatpush.bf16.msrb.mxu2 %v10809_v37  ;;  %v11481_v37 = vor.u32 %v14714_v30, %v11480_v20  ;;  %v11649_v0 = vor.u32 %v14756_v55, %v11648_v52  ;;  %v14648_v20 = vld [vmem:[%s16127_s17 + $0xc54] sm:$0xf0]  ;;  %v11817_v30 = vor.u32 %v14798_v21, %v11816_v9  ;;  %v14786_v52 = vld [vmem:[%s16127_s17 + $0x10a4] sm:$0xf0]  ;;  %v12104_v21 = vld [vmem:[%s16127_s17 + $0x1330] sm:$0xf] }
 0x39e   : > { %8657 = vmatpush.bf16.msrb.mxu3 %v11001_v41  ;;  %8619 = vmatmul.bf16.vlgmr.msrb.gmra.mxu0 %v16308_v31  ;;  %v14660_v41 = vld [vmem:[%s16127_s17 + $0xcb4] sm:$0xf0] }
 0x39f   : > { %8663 = vmatpush.bf16.msra.mxu0 %v11361_v44  ;;  %8632 = vmatmul.bf16.vlgmr.msrb.gmra.mxu1 %v16314_v38  ;;  %v11456_v44 = vld [vmem:[%s16127_s17 + $0xe20] sm:$0xf]  ;;  %v11265_v58 = vor.u32 %v14660_v41, %v11264_v39  ;;  %v14744_v33 = vld [vmem:[%s16127_s17 + $0xf54] sm:$0xf0]  ;;  %v11384_v39 = vld [vmem:[%s16127_s17 + $0xd90] sm:$0xf] }
 0x3a0   : > { %8676 = vmatpush.bf16.msra.mxu1 %v11553_v45  ;;  %8645 = vmatmul.bf16.vlgmr.msrb.gmra.mxu2 %v16305_v25  ;;  %v11865_v45 = vor.u32 %v14810_v53, %v11864_v35  ;;  %v11457_v1 = vor.u32 %v14708_v51, %v11456_v44  ;;  %v11792_v35 = vld [vmem:[%s16127_s17 + $0x10c0] sm:$0xf]  ;;  %v14792_v53 = vld [vmem:[%s16127_s17 + $0x10d4] sm:$0xf0]  ;;  %v14690_v41 = vld [vmem:[%s16127_s17 + $0xda4] sm:$0xf0] }
 0x3a1   : > { %8689 = vmatpush.bf16.msra.mxu2 %v11745_v50  ;;  %8658 = vmatmul.bf16.vlgmr.msrb.gmra.mxu3 %v16310_v32  ;;  %v8426_v50 = vadd.f32 %v8425_v36, %v8413_v26  ;;  %v11217_v26 = vor.u32 %v14648_v20, %v11216_v19  ;;  %v14642_v36 = vld [vmem:[%s16127_s17 + $0xc24] sm:$0xf0]  ;;  %v11576_v44 = vld [vmem:[%s16127_s17 + $0xf10] sm:$0xf] }
 0x3a2   : > { %8702 = vmatpush.bf16.msra.mxu3 %v11937_v57  ;;  %v14804_v57 = vld [vmem:[%s16127_s17 + $0x1134] sm:$0xf0]  ;;  %v11768_v51 = vld [vmem:[%s16127_s17 + $0x1090] sm:$0xf]  ;;  %v14966_v19 = vld [vmem:[%s16127_s17 + $0x1644] sm:$0xf0] }
 0x3a3   : > { %8664 = vmatpush.bf16.msra.mxu0 %v11337_v61  ;;  %v11432_v61 = vld [vmem:[%s16127_s17 + $0xdf0] sm:$0xf]  ;;  %v8414_v17 = vpop.f32.mrf.mxu0  ;;  %v11769_v5 = vor.u32 %v14786_v52, %v11768_v51  ;;  %v14858_v51 = vld [vmem:[%s16127_s17 + $0x12e4] sm:$0xf0] }
 0x3a4   : > { %8677 = vmatpush.bf16.msra.mxu1 %v11529_v63  ;;  %v11841_v63 = vor.u32 %v14804_v57, %v11840_v54  ;;  %v8451_v7 = vpop.f32.mrf.mxu3  ;;  %v12128_v54 = vld [vmem:[%s16127_s17 + $0x1360] sm:$0xf]  ;;  %v14876_v57 = vld [vmem:[%s16127_s17 + $0x1374] sm:$0xf0]  ;;  %v14870_v17 = vld [vmem:[%s16127_s17 + $0x1344] sm:$0xf0] }
 0x3a5   : > { %8690 = vmatpush.bf16.msra.mxu2 %v11721_v2  ;;  %v8438_v2 = vpop.f32.mrf.mxu2  ;;  %v12680_v20 = vld [vmem:[%s16127_s17 + $0x17b0] sm:$0xf] }
 0x3a6   : > { %8703 = vmatpush.bf16.msra.mxu3 %v11913_v6  ;;  %v8439_v6 = vadd.f32 %v8438_v2, %v8426_v50  ;;  %v14738_v50 = vld [vmem:[%s16127_s17 + $0xf24] sm:$0xf0]  ;;  %v12248_v52 = vld [vmem:[%s16127_s17 + $0x1450] sm:$0xf] }
 0x3a7   : > { %8665 = vmatpush.bf16.msra.mxu0 %v11313_v16  ;;  %v8427_v16 = vpop.f32.mrf.mxu1  ;;  %v11577_v2 = vor.u32 %v14738_v50, %v11576_v44  ;;  %v12056_v50 = vld [vmem:[%s16127_s17 + $0x12d0] sm:$0xf] }
 0x3a8   : > { %8678 = vmatpush.bf16.msra.mxu1 %v11505_v13  ;;  %v18032_v13 = vadd.f32 %v8451_v7, %v8439_v6  ;;  %v12129_v6 = vor.u32 %v14876_v57, %v12128_v54  ;;  %v14906_v54 = vld [vmem:[%s16127_s17 + $0x1464] sm:$0xf0]  ;;  %v12440_v57 = vld [vmem:[%s16127_s17 + $0x15d0] sm:$0xf] }
 0x3a9   : > { %8691 = vmatpush.bf16.msra.mxu2 %v11697_v14  ;;  %v11433_v14 = vor.u32 %v14702_v56, %v11432_v61  ;;  %v14972_v61 = vld [vmem:[%s16127_s17 + $0x1674] sm:$0xf0]  ;;  %v12704_v56 = vld [vmem:[%s16127_s17 + $0x17e0] sm:$0xf] }
 0x3aa   : > { %8704 = vmatpush.bf16.msra.mxu3 %v11889_v23  ;;  %v11408_v23 = vld [vmem:[%s16127_s17 + $0xdc0] sm:$0xf]  ;;  %v12513_v9 = vor.u32 %v14972_v61, %v12512_v60  ;;  %v12705_v16 = vor.u32 %v15020_v3, %v12704_v56  ;;  %v12057_v61 = vor.u32 %v14858_v51, %v12056_v50 }
 0x3ab   : > { %8666 = vmatpush.bf16.msra.mxu0 %v11289_v40  ;;  %v11192_v40 = vld [vmem:[%s16127_s17 + $0xc10] sm:$0xf]  ;;  %v12032_v3 = vld [vmem:[%s16127_s17 + $0x12a0] sm:$0xf] }
 0x3ac   : > { %8679 = vmatpush.bf16.msra.mxu1 %v11481_v37  ;;  %v11409_v37 = vor.u32 %v14696_v42, %v11408_v23  ;;  %v15014_v23 = vld [vmem:[%s16127_s17 + $0x17c4] sm:$0xf0]  ;;  %v11984_v51 = vld [vmem:[%s16127_s17 + $0x1240] sm:$0xf] }
 0x3ad   : > { %8692 = vmatpush.bf16.msra.mxu2 %v11673_v43  ;;  %v11601_v43 = vor.u32 %v14744_v33, %v11600_v22  ;;  %v8440_v55 = vpop.f32.mrf.mxu2  ;;  %v12080_v33 = vld [vmem:[%s16127_s17 + $0x1300] sm:$0xf] }
 0x3ae   : > { %8705 = vmatpush.bf16.msra.mxu3 %v11865_v45  ;;  %v11793_v45 = vor.u32 %v14792_v53, %v11792_v35  ;;  %v14864_v35 = vld [vmem:[%s16127_s17 + $0x1314] sm:$0xf0]  ;;  %v12272_v53 = vld [vmem:[%s16127_s17 + $0x1480] sm:$0xf] }
 0x3af   : > { %8667 = vmatpush.bf16.msra.mxu0 %v11265_v58  ;;  %v12320_v58 = vld [vmem:[%s16127_s17 + $0x14e0] sm:$0xf] }
 0x3b0   : > { %8680 = vmatpush.bf16.msra.mxu1 %v11457_v1  ;;  %v8453_v1 = vpop.f32.mrf.mxu3  ;;  %v12321_v7 = vor.u32 %v14924_v4, %v12320_v58  ;;  %v14954_v58 = vld [vmem:[%s16127_s17 + $0x15e4] sm:$0xf0] }
 0x3b1   : > { %8693 = vmatpush.bf16.msra.mxu2 %v11649_v0  ;;  %v11193_v0 = vor.u32 %v14642_v36, %v11192_v40  ;;  %v14912_v40 = vld [vmem:[%s16127_s17 + $0x1494] sm:$0xf0]  ;;  %v12464_v36 = vld [vmem:[%s16127_s17 + $0x1600] sm:$0xf]  ;;  %v15002_v4 = vld [vmem:[%s16127_s17 + $0x1764] sm:$0xf0]  ;;  %v12441_v56 = vor.u32 %v14954_v58, %v12440_v57 }
 0x3b2   : > { %8706 = vmatpush.bf16.msra.mxu3 %v11841_v63  ;;  %v11385_v63 = vor.u32 %v14690_v41, %v11384_v39  ;;  %v15008_v39 = vld [vmem:[%s16127_s17 + $0x1794] sm:$0xf0]  ;;  %v12081_v41 = vor.u32 %v14864_v35, %v12080_v33  ;;  %v12273_v44 = vor.u32 %v14912_v40, %v12272_v53  ;;  %v14894_v33 = vld [vmem:[%s16127_s17 + $0x1404] sm:$0xf0]  ;;  %v12392_v35 = vld [vmem:[%s16127_s17 + $0x1570] sm:$0xf] }
 0x3b3   : > { %8668 = vmatpush.bf16.msra.mxu0 %v11241_v10  ;;  %v12296_v10 = vld [vmem:[%s16127_s17 + $0x14b0] sm:$0xf]  ;;  %v14942_v53 = vld [vmem:[%s16127_s17 + $0x1584] sm:$0xf0]  ;;  %v14888_v57 = vld [vmem:[%s16127_s17 + $0x13d4] sm:$0xf0] }
 0x3b4   : > { %8681 = vmatpush.bf16.msra.mxu1 %v11433_v14  ;;  %v14918_v14 = vld [vmem:[%s16127_s17 + $0x14c4] sm:$0xf0]  ;;  %v12393_v50 = vor.u32 %v14942_v53, %v12392_v35  ;;  %v12368_v58 = vld [vmem:[%s16127_s17 + $0x1540] sm:$0xf]  ;;  %v15212_v35 = vld [vmem:[%s16127_s17 + $0x1df4] sm:$0xf0] }
 0x3b5   : > { %8694 = vmatpush.bf16.msra.mxu2 %v11625_v18  ;;  %v12488_v18 = vld [vmem:[%s16127_s17 + $0x1630] sm:$0xf]  ;;  %v12297_v42 = vor.u32 %v14918_v14, %v12296_v10  ;;  %v12608_v10 = vld [vmem:[%s16127_s17 + $0x1720] sm:$0xf] }
 0x3b6   : > { %8707 = vmatpush.bf16.msra.mxu3 %v11817_v30  ;;  %v12105_v30 = vor.u32 %v14870_v17, %v12104_v21  ;;  %v12489_v22 = vor.u32 %v14966_v19, %v12488_v18  ;;  %v14900_v21 = vld [vmem:[%s16127_s17 + $0x1434] sm:$0xf0]  ;;  %v12416_v17 = vld [vmem:[%s16127_s17 + $0x15a0] sm:$0xf] }
 0x3b7   : > { %8669 = vmatpush.bf16.msra.mxu0 %v11217_v26  ;;  %v12681_v26 = vor.u32 %v15014_v23, %v12680_v20  ;;  %v12008_v20 = vld [vmem:[%s16127_s17 + $0x1270] sm:$0xf]  ;;  %v14846_v23 = vld [vmem:[%s16127_s17 + $0x1284] sm:$0xf0] }
 0x3b8   : > { %8682 = vmatpush.bf16.msra.mxu1 %v11409_v37  ;;  %v14960_v37 = vld [vmem:[%s16127_s17 + $0x1614] sm:$0xf0] }
 0x3b9   : > { %8695 = vmatpush.bf16.msra.mxu2 %v11601_v43  ;;  %v12656_v43 = vld [vmem:[%s16127_s17 + $0x1780] sm:$0xf] }
 0x3ba   : > { %8708 = vmatpush.bf16.msra.mxu3 %v11793_v45  ;;  %v12465_v45 = vor.u32 %v14960_v37, %v12464_v36  ;;  %v12657_v55 = vor.u32 %v15008_v39, %v12656_v43  ;;  %v12584_v36 = vld [vmem:[%s16127_s17 + $0x16f0] sm:$0xf]  ;;  %v14990_v37 = vld [vmem:[%s16127_s17 + $0x1704] sm:$0xf0]  ;;  %v12009_v39 = vor.u32 %v14846_v23, %v12008_v20  ;;  %v15116_v20 = vld [vmem:[%s16127_s17 + $0x1af4] sm:$0xf0] }
 0x3bb   : > { %8670 = vmatpush.bf16.msra.mxu0 %v11193_v0  ;;  %v8464_v1 = vpop.f32.mrf.mxu0  ;;  %v12632_v0 = vld [vmem:[%s16127_s17 + $0x1750] sm:$0xf]  ;;  %v13280_v23 = vld [vmem:[%s16127_s17 + $0x1c60] sm:$0xf] }
 0x3bc   : > { %8683 = vmatpush.bf16.msra.mxu1 %v11385_v63  ;;  %v8465_v60 = vadd.f32 %v8464_v1, %v18032_v13  ;;  %v8477_v63 = vpop.f32.mrf.mxu1  ;;  %v14948_v13 = vld [vmem:[%s16127_s17 + $0x15b4] sm:$0xf0] }
 0x3bd   : > { %8696 = vmatpush.bf16.msra.mxu2 %v11577_v2  ;;  %v12249_v2 = vor.u32 %v14906_v54, %v12248_v52  ;;  %v12417_v19 = vor.u32 %v14948_v13, %v12416_v17  ;;  %v14840_v52 = vld [vmem:[%s16127_s17 + $0x1254] sm:$0xf0]  ;;  %v12585_v54 = vor.u32 %v14990_v37, %v12584_v36  ;;  %v14978_v17 = vld [vmem:[%s16127_s17 + $0x16a4] sm:$0xf0]  ;;  %v12872_v37 = vld [vmem:[%s16127_s17 + $0x1930] sm:$0xf] }
 0x3be   : > { %8709 = vmatpush.bf16.msra.mxu3 %v11769_v5  ;;  %8671 = vmatmul.bf16.vlgmr.msra.gmra.mxu0 %v16382_v8  ;;  %v14852_v5 = vld [vmem:[%s16127_s17 + $0x12b4] sm:$0xf0] }
 0x3bf   : > { %8715 = vmatpush.bf16.msrb.mxu0 %v12129_v6  ;;  %8684 = vmatmul.bf16.vlgmr.msra.gmra.mxu1 %v16388_v12  ;;  %v12224_v6 = vld [vmem:[%s16127_s17 + $0x1420] sm:$0xf]  ;;  %v12033_v14 = vor.u32 %v14852_v5, %v12032_v3  ;;  %v14936_v1 = vld [vmem:[%s16127_s17 + $0x1554] sm:$0xf0]  ;;  %v12152_v3 = vld [vmem:[%s16127_s17 + $0x1390] sm:$0xf] }
 0x3c0   : > { %8728 = vmatpush.bf16.msrb.mxu1 %v12321_v7  ;;  %8697 = vmatmul.bf16.vlgmr.msra.gmra.mxu2 %v16386_v11  ;;  %v12633_v7 = vor.u32 %v15002_v4, %v12632_v0  ;;  %v12225_v18 = vor.u32 %v14900_v21, %v12224_v6  ;;  %v12560_v0 = vld [vmem:[%s16127_s17 + $0x16c0] sm:$0xf]  ;;  %v14984_v4 = vld [vmem:[%s16127_s17 + $0x16d4] sm:$0xf0]  ;;  %v14882_v5 = vld [vmem:[%s16127_s17 + $0x13a4] sm:$0xf0] }
 0x3c1   : > { %8741 = vmatpush.bf16.msrb.mxu2 %v12513_v9  ;;  %8710 = vmatmul.bf16.vlgmr.msra.gmra.mxu3 %v16391_v15  ;;  %v8478_v9 = vadd.f32 %v8477_v63, %v8465_v60  ;;  %v11985_v60 = vor.u32 %v14840_v52, %v11984_v51  ;;  %v14834_v63 = vld [vmem:[%s16127_s17 + $0x1224] sm:$0xf0]  ;;  %v12344_v6 = vld [vmem:[%s16127_s17 + $0x1510] sm:$0xf] }
 0x3c2   : > { %8754 = vmatpush.bf16.msrb.mxu3 %v12705_v16  ;;  %v14996_v16 = vld [vmem:[%s16127_s17 + $0x1734] sm:$0xf0]  ;;  %v12536_v21 = vld [vmem:[%s16127_s17 + $0x1690] sm:$0xf]  ;;  %v15158_v51 = vld [vmem:[%s16127_s17 + $0x1c44] sm:$0xf0] }
 0x3c3   : > { %8716 = vmatpush.bf16.msrb.mxu0 %v12105_v30  ;;  %v12200_v30 = vld [vmem:[%s16127_s17 + $0x13f0] sm:$0xf]  ;;  %v8466_v43 = vpop.f32.mrf.mxu0  ;;  %v12537_v53 = vor.u32 %v14978_v17, %v12536_v21  ;;  %v15050_v21 = vld [vmem:[%s16127_s17 + $0x18e4] sm:$0xf0] }
 0x3c4   : > { %8729 = vmatpush.bf16.msrb.mxu1 %v12297_v42  ;;  %v12609_v42 = vor.u32 %v14996_v16, %v12608_v10  ;;  %v8503_v40 = vpop.f32.mrf.mxu3  ;;  %v12896_v10 = vld [vmem:[%s16127_s17 + $0x1960] sm:$0xf]  ;;  %v15068_v16 = vld [vmem:[%s16127_s17 + $0x1974] sm:$0xf0]  ;;  %v15062_v43 = vld [vmem:[%s16127_s17 + $0x1944] sm:$0xf0] }
 0x3c5   : > { %8742 = vmatpush.bf16.msrb.mxu2 %v12489_v22  ;;  %v8490_v22 = vpop.f32.mrf.mxu2  ;;  %v13448_v52 = vld [vmem:[%s16127_s17 + $0x1db0] sm:$0xf] }
 0x3c6   : > { %8755 = vmatpush.bf16.msrb.mxu3 %v12681_v26  ;;  %v8491_v26 = vadd.f32 %v8490_v22, %v8478_v9  ;;  %v14930_v9 = vld [vmem:[%s16127_s17 + $0x1524] sm:$0xf0]  ;;  %v13016_v17 = vld [vmem:[%s16127_s17 + $0x1a50] sm:$0xf] }
 0x3c7   : > { %8717 = vmatpush.bf16.msrb.mxu0 %v12081_v41  ;;  %v8479_v41 = vpop.f32.mrf.mxu1  ;;  %v12345_v22 = vor.u32 %v14930_v9, %v12344_v6  ;;  %v12824_v9 = vld [vmem:[%s16127_s17 + $0x18d0] sm:$0xf] }
 0x3c8   : > { %8730 = vmatpush.bf16.msrb.mxu1 %v12273_v44  ;;  %v18103_v44 = vadd.f32 %v8503_v40, %v8491_v26  ;;  %v12897_v26 = vor.u32 %v15068_v16, %v12896_v10  ;;  %v15098_v10 = vld [vmem:[%s16127_s17 + $0x1a64] sm:$0xf0]  ;;  %v13208_v16 = vld [vmem:[%s16127_s17 + $0x1bd0] sm:$0xf] }
 0x3c9   : > { %8743 = vmatpush.bf16.msrb.mxu2 %v12465_v45  ;;  %v12201_v45 = vor.u32 %v14894_v33, %v12200_v30  ;;  %v15164_v30 = vld [vmem:[%s16127_s17 + $0x1c74] sm:$0xf0]  ;;  %v13472_v33 = vld [vmem:[%s16127_s17 + $0x1de0] sm:$0xf] }
 0x3ca   : > { %8756 = vmatpush.bf16.msrb.mxu3 %v12657_v55  ;;  %v12176_v55 = vld [vmem:[%s16127_s17 + $0x13c0] sm:$0xf]  ;;  %v13281_v36 = vor.u32 %v15164_v30, %v13280_v23  ;;  %v13473_v41 = vor.u32 %v15212_v35, %v13472_v33  ;;  %v12825_v30 = vor.u32 %v15050_v21, %v12824_v9 }
 0x3cb   : > { %8718 = vmatpush.bf16.msrb.mxu0 %v12057_v61  ;;  %v11960_v61 = vld [vmem:[%s16127_s17 + $0x1210] sm:$0xf]  ;;  %v12800_v35 = vld [vmem:[%s16127_s17 + $0x18a0] sm:$0xf] }
 0x3cc   : > { %8731 = vmatpush.bf16.msrb.mxu1 %v12249_v2  ;;  %v12177_v2 = vor.u32 %v14888_v57, %v12176_v55  ;;  %v15206_v55 = vld [vmem:[%s16127_s17 + $0x1dc4] sm:$0xf0]  ;;  %v12752_v21 = vld [vmem:[%s16127_s17 + $0x1840] sm:$0xf] }
 0x3cd   : > { %8744 = vmatpush.bf16.msrb.mxu2 %v12441_v56  ;;  %v12369_v56 = vor.u32 %v14936_v1, %v12368_v58  ;;  %v8492_v13 = vpop.f32.mrf.mxu2  ;;  %v12848_v1 = vld [vmem:[%s16127_s17 + $0x1900] sm:$0xf] }
 0x3ce   : > { %8757 = vmatpush.bf16.msrb.mxu3 %v12633_v7  ;;  %v12561_v7 = vor.u32 %v14984_v4, %v12560_v0  ;;  %v15056_v0 = vld [vmem:[%s16127_s17 + $0x1914] sm:$0xf0]  ;;  %v13040_v4 = vld [vmem:[%s16127_s17 + $0x1a80] sm:$0xf] }
 0x3cf   : > { %8719 = vmatpush.bf16.msrb.mxu0 %v12033_v14  ;;  %v13088_v14 = vld [vmem:[%s16127_s17 + $0x1ae0] sm:$0xf] }
 0x3d0   : > { %8732 = vmatpush.bf16.msrb.mxu1 %v12225_v18  ;;  %v8505_v18 = vpop.f32.mrf.mxu3  ;;  %v13089_v40 = vor.u32 %v15116_v20, %v13088_v14  ;;  %v15146_v14 = vld [vmem:[%s16127_s17 + $0x1be4] sm:$0xf0] }
 0x3d1   : > { %8745 = vmatpush.bf16.msrb.mxu2 %v12417_v19  ;;  %v11961_v19 = vor.u32 %v14834_v63, %v11960_v61  ;;  %v15104_v61 = vld [vmem:[%s16127_s17 + $0x1a94] sm:$0xf0]  ;;  %v13232_v63 = vld [vmem:[%s16127_s17 + $0x1c00] sm:$0xf]  ;;  %v15194_v20 = vld [vmem:[%s16127_s17 + $0x1d64] sm:$0xf0]  ;;  %v13209_v33 = vor.u32 %v15146_v14, %v13208_v16 }
 0x3d2   : > { %8758 = vmatpush.bf16.msrb.mxu3 %v12609_v42  ;;  %v12153_v42 = vor.u32 %v14882_v5, %v12152_v3  ;;  %v15200_v3 = vld [vmem:[%s16127_s17 + $0x1d94] sm:$0xf0]  ;;  %v12849_v5 = vor.u32 %v15056_v0, %v12848_v1  ;;  %v13041_v6 = vor.u32 %v15104_v61, %v13040_v4  ;;  %v15086_v1 = vld [vmem:[%s16127_s17 + $0x1a04] sm:$0xf0]  ;;  %v13160_v0 = vld [vmem:[%s16127_s17 + $0x1b70] sm:$0xf] }
 0x3d3   : > { %8720 = vmatpush.bf16.msrb.mxu0 %v12009_v39  ;;  %v13064_v39 = vld [vmem:[%s16127_s17 + $0x1ab0] sm:$0xf]  ;;  %v15134_v4 = vld [vmem:[%s16127_s17 + $0x1b84] sm:$0xf0]  ;;  %v15080_v16 = vld [vmem:[%s16127_s17 + $0x19d4] sm:$0xf0] }
 0x3d4   : > { %8733 = vmatpush.bf16.msrb.mxu1 %v12201_v45  ;;  %v15110_v45 = vld [vmem:[%s16127_s17 + $0x1ac4] sm:$0xf0]  ;;  %v13161_v9 = vor.u32 %v15134_v4, %v13160_v0  ;;  %v13136_v14 = vld [vmem:[%s16127_s17 + $0x1b40] sm:$0xf]  ;;  %v15404_v0 = vld [vmem:[%s16127_s17 + $0x23f4] sm:$0xf0] }
 0x3d5   : > { %8746 = vmatpush.bf16.msrb.mxu2 %v12393_v50  ;;  %v13256_v50 = vld [vmem:[%s16127_s17 + $0x1c30] sm:$0xf]  ;;  %v13065_v57 = vor.u32 %v15110_v45, %v13064_v39  ;;  %v13376_v39 = vld [vmem:[%s16127_s17 + $0x1d20] sm:$0xf] }
 0x3d6   : > { %8759 = vmatpush.bf16.msrb.mxu3 %v12585_v54  ;;  %v12873_v54 = vor.u32 %v15062_v43, %v12872_v37  ;;  %v13257_v58 = vor.u32 %v15158_v51, %v13256_v50  ;;  %v15092_v37 = vld [vmem:[%s16127_s17 + $0x1a34] sm:$0xf0]  ;;  %v13184_v43 = vld [vmem:[%s16127_s17 + $0x1ba0] sm:$0xf] }
 0x3d7   : > { %8721 = vmatpush.bf16.msrb.mxu0 %v11985_v60  ;;  %v13449_v60 = vor.u32 %v15206_v55, %v13448_v52  ;;  %v12776_v52 = vld [vmem:[%s16127_s17 + $0x1870] sm:$0xf]  ;;  %v15038_v55 = vld [vmem:[%s16127_s17 + $0x1884] sm:$0xf0] }
 0x3d8   : > { %8734 = vmatpush.bf16.msrb.mxu1 %v12177_v2  ;;  %v15152_v2 = vld [vmem:[%s16127_s17 + $0x1c14] sm:$0xf0] }
 0x3d9   : > { %8747 = vmatpush.bf16.msrb.mxu2 %v12369_v56  ;;  %v13424_v56 = vld [vmem:[%s16127_s17 + $0x1d80] sm:$0xf] }
 0x3da   : > { %8760 = vmatpush.bf16.msrb.mxu3 %v12561_v7  ;;  %v13233_v7 = vor.u32 %v15152_v2, %v13232_v63  ;;  %v13425_v13 = vor.u32 %v15200_v3, %v13424_v56  ;;  %v13352_v63 = vld [vmem:[%s16127_s17 + $0x1cf0] sm:$0xf]  ;;  %v15182_v2 = vld [vmem:[%s16127_s17 + $0x1d04] sm:$0xf0]  ;;  %v12777_v3 = vor.u32 %v15038_v55, %v12776_v52  ;;  %v15308_v52 = vld [vmem:[%s16127_s17 + $0x20f4] sm:$0xf0] }
 0x3db   : > { %8722 = vmatpush.bf16.msrb.mxu0 %v11961_v19  ;;  %v8516_v18 = vpop.f32.mrf.mxu0  ;;  %v13400_v19 = vld [vmem:[%s16127_s17 + $0x1d50] sm:$0xf]  ;;  %v14048_v55 = vld [vmem:[%s16127_s17 + $0x2260] sm:$0xf] }
 0x3dc   : > { %8735 = vmatpush.bf16.msrb.mxu1 %v12153_v42  ;;  %v8517_v23 = vadd.f32 %v8516_v18, %v18103_v44  ;;  %v8529_v42 = vpop.f32.mrf.mxu1  ;;  %v15140_v44 = vld [vmem:[%s16127_s17 + $0x1bb4] sm:$0xf0] }
 0x3dd   : > { %8748 = vmatpush.bf16.msrb.mxu2 %v12345_v22  ;;  %v13017_v22 = vor.u32 %v15098_v10, %v13016_v17  ;;  %v13185_v51 = vor.u32 %v15140_v44, %v13184_v43  ;;  %v15032_v17 = vld [vmem:[%s16127_s17 + $0x1854] sm:$0xf0]  ;;  %v13353_v10 = vor.u32 %v15182_v2, %v13352_v63  ;;  %v15170_v43 = vld [vmem:[%s16127_s17 + $0x1ca4] sm:$0xf0]  ;;  %v13640_v2 = vld [vmem:[%s16127_s17 + $0x1f30] sm:$0xf] }
 0x3de   : > { %8761 = vmatpush.bf16.msrb.mxu3 %v12537_v53  ;;  %8723 = vmatmul.bf16.vlgmr.msrb.gmra.mxu0 %v16448_v46  ;;  %v15044_v53 = vld [vmem:[%s16127_s17 + $0x18b4] sm:$0xf0] }
 0x3df   : > { %8767 = vmatpush.bf16.msra.mxu0 %v12897_v26  ;;  %8736 = vmatmul.bf16.vlgmr.msrb.gmra.mxu1 %v16452_v48  ;;  %v12992_v26 = vld [vmem:[%s16127_s17 + $0x1a20] sm:$0xf]  ;;  %v12801_v45 = vor.u32 %v15044_v53, %v12800_v35  ;;  %v15128_v18 = vld [vmem:[%s16127_s17 + $0x1b54] sm:$0xf0]  ;;  %v12920_v35 = vld [vmem:[%s16127_s17 + $0x1990] sm:$0xf] }
 0x3e0   : > { %8780 = vmatpush.bf16.msra.mxu1 %v13089_v40  ;;  %8749 = vmatmul.bf16.vlgmr.msrb.gmra.mxu2 %v16450_v47  ;;  %v13401_v40 = vor.u32 %v15194_v20, %v13400_v19  ;;  %v12993_v50 = vor.u32 %v15092_v37, %v12992_v26  ;;  %v13328_v19 = vld [vmem:[%s16127_s17 + $0x1cc0] sm:$0xf]  ;;  %v15176_v20 = vld [vmem:[%s16127_s17 + $0x1cd4] sm:$0xf0]  ;;  %v15074_v53 = vld [vmem:[%s16127_s17 + $0x19a4] sm:$0xf0] }
 0x3e1   : > { %8793 = vmatpush.bf16.msra.mxu2 %v13281_v36  ;;  %8762 = vmatmul.bf16.vlgmr.msrb.gmra.mxu3 %v16454_v49  ;;  %v8530_v36 = vadd.f32 %v8529_v42, %v8517_v23  ;;  %v12753_v23 = vor.u32 %v15032_v17, %v12752_v21  ;;  %v15026_v42 = vld [vmem:[%s16127_s17 + $0x1824] sm:$0xf0]  ;;  %v13112_v26 = vld [vmem:[%s16127_s17 + $0x1b10] sm:$0xf] }
 0x3e2   : > { %8806 = vmatpush.bf16.msra.mxu3 %v13473_v41  ;;  %v15188_v41 = vld [vmem:[%s16127_s17 + $0x1d34] sm:$0xf0]  ;;  %v13304_v37 = vld [vmem:[%s16127_s17 + $0x1c90] sm:$0xf]  ;;  %v15350_v21 = vld [vmem:[%s16127_s17 + $0x2244] sm:$0xf0] }
 0x3e3   : > { %8768 = vmatpush.bf16.msra.mxu0 %v12873_v54  ;;  %v12968_v54 = vld [vmem:[%s16127_s17 + $0x19f0] sm:$0xf]  ;;  %v8518_v56 = vpop.f32.mrf.mxu0  ;;  %v13305_v4 = vor.u32 %v15170_v43, %v13304_v37 }
 0x3e4   : > { %8781 = vmatpush.bf16.msra.mxu1 %v13065_v57  ;;  %v13377_v57 = vor.u32 %v15188_v41, %v13376_v39  ;;  %v8555_v61 = vpop.f32.mrf.mxu3  ;;  %v13664_v39 = vld [vmem:[%s16127_s17 + $0x1f60] sm:$0xf]  ;;  %v15260_v41 = vld [vmem:[%s16127_s17 + $0x1f74] sm:$0xf0]  ;;  %v15254_v56 = vld [vmem:[%s16127_s17 + $0x1f44] sm:$0xf0] }
 0x3e5   : > { %8794 = vmatpush.bf16.msra.mxu2 %v13257_v58  ;;  %v8542_v58 = vpop.f32.mrf.mxu2  ;;  %v14216_v17 = vld [vmem:[%s16127_s17 + $0x23b0] sm:$0xf] }
 0x3e6   : > { %8807 = vmatpush.bf16.msra.mxu3 %v13449_v60  ;;  %v8543_v60 = vadd.f32 %v8542_v58, %v8530_v36  ;;  %v15122_v36 = vld [vmem:[%s16127_s17 + $0x1b24] sm:$0xf0] }
 0x3e7   : > { %8769 = vmatpush.bf16.msra.mxu0 %v12849_v5  ;;  %v8531_v5 = vpop.f32.mrf.mxu1  ;;  %v13113_v58 = vor.u32 %v15122_v36, %v13112_v26  ;;  %v14192_v26 = vld [vmem:[%s16127_s17 + $0x2380] sm:$0xf]  ;;  %v15752_v36 = vld [vmem:[#allocation1 + $0x1b] sm:$0xff] }
 0x3e8   : > { %8782 = vmatpush.bf16.msra.mxu1 %v13041_v6  ;;  %v18174_v6 = vadd.f32 %v8555_v61, %v8543_v60  ;;  %v13665_v60 = vor.u32 %v15260_v41, %v13664_v39  ;;  %v13592_v39 = vld [vmem:[%s16127_s17 + $0x1ed0] sm:$0xf]  ;;  %v15242_v41 = vld [vmem:[%s16127_s17 + $0x1ee4] sm:$0xf0] }
 0x3e9   : > { %8795 = vmatpush.bf16.msra.mxu2 %v13233_v7  ;;  %v12969_v7 = vor.u32 %v15086_v1, %v12968_v54  ;;  %v15356_v54 = vld [vmem:[%s16127_s17 + $0x2274] sm:$0xf0]  ;;  %v14240_v1 = vld [vmem:[%s16127_s17 + $0x23e0] sm:$0xf] }
 0x3ea   : > { %8808 = vmatpush.bf16.msra.mxu3 %v13425_v13  ;;  %v12944_v13 = vld [vmem:[%s16127_s17 + $0x19c0] sm:$0xf]  ;;  %v14049_v63 = vor.u32 %v15356_v54, %v14048_v55  ;;  %v14241_v5 = vor.u32 %v15404_v0, %v14240_v1  ;;  %v15338_v55 = vld [vmem:[%s16127_s17 + $0x21e4] sm:$0xf0]  ;;  %v14168_v54 = vld [vmem:[%s16127_s17 + $0x2350] sm:$0xf] }
 0x3eb   : > { %8770 = vmatpush.bf16.msra.mxu0 %v12825_v30  ;;  %v12728_v30 = vld [vmem:[%s16127_s17 + $0x1810] sm:$0xf] }
 0x3ec   : > { %8783 = vmatpush.bf16.msra.mxu1 %v13017_v22  ;;  %v12945_v22 = vor.u32 %v15080_v16, %v12944_v13  ;;  %v15398_v13 = vld [vmem:[%s16127_s17 + $0x23c4] sm:$0xf0] }
 0x3ed   : > { %8796 = vmatpush.bf16.msra.mxu2 %v13209_v33  ;;  %v13137_v33 = vor.u32 %v15128_v18, %v13136_v14  ;;  %v8544_v44 = vpop.f32.mrf.mxu2  ;;  %v13616_v18 = vld [vmem:[%s16127_s17 + $0x1f00] sm:$0xf] }
 0x3ee   : > { %8809 = vmatpush.bf16.msra.mxu3 %v13401_v40  ;;  %v13329_v40 = vor.u32 %v15176_v20, %v13328_v19  ;;  %v15248_v19 = vld [vmem:[%s16127_s17 + $0x1f14] sm:$0xf0]  ;;  %v13808_v20 = vld [vmem:[%s16127_s17 + $0x2080] sm:$0xf] }
 0x3ef   : > { %8771 = vmatpush.bf16.msra.mxu0 %v12801_v45  ;;  %v13856_v45 = vld [vmem:[%s16127_s17 + $0x20e0] sm:$0xf]  ;;  %v13617_v37 = vor.u32 %v15248_v19, %v13616_v18  ;;  %v13736_v18 = vld [vmem:[%s16127_s17 + $0x1ff0] sm:$0xf] }
 0x3f0   : > { %8784 = vmatpush.bf16.msra.mxu1 %v12993_v50  ;;  %v8557_v50 = vpop.f32.mrf.mxu3  ;;  %v13857_v61 = vor.u32 %v15308_v52, %v13856_v45  ;;  %v13784_v45 = vld [vmem:[%s16127_s17 + $0x2050] sm:$0xf] }
 0x3f1   : > { %8797 = vmatpush.bf16.msra.mxu2 %v13185_v51  ;;  %v12729_v51 = vor.u32 %v15026_v42, %v12728_v30  ;;  %v14217_v30 = vor.u32 %v15398_v13, %v14216_v17  ;;  %v15296_v42 = vld [vmem:[%s16127_s17 + $0x2094] sm:$0xf0]  ;;  %v13976_v52 = vld [vmem:[%s16127_s17 + $0x21d0] sm:$0xf] }
 0x3f2   : > { %8810 = vmatpush.bf16.msra.mxu3 %v13377_v57  ;;  %v12921_v57 = vor.u32 %v15074_v53, %v12920_v35  ;;  %v15750_v35 = vld [vmem:[#allocation1 + $0x12] sm:$0xff]  ;;  %v15751_v53 = vld [vmem:[#allocation1 + $0x9] sm:$0xff]  ;;  %v13809_v43 = vor.u32 %v15296_v42, %v13808_v20 }
 0x3f3   : > { %8772 = vmatpush.bf16.msra.mxu0 %v12777_v3  ;;  %v13832_v3 = vld [vmem:[%s16127_s17 + $0x20b0] sm:$0xf]  ;;  %v15326_v42 = vld [vmem:[%s16127_s17 + $0x2184] sm:$0xf0] }
 0x3f4   : > { %8785 = vmatpush.bf16.msra.mxu1 %v12969_v7  ;;  %v15302_v7 = vld [vmem:[%s16127_s17 + $0x20c4] sm:$0xf0] }
 0x3f5   : > { %8798 = vmatpush.bf16.msra.mxu2 %v13161_v9  ;;  %v14024_v9 = vld [vmem:[%s16127_s17 + $0x2230] sm:$0xf]  ;;  %v13833_v16 = vor.u32 %v15302_v7, %v13832_v3  ;;  %v15284_v3 = vld [vmem:[%s16127_s17 + $0x2034] sm:$0xf0] }
 0x3f6   : > { %8811 = vmatpush.bf16.msra.mxu3 %v13353_v10  ;;  %v13641_v10 = vor.u32 %v15254_v56, %v13640_v2  ;;  %v14025_v14 = vor.u32 %v15350_v21, %v14024_v9  ;;  %v15332_v7 = vld [vmem:[%s16127_s17 + $0x21b4] sm:$0xf0]  ;;  %v14144_v9 = vld [vmem:[%s16127_s17 + $0x2320] sm:$0xf] }
 0x3f7   : > { %8773 = vmatpush.bf16.msra.mxu0 %v12753_v23  ;;  %v15749_v23 = vld [vmem:[#allocation1] sm:$0xff] }
 0x3f8   : > { %8786 = vmatpush.bf16.msra.mxu1 %v12945_v22  ;;  %v14000_v22 = vld [vmem:[%s16127_s17 + $0x2200] sm:$0xf]  ;;  %v15380_v21 = vld [vmem:[%s16127_s17 + $0x2334] sm:$0xf0] }
 0x3f9   : > { %8799 = vmatpush.bf16.msra.mxu2 %v13137_v33  ;;  %v15344_v33 = vld [vmem:[%s16127_s17 + $0x2214] sm:$0xf0]  ;;  %v14145_v20 = vor.u32 %v15380_v21, %v14144_v9  ;;  %v15314_v9 = vld [vmem:[%s16127_s17 + $0x2124] sm:$0xf0]  ;;  %v14072_v21 = vld [vmem:[%s16127_s17 + $0x2290] sm:$0xf] }
 0x3fa   : > { %8812 = vmatpush.bf16.msra.mxu3 %v13329_v40  ;;  %v15392_v40 = vld [vmem:[%s16127_s17 + $0x2394] sm:$0xf0]  ;;  %v14001_v44 = vor.u32 %v15344_v33, %v14000_v22  ;;  %v14120_v33 = vld [vmem:[%s16127_s17 + $0x22f0] sm:$0xf] }
 0x3fb   : > { %8774 = vmatpush.bf16.msra.mxu0 %v12729_v51  ;;  %v14193_v50 = vor.u32 %v15392_v40, %v14192_v26  ;;  %v15290_v51 = vld [vmem:[%s16127_s17 + $0x2064] sm:$0xf0]  ;;  %v18224_v1 = vpop.f32.mrf.mxu0 }
 0x3fc   : > { %8787 = vmatpush.bf16.msra.mxu1 %v12921_v57  ;;  %v15386_v57 = vld [vmem:[%s16127_s17 + $0x2364] sm:$0xf0]  ;;  %v13785_v0 = vor.u32 %v15290_v51, %v13784_v45  ;;  %v18229_v2 = vpop.f32.mrf.mxu1  ;;  %v15272_v45 = vld [vmem:[%s16127_s17 + $0x1fd4] sm:$0xf0] }
 0x3fd   : > { %8800 = vmatpush.bf16.msra.mxu2 %v13113_v58  ;;  %v13593_v58 = vor.u32 %v15242_v41, %v13592_v39  ;;  %v14169_v56 = vor.u32 %v15386_v57, %v14168_v54  ;;  %v15320_v51 = vld [vmem:[%s16127_s17 + $0x2154] sm:$0xf0]  ;;  %v15753_v54 = vld [vmem:[%s16134_s12] sm:$0x3f] }
 0x3fe   : > { %8813 = vmatpush.bf16.msra.mxu3 %v13305_v4  ;;  %8775 = vmatmul.bf16.vlgmr.msra.gmra.mxu0 %v15749_v23  ;;  %v13977_v4 = vor.u32 %v15338_v55, %v13976_v52  ;;  %v15278_v23 = vld [vmem:[%s16127_s17 + $0x2004] sm:$0xf0]  ;;  %v14096_v52 = vld [vmem:[%s16127_s17 + $0x22c0] sm:$0xf]  ;;  %v15368_v55 = vld [vmem:[%s16127_s17 + $0x22d4] sm:$0xf0] }
 0x3ff   : > { %8819 = vmatpush.bf16.msrb.mxu0 %v13665_v60  ;;  %8788 = vmatmul.bf16.vlgmr.msra.gmra.mxu1 %v15751_v53  ;;  %v13568_v60 = vld [vmem:[%s16127_s17 + $0x1ea0] sm:$0xf]  ;;  %v13737_v40 = vor.u32 %v15278_v23, %v13736_v18  ;;  %v1489_v57 = vperm.slane %v15753_v54, 4  ;;  %v10018_v23 = vld [vmem:[%s16127_s17 + $0x2f8] sm:$0xf0] }
 0x400   : > { %8832 = vmatpush.bf16.msrb.mxu1 %v13857_v61  ;;  %8801 = vmatmul.bf16.vlgmr.msra.gmra.mxu2 %v15750_v35  ;;  %v15236_v61 = vld [vmem:[%s16127_s17 + $0x1eb4] sm:$0xf0]  ;;  %v15374_v35 = vld [vmem:[%s16127_s17 + $0x2304] sm:$0xf0]  ;;  %v10378_v54 = vld [vmem:[%s16127_s17 + $0x5c8] sm:$0xf0] }
 0x401   : > { %8845 = vmatpush.bf16.msrb.mxu2 %v14049_v63  ;;  %8814 = vmatmul.bf16.vlgmr.msra.gmra.mxu3 %v15752_v36  ;;  %v13760_v63 = vld [vmem:[%s16127_s17 + $0x2020] sm:$0xf]  ;;  %v13569_v17 = vor.u32 %v15236_v61, %v13568_v60  ;;  %v14121_v41 = vor.u32 %v15374_v35, %v14120_v33  ;;  %v8569_v18 = vadd.f32 %v18224_v1, %v1489_v57 }
 0x402   : > { %8858 = vmatpush.bf16.msrb.mxu3 %v14241_v5  ;;  %v13952_v5 = vld [vmem:[%s16127_s17 + $0x21a0] sm:$0xf]  ;;  %v13761_v13 = vor.u32 %v15284_v3, %v13760_v63  ;;  %v13688_v63 = vld [vmem:[%s16127_s17 + $0x1f90] sm:$0xf] }
 0x403   : > { %8820 = vmatpush.bf16.msrb.mxu0 %v13641_v10  ;;  %v13953_v10 = vor.u32 %v15332_v7, %v13952_v5  ;;  %v18239_v19 = vpop.f32.mrf.mxu2  ;;  %v8570_v26 = vpop.f32.mrf.mxu0  ;;  %v13880_v3 = vld [vmem:[%s16127_s17 + $0x2110] sm:$0xf]  ;;  %v14097_v7 = vor.u32 %v15368_v55, %v14096_v52  ;;  %v10186_v52 = vld [vmem:[%s16127_s17 + $0x448] sm:$0xf0]  ;;  %v14435_v55 = vld [vmem:[%s16127_s17 + $0x5b4] sm:$0xf] }
 0x404   : > { %8833 = vmatpush.bf16.msrb.mxu1 %v13833_v16  ;;  %v13544_v16 = vld [vmem:[%s16127_s17 + $0x1e70] sm:$0xf]  ;;  %v18244_v22 = vpop.f32.mrf.mxu3  ;;  %v8583_v39 = vpop.f32.mrf.mxu1  ;;  %v13881_v35 = vor.u32 %v15314_v9, %v13880_v3  ;;  %v10402_v26 = vld [vmem:[%s16127_s17 + $0x5f8] sm:$0xf0] }
 0x405   : > { %8846 = vmatpush.bf16.msrb.mxu2 %v14025_v14  ;;  %v15230_v14 = vld [vmem:[%s16127_s17 + $0x1e84] sm:$0xf0]  ;;  %v14339_v39 = vld [vmem:[%s16127_s17 + $0x2b4] sm:$0xf]  ;;  %v9970_v3 = vld [vmem:[%s16127_s17 + $0x298] sm:$0xf0] }
 0x406   : > { %8859 = vmatpush.bf16.msrb.mxu3 %v14217_v30  ;;  %v13928_v30 = vld [vmem:[%s16127_s17 + $0x2170] sm:$0xf]  ;;  %v13545_v53 = vor.u32 %v15230_v14, %v13544_v16  ;;  %v9826_v16 = vld [vmem:[%s16127_s17 + $0x178] sm:$0xf0]  ;;  %v14345_v14 = vld [vmem:[%s16127_s17 + $0x2e4] sm:$0xf] }
 0x407   : > { %8821 = vmatpush.bf16.msrb.mxu0 %v13617_v37  ;;  %v13929_v36 = vor.u32 %v15326_v42, %v13928_v30  ;;  %v13520_v37 = vld [vmem:[%s16127_s17 + $0x1e40] sm:$0xf]  ;;  %v14393_v30 = vld [vmem:[%s16127_s17 + $0x464] sm:$0xf]  ;;  %v10210_v42 = vld [vmem:[%s16127_s17 + $0x478] sm:$0xf0] }
 0x408   : > { %8834 = vmatpush.bf16.msrb.mxu1 %v13809_v43  ;;  %v15224_v43 = vld [vmem:[%s16127_s17 + $0x1e54] sm:$0xf0]  ;;  %v15755_v9 = vld [vmem:[#allocation1 + $0x36] sm:$0xff] }
 0x409   : > { %8847 = vmatpush.bf16.msrb.mxu2 %v14001_v44  ;;  %v13712_v44 = vld [vmem:[%s16127_s17 + $0x1fc0] sm:$0xf] }
 0x40a   : > { %8860 = vmatpush.bf16.msrb.mxu3 %v14193_v50  ;;  %v13904_v50 = vld [vmem:[%s16127_s17 + $0x2140] sm:$0xf]  ;;  %v13713_v60 = vor.u32 %v15272_v45, %v13712_v44  ;;  %v9802_v44 = vld [vmem:[%s16127_s17 + $0x148] sm:$0xf0] }
 0x40b   : > { %8822 = vmatpush.bf16.msrb.mxu0 %v13593_v58  ;;  %v13521_v58 = vor.u32 %v15224_v43, %v13520_v37  ;;  %v13905_v61 = vor.u32 %v15320_v51, %v13904_v50  ;;  %v8596_v5 = vpop.f32.mrf.mxu2  ;;  %v10213_v37 = vor.u32 %v14393_v30, %v10210_v42  ;;  %v14291_v43 = vld [vmem:[%s16127_s17 + $0x134] sm:$0xf]  ;;  %v9994_v50 = vld [vmem:[%s16127_s17 + $0x2c8] sm:$0xf0] }
 0x40c   : > { %8835 = vmatpush.bf16.msrb.mxu1 %v13785_v0  ;;  %v13496_v0 = vld [vmem:[%s16127_s17 + $0x1e10] sm:$0xf]  ;;  %v14387_v51 = vld [vmem:[%s16127_s17 + $0x434] sm:$0xf]  ;;  %v9805_v57 = vor.u32 %v14291_v43, %v9802_v44  ;;  %v14381_v5 = vld [vmem:[%s16127_s17 + $0x404] sm:$0xf] }
 0x40d   : > { %8848 = vmatpush.bf16.msrb.mxu2 %v13977_v4  ;;  %v15218_v4 = vld [vmem:[%s16127_s17 + $0x1e24] sm:$0xf0]  ;;  %v14327_v30 = vld [vmem:[%s16127_s17 + $0x254] sm:$0xf]  ;;  %v14273_v43 = vld [vmem:[%s16127_s17 + $0xa4] sm:$0xf] }
 0x40e   : > { %8861 = vmatpush.bf16.msrb.mxu3 %v14169_v56  ;;  %v15266_v56 = vld [vmem:[%s16127_s17 + $0x1fa4] sm:$0xf0]  ;;  %v9730_v44 = vld [vmem:[%s16127_s17 + $0xb8] sm:$0xf0] }
 0x40f   : > { %8823 = vmatpush.bf16.msrb.mxu0 %v13569_v17  ;;  %v15362_v17 = vld [vmem:[%s16127_s17 + $0x22a4] sm:$0xf0]  ;;  %v13689_v33 = vor.u32 %v15266_v56, %v13688_v63  ;;  %v15754_v63 = vld [vmem:[#allocation1 + $0x24] sm:$0xff]  ;;  %v10381_v56 = vor.u32 %v14435_v55, %v10378_v54  ;;  %v14417_v54 = vld [vmem:[%s16127_s17 + $0x524] sm:$0xf] }
 0x410   : > { %8836 = vmatpush.bf16.msrb.mxu1 %v13761_v13  ;;  %v8609_v13 = vpop.f32.mrf.mxu3  ;;  %v14073_v1 = vor.u32 %v15362_v17, %v14072_v21  ;;  %v15756_v21 = vld [vmem:[#allocation1 + $0x2d] sm:$0xff]  ;;  %v10114_v55 = vld [vmem:[%s16127_s17 + $0x3b8] sm:$0xf0] }
 0x411   : > { %8849 = vmatpush.bf16.msrb.mxu2 %v13953_v10  ;;  %v14297_v10 = vld [vmem:[%s16127_s17 + $0x164] sm:$0xf]  ;;  %v15757_v13 = vld [vmem:[#allocation1 + $0x3f] sm:$0xff] }
 0x412   : > { %8862 = vmatpush.bf16.msrb.mxu3 %v14145_v20  ;;  %v13497_v20 = vor.u32 %v15218_v4, %v13496_v0  ;;  %v14285_v4 = vld [vmem:[%s16127_s17 + $0x104] sm:$0xf] }
 0x413   : > { %8824 = vmatpush.bf16.msrb.mxu0 %v13545_v53  ;;  %v14441_v53 = vld [vmem:[%s16127_s17 + $0x5e4] sm:$0xf] }
 0x414   : > { %8837 = vmatpush.bf16.msrb.mxu1 %v13737_v40  ;;  %v9829_v40 = vor.u32 %v14297_v10, %v9826_v16  ;;  %v10405_v45 = vor.u32 %v14441_v53, %v10402_v26  ;;  %v14429_v17 = vld [vmem:[%s16127_s17 + $0x584] sm:$0xf]  ;;  %v10138_v53 = vld [vmem:[%s16127_s17 + $0x3e8] sm:$0xf0]  ;;  %v14423_v26 = vld [vmem:[%s16127_s17 + $0x554] sm:$0xf] }
 0x415   : > { %8850 = vmatpush.bf16.msrb.mxu2 %v13929_v36  ;;  %v10021_v36 = vor.u32 %v14345_v14, %v10018_v23  ;;  %v9754_v23 = vld [vmem:[%s16127_s17 + $0xe8] sm:$0xf0] }
 0x416   : > { %8863 = vmatpush.bf16.msrb.mxu3 %v14121_v41  ;;  %v8582_v41 = vadd.f32 %v18229_v2, %v8569_v18  ;;  %v9997_v2 = vor.u32 %v14339_v39, %v9994_v50  ;;  %v14321_v39 = vld [vmem:[%s16127_s17 + $0x224] sm:$0xf] }
 0x417   : > { %8825 = vmatpush.bf16.msrb.mxu0 %v13521_v58  ;;  %v10189_v58 = vor.u32 %v14387_v51, %v10186_v52  ;;  %v9922_v51 = vld [vmem:[%s16127_s17 + $0x238] sm:$0xf0]  ;;  %v14369_v52 = vld [vmem:[%s16127_s17 + $0x3a4] sm:$0xf] }
 0x418   : > { %8838 = vmatpush.bf16.msrb.mxu1 %v13713_v60  ;;  %v8595_v0 = vadd.f32 %v18239_v19, %v8582_v41  ;;  %v9778_v60 = vld [vmem:[%s16127_s17 + $0x118] sm:$0xf0] }
 0x419   : > { %8851 = vmatpush.bf16.msrb.mxu2 %v13905_v61  ;;  %v14333_v61 = vld [vmem:[%s16127_s17 + $0x284] sm:$0xf]  ;;  %v10354_v19 = vld [vmem:[%s16127_s17 + $0x598] sm:$0xf0]  ;;  %v9781_v10 = vor.u32 %v14285_v4, %v9778_v60  ;;  %v10117_v4 = vor.u32 %v14369_v52, %v10114_v55  ;;  %v14267_v60 = vld [vmem:[%s16127_s17 + $0x74] sm:$0xf] }
 0x41a   : > { %8864 = vmatpush.bf16.msrb.mxu3 %v14097_v7  ;;  %v10162_v7 = vld [vmem:[%s16127_s17 + $0x418] sm:$0xf0]  ;;  %v9973_v16 = vor.u32 %v14333_v61, %v9970_v3  ;;  %v8608_v18 = vadd.f32 %v18244_v22, %v8595_v0  ;;  %v10357_v42 = vor.u32 %v14429_v17, %v10354_v19  ;;  %v9925_v0 = vor.u32 %v14321_v39, %v9922_v51  ;;  %v9706_v61 = vld [vmem:[%s16127_s17 + $0x88] sm:$0xf0]  ;;  %v14411_v19 = vld [vmem:[%s16127_s17 + $0x4f4] sm:$0xf] }
 0x41b   : > { %8826 = vmatpush.bf16.msrb.mxu0 %v13497_v20  ;;  %v10165_v14 = vor.u32 %v14381_v5, %v10162_v7  ;;  %v14279_v20 = vld [vmem:[%s16127_s17 + $0xd4] sm:$0xf]  ;;  %v8620_v22 = vpop.f32.mrf.mxu0  ;;  %v9898_v5 = vld [vmem:[%s16127_s17 + $0x208] sm:$0xf0] }
 0x41c   : > { %8839 = vmatpush.bf16.msrb.mxu1 %v13689_v33  ;;  %v9946_v33 = vld [vmem:[%s16127_s17 + $0x268] sm:$0xf0]  ;;  %v8621_v41 = vadd.f32 %v8620_v22, %v8608_v18  ;;  %v14363_v7 = vld [vmem:[%s16127_s17 + $0x374] sm:$0xf]  ;;  %v10258_v22 = vld [vmem:[%s16127_s17 + $0x4d8] sm:$0xf0] }
 0x41d   : > { %8852 = vmatpush.bf16.msrb.mxu2 %v13881_v35  ;;  %v14375_v35 = vld [vmem:[%s16127_s17 + $0x3d4] sm:$0xf]  ;;  %v10042_v55 = vld [vmem:[%s16127_s17 + $0x328] sm:$0xf0] }
 0x41e   : > { %8865 = vmatpush.bf16.msrb.mxu3 %v14073_v1  ;;  %8827 = vmatmul.bf16.vlgmr.msrb.gmra.mxu0 %v15754_v63  ;;  %v10330_v1 = vld [vmem:[%s16127_s17 + $0x568] sm:$0xf0]  ;;  %v14315_v63 = vld [vmem:[%s16127_s17 + $0x1f4] sm:$0xf] }
 0x41f   : > { %8871 = vmatpush.bf16.msra.mxu0 %v9829_v40  ;;  %8840 = vmatmul.bf16.vlgmr.msrb.gmra.mxu1 %v15756_v21  ;;  %v9757_v40 = vor.u32 %v14279_v20, %v9754_v23  ;;  %v10333_v50 = vor.u32 %v14423_v26, %v10330_v1  ;;  %v9901_v18 = vor.u32 %v14315_v63, %v9898_v5  ;;  %v14261_v23 = vld [vmem:[%s16127_s17 + $0x44] sm:$0xf]  ;;  %v10066_v1 = vld [vmem:[%s16127_s17 + $0x358] sm:$0xf0] }
 0x420   : > { %8884 = vmatpush.bf16.msra.mxu1 %v10021_v36  ;;  %8853 = vmatmul.bf16.vlgmr.msrb.gmra.mxu2 %v15755_v9  ;;  %v9949_v36 = vor.u32 %v14327_v30, %v9946_v33  ;;  %v10090_v9 = vld [vmem:[%s16127_s17 + $0x388] sm:$0xf0]  ;;  %v9682_v30 = vld [vmem:[%s16127_s17 + $0x58] sm:$0xf0]  ;;  %v14357_v26 = vld [vmem:[%s16127_s17 + $0x344] sm:$0xf] }
 0x421   : > { %8897 = vmatpush.bf16.msra.mxu2 %v10213_v37  ;;  %8866 = vmatmul.bf16.vlgmr.msrb.gmra.mxu3 %v15757_v13  ;;  %v10141_v37 = vor.u32 %v14375_v35, %v10138_v53  ;;  %v10282_v13 = vld [vmem:[%s16127_s17 + $0x508] sm:$0xf0]  ;;  %v10093_v20 = vor.u32 %v14363_v7, %v10090_v9  ;;  %v9874_v53 = vld [vmem:[%s16127_s17 + $0x1d8] sm:$0xf0]  ;;  %v10069_v39 = vor.u32 %v14357_v26, %v10066_v1  ;;  %v14585_v63 = vld [vmem:[%s16127_s17 + $0xa64] sm:$0xf] }
 0x422   : > { %8910 = vmatpush.bf16.msra.mxu3 %v10405_v45  ;;  %v8633_v45 = vpop.f32.mrf.mxu1  ;;  %v10285_v35 = vor.u32 %v14411_v19, %v10282_v13  ;;  %v14633_v7 = vld [vmem:[%s16127_s17 + $0xbe4] sm:$0xf]  ;;  %v11170_v9 = vld [vmem:[%s16127_s17 + $0xbf8] sm:$0xf0] }
 0x423   : > { %8872 = vmatpush.bf16.msra.mxu0 %v9805_v57  ;;  %v10306_v57 = vld [vmem:[%s16127_s17 + $0x538] sm:$0xf0] }
 0x424   : > { %8885 = vmatpush.bf16.msra.mxu1 %v9997_v2  ;;  %v8634_v2 = vadd.f32 %v8633_v45, %v8621_v41  ;;  %v10309_v3 = vor.u32 %v14417_v54, %v10306_v57  ;;  %v8659_v17 = vpop.f32.mrf.mxu3  ;;  %v14303_v41 = vld [vmem:[%s16127_s17 + $0x194] sm:$0xf]  ;;  %v9850_v45 = vld [vmem:[%s16127_s17 + $0x1a8] sm:$0xf0] }
 0x425   : > { %8898 = vmatpush.bf16.msra.mxu2 %v10189_v58  ;;  %v9733_v58 = vor.u32 %v14273_v43, %v9730_v44  ;;  %v9658_v43 = vld [vmem:[%s16127_s17 + $0x28] sm:$0xf0]  ;;  %v14399_v54 = vld [vmem:[%s16127_s17 + $0x494] sm:$0xf] }
 0x426   : > { %8911 = vmatpush.bf16.msra.mxu3 %v10381_v56  ;;  %v8646_v56 = vpop.f32.mrf.mxu2  ;;  %v10234_v57 = vld [vmem:[%s16127_s17 + $0x4a8] sm:$0xf0] }
 0x427   : > { %8873 = vmatpush.bf16.msra.mxu0 %v9781_v10  ;;  %v8647_v21 = vadd.f32 %v8646_v56, %v8634_v2  ;;  %v9709_v10 = vor.u32 %v14267_v60, %v9706_v61  ;;  %v10786_v61 = vld [vmem:[%s16127_s17 + $0x8f8] sm:$0xf0] }
 0x428   : > { %8886 = vmatpush.bf16.msra.mxu1 %v9973_v16  ;;  %v10978_v56 = vld [vmem:[%s16127_s17 + $0xa78] sm:$0xf0] }
 0x429   : > { %8899 = vmatpush.bf16.msra.mxu2 %v10165_v14  ;;  %v18317_v16 = vadd.f32 %v8659_v17, %v8647_v21  ;;  %v8622_v14 = vpop.f32.mrf.mxu0  ;;  %v10237_v21 = vor.u32 %v14399_v54, %v10234_v57  ;;  %v10981_v13 = vor.u32 %v14585_v63, %v10978_v56  ;;  %v14519_v54 = vld [vmem:[%s16127_s17 + $0x854] sm:$0xf] }
 0x42a   : > { %8912 = vmatpush.bf16.msra.mxu3 %v10357_v42  ;;  %v14309_v42 = vld [vmem:[%s16127_s17 + $0x1c4] sm:$0xf]  ;;  %v8635_v33 = vpop.f32.mrf.mxu1  ;;  %v10570_v14 = vld [vmem:[%s16127_s17 + $0x748] sm:$0xf0] }
 0x42b   : > { %8874 = vmatpush.bf16.msra.mxu0 %v9757_v40  ;;  %v14405_v40 = vld [vmem:[%s16127_s17 + $0x4c4] sm:$0xf]  ;;  %v9877_v44 = vor.u32 %v14309_v42, %v9874_v53  ;;  %v10954_v42 = vld [vmem:[%s16127_s17 + $0xa48] sm:$0xf0]  ;;  %v14627_v33 = vld [vmem:[%s16127_s17 + $0xbb4] sm:$0xf] }
 0x42c   : > { %8887 = vmatpush.bf16.msra.mxu1 %v9949_v36  ;;  %v9685_v36 = vor.u32 %v14261_v23, %v9682_v30  ;;  %v10261_v52 = vor.u32 %v14405_v40, %v10258_v22  ;;  %v8661_v2 = vpop.f32.mrf.mxu3  ;;  %v10762_v23 = vld [vmem:[%s16127_s17 + $0x8c8] sm:$0xf0]  ;;  %v14579_v30 = vld [vmem:[%s16127_s17 + $0xa34] sm:$0xf]  ;;  %v14477_v40 = vld [vmem:[%s16127_s17 + $0x704] sm:$0xf] }
 0x42d   : > { %8900 = vmatpush.bf16.msra.mxu2 %v10141_v37  ;;  %v14255_v37 = vld [vmem:[%s16127_s17 + $0x14] sm:$0xf]  ;;  %v10957_v1 = vor.u32 %v14579_v30, %v10954_v42  ;;  %v10546_v22 = vld [vmem:[%s16127_s17 + $0x718] sm:$0xf0]  ;;  %v10906_v2 = vld [vmem:[%s16127_s17 + $0x9e8] sm:$0xf0] }
 0x42e   : > { %8913 = vmatpush.bf16.msra.mxu3 %v10333_v50  ;;  %v14351_v50 = vld [vmem:[%s16127_s17 + $0x314] sm:$0xf]  ;;  %v8648_v51 = vpop.f32.mrf.mxu2  ;;  %v9661_v60 = vor.u32 %v14255_v37, %v9658_v43  ;;  %v10738_v43 = vld [vmem:[%s16127_s17 + $0x898] sm:$0xf0]  ;;  %v10474_v30 = vld [vmem:[%s16127_s17 + $0x688] sm:$0xf0] }
 0x42f   : > { %8875 = vmatpush.bf16.msra.mxu0 %v9733_v58  ;;  %v14489_v58 = vld [vmem:[%s16127_s17 + $0x764] sm:$0xf]  ;;  %v10045_v5 = vor.u32 %v14351_v50, %v10042_v55  ;;  %v10549_v50 = vor.u32 %v14477_v40, %v10546_v22  ;;  %v10522_v55 = vld [vmem:[%s16127_s17 + $0x6e8] sm:$0xf0]  ;;  %v14507_v42 = vld [vmem:[%s16127_s17 + $0x7f4] sm:$0xf] }
 0x430   : > { %8888 = vmatpush.bf16.msra.mxu1 %v9925_v0  ;;  %v10594_v0 = vld [vmem:[%s16127_s17 + $0x778] sm:$0xf0] }
 0x431   : > { %8901 = vmatpush.bf16.msra.mxu2 %v10117_v4  ;;  %v14537_v4 = vld [vmem:[%s16127_s17 + $0x8e4] sm:$0xf]  ;;  %v10597_v17 = vor.u32 %v14489_v58, %v10594_v0  ;;  %v14615_v0 = vld [vmem:[%s16127_s17 + $0xb54] sm:$0xf] }
 0x432   : > { %8914 = vmatpush.bf16.msra.mxu3 %v10309_v3  ;;  %v9853_v3 = vor.u32 %v14303_v41, %v9850_v45  ;;  %v10789_v19 = vor.u32 %v14537_v4, %v10786_v61  ;;  %v14621_v41 = vld [vmem:[%s16127_s17 + $0xb84] sm:$0xf]  ;;  %v11122_v45 = vld [vmem:[%s16127_s17 + $0xb98] sm:$0xf0]  ;;  %v11098_v4 = vld [vmem:[%s16127_s17 + $0xb68] sm:$0xf0] }
 0x433   : > { %8876 = vmatpush.bf16.msra.mxu0 %v9709_v10  ;;  %v14483_v10 = vld [vmem:[%s16127_s17 + $0x734] sm:$0xf]  ;;  %v11125_v57 = vor.u32 %v14621_v41, %v11122_v45 }
 0x434   : > { %8889 = vmatpush.bf16.msra.mxu1 %v9901_v18  ;;  %v14531_v18 = vld [vmem:[%s16127_s17 + $0x8b4] sm:$0xf]  ;;  %v10573_v53 = vor.u32 %v14483_v10, %v10570_v14  ;;  %v11074_v10 = vld [vmem:[%s16127_s17 + $0xb38] sm:$0xf0] }
 0x435   : > { %8902 = vmatpush.bf16.msra.mxu2 %v10093_v20  ;;  %v11173_v20 = vor.u32 %v14633_v7, %v11170_v9  ;;  %v10765_v26 = vor.u32 %v14531_v18, %v10762_v23  ;;  %v14513_v7 = vld [vmem:[%s16127_s17 + $0x824] sm:$0xf]  ;;  %v11101_v9 = vor.u32 %v14615_v0, %v11098_v4  ;;  %v14459_v23 = vld [vmem:[%s16127_s17 + $0x674] sm:$0xf]  ;;  %v10426_v4 = vld [vmem:[%s16127_s17 + $0x628] sm:$0xf0] }
 0x436   : > { %8915 = vmatpush.bf16.msra.mxu3 %v10285_v35  ;;  %v11146_v35 = vld [vmem:[%s16127_s17 + $0xbc8] sm:$0xf0]  ;;  %v14447_v0 = vld [vmem:[%s16127_s17 + $0x614] sm:$0xf] }
 0x437   : > { %8877 = vmatpush.bf16.msra.mxu0 %v9685_v36  ;;  %v14525_v36 = vld [vmem:[%s16127_s17 + $0x884] sm:$0xf]  ;;  %v11149_v37 = vor.u32 %v14627_v33, %v11146_v35 }
 0x438   : > { %8890 = vmatpush.bf16.msra.mxu1 %v9877_v44  ;;  %v14573_v44 = vld [vmem:[%s16127_s17 + $0xa04] sm:$0xf]  ;;  %v10741_v51 = vor.u32 %v14525_v36, %v10738_v43  ;;  %v14603_v36 = vld [vmem:[%s16127_s17 + $0xaf4] sm:$0xf] }
 0x439   : > { %8903 = vmatpush.bf16.msra.mxu2 %v10069_v39  ;;  %v10930_v39 = vld [vmem:[%s16127_s17 + $0xa18] sm:$0xf0] }
 0x43a   : > { %8916 = vmatpush.bf16.msra.mxu3 %v10261_v52  ;;  %v10933_v52 = vor.u32 %v14573_v44, %v10930_v39  ;;  %v10477_v44 = vor.u32 %v14459_v23, %v10474_v30 }
 0x43b   : > { %8878 = vmatpush.bf16.msra.mxu0 %v9661_v60  ;;  %v8672_v58 = vpop.f32.mrf.mxu0 }
 0x43c   : > { %8891 = vmatpush.bf16.msra.mxu1 %v9853_v3  ;;  %v8685_v61 = vpop.f32.mrf.mxu1  ;;  %v14465_v3 = vld [vmem:[%s16127_s17 + $0x6a4] sm:$0xf] }
 0x43d   : > { %8904 = vmatpush.bf16.msra.mxu2 %v10045_v5  ;;  %v10498_v5 = vld [vmem:[%s16127_s17 + $0x6b8] sm:$0xf0] }
 0x43e   : > { %8917 = vmatpush.bf16.msra.mxu3 %v10237_v21  ;;  %8879 = vmatmul.bf16.vlgmr.msra.gmra.mxu0 %v16256_v28  ;;  %v10714_v28 = vld [vmem:[%s16127_s17 + $0x868] sm:$0xf0]  ;;  %v10501_v14 = vor.u32 %v14465_v3, %v10498_v5 }
 0x43f   : > { %8923 = vmatpush.bf16.msrb.mxu0 %v10597_v17  ;;  %8892 = vmatmul.bf16.vlgmr.msra.gmra.mxu1 %v16262_v34  ;;  %v8673_v34 = vadd.f32 %v8672_v58, %v18317_v16  ;;  %v10717_v63 = vor.u32 %v14519_v54, %v10714_v28  ;;  %v10690_v17 = vld [vmem:[%s16127_s17 + $0x838] sm:$0xf0]  ;;  %v10810_v5 = vld [vmem:[%s16127_s17 + $0x928] sm:$0xf0] }
 0x440   : > { %8936 = vmatpush.bf16.msrb.mxu1 %v10789_v19  ;;  %8905 = vmatmul.bf16.vlgmr.msra.gmra.mxu2 %v16254_v27  ;;  %v14471_v27 = vld [vmem:[%s16127_s17 + $0x6d4] sm:$0xf]  ;;  %v14561_v19 = vld [vmem:[%s16127_s17 + $0x9a4] sm:$0xf]  ;;  %v10882_v16 = vld [vmem:[%s16127_s17 + $0x9b8] sm:$0xf0]  ;;  %v10693_v18 = vor.u32 %v14513_v7, %v10690_v17 }
 0x441   : > { %8949 = vmatpush.bf16.msrb.mxu2 %v10981_v13  ;;  %8918 = vmatmul.bf16.vlgmr.msra.gmra.mxu3 %v16258_v29  ;;  %v14567_v29 = vld [vmem:[%s16127_s17 + $0x9d4] sm:$0xf]  ;;  %v10525_v60 = vor.u32 %v14471_v27, %v10522_v55  ;;  %v8686_v21 = vadd.f32 %v8685_v61, %v8673_v34  ;;  %v14609_v13 = vld [vmem:[%s16127_s17 + $0xb24] sm:$0xf]  ;;  %v10642_v54 = vld [vmem:[%s16127_s17 + $0x7d8] sm:$0xf0] }
 0x442   : > { %8962 = vmatpush.bf16.msrb.mxu3 %v11173_v20  ;;  %v10909_v56 = vor.u32 %v14567_v29, %v10906_v2  ;;  %v10885_v20 = vor.u32 %v14561_v19, %v10882_v16  ;;  %v11077_v33 = vor.u32 %v14609_v13, %v11074_v10  ;;  %v14501_v27 = vld [vmem:[%s16127_s17 + $0x7c4] sm:$0xf]  ;;  %v10834_v28 = vld [vmem:[%s16127_s17 + $0x958] sm:$0xf0]  ;;  %v14495_v61 = vld [vmem:[%s16127_s17 + $0x794] sm:$0xf]  ;;  %v10429_v10 = vor.u32 %v14447_v0, %v10426_v4 }
 0x443   : > { %8924 = vmatpush.bf16.msrb.mxu0 %v10573_v53  ;;  %v8698_v35 = vpop.f32.mrf.mxu2  ;;  %v10666_v53 = vld [vmem:[%s16127_s17 + $0x808] sm:$0xf0]  ;;  %v8674_v43 = vpop.f32.mrf.mxu0  ;;  %v14597_v29 = vld [vmem:[%s16127_s17 + $0xac4] sm:$0xf]  ;;  %v11026_v2 = vld [vmem:[%s16127_s17 + $0xad8] sm:$0xf0]  ;;  %v10645_v34 = vor.u32 %v14501_v27, %v10642_v54 }
 0x444   : > { %8937 = vmatpush.bf16.msrb.mxu1 %v10765_v26  ;;  %v14555_v26 = vld [vmem:[%s16127_s17 + $0x974] sm:$0xf]  ;;  %v8699_v40 = vadd.f32 %v8698_v35, %v8686_v21  ;;  %v8711_v22 = vpop.f32.mrf.mxu3  ;;  %v8687_v39 = vpop.f32.mrf.mxu1  ;;  %v10669_v45 = vor.u32 %v14507_v42, %v10666_v53  ;;  %v11029_v3 = vor.u32 %v14597_v29, %v11026_v2  ;;  %v14681_v17 = vld [vmem:[%s16127_s17 + $0xd64] sm:$0xf]  ;;  %v11362_v19 = vld [vmem:[%s16127_s17 + $0xd78] sm:$0xf0] }
 0x445   : > { %8950 = vmatpush.bf16.msrb.mxu2 %v10957_v1  ;;  %v10858_v1 = vld [vmem:[%s16127_s17 + $0x988] sm:$0xf0]  ;;  %v14591_v7 = vld [vmem:[%s16127_s17 + $0xa94] sm:$0xf]  ;;  %v14729_v16 = vld [vmem:[%s16127_s17 + $0xee4] sm:$0xf]  ;;  %v11365_v53 = vor.u32 %v14681_v17, %v11362_v19 }
 0x446   : > { %8963 = vmatpush.bf16.msrb.mxu3 %v11149_v37  ;;  %v11050_v37 = vld [vmem:[%s16127_s17 + $0xb08] sm:$0xf0]  ;;  %v18388_v41 = vadd.f32 %v8711_v22, %v8699_v40  ;;  %v14825_v42 = vld [vmem:[%s16127_s17 + $0x11e4] sm:$0xf]  ;;  %v14675_v40 = vld [vmem:[%s16127_s17 + $0xd34] sm:$0xf] }
 0x447   : > { %8925 = vmatpush.bf16.msrb.mxu0 %v10549_v50  ;;  %v10861_v50 = vor.u32 %v14555_v26, %v10858_v1  ;;  %v11053_v55 = vor.u32 %v14603_v36, %v11050_v37  ;;  %v11338_v22 = vld [vmem:[%s16127_s17 + $0xd48] sm:$0xf0]  ;;  %v14723_v36 = vld [vmem:[%s16127_s17 + $0xeb4] sm:$0xf]  ;;  %v11314_v54 = vld [vmem:[%s16127_s17 + $0xd18] sm:$0xf0] }
 0x448   : > { %8938 = vmatpush.bf16.msrb.mxu1 %v10741_v51  ;;  %v14453_v51 = vld [vmem:[%s16127_s17 + $0x644] sm:$0xf]  ;;  %v11530_v43 = vld [vmem:[%s16127_s17 + $0xec8] sm:$0xf0]  ;;  %v11506_v29 = vld [vmem:[%s16127_s17 + $0xe98] sm:$0xf0] }
 0x449   : > { %8951 = vmatpush.bf16.msrb.mxu2 %v10933_v52  ;;  %v10450_v52 = vld [vmem:[%s16127_s17 + $0x658] sm:$0xf0]  ;;  %v11722_v39 = vld [vmem:[%s16127_s17 + $0x1048] sm:$0xf0]  ;;  %v14765_v2 = vld [vmem:[%s16127_s17 + $0x1004] sm:$0xf] }
 0x44a   : > { %8964 = vmatpush.bf16.msrb.mxu3 %v11125_v57  ;;  %v14549_v57 = vld [vmem:[%s16127_s17 + $0x944] sm:$0xf]  ;;  %v10453_v58 = vor.u32 %v14453_v51, %v10450_v52  ;;  %v11341_v51 = vor.u32 %v14675_v40, %v11338_v22  ;;  %v11533_v52 = vor.u32 %v14723_v36, %v11530_v43  ;;  %v11890_v4 = vld [vmem:[%s16127_s17 + $0x1198] sm:$0xf0]  ;;  %v14651_v40 = vld [vmem:[%s16127_s17 + $0xc74] sm:$0xf] }
 0x44b   : > { %8926 = vmatpush.bf16.msrb.mxu0 %v10525_v60  ;;  %v10837_v60 = vor.u32 %v14549_v57, %v10834_v28  ;;  %v8700_v21 = vpop.f32.mrf.mxu2  ;;  %v14717_v57 = vld [vmem:[%s16127_s17 + $0xe84] sm:$0xf]  ;;  %v11242_v22 = vld [vmem:[%s16127_s17 + $0xc88] sm:$0xf0]  ;;  %v14699_v36 = vld [vmem:[%s16127_s17 + $0xdf4] sm:$0xf] }
 0x44c   : > { %8939 = vmatpush.bf16.msrb.mxu1 %v10717_v63  ;;  %v10618_v63 = vld [vmem:[%s16127_s17 + $0x7a8] sm:$0xf0]  ;;  %v8713_v13 = vpop.f32.mrf.mxu3  ;;  %v14813_v0 = vld [vmem:[%s16127_s17 + $0x1184] sm:$0xf] }
 0x44d   : > { %8952 = vmatpush.bf16.msrb.mxu2 %v10909_v56  ;;  %v14543_v56 = vld [vmem:[%s16127_s17 + $0x914] sm:$0xf]  ;;  %v10621_v23 = vor.u32 %v14495_v61, %v10618_v63  ;;  %v11290_v63 = vld [vmem:[%s16127_s17 + $0xce8] sm:$0xf0] }
 0x44e   : > { %8965 = vmatpush.bf16.msrb.mxu3 %v11101_v9  ;;  %v11002_v9 = vld [vmem:[%s16127_s17 + $0xaa8] sm:$0xf0]  ;;  %v10813_v30 = vor.u32 %v14543_v56, %v10810_v5  ;;  %v14663_v61 = vld [vmem:[%s16127_s17 + $0xcd4] sm:$0xf] }
 0x44f   : > { %8927 = vmatpush.bf16.msrb.mxu0 %v10501_v14  ;;  %v11554_v14 = vld [vmem:[%s16127_s17 + $0xef8] sm:$0xf0]  ;;  %v11005_v35 = vor.u32 %v14591_v7, %v11002_v9  ;;  %v14711_v56 = vld [vmem:[%s16127_s17 + $0xe54] sm:$0xf]  ;;  %v11674_v5 = vld [vmem:[%s16127_s17 + $0xfe8] sm:$0xf0]  ;;  %v11293_v17 = vor.u32 %v14663_v61, %v11290_v63 }
 0x450   : > { %8940 = vmatpush.bf16.msrb.mxu1 %v10693_v18  ;;  %v14777_v18 = vld [vmem:[%s16127_s17 + $0x1064] sm:$0xf]  ;;  %v11557_v26 = vor.u32 %v14729_v16, %v11554_v14  ;;  %v14807_v9 = vld [vmem:[%s16127_s17 + $0x1154] sm:$0xf]  ;;  %v11866_v21 = vld [vmem:[%s16127_s17 + $0x1168] sm:$0xf0] }
 0x451   : > { %8953 = vmatpush.bf16.msrb.mxu2 %v10885_v20  ;;  %v11746_v20 = vld [vmem:[%s16127_s17 + $0x1078] sm:$0xf0]  ;;  %v14789_v63 = vld [vmem:[%s16127_s17 + $0x10c4] sm:$0xf] }
 0x452   : > { %8966 = vmatpush.bf16.msrb.mxu3 %v11077_v33  ;;  %v11938_v33 = vld [vmem:[%s16127_s17 + $0x11f8] sm:$0xf0]  ;;  %v11749_v1 = vor.u32 %v14777_v18, %v11746_v20  ;;  %v14705_v18 = vld [vmem:[%s16127_s17 + $0xe24] sm:$0xf]  ;;  %v11869_v20 = vor.u32 %v14807_v9, %v11866_v21  ;;  %v14687_v9 = vld [vmem:[%s16127_s17 + $0xd94] sm:$0xf] }
 0x453   : > { %8928 = vmatpush.bf16.msrb.mxu0 %v10477_v44  ;;  %v11941_v37 = vor.u32 %v14825_v42, %v11938_v33  ;;  %v14771_v44 = vld [vmem:[%s16127_s17 + $0x1034] sm:$0xf]  ;;  %v11266_v14 = vld [vmem:[%s16127_s17 + $0xcb8] sm:$0xf0]  ;;  %v14753_v42 = vld [vmem:[%s16127_s17 + $0xfa4] sm:$0xf] }
 0x454   : > { %8941 = vmatpush.bf16.msrb.mxu1 %v10669_v45  ;;  %v14819_v45 = vld [vmem:[%s16127_s17 + $0x11b4] sm:$0xf]  ;;  %v11725_v27 = vor.u32 %v14771_v44, %v11722_v39  ;;  %v14801_v33 = vld [vmem:[%s16127_s17 + $0x1124] sm:$0xf]  ;;  %v11434_v44 = vld [vmem:[%s16127_s17 + $0xe08] sm:$0xf0] }
 0x455   : > { %8954 = vmatpush.bf16.msrb.mxu2 %v10861_v50  ;;  %v11914_v50 = vld [vmem:[%s16127_s17 + $0x11c8] sm:$0xf0]  ;;  %v14747_v39 = vld [vmem:[%s16127_s17 + $0xf74] sm:$0xf]  ;;  %v11602_v61 = vld [vmem:[%s16127_s17 + $0xf58] sm:$0xf0] }
 0x456   : > { %8967 = vmatpush.bf16.msrb.mxu3 %v11053_v55  ;;  %v14669_v55 = vld [vmem:[%s16127_s17 + $0xd04] sm:$0xf]  ;;  %v11917_v28 = vor.u32 %v14819_v45, %v11914_v50  ;;  %v11626_v45 = vld [vmem:[%s16127_s17 + $0xf88] sm:$0xf0] }
 0x457   : > { %8929 = vmatpush.bf16.msrb.mxu0 %v10453_v58  ;;  %v11698_v58 = vld [vmem:[%s16127_s17 + $0x1018] sm:$0xf0]  ;;  %v11386_v21 = vld [vmem:[%s16127_s17 + $0xda8] sm:$0xf0] }
 0x458   : > { %8942 = vmatpush.bf16.msrb.mxu1 %v10645_v34  ;;  %v11317_v34 = vor.u32 %v14669_v55, %v11314_v54  ;;  %v11245_v54 = vor.u32 %v14651_v40, %v11242_v22 }
 0x459   : > { %8955 = vmatpush.bf16.msrb.mxu2 %v10837_v60  ;;  %v11701_v60 = vor.u32 %v14765_v2, %v11698_v58  ;;  %v11629_v2 = vor.u32 %v14747_v39, %v11626_v45  ;;  %v14645_v58 = vld [vmem:[%s16127_s17 + $0xc44] sm:$0xf]  ;;  %v14915_v39 = vld [vmem:[%s16127_s17 + $0x14b4] sm:$0xf] }
 0x45a   : > { %8968 = vmatpush.bf16.msrb.mxu3 %v11029_v3  ;;  %v11893_v3 = vor.u32 %v14813_v0, %v11890_v4  ;;  %v11218_v0 = vld [vmem:[%s16127_s17 + $0xc58] sm:$0xf0]  ;;  %v14693_v4 = vld [vmem:[%s16127_s17 + $0xdc4] sm:$0xf] }
 0x45b   : > { %8930 = vmatpush.bf16.msrb.mxu0 %v10429_v10  ;;  %v8724_v7 = vpop.f32.mrf.mxu0  ;;  %v14657_v10 = vld [vmem:[%s16127_s17 + $0xca4] sm:$0xf] }
 0x45c   : > { %8943 = vmatpush.bf16.msrb.mxu1 %v10621_v23  ;;  %v8737_v19 = vpop.f32.mrf.mxu1 }
 0x45d   : > { %8956 = vmatpush.bf16.msrb.mxu2 %v10813_v30  ;;  %v11458_v30 = vld [vmem:[%s16127_s17 + $0xe38] sm:$0xf0] }
 0x45e   : > { %8969 = vmatpush.bf16.msrb.mxu3 %v11005_v35  ;;  %8931 = vmatmul.bf16.vlgmr.msrb.gmra.mxu0 %v16308_v31  ;;  %v11482_v31 = vld [vmem:[%s16127_s17 + $0xe68] sm:$0xf0]  ;;  %v11842_v35 = vld [vmem:[%s16127_s17 + $0x1138] sm:$0xf0] }
 0x45f   : > { %8975 = vmatpush.bf16.msra.mxu0 %v11365_v53  ;;  %8944 = vmatmul.bf16.vlgmr.msrb.gmra.mxu1 %v16314_v38  ;;  %v8725_v38 = vadd.f32 %v8724_v7, %v18388_v41  ;;  %v11485_v16 = vor.u32 %v14711_v56, %v11482_v31  ;;  %v11650_v41 = vld [vmem:[%s16127_s17 + $0xfb8] sm:$0xf0]  ;;  %v11269_v53 = vor.u32 %v14657_v10, %v11266_v14  ;;  %v14639_v31 = vld [vmem:[%s16127_s17 + $0xc14] sm:$0xf]  ;;  %v14873_v14 = vld [vmem:[%s16127_s17 + $0x1364] sm:$0xf] }
 0x460   : > { %8988 = vmatpush.bf16.msra.mxu1 %v11557_v26  ;;  %8957 = vmatmul.bf16.vlgmr.msrb.gmra.mxu2 %v16305_v25  ;;  %v11509_v25 = vor.u32 %v14717_v57, %v11506_v29  ;;  %v11461_v26 = vor.u32 %v14705_v18, %v11458_v30  ;;  %v11437_v29 = vor.u32 %v14699_v36, %v11434_v44  ;;  %v11794_v56 = vld [vmem:[%s16127_s17 + $0x10d8] sm:$0xf0]  ;;  %v12106_v44 = vld [vmem:[%s16127_s17 + $0x1348] sm:$0xf0] }
 0x461   : > { %9001 = vmatpush.bf16.msra.mxu2 %v11749_v1  ;;  %8970 = vmatmul.bf16.vlgmr.msrb.gmra.mxu3 %v16310_v32  ;;  %v14759_v32 = vld [vmem:[%s16127_s17 + $0xfd4] sm:$0xf]  ;;  %v8738_v23 = vadd.f32 %v8737_v19, %v8725_v38  ;;  %v11653_v1 = vor.u32 %v14753_v42, %v11650_v41  ;;  %v11578_v19 = vld [vmem:[%s16127_s17 + $0xf28] sm:$0xf0]  ;;  %v12130_v18 = vld [vmem:[%s16127_s17 + $0x1378] sm:$0xf0] }
 0x462   : > { %9014 = vmatpush.bf16.msra.mxu3 %v11941_v37  ;;  %v11677_v13 = vor.u32 %v14759_v32, %v11674_v5  ;;  %v11845_v37 = vor.u32 %v14801_v33, %v11842_v35  ;;  %v11194_v32 = vld [vmem:[%s16127_s17 + $0xc28] sm:$0xf0]  ;;  %v14735_v38 = vld [vmem:[%s16127_s17 + $0xf14] sm:$0xf]  ;;  %v12322_v42 = vld [vmem:[%s16127_s17 + $0x14f8] sm:$0xf0]  ;;  %v11389_v35 = vor.u32 %v14687_v9, %v11386_v21  ;;  %v12133_v22 = vor.u32 %v14873_v14, %v12130_v18 }
 0x463   : > { %8976 = vmatpush.bf16.msra.mxu0 %v11341_v51  ;;  %v8750_v43 = vpop.f32.mrf.mxu2  ;;  %v8726_v55 = vpop.f32.mrf.mxu0  ;;  %v11197_v30 = vor.u32 %v14639_v31, %v11194_v32  ;;  %v14969_v41 = vld [vmem:[%s16127_s17 + $0x1664] sm:$0xf]  ;;  %v12514_v33 = vld [vmem:[%s16127_s17 + $0x1678] sm:$0xf0]  ;;  %v14855_v31 = vld [vmem:[%s16127_s17 + $0x12d4] sm:$0xf] }
 0x464   : > { %8989 = vmatpush.bf16.msra.mxu1 %v11533_v52  ;;  %v8751_v50 = vadd.f32 %v8750_v43, %v8738_v23  ;;  %v8763_v51 = vpop.f32.mrf.mxu3  ;;  %v14795_v52 = vld [vmem:[%s16127_s17 + $0x10f4] sm:$0xf]  ;;  %v8739_v57 = vpop.f32.mrf.mxu1  ;;  %v12682_v55 = vld [vmem:[%s16127_s17 + $0x17c8] sm:$0xf0]  ;;  %v14849_v14 = vld [vmem:[%s16127_s17 + $0x12a4] sm:$0xf] }
 0x465   : > { %9002 = vmatpush.bf16.msra.mxu2 %v11725_v27  ;;  %v11818_v27 = vld [vmem:[%s16127_s17 + $0x1108] sm:$0xf0]  ;;  %v14867_v43 = vld [vmem:[%s16127_s17 + $0x1334] sm:$0xf]  ;;  %v12034_v18 = vld [vmem:[%s16127_s17 + $0x12b8] sm:$0xf0] }
 0x466   : > { %9015 = vmatpush.bf16.msra.mxu3 %v11917_v28  ;;  %v18459_v28 = vadd.f32 %v8763_v51, %v8751_v50  ;;  %v12298_v50 = vld [vmem:[%s16127_s17 + $0x14c8] sm:$0xf0]  ;;  %v14963_v51 = vld [vmem:[%s16127_s17 + $0x1634] sm:$0xf] }
 0x467   : > { %8977 = vmatpush.bf16.msra.mxu0 %v11317_v34  ;;  %v11821_v34 = vor.u32 %v14795_v52, %v11818_v27  ;;  %v12490_v52 = vld [vmem:[%s16127_s17 + $0x1648] sm:$0xf0]  ;;  %v15011_v27 = vld [vmem:[%s16127_s17 + $0x17b4] sm:$0xf]  ;;  %v12301_v57 = vor.u32 %v14915_v39, %v12298_v50 }
 0x468   : > { %8990 = vmatpush.bf16.msra.mxu1 %v11509_v25  ;;  %v11410_v25 = vld [vmem:[%s16127_s17 + $0xdd8] sm:$0xf0]  ;;  %v12058_v32 = vld [vmem:[%s16127_s17 + $0x12e8] sm:$0xf0]  ;;  %v14999_v21 = vld [vmem:[%s16127_s17 + $0x1754] sm:$0xf] }
 0x469   : > { %9003 = vmatpush.bf16.msra.mxu2 %v11701_v60  ;;  %v14741_v60 = vld [vmem:[%s16127_s17 + $0xf44] sm:$0xf]  ;;  %v11413_v5 = vor.u32 %v14693_v4, %v11410_v25  ;;  %v12685_v4 = vor.u32 %v15011_v27, %v12682_v55  ;;  %v12442_v9 = vld [vmem:[%s16127_s17 + $0x15e8] sm:$0xf0]  ;;  %v14939_v39 = vld [vmem:[%s16127_s17 + $0x1574] sm:$0xf] }
 0x46a   : > { %9016 = vmatpush.bf16.msra.mxu3 %v11893_v3  ;;  %v11221_v3 = vor.u32 %v14645_v58, %v11218_v0  ;;  %v11605_v7 = vor.u32 %v14741_v60, %v11602_v61  ;;  %v12082_v58 = vld [vmem:[%s16127_s17 + $0x1318] sm:$0xf0]  ;;  %v14909_v0 = vld [vmem:[%s16127_s17 + $0x1484] sm:$0xf]  ;;  %v12586_v27 = vld [vmem:[%s16127_s17 + $0x1708] sm:$0xf0] }
 0x46b   : > { %8978 = vmatpush.bf16.msra.mxu0 %v11293_v17  ;;  %v11797_v17 = vor.u32 %v14789_v63, %v11794_v56  ;;  %v8752_v10 = vpop.f32.mrf.mxu2  ;;  %v14957_v25 = vld [vmem:[%s16127_s17 + $0x1604] sm:$0xf]  ;;  %v12466_v60 = vld [vmem:[%s16127_s17 + $0x1618] sm:$0xf0] }
 0x46c   : > { %8991 = vmatpush.bf16.msra.mxu1 %v11485_v16  ;;  %v14783_v16 = vld [vmem:[%s16127_s17 + $0x1094] sm:$0xf]  ;;  %v8765_v23 = vpop.f32.mrf.mxu3  ;;  %v15005_v61 = vld [vmem:[%s16127_s17 + $0x1784] sm:$0xf]  ;;  %v12658_v63 = vld [vmem:[%s16127_s17 + $0x1798] sm:$0xf0] }
 0x46d   : > { %9004 = vmatpush.bf16.msra.mxu2 %v11677_v13  ;;  %v11770_v13 = vld [vmem:[%s16127_s17 + $0x10a8] sm:$0xf0] }
 0x46e   : > { %9017 = vmatpush.bf16.msra.mxu3 %v11869_v20  ;;  %v14921_v20 = vld [vmem:[%s16127_s17 + $0x14e4] sm:$0xf]  ;;  %v11773_v40 = vor.u32 %v14783_v16, %v11770_v13 }
 0x46f   : > { %8979 = vmatpush.bf16.msra.mxu0 %v11269_v53  ;;  %v11581_v53 = vor.u32 %v14735_v38, %v11578_v19  ;;  %v12325_v36 = vor.u32 %v14921_v20, %v12322_v42  ;;  %v12634_v38 = vld [vmem:[%s16127_s17 + $0x1768] sm:$0xf0]  ;;  %v12061_v19 = vor.u32 %v14855_v31, %v12058_v32  ;;  %v14897_v20 = vld [vmem:[%s16127_s17 + $0x1424] sm:$0xf]  ;;  %v12226_v42 = vld [vmem:[%s16127_s17 + $0x1438] sm:$0xf0] }
 0x470   : > { %8992 = vmatpush.bf16.msra.mxu1 %v11461_v26  ;;  %v15017_v26 = vld [vmem:[%s16127_s17 + $0x17e4] sm:$0xf]  ;;  %v12637_v23 = vor.u32 %v14999_v21, %v12634_v38  ;;  %v14831_v31 = vld [vmem:[%s16127_s17 + $0x1214] sm:$0xf]  ;;  %v11962_v32 = vld [vmem:[%s16127_s17 + $0x1228] sm:$0xf0] }
 0x471   : > { %9005 = vmatpush.bf16.msra.mxu2 %v11653_v1  ;;  %v12706_v1 = vld [vmem:[%s16127_s17 + $0x17f8] sm:$0xf0]  ;;  %v12346_v21 = vld [vmem:[%s16127_s17 + $0x1528] sm:$0xf0]  ;;  %v14975_v38 = vld [vmem:[%s16127_s17 + $0x1694] sm:$0xf] }
 0x472   : > { %9018 = vmatpush.bf16.msra.mxu3 %v11845_v37  ;;  %v12517_v37 = vor.u32 %v14969_v41, %v12514_v33  ;;  %v12709_v45 = vor.u32 %v15017_v26, %v12706_v1  ;;  %v14945_v41 = vld [vmem:[%s16127_s17 + $0x15a4] sm:$0xf]  ;;  %v12229_v26 = vor.u32 %v14897_v20, %v12226_v42  ;;  %v13090_v20 = vld [vmem:[%s16127_s17 + $0x1af8] sm:$0xf0] }
 0x473   : > { %8980 = vmatpush.bf16.msra.mxu0 %v11245_v54  ;;  %v12109_v54 = vor.u32 %v14867_v43, %v12106_v44  ;;  %v14993_v33 = vld [vmem:[%s16127_s17 + $0x1724] sm:$0xf]  ;;  %v12202_v44 = vld [vmem:[%s16127_s17 + $0x1408] sm:$0xf0] }
 0x474   : > { %8993 = vmatpush.bf16.msra.mxu1 %v11437_v29  ;;  %v12493_v29 = vor.u32 %v14963_v51, %v12490_v52  ;;  %v14987_v52 = vld [vmem:[%s16127_s17 + $0x16f4] sm:$0xf] }
 0x475   : > { %9006 = vmatpush.bf16.msra.mxu2 %v11629_v2  ;;  %v14861_v2 = vld [vmem:[%s16127_s17 + $0x1304] sm:$0xf] }
 0x476   : > { %9019 = vmatpush.bf16.msra.mxu3 %v11821_v34  ;;  %v12274_v34 = vld [vmem:[%s16127_s17 + $0x1498] sm:$0xf0] }
 0x477   : > { %8981 = vmatpush.bf16.msra.mxu0 %v11221_v3  ;;  %v12277_v56 = vor.u32 %v14909_v0, %v12274_v34  ;;  %v12469_v3 = vor.u32 %v14957_v25, %v12466_v60  ;;  %v14837_v0 = vld [vmem:[%s16127_s17 + $0x1244] sm:$0xf]  ;;  %v12589_v25 = vor.u32 %v14987_v52, %v12586_v27  ;;  %v12178_v60 = vld [vmem:[%s16127_s17 + $0x13d8] sm:$0xf0] }
 0x478   : > { %8994 = vmatpush.bf16.msra.mxu1 %v11413_v5  ;;  %v12250_v5 = vld [vmem:[%s16127_s17 + $0x1468] sm:$0xf0]  ;;  %v14885_v34 = vld [vmem:[%s16127_s17 + $0x13c4] sm:$0xf] }
 0x479   : > { %9007 = vmatpush.bf16.msra.mxu2 %v11605_v7  ;;  %v14951_v7 = vld [vmem:[%s16127_s17 + $0x15d4] sm:$0xf] }
 0x47a   : > { %9020 = vmatpush.bf16.msra.mxu3 %v11797_v17  ;;  %v12445_v10 = vor.u32 %v14951_v7, %v12442_v9  ;;  %v12154_v7 = vld [vmem:[%s16127_s17 + $0x13a8] sm:$0xf0]  ;;  %v14927_v9 = vld [vmem:[%s16127_s17 + $0x1514] sm:$0xf] }
 0x47b   : > { %8982 = vmatpush.bf16.msra.mxu0 %v11197_v30 }
 0x47c   : > { %8995 = vmatpush.bf16.msra.mxu1 %v11389_v35  ;;  %v8789_v16 = vpop.f32.mrf.mxu1  ;;  %v12610_v35 = vld [vmem:[%s16127_s17 + $0x1738] sm:$0xf0] }
 0x47d   : > { %9008 = vmatpush.bf16.msra.mxu2 %v11581_v53  ;;  %v12037_v53 = vor.u32 %v14849_v14, %v12034_v18  ;;  %v11965_v18 = vor.u32 %v14831_v31, %v11962_v32  ;;  %v13210_v31 = vld [vmem:[%s16127_s17 + $0x1be8] sm:$0xf0]  ;;  %v15191_v32 = vld [vmem:[%s16127_s17 + $0x1d54] sm:$0xf] }
 0x47e   : > { %9021 = vmatpush.bf16.msra.mxu3 %v11773_v40  ;;  %8983 = vmatmul.bf16.vlgmr.msra.gmra.mxu0 %v16382_v8  ;;  %v12085_v8 = vor.u32 %v14861_v2, %v12082_v58  ;;  %v14843_v40 = vld [vmem:[%s16127_s17 + $0x1274] sm:$0xf] }
 0x47f   : > { %9027 = vmatpush.bf16.msrb.mxu0 %v12133_v22  ;;  %8996 = vmatmul.bf16.vlgmr.msra.gmra.mxu1 %v16388_v12  ;;  %v12661_v12 = vor.u32 %v15005_v61, %v12658_v63  ;;  %v12010_v22 = vld [vmem:[%s16127_s17 + $0x1288] sm:$0xf0]  ;;  %v14933_v61 = vld [vmem:[%s16127_s17 + $0x1544] sm:$0xf]  ;;  %v12370_v63 = vld [vmem:[%s16127_s17 + $0x1558] sm:$0xf0] }
 0x480   : > { %9040 = vmatpush.bf16.msrb.mxu1 %v12325_v36  ;;  %9009 = vmatmul.bf16.vlgmr.msra.gmra.mxu2 %v16386_v11  ;;  %v14903_v11 = vld [vmem:[%s16127_s17 + $0x1454] sm:$0xf] }
 0x481   : > { %9053 = vmatpush.bf16.msrb.mxu2 %v12517_v37  ;;  %9022 = vmatmul.bf16.vlgmr.msra.gmra.mxu3 %v16391_v15  ;;  %v8776_v15 = vpop.f32.mrf.mxu0  ;;  %v12253_v13 = vor.u32 %v14903_v11, %v12250_v5  ;;  %v14891_v36 = vld [vmem:[%s16127_s17 + $0x13f4] sm:$0xf]  ;;  %v12613_v37 = vor.u32 %v14993_v33, %v12610_v35  ;;  %v12181_v11 = vor.u32 %v14885_v34, %v12178_v60  ;;  %v13474_v33 = vld [vmem:[%s16127_s17 + $0x1df8] sm:$0xf0]  ;;  %v15197_v34 = vld [vmem:[%s16127_s17 + $0x1d84] sm:$0xf] }
 0x482   : > { %9066 = vmatpush.bf16.msrb.mxu3 %v12709_v45  ;;  %v8777_v17 = vadd.f32 %v8776_v15, %v18459_v28  ;;  %v12418_v28 = vld [vmem:[%s16127_s17 + $0x15b8] sm:$0xf0]  ;;  %v12394_v45 = vld [vmem:[%s16127_s17 + $0x1588] sm:$0xf0]  ;;  %v12205_v2 = vor.u32 %v14891_v36, %v12202_v44  ;;  %v14879_v5 = vld [vmem:[%s16127_s17 + $0x1394] sm:$0xf] }
 0x483   : > { %9028 = vmatpush.bf16.msrb.mxu0 %v12109_v54  ;;  %v12421_v1 = vor.u32 %v14945_v41, %v12418_v28  ;;  %v8802_v43 = vpop.f32.mrf.mxu2  ;;  %v12013_v54 = vor.u32 %v14843_v40, %v12010_v22  ;;  %v12397_v58 = vor.u32 %v14939_v39, %v12394_v45  ;;  %v12157_v42 = vor.u32 %v14879_v5, %v12154_v7  ;;  %v15209_v28 = vld [vmem:[%s16127_s17 + $0x1de4] sm:$0xf]  ;;  %v15059_v40 = vld [vmem:[%s16127_s17 + $0x1934] sm:$0xf]  ;;  %v12874_v22 = vld [vmem:[%s16127_s17 + $0x1948] sm:$0xf0] }
 0x484   : > { %9041 = vmatpush.bf16.msrb.mxu1 %v12301_v57  ;;  %v8790_v30 = vadd.f32 %v8789_v16, %v8777_v17  ;;  %v8815_v51 = vpop.f32.mrf.mxu3  ;;  %v8791_v57 = vpop.f32.mrf.mxu1  ;;  %v12538_v17 = vld [vmem:[%s16127_s17 + $0x16a8] sm:$0xf0]  ;;  %v15065_v16 = vld [vmem:[%s16127_s17 + $0x1964] sm:$0xf]  ;;  %v12349_v41 = vor.u32 %v14927_v9, %v12346_v21  ;;  %v15107_v36 = vld [vmem:[%s16127_s17 + $0x1ab4] sm:$0xf] }
 0x485   : > { %9054 = vmatpush.bf16.msrb.mxu2 %v12493_v29  ;;  %v12541_v35 = vor.u32 %v14975_v38, %v12538_v17  ;;  %v15155_v44 = vld [vmem:[%s16127_s17 + $0x1c34] sm:$0xf]  ;;  %v13258_v39 = vld [vmem:[%s16127_s17 + $0x1c48] sm:$0xf0]  ;;  %v15101_v57 = vld [vmem:[%s16127_s17 + $0x1a84] sm:$0xf] }
 0x486   : > { %9067 = vmatpush.bf16.msrb.mxu3 %v12685_v4  ;;  %v8803_v50 = vadd.f32 %v8802_v43, %v8790_v30  ;;  %v11986_v4 = vld [vmem:[%s16127_s17 + $0x1258] sm:$0xf0]  ;;  %v13066_v43 = vld [vmem:[%s16127_s17 + $0x1ac8] sm:$0xf0]  ;;  %v15203_v45 = vld [vmem:[%s16127_s17 + $0x1db4] sm:$0xf]  ;;  %v13261_v27 = vor.u32 %v15155_v44, %v13258_v39 }
 0x487   : > { %9029 = vmatpush.bf16.msrb.mxu0 %v12085_v8  ;;  %v14981_v8 = vld [vmem:[%s16127_s17 + $0x16c4] sm:$0xf]  ;;  %v13282_v30 = vld [vmem:[%s16127_s17 + $0x1c78] sm:$0xf0]  ;;  %v13069_v52 = vor.u32 %v15107_v36, %v13066_v43  ;;  %v15179_v36 = vld [vmem:[%s16127_s17 + $0x1cf4] sm:$0xf] }
 0x488   : > { %9042 = vmatpush.bf16.msrb.mxu1 %v12277_v56  ;;  %v18530_v29 = vadd.f32 %v8815_v51, %v8803_v50  ;;  %v12562_v56 = vld [vmem:[%s16127_s17 + $0x16d8] sm:$0xf0]  ;;  %v13450_v50 = vld [vmem:[%s16127_s17 + $0x1dc8] sm:$0xf0]  ;;  %v12877_v51 = vor.u32 %v15059_v40, %v12874_v22  ;;  %v15041_v21 = vld [vmem:[%s16127_s17 + $0x18a4] sm:$0xf] }
 0x489   : > { %9055 = vmatpush.bf16.msrb.mxu2 %v12469_v3  ;;  %v8778_v55 = vpop.f32.mrf.mxu0  ;;  %v11989_v3 = vor.u32 %v14837_v0, %v11986_v4  ;;  %v12565_v15 = vor.u32 %v14981_v8, %v12562_v56  ;;  %v15149_v0 = vld [vmem:[%s16127_s17 + $0x1c04] sm:$0xf]  ;;  %v13234_v4 = vld [vmem:[%s16127_s17 + $0x1c18] sm:$0xf0]  ;;  %v12826_v8 = vld [vmem:[%s16127_s17 + $0x18e8] sm:$0xf0] }
 0x48a   : > { %9068 = vmatpush.bf16.msrb.mxu3 %v12661_v12  ;;  %v12373_v12 = vor.u32 %v14933_v61, %v12370_v63  ;;  %v15053_v55 = vld [vmem:[%s16127_s17 + $0x1904] sm:$0xf]  ;;  %v13237_v61 = vor.u32 %v15149_v0, %v13234_v4  ;;  %v15047_v63 = vld [vmem:[%s16127_s17 + $0x18d4] sm:$0xf]  ;;  %v13018_v56 = vld [vmem:[%s16127_s17 + $0x1a68] sm:$0xf0] }
 0x48b   : > { %9030 = vmatpush.bf16.msrb.mxu0 %v12061_v19  ;;  %v8804_v19 = vpop.f32.mrf.mxu2  ;;  %v12829_v5 = vor.u32 %v15047_v63, %v12826_v8  ;;  %v12802_v38 = vld [vmem:[%s16127_s17 + $0x18b8] sm:$0xf0]  ;;  %v15089_v17 = vld [vmem:[%s16127_s17 + $0x1a24] sm:$0xf]  ;;  %v15071_v63 = vld [vmem:[%s16127_s17 + $0x1994] sm:$0xf] }
 0x48c   : > { %9043 = vmatpush.bf16.msrb.mxu1 %v12253_v13  ;;  %v12898_v13 = vld [vmem:[%s16127_s17 + $0x1978] sm:$0xf0]  ;;  %v8817_v14 = vpop.f32.mrf.mxu3  ;;  %v15173_v0 = vld [vmem:[%s16127_s17 + $0x1cc4] sm:$0xf]  ;;  %v12922_v8 = vld [vmem:[%s16127_s17 + $0x19a8] sm:$0xf0] }
 0x48d   : > { %9056 = vmatpush.bf16.msrb.mxu2 %v12445_v10  ;;  %v15113_v10 = vld [vmem:[%s16127_s17 + $0x1ae4] sm:$0xf]  ;;  %v13330_v4 = vld [vmem:[%s16127_s17 + $0x1cd8] sm:$0xf0] }
 0x48e   : > { %9069 = vmatpush.bf16.msrb.mxu3 %v12637_v23  ;;  %v15161_v23 = vld [vmem:[%s16127_s17 + $0x1c64] sm:$0xf] }
 0x48f   : > { %9031 = vmatpush.bf16.msrb.mxu0 %v12037_v53  ;;  %v12901_v53 = vor.u32 %v15065_v16, %v12898_v13  ;;  %v12994_v13 = vld [vmem:[%s16127_s17 + $0x1a38] sm:$0xf0]  ;;  %v15185_v14 = vld [vmem:[%s16127_s17 + $0x1d24] sm:$0xf] }
 0x490   : > { %9044 = vmatpush.bf16.msrb.mxu1 %v12229_v26  ;;  %v13093_v26 = vor.u32 %v15113_v10, %v13090_v20  ;;  %v15137_v10 = vld [vmem:[%s16127_s17 + $0x1ba4] sm:$0xf]  ;;  %v12805_v20 = vor.u32 %v15041_v21, %v12802_v38  ;;  %v14050_v21 = vld [vmem:[%s16127_s17 + $0x2278] sm:$0xf0]  ;;  %v12925_v38 = vor.u32 %v15071_v63, %v12922_v8  ;;  %v15335_v63 = vld [vmem:[%s16127_s17 + $0x21d4] sm:$0xf] }
 0x491   : > { %9057 = vmatpush.bf16.msrb.mxu2 %v12421_v1  ;;  %v13285_v1 = vor.u32 %v15161_v23, %v13282_v30  ;;  %v12997_v23 = vor.u32 %v15089_v17, %v12994_v13  ;;  %v13978_v8 = vld [vmem:[%s16127_s17 + $0x21e8] sm:$0xf0] }
 0x492   : > { %9070 = vmatpush.bf16.msrb.mxu3 %v12613_v37  ;;  %v13477_v37 = vor.u32 %v15209_v28, %v13474_v33  ;;  %v15083_v28 = vld [vmem:[%s16127_s17 + $0x19f4] sm:$0xf] }
 0x493   : > { %9032 = vmatpush.bf16.msrb.mxu0 %v12013_v54  ;;  %v12850_v54 = vld [vmem:[%s16127_s17 + $0x1918] sm:$0xf0] }
 0x494   : > { %9045 = vmatpush.bf16.msrb.mxu1 %v12205_v2  ;;  %v13453_v2 = vor.u32 %v15203_v45, %v13450_v50 }
 0x495   : > { %9058 = vmatpush.bf16.msrb.mxu2 %v12397_v58  ;;  %v13042_v58 = vld [vmem:[%s16127_s17 + $0x1a98] sm:$0xf0] }
 0x496   : > { %9071 = vmatpush.bf16.msrb.mxu3 %v12589_v25  ;;  %v13426_v25 = vld [vmem:[%s16127_s17 + $0x1d98] sm:$0xf0]  ;;  %v13045_v60 = vor.u32 %v15101_v57, %v13042_v58 }
 0x497   : > { %9033 = vmatpush.bf16.msrb.mxu0 %v11989_v3  ;;  %v15143_v3 = vld [vmem:[%s16127_s17 + $0x1bd4] sm:$0xf]  ;;  %v12946_v57 = vld [vmem:[%s16127_s17 + $0x19d8] sm:$0xf0] }
 0x498   : > { %9046 = vmatpush.bf16.msrb.mxu1 %v12181_v11  ;;  %v13402_v11 = vld [vmem:[%s16127_s17 + $0x1d68] sm:$0xf0]  ;;  %v13138_v58 = vld [vmem:[%s16127_s17 + $0x1b58] sm:$0xf0] }
 0x499   : > { %9059 = vmatpush.bf16.msrb.mxu2 %v12373_v12  ;;  %v13405_v19 = vor.u32 %v15191_v32, %v13402_v11  ;;  %v15257_v32 = vld [vmem:[%s16127_s17 + $0x1f64] sm:$0xf]  ;;  %v13666_v11 = vld [vmem:[%s16127_s17 + $0x1f78] sm:$0xf0] }
 0x49a   : > { %9072 = vmatpush.bf16.msrb.mxu3 %v12565_v15  ;;  %v13213_v15 = vor.u32 %v15143_v3, %v13210_v31  ;;  %v15167_v3 = vld [vmem:[%s16127_s17 + $0x1c94] sm:$0xf]  ;;  %v13306_v31 = vld [vmem:[%s16127_s17 + $0x1ca8] sm:$0xf0] }
 0x49b   : > { %9034 = vmatpush.bf16.msrb.mxu0 %v11965_v18  ;;  %v13378_v18 = vld [vmem:[%s16127_s17 + $0x1d38] sm:$0xf0]  ;;  %v13309_v13 = vor.u32 %v15167_v3, %v13306_v31 }
 0x49c   : > { %9047 = vmatpush.bf16.msrb.mxu1 %v12157_v42  ;;  %v8841_v7 = vpop.f32.mrf.mxu1  ;;  %v15035_v42 = vld [vmem:[%s16127_s17 + $0x1874] sm:$0xf]  ;;  %v13381_v33 = vor.u32 %v15185_v14, %v13378_v18 }
 0x49d   : > { %9060 = vmatpush.bf16.msrb.mxu2 %v12349_v41  ;;  %v12778_v41 = vld [vmem:[%s16127_s17 + $0x1888] sm:$0xf0]  ;;  %v15251_v18 = vld [vmem:[%s16127_s17 + $0x1f34] sm:$0xf] }
 0x49e   : > { %9073 = vmatpush.bf16.msrb.mxu3 %v12541_v35  ;;  %9035 = vmatmul.bf16.vlgmr.msrb.gmra.mxu0 %v16448_v46  ;;  %v12853_v46 = vor.u32 %v15053_v55, %v12850_v54  ;;  %v12781_v44 = vor.u32 %v15035_v42, %v12778_v41  ;;  %v15077_v55 = vld [vmem:[%s16127_s17 + $0x19c4] sm:$0xf]  ;;  %v13834_v42 = vld [vmem:[%s16127_s17 + $0x20c8] sm:$0xf0]  ;;  %v15347_v41 = vld [vmem:[%s16127_s17 + $0x2234] sm:$0xf] }
 0x49f   : > { %9079 = vmatpush.bf16.msra.mxu0 %v12901_v53  ;;  %9048 = vmatmul.bf16.vlgmr.msrb.gmra.mxu1 %v16452_v48  ;;  %v13429_v48 = vor.u32 %v15197_v34, %v13426_v25  ;;  %v12970_v53 = vld [vmem:[%s16127_s17 + $0x1a08] sm:$0xf0]  ;;  %v15023_v25 = vld [vmem:[%s16127_s17 + $0x1814] sm:$0xf] }
 0x4a0   : > { %9092 = vmatpush.bf16.msra.mxu1 %v13093_v26  ;;  %9061 = vmatmul.bf16.vlgmr.msrb.gmra.mxu2 %v16450_v47  ;;  %v15095_v47 = vld [vmem:[%s16127_s17 + $0x1a54] sm:$0xf]  ;;  %v12973_v50 = vor.u32 %v15083_v28, %v12970_v53  ;;  %v14026_v28 = vld [vmem:[%s16127_s17 + $0x2248] sm:$0xf0] }
 0x4a1   : > { %9105 = vmatpush.bf16.msra.mxu2 %v13285_v1  ;;  %9074 = vmatmul.bf16.vlgmr.msrb.gmra.mxu3 %v16454_v49  ;;  %v8828_v49 = vpop.f32.mrf.mxu0  ;;  %v13021_v9 = vor.u32 %v15095_v47, %v13018_v56  ;;  %v15131_v26 = vld [vmem:[%s16127_s17 + $0x1b74] sm:$0xf]  ;;  %v13162_v1 = vld [vmem:[%s16127_s17 + $0x1b88] sm:$0xf0] }
 0x4a2   : > { %9118 = vmatpush.bf16.msra.mxu3 %v13477_v37  ;;  %v8829_v12 = vadd.f32 %v8828_v49, %v18530_v29  ;;  %v13186_v29 = vld [vmem:[%s16127_s17 + $0x1bb8] sm:$0xf0]  ;;  %v13354_v37 = vld [vmem:[%s16127_s17 + $0x1d08] sm:$0xf0]  ;;  %v15119_v47 = vld [vmem:[%s16127_s17 + $0x1b14] sm:$0xf] }
 0x4a3   : > { %9080 = vmatpush.bf16.msra.mxu0 %v12877_v51  ;;  %v13189_v30 = vor.u32 %v15137_v10, %v13186_v29  ;;  %v8854_v35 = vpop.f32.mrf.mxu2  ;;  %v13165_v51 = vor.u32 %v15131_v26, %v13162_v1  ;;  %v13357_v54 = vor.u32 %v15179_v36, %v13354_v37  ;;  %v13114_v56 = vld [vmem:[%s16127_s17 + $0x1b28] sm:$0xf0]  ;;  %v13669_v10 = vor.u32 %v15257_v32, %v13666_v11  ;;  %v15293_v36 = vld [vmem:[%s16127_s17 + $0x2084] sm:$0xf]  ;;  %v15758_v37 = vld [vmem:[#allocation1] sm:$0xff] }
 0x4a4   : > { %9093 = vmatpush.bf16.msra.mxu1 %v13069_v52  ;;  %v8842_v16 = vadd.f32 %v8841_v7, %v8829_v12  ;;  %v8867_v22 = vpop.f32.mrf.mxu3  ;;  %v8843_v39 = vpop.f32.mrf.mxu1  ;;  %v15029_v52 = vld [vmem:[%s16127_s17 + $0x1844] sm:$0xf]  ;;  %v13117_v17 = vor.u32 %v15119_v47, %v13114_v56  ;;  %v14029_v1 = vor.u32 %v15347_v41, %v14026_v28  ;;  %v15383_v47 = vld [vmem:[%s16127_s17 + $0x2354] sm:$0xf]  ;;  %v13570_v11 = vld [vmem:[%s16127_s17 + $0x1eb8] sm:$0xf0] }
 0x4a5   : > { %9106 = vmatpush.bf16.msra.mxu2 %v13261_v27  ;;  %v12754_v27 = vld [vmem:[%s16127_s17 + $0x1858] sm:$0xf0]  ;;  %v15305_v12 = vld [vmem:[%s16127_s17 + $0x20e4] sm:$0xf]  ;;  %v15323_v41 = vld [vmem:[%s16127_s17 + $0x2174] sm:$0xf] }
 0x4a6   : > { %9119 = vmatpush.bf16.msra.mxu3 %v13453_v2  ;;  %v8855_v40 = vadd.f32 %v8854_v35, %v8842_v16  ;;  %v15125_v2 = vld [vmem:[%s16127_s17 + $0x1b44] sm:$0xf]  ;;  %v12757_v34 = vor.u32 %v15029_v52, %v12754_v27  ;;  %v14242_v16 = vld [vmem:[%s16127_s17 + $0x23f8] sm:$0xf0]  ;;  %v14218_v35 = vld [vmem:[%s16127_s17 + $0x23c8] sm:$0xf0] }
 0x4a7   : > { %9081 = vmatpush.bf16.msra.mxu0 %v12853_v46  ;;  %v12730_v46 = vld [vmem:[%s16127_s17 + $0x1828] sm:$0xf0]  ;;  %v15341_v39 = vld [vmem:[%s16127_s17 + $0x2204] sm:$0xf] }
 0x4a8   : > { %9094 = vmatpush.bf16.msra.mxu1 %v13045_v60  ;;  %v18601_v45 = vadd.f32 %v8867_v22, %v8855_v40  ;;  %v12949_v60 = vor.u32 %v15077_v55, %v12946_v57  ;;  %v12733_v7 = vor.u32 %v15023_v25, %v12730_v46  ;;  %v15245_v40 = vld [vmem:[%s16127_s17 + $0x1f04] sm:$0xf]  ;;  %v13618_v22 = vld [vmem:[%s16127_s17 + $0x1f18] sm:$0xf0]  ;;  %v13930_v28 = vld [vmem:[%s16127_s17 + $0x2188] sm:$0xf0] }
 0x4a9   : > { %9107 = vmatpush.bf16.msra.mxu2 %v13237_v61  ;;  %v8830_v43 = vpop.f32.mrf.mxu0  ;;  %v13141_v61 = vor.u32 %v15125_v2, %v13138_v58  ;;  %v15760_v52 = vld [vmem:[#allocation1 + $0x9] sm:$0xff]  ;;  %v14194_v55 = vld [vmem:[%s16127_s17 + $0x2398] sm:$0xf0]  ;;  %v13621_v57 = vor.u32 %v15245_v40, %v13618_v22  ;;  %v15239_v2 = vld [vmem:[%s16127_s17 + $0x1ed4] sm:$0xf] }
 0x4aa   : > { %9120 = vmatpush.bf16.msra.mxu3 %v13429_v48  ;;  %v13333_v48 = vor.u32 %v15173_v0, %v13330_v4  ;;  %v15389_v27 = vld [vmem:[%s16127_s17 + $0x2384] sm:$0xf]  ;;  %v13594_v4 = vld [vmem:[%s16127_s17 + $0x1ee8] sm:$0xf0] }
 0x4ab   : > { %9082 = vmatpush.bf16.msra.mxu0 %v12829_v5  ;;  %v8856_v49 = vpop.f32.mrf.mxu2  ;;  %v15762_v25 = vld [vmem:[%s16134_s12] sm:$0x3f]  ;;  %v13597_v56 = vor.u32 %v15239_v2, %v13594_v4  ;;  %v15215_v4 = vld [vmem:[%s16127_s17 + $0x1e14] sm:$0xf] }
 0x4ac   : > { %9095 = vmatpush.bf16.msra.mxu1 %v13021_v9  ;;  %v8869_v5 = vpop.f32.mrf.mxu3  ;;  %v13858_v9 = vld [vmem:[%s16127_s17 + $0x20f8] sm:$0xf0]  ;;  %v1490_v46 = vperm.slane %v15762_v25, 5  ;;  %v13981_v49 = vor.u32 %v15335_v63, %v13978_v8  ;;  %v15233_v32 = vld [vmem:[%s16127_s17 + $0x1ea4] sm:$0xf] }
 0x4ad   : > { %9108 = vmatpush.bf16.msra.mxu2 %v13213_v15  ;;  %v15353_v15 = vld [vmem:[%s16127_s17 + $0x2264] sm:$0xf]  ;;  %v13861_v29 = vor.u32 %v15305_v12, %v13858_v9  ;;  %v15263_v25 = vld [vmem:[%s16127_s17 + $0x1f94] sm:$0xf]  ;;  %v13882_v8 = vld [vmem:[%s16127_s17 + $0x2128] sm:$0xf0] }
 0x4ae   : > { %9121 = vmatpush.bf16.msra.mxu3 %v13405_v19  ;;  %v15401_v19 = vld [vmem:[%s16127_s17 + $0x23e4] sm:$0xf]  ;;  %v14053_v14 = vor.u32 %v15353_v15, %v14050_v21  ;;  %v13762_v15 = vld [vmem:[%s16127_s17 + $0x2038] sm:$0xf0]  ;;  %v15311_v63 = vld [vmem:[%s16127_s17 + $0x2114] sm:$0xf] }
 0x4af   : > { %9083 = vmatpush.bf16.msra.mxu0 %v12805_v20  ;;  %v13642_v20 = vld [vmem:[%s16127_s17 + $0x1f48] sm:$0xf0]  ;;  %v15281_v12 = vld [vmem:[%s16127_s17 + $0x2024] sm:$0xf] }
 0x4b0   : > { %9096 = vmatpush.bf16.msra.mxu1 %v12997_v23  ;;  %v15299_v23 = vld [vmem:[%s16127_s17 + $0x20b4] sm:$0xf]  ;;  %v13645_v53 = vor.u32 %v15251_v18, %v13642_v20  ;;  %v15329_v21 = vld [vmem:[%s16127_s17 + $0x21a4] sm:$0xf]  ;;  %v13546_v18 = vld [vmem:[%s16127_s17 + $0x1e88] sm:$0xf0] }
 0x4b1   : > { %9109 = vmatpush.bf16.msra.mxu2 %v13189_v30  ;;  %v14245_v30 = vor.u32 %v15401_v19, %v14242_v16  ;;  %v13837_v26 = vor.u32 %v15299_v23, %v13834_v42  ;;  %v14146_v19 = vld [vmem:[%s16127_s17 + $0x2338] sm:$0xf0]  ;;  %v15275_v20 = vld [vmem:[%s16127_s17 + $0x1ff4] sm:$0xf]  ;;  %v13738_v42 = vld [vmem:[%s16127_s17 + $0x2008] sm:$0xf0] }
 0x4b2   : > { %9122 = vmatpush.bf16.msra.mxu3 %v13381_v33  ;;  %v15395_v33 = vld [vmem:[%s16127_s17 + $0x23b4] sm:$0xf] }
 0x4b3   : > { %9084 = vmatpush.bf16.msra.mxu0 %v12781_v44  ;;  %v14221_v43 = vor.u32 %v15395_v33, %v14218_v35  ;;  %v13810_v44 = vld [vmem:[%s16127_s17 + $0x2098] sm:$0xf0] }
 0x4b4   : > { %9097 = vmatpush.bf16.msra.mxu1 %v12973_v50  ;;  %v14002_v50 = vld [vmem:[%s16127_s17 + $0x2218] sm:$0xf0]  ;;  %v13813_v58 = vor.u32 %v15293_v36, %v13810_v44  ;;  %v13741_v36 = vor.u32 %v15275_v20, %v13738_v42  ;;  %v15765_v42 = vld [vmem:[#allocation1 + $0x36] sm:$0xff] }
 0x4b5   : > { %9110 = vmatpush.bf16.msra.mxu2 %v13165_v51  ;;  %v15759_v51 = vld [vmem:[#allocation1 + $0x12] sm:$0xff]  ;;  %v14005_v0 = vor.u32 %v15341_v39, %v14002_v50  ;;  %v13522_v44 = vld [vmem:[%s16127_s17 + $0x1e58] sm:$0xf0]  ;;  %v15269_v39 = vld [vmem:[%s16127_s17 + $0x1fc4] sm:$0xf] }
 0x4b6   : > { %9123 = vmatpush.bf16.msra.mxu3 %v13357_v54  ;;  %v15761_v54 = vld [vmem:[#allocation1 + $0x1b] sm:$0xff] }
 0x4b7   : > { %9085 = vmatpush.bf16.msra.mxu0 %v12757_v34  ;;  %v15287_v34 = vld [vmem:[%s16127_s17 + $0x2054] sm:$0xf] }
 0x4b8   : > { %9098 = vmatpush.bf16.msra.mxu1 %v12949_v60  ;;  %v14197_v60 = vor.u32 %v15389_v27, %v14194_v55  ;;  %v15317_v27 = vld [vmem:[%s16127_s17 + $0x2144] sm:$0xf]  ;;  %v13906_v55 = vld [vmem:[%s16127_s17 + $0x2158] sm:$0xf0] }
 0x4b9   : > { %9111 = vmatpush.bf16.msra.mxu2 %v13141_v61  ;;  %v13786_v61 = vld [vmem:[%s16127_s17 + $0x2068] sm:$0xf0] }
 0x4ba   : > { %9124 = vmatpush.bf16.msra.mxu3 %v13333_v48  ;;  %v14170_v48 = vld [vmem:[%s16127_s17 + $0x2368] sm:$0xf0]  ;;  %v13789_v31 = vor.u32 %v15287_v34, %v13786_v61 }
 0x4bb   : > { %9086 = vmatpush.bf16.msra.mxu0 %v12733_v7  ;;  %v8880_v3 = vpop.f32.mrf.mxu0  ;;  %v14173_v9 = vor.u32 %v15383_v47, %v14170_v48  ;;  %v13498_v34 = vld [vmem:[%s16127_s17 + $0x1e28] sm:$0xf0]  ;;  %v15359_v48 = vld [vmem:[%s16127_s17 + $0x2294] sm:$0xf] }
 0x4bc   : > { %9099 = vmatpush.bf16.msra.mxu1 %v12925_v38  ;;  %v8881_v5 = vadd.f32 %v8880_v3, %v1490_v46  ;;  %v8893_v7 = vpop.f32.mrf.mxu1  ;;  %v13954_v38 = vld [vmem:[%s16127_s17 + $0x21b8] sm:$0xf0]  ;;  %v13690_v61 = vld [vmem:[%s16127_s17 + $0x1fa8] sm:$0xf0]  ;;  %v15603_v3 = vld [vmem:[%s16140_s9 + $0x38] sm:$0xff]  }
 0x4bd   : > { %9112 = vmatpush.bf16.msra.mxu2 %v13117_v17  ;;  %v15377_v17 = vld [vmem:[%s16127_s17 + $0x2324] sm:$0xf] }
 0x4be   : > { %9125 = vmatpush.bf16.msra.mxu3 %v13309_v13  ;;  %9087 = vmatmul.bf16.vlgmr.msra.gmra.mxu0 %v15758_v37  ;;  %v8894_v16 = vadd.f32 %v8893_v7, %v8881_v5  ;;  %v13573_v13 = vor.u32 %v15233_v32, %v13570_v11  ;;  %v13933_v37 = vor.u32 %v15323_v41, %v13930_v28  ;;  %v15619_v32 = vld [vmem:[%s16140_s9 + $0xb8] sm:$0xff]  }
 0x4bf   : > { %9131 = vmatpush.bf16.msrb.mxu0 %v13669_v10  ;;  %9100 = vmatmul.bf16.vlgmr.msra.gmra.mxu1 %v15760_v52  ;;  %v13765_v10 = vor.u32 %v15281_v12, %v13762_v15  ;;  %v13714_v52 = vld [vmem:[%s16127_s17 + $0x1fd8] sm:$0xf0]  ;;  %v13693_v11 = vor.u32 %v15263_v25, %v13690_v61  ;;  %v13885_v12 = vor.u32 %v15311_v63, %v13882_v8  ;;  %v15627_v5 = vld [vmem:[%s16140_s9 + $0xf8] sm:$0xff]  }
 0x4c0   : > { %9144 = vmatpush.bf16.msrb.mxu1 %v13861_v29  ;;  %9113 = vmatmul.bf16.vlgmr.msra.gmra.mxu2 %v15759_v51  ;;  %v13957_v29 = vor.u32 %v15329_v21, %v13954_v38  ;;  %v15500_v21 = vunpack.c.h.bf16 %v15619_v32  ;;  %v15532_v38 = vunpack.c.h.bf16 %v15627_v5  ;;  %v15531_v20 = vunpack.c.l.bf16 %v15627_v5  ;;  %v15599_v8 = vld [vmem:[%s16140_s9 + $0x18] sm:$0xff]  }
 0x4c1   : > { %9157 = vmatpush.bf16.msrb.mxu2 %v14053_v14  ;;  %9126 = vmatmul.bf16.vlgmr.msra.gmra.mxu3 %v15761_v54  ;;  %v15227_v14 = vld [vmem:[%s16127_s17 + $0x1e74] sm:$0xf]  ;;  %v15365_v54 = vld [vmem:[%s16127_s17 + $0x22c4] sm:$0xf]  ;;  %v15420_v5 = vunpack.c.h.bf16 %v15599_v8 }
 0x4c2   : > { %9170 = vmatpush.bf16.msrb.mxu3 %v14245_v30  ;;  %v14149_v30 = vor.u32 %v15377_v17, %v14146_v19  ;;  %v15602_v17 = vld [vmem:[%s16140_s9 + $0x30] sm:$0xff]   ;;  %v15435_v19 = vunpack.c.l.bf16 %v15603_v3 }
 0x4c3   : > { %9132 = vmatpush.bf16.msrb.mxu0 %v13645_v53  ;;  %v8906_v23 = vpop.f32.mrf.mxu2  ;;  %v15371_v53 = vld [vmem:[%s16127_s17 + $0x22f4] sm:$0xf]  ;;  %v8882_v22 = vpop.f32.mrf.mxu0 }
 0x4c4   : > { %9145 = vmatpush.bf16.msrb.mxu1 %v13837_v26  ;;  %v8907_v33 = vadd.f32 %v8906_v23, %v8894_v16  ;;  %v8919_v35 = vpop.f32.mrf.mxu3  ;;  %v14122_v26 = vld [vmem:[%s16127_s17 + $0x2308] sm:$0xf0]  ;;  %v8895_v50 = vpop.f32.mrf.mxu1  ;;  %v15610_v16 = vld [vmem:[%s16140_s9 + $0x70] sm:$0xff]   ;;  %v15432_v23 = vunpack.c.h.bf16 %v15602_v17  ;;  %v15617_v22 = vld [vmem:[%s16140_s9 + $0xa8] sm:$0xff]  }
 0x4c5   : > { %9158 = vmatpush.bf16.msrb.mxu2 %v14029_v1  ;;  %v13549_v1 = vor.u32 %v15227_v14, %v13546_v18  ;;  %v14125_v51 = vor.u32 %v15371_v53, %v14122_v26  ;;  %v15626_v14 = vld [vmem:[%s16140_s9 + $0xf0] sm:$0xff]   ;;  %v15464_v41 = vunpack.c.h.bf16 %v15610_v16  ;;  %v15431_v26 = vunpack.c.l.bf16 %v15602_v17 }
 0x4c6   : > { %9171 = vmatpush.bf16.msrb.mxu3 %v14221_v43  ;;  %v18668_v40 = vadd.f32 %v8919_v35, %v8907_v33  ;;  %v15221_v43 = vld [vmem:[%s16127_s17 + $0x1e44] sm:$0xf]  ;;  %v15763_v18 = vld [vmem:[#allocation1 + $0x24] sm:$0xff]  ;;  %v15601_v33 = vld [vmem:[%s16140_s9 + $0x28] sm:$0xff]   ;;  %v15528_v53 = vunpack.c.h.bf16 %v15626_v14 }
 0x4c7   : > { %9133 = vmatpush.bf16.msrb.mxu0 %v13621_v57  ;;  %v14098_v57 = vld [vmem:[%s16127_s17 + $0x22d8] sm:$0xf0]  ;;  %v13525_v2 = vor.u32 %v15221_v43, %v13522_v44  ;;  %v15625_v43 = vld [vmem:[%s16140_s9 + $0xe8] sm:$0xff]   ;;  %v15527_v44 = vunpack.c.l.bf16 %v15626_v14 }
 0x4c8   : > { %9146 = vmatpush.bf16.msrb.mxu1 %v13813_v58  ;;  %v13717_v58 = vor.u32 %v15269_v39, %v13714_v52  ;;  %v15766_v35 = vld [vmem:[#allocation1 + $0x3f] sm:$0xff]  ;;  %v15428_v39 = vunpack.c.h.bf16 %v15601_v33  ;;  %v15600_v52 = vld [vmem:[%s16140_s9 + $0x20] sm:$0xff]  }
 0x4c9   : > { %9159 = vmatpush.bf16.msrb.mxu2 %v14005_v0  ;;  %v13909_v0 = vor.u32 %v15317_v27, %v13906_v55  ;;  %v15524_v27 = vunpack.c.h.bf16 %v15625_v43  ;;  %v15427_v55 = vunpack.c.l.bf16 %v15601_v33  ;;  %v15597_v33 = vld [vmem:[%s16140_s9 + $0x8] sm:$0xff]  }
 0x4ca   : > { %9172 = vmatpush.bf16.msrb.mxu3 %v14197_v60  ;;  %v14101_v60 = vor.u32 %v15365_v54, %v14098_v57  ;;  %v15608_v54 = vld [vmem:[%s16140_s9 + $0x60] sm:$0xff]  }
 0x4cb   : > { %9134 = vmatpush.bf16.msrb.mxu0 %v13597_v56  ;;  %v8908_v46 = vpop.f32.mrf.mxu2  ;;  %v14074_v56 = vld [vmem:[%s16127_s17 + $0x22a8] sm:$0xf0]  ;;  %v15456_v61 = vunpack.c.h.bf16 %v15608_v54 }
 0x4cc   : > { %9147 = vmatpush.bf16.msrb.mxu1 %v13789_v31  ;;  %v8921_v47 = vpop.f32.mrf.mxu3  ;;  %v13501_v31 = vor.u32 %v15215_v4, %v13498_v34  ;;  %v14077_v7 = vor.u32 %v15359_v48, %v14074_v56  ;;  %v15616_v57 = vld [vmem:[%s16140_s9 + $0xa0] sm:$0xff]   ;;  %v15523_v46 = vunpack.c.l.bf16 %v15625_v43  ;;  %v15423_v56 = vunpack.c.l.bf16 %v15600_v52 }
 0x4cd   : > { %9160 = vmatpush.bf16.msrb.mxu2 %v13981_v49  ;;  %v15611_v49 = vld [vmem:[%s16140_s9 + $0x78] sm:$0xff]   ;;  %v15624_v4 = vld [vmem:[%s16140_s9 + $0xe0] sm:$0xff]   ;;  %v15488_v63 = vunpack.c.h.bf16 %v15616_v57 }
 0x4ce   : > { %9173 = vmatpush.bf16.msrb.mxu3 %v14173_v9  ;;  %v15436_v9 = vunpack.c.h.bf16 %v15603_v3  ;;  %v15468_v15 = vunpack.c.h.bf16 %v15611_v49  ;;  %v15520_v48 = vunpack.c.h.bf16 %v15624_v4  ;;  %v15607_v3 = vld [vmem:[%s16140_s9 + $0x58] sm:$0xff]  }
 0x4cf   : > { %9135 = vmatpush.bf16.msrb.mxu0 %v13573_v13  ;;  %v15618_v13 = vld [vmem:[%s16140_s9 + $0xb0] sm:$0xff]   ;;  %v15451_v14 = vunpack.c.l.bf16 %v15607_v3 }
 0x4d0   : > { %9148 = vmatpush.bf16.msrb.mxu1 %v13765_v10  ;;  %v15467_v10 = vunpack.c.l.bf16 %v15611_v49  ;;  %v15496_v28 = vunpack.c.h.bf16 %v15618_v13  ;;  %v15487_v49 = vunpack.c.l.bf16 %v15616_v57  ;;  %v15604_v57 = vld [vmem:[%s16140_s9 + $0x40] sm:$0xff]  }
 0x4d1   : > { %9161 = vmatpush.bf16.msrb.mxu2 %v13957_v29  ;;  %v15499_v29 = vunpack.c.l.bf16 %v15619_v32  ;;  %v15623_v32 = vld [vmem:[%s16140_s9 + $0xd8] sm:$0xff]  }
 0x4d2   : > { %9174 = vmatpush.bf16.msrb.mxu3 %v14149_v30  ;;  %v15764_v30 = vld [vmem:[#allocation1 + $0x2d] sm:$0xff]  ;;  %v15516_v17 = vunpack.c.h.bf16 %v15623_v32 }
 0x4d3   : > { %9136 = vmatpush.bf16.msrb.mxu0 %v13549_v1  ;;  %v15609_v1 = vld [vmem:[%s16140_s9 + $0x68] sm:$0xff]  }
 0x4d4   : > { %9149 = vmatpush.bf16.msrb.mxu1 %v13741_v36  ;;  %v15463_v36 = vunpack.c.l.bf16 %v15610_v16  ;;  %v15460_v50 = vunpack.c.h.bf16 %v15609_v1  ;;  %v15606_v16 = vld [vmem:[%s16140_s9 + $0x50] sm:$0xff]  }
 0x4d5   : > { %9162 = vmatpush.bf16.msrb.mxu2 %v13933_v37  ;;  %v15495_v37 = vunpack.c.l.bf16 %v15618_v13  ;;  %v15614_v13 = vld [vmem:[%s16140_s9 + $0x90] sm:$0xff]  }
 0x4d6   : > { %9175 = vmatpush.bf16.msrb.mxu3 %v14125_v51  ;;  %v15492_v51 = vunpack.c.h.bf16 %v15617_v22 }
 0x4d7   : > { %9137 = vmatpush.bf16.msrb.mxu0 %v13525_v2 }
 0x4d8   : > { %9150 = vmatpush.bf16.msrb.mxu1 %v13717_v58  ;;  %v15459_v58 = vunpack.c.l.bf16 %v15609_v1  ;;  %v15613_v1 = vld [vmem:[%s16140_s9 + $0x88] sm:$0xff]  }
 0x4d9   : > { %9163 = vmatpush.bf16.msrb.mxu2 %v13909_v0  ;;  %v15491_v0 = vunpack.c.l.bf16 %v15617_v22  ;;  %v15447_v22 = vunpack.c.l.bf16 %v15606_v16 }
 0x4da   : > { %9176 = vmatpush.bf16.msrb.mxu3 %v14101_v60  ;;  %v15424_v60 = vunpack.c.h.bf16 %v15600_v52  ;;  %v15476_v52 = vunpack.c.h.bf16 %v15613_v1 }
 0x4db   : > { %9138 = vmatpush.bf16.msrb.mxu0 %v13501_v31  ;;  %v8932_v2 = vpop.f32.mrf.mxu0  ;;  %v15455_v31 = vunpack.c.l.bf16 %v15608_v54  ;;  %v15411_v54 = vunpack.c.l.bf16 %v15597_v33 }
 0x4dc   : > { %9151 = vmatpush.bf16.msrb.mxu1 %v13693_v11  ;;  %v8933_v34 = vadd.f32 %v8932_v2, %v18668_v40  ;;  %v8945_v25 = vpop.f32.mrf.mxu1  ;;  %v15615_v40 = vld [vmem:[%s16140_s9 + $0x98] sm:$0xff]   ;;  %v15612_v2 = vld [vmem:[%s16140_s9 + $0x80] sm:$0xff]  }
 0x4dd   : > { %9164 = vmatpush.bf16.msrb.mxu2 %v13885_v12  ;;  %v15519_v12 = vunpack.c.l.bf16 %v15624_v4  ;;  %v15620_v4 = vld [vmem:[%s16140_s9 + $0xc0] sm:$0xff]  }
 0x4de   : > { %9177 = vmatpush.bf16.msrb.mxu3 %v14077_v7  ;;  %9139 = vmatmul.bf16.vlgmr.msrb.gmra.mxu0 %v15763_v18  ;;  %v8946_v47 = vadd.f32 %v8945_v25, %v8933_v34  ;;  %v15483_v18 = vunpack.c.l.bf16 %v15615_v40 }
 0x4df   : > { %9381 = vmatpush.msra.mxu0 %v15436_v9  ;;  %9152 = vmatmul.bf16.vlgmr.msrb.gmra.mxu1 %v15764_v30  ;;  %v15515_v30 = vunpack.c.l.bf16 %v15623_v32  ;;  %v15634_v32 = vld [vmem:[%s16140_s9 + $0x130] sm:$0xff]  }
 0x4e0   : > { %9401 = vmatpush.msra.mxu1 %v15468_v15  ;;  %9165 = vmatmul.bf16.vlgmr.msrb.gmra.mxu2 %v15765_v42  ;;  %v15452_v15 = vunpack.c.h.bf16 %v15607_v3  ;;  %v9183_v3 = vmax.f32 %v16920_v59, 0.0  ;;  %v15560_v59 = vunpack.c.h.bf16 %v15634_v32 }
 0x4e1   : > { %9421 = vmatpush.msra.mxu2 %v15500_v21  ;;  %9178 = vmatmul.bf16.vlgmr.msrb.gmra.mxu3 %v15766_v35  ;;  %v15484_v21 = vunpack.c.h.bf16 %v15615_v40 }
 0x4e2   : > { %9441 = vmatpush.msra.mxu3 %v15532_v38  ;;  %9382 = vmatpush.msra.mxu0 %v15435_v19  ;;  %v15598_v38 = vld [vmem:[%s16140_s9 + $0x10] sm:$0xff]   ;;  %v15419_v19 = vunpack.c.l.bf16 %v15599_v8  ;;  %v15439_v8 = vunpack.c.l.bf16 %v15604_v57 }
 0x4e3   : > { %9402 = vmatpush.msra.mxu1 %v15467_v10  ;;  %9422 = vmatpush.msra.mxu2 %v15499_v29  ;;  %v8958_v11 = vpop.f32.mrf.mxu2  ;;  %v8934_v29 = vpop.f32.mrf.mxu0  ;;  %v15416_v42 = vunpack.c.h.bf16 %v15598_v38 }
 0x4e4   : > { %9442 = vmatpush.msra.mxu3 %v15531_v20  ;;  %9383 = vmatpush.msra.mxu0 %v15432_v23  ;;  %v8959_v7 = vadd.f32 %v8958_v11, %v8946_v47  ;;  %v8971_v9 = vpop.f32.mrf.mxu3  ;;  %v15622_v20 = vld [vmem:[%s16140_s9 + $0xd0] sm:$0xff]   ;;  %v8947_v23 = vpop.f32.mrf.mxu1  ;;  %v15471_v47 = vunpack.c.l.bf16 %v15612_v2  ;;  %v9186_v11 = vmax.f32 %v18174_v6, 0.0 }
 0x4e5   : > { %9403 = vmatpush.msra.mxu1 %v15464_v41  ;;  %9423 = vmatpush.msra.mxu2 %v15496_v28  ;;  %v15448_v41 = vunpack.c.h.bf16 %v15606_v16  ;;  %v15480_v28 = vunpack.c.h.bf16 %v15614_v13  ;;  %v15512_v35 = vunpack.c.h.bf16 %v15622_v20 }
 0x4e6   : > { %9443 = vmatpush.msra.mxu3 %v15528_v53  ;;  %9384 = vmatpush.msra.mxu0 %v15431_v26  ;;  %v18710_v10 = vadd.f32 %v8971_v9, %v8959_v7  ;;  %v15415_v53 = vunpack.c.l.bf16 %v15598_v38  ;;  %v15605_v26 = vld [vmem:[%s16140_s9 + $0x48] sm:$0xff]  }
 0x4e7   : > { %9404 = vmatpush.msra.mxu1 %v15463_v36  ;;  %9424 = vmatpush.msra.mxu2 %v15495_v37  ;;  %v15479_v36 = vunpack.c.l.bf16 %v15614_v13  ;;  %v15621_v37 = vld [vmem:[%s16140_s9 + $0xc8] sm:$0xff]   ;;  %v15631_v13 = vld [vmem:[%s16140_s9 + $0x118] sm:$0xff]  }
 0x4e8   : > { %9444 = vmatpush.msra.mxu3 %v15527_v44  ;;  %9385 = vmatpush.msra.mxu0 %v15428_v39  ;;  %v15511_v44 = vunpack.c.l.bf16 %v15622_v20  ;;  %v15412_v39 = vunpack.c.h.bf16 %v15597_v33  ;;  %v15507_v34 = vunpack.c.l.bf16 %v15621_v37  ;;  %v15548_v23 = vunpack.c.h.bf16 %v15631_v13  ;;  %v15629_v33 = vld [vmem:[%s16140_s9 + $0x108] sm:$0xff]  }
 0x4e9   : > { %9405 = vmatpush.msra.mxu1 %v15460_v50  ;;  %9425 = vmatpush.msra.mxu2 %v15492_v51  ;;  %v15444_v51 = vunpack.c.h.bf16 %v15605_v26 }
 0x4ea   : > { %9445 = vmatpush.msra.mxu3 %v15524_v27  ;;  %9386 = vmatpush.msra.mxu0 %v15427_v55  ;;  %v15406_v27 = vld [vmem:[%s16140_s9] sm:$0xff]   ;;  %v15508_v55 = vunpack.c.h.bf16 %v15621_v37 }
 0x4eb   : > { %9406 = vmatpush.msra.mxu1 %v15459_v58  ;;  %9426 = vmatpush.msra.mxu2 %v15491_v0  ;;  %v8960_v43 = vpop.f32.mrf.mxu2  ;;  %v15443_v58 = vunpack.c.l.bf16 %v15605_v26  ;;  %v15475_v0 = vunpack.c.l.bf16 %v15613_v1  ;;  %v15408_v25 = vunpack.c.h.bf16 %v15406_v27  ;;  %v15540_v26 = vunpack.c.h.bf16 %v15629_v33  ;;  %v15628_v1 = vld [vmem:[%s16140_s9 + $0x100] sm:$0xff]  }
 0x4ec   : > { %9446 = vmatpush.msra.mxu3 %v15523_v46  ;;  %9387 = vmatpush.msra.mxu0 %v15424_v60  ;;  %v8973_v50 = vpop.f32.mrf.mxu3  ;;  %v15440_v46 = vunpack.c.h.bf16 %v15604_v57  ;;  %v15472_v60 = vunpack.c.h.bf16 %v15612_v2  ;;  %v15535_v37 = vunpack.c.l.bf16 %v15628_v1  ;;  %v9187_v43 = vmax.f32 %v18601_v45, 0.0  ;;  %v15641_v45 = vld [vmem:[%s16140_s9 + $0x168] sm:$0xff]  }
 0x4ed   : > { %9407 = vmatpush.msra.mxu1 %v15456_v61  ;;  %9427 = vmatpush.msra.mxu2 %v15488_v63  ;;  %v15504_v61 = vunpack.c.h.bf16 %v15620_v4  ;;  %v15407_v63 = vunpack.c.l.bf16 %v15406_v27  ;;  %v15643_v27 = vld [vmem:[%s16140_s9 + $0x178] sm:$0xff]  }
 0x4ee   : > { %9447 = vmatpush.msra.mxu3 %v15520_v48  ;;  %9388 = vmatpush.msra.mxu0 %v15423_v56  ;;  %v15635_v48 = vld [vmem:[%s16140_s9 + $0x138] sm:$0xff]   ;;  %v15503_v56 = vunpack.c.l.bf16 %v15620_v4  ;;  %v15596_v57 = vunpack.c.h.bf16 %v15643_v27  ;;  %v15595_v2 = vunpack.c.l.bf16 %v15643_v27 }
 0x4ef   : > { %9408 = vmatpush.msra.mxu1 %v15455_v31  ;;  %9428 = vmatpush.msra.mxu2 %v15487_v49  ;;  %v15564_v40 = vunpack.c.h.bf16 %v15635_v48  ;;  %v9184_v31 = vmax.f32 %v17338_v62, 0.0  ;;  %v9185_v49 = vmax.f32 %v17756_v24, 0.0  ;;  %v15559_v62 = vunpack.c.l.bf16 %v15634_v32  ;;  %v15637_v32 = vld [vmem:[%s16140_s9 + $0x148] sm:$0xff]  }
 0x4f0   : > { %9448 = vmatpush.msra.mxu3 %v15519_v12  ;;  %9389 = vmatpush.msra.mxu0 %v15420_v5  ;;  %v15563_v12 = vunpack.c.l.bf16 %v15635_v48  ;;  %v15633_v5 = vld [vmem:[%s16140_s9 + $0x128] sm:$0xff]  }
 0x4f1   : > { %9409 = vmatpush.msra.mxu1 %v15452_v15  ;;  %9429 = vmatpush.msra.mxu2 %v15484_v21  ;;  %v15556_v15 = vunpack.c.h.bf16 %v15633_v5  ;;  %v15632_v21 = vld [vmem:[%s16140_s9 + $0x120] sm:$0xff]   ;;  %v15555_v38 = vunpack.c.l.bf16 %v15633_v5 }
 0x4f2   : > { %9449 = vmatpush.msra.mxu3 %v15516_v17  ;;  %9390 = vmatpush.msra.mxu0 %v15419_v19  ;;  %v15552_v17 = vunpack.c.h.bf16 %v15632_v21 }
 0x4f3   : > { %9410 = vmatpush.msra.mxu1 %v15451_v14  ;;  %9430 = vmatpush.msra.mxu2 %v15483_v18  ;;  %v15551_v18 = vunpack.c.l.bf16 %v15632_v21 }
 0x4f4   : > { %9450 = vmatpush.msra.mxu3 %v15515_v30  ;;  %9391 = vmatpush.msra.mxu0 %v15416_v42  ;;  %v15630_v30 = vld [vmem:[%s16140_s9 + $0x110] sm:$0xff]   ;;  %v15547_v42 = vunpack.c.l.bf16 %v15631_v13 }
 0x4f5   : > { %9411 = vmatpush.msra.mxu1 %v15448_v41  ;;  %9431 = vmatpush.msra.mxu2 %v15480_v28  ;;  %v15544_v41 = vunpack.c.h.bf16 %v15630_v30 }
 0x4f6   : > { %9451 = vmatpush.msra.mxu3 %v15512_v35  ;;  %9392 = vmatpush.msra.mxu0 %v15415_v53  ;;  %v15543_v53 = vunpack.c.l.bf16 %v15630_v30 }
 0x4f7   : > { %9412 = vmatpush.msra.mxu1 %v15447_v22  ;;  %9432 = vmatpush.msra.mxu2 %v15479_v36  ;;  %v15539_v22 = vunpack.c.l.bf16 %v15629_v33  ;;  %v15536_v36 = vunpack.c.h.bf16 %v15628_v1 }
 0x4f8   : > { %9452 = vmatpush.msra.mxu3 %v15511_v44  ;;  %9393 = vmatpush.msra.mxu0 %v15412_v39 }
 0x4f9   : > { %9413 = vmatpush.msra.mxu1 %v15444_v51  ;;  %9433 = vmatpush.msra.mxu2 %v15476_v52 }
 0x4fa   : > { %9453 = vmatpush.msra.mxu3 %v15508_v55  ;;  %9394 = vmatpush.msra.mxu0 %v15411_v54  ;;  %v15642_v55 = vld [vmem:[%s16140_s9 + $0x170] sm:$0xff]  }
 0x4fb   : > { %9414 = vmatpush.msra.mxu1 %v15443_v58  ;;  %9434 = vmatpush.msra.mxu2 %v15475_v0  ;;  %v8984_v7 = vpop.f32.mrf.mxu0  ;;  %v15592_v58 = vunpack.c.h.bf16 %v15642_v55  ;;  %v15591_v0 = vunpack.c.l.bf16 %v15642_v55 }
 0x4fc   : > { %9454 = vmatpush.msra.mxu3 %v15507_v34  ;;  %9395 = vmatpush.msra.mxu0 %v15408_v25  ;;  %v8985_v24 = vadd.f32 %v8984_v7, %v18710_v10  ;;  %v8997_v9 = vpop.f32.mrf.mxu1  ;;  %v15588_v34 = vunpack.c.h.bf16 %v15641_v45 }
 0x4fd   : > { %9415 = vmatpush.msra.mxu1 %v15440_v46  ;;  %9435 = vmatpush.msra.mxu2 %v15472_v60  ;;  %v15640_v46 = vld [vmem:[%s16140_s9 + $0x160] sm:$0xff]   ;;  %v15587_v60 = vunpack.c.l.bf16 %v15641_v45 }
 0x4fe   : > { %9455 = vmatpush.msra.mxu3 %v15504_v61  ;;  %9396 = vmatpush.msra.mxu0 %v15407_v63  ;;  %v8998_v6 = vadd.f32 %v8997_v9, %v8985_v24  ;;  %v15584_v61 = vunpack.c.h.bf16 %v15640_v46  ;;  %v15639_v63 = vld [vmem:[%s16140_s9 + $0x158] sm:$0xff]   ;;  %v15571_v24 = vunpack.c.l.bf16 %v15637_v32  ;;  %v15636_v9 = vld [vmem:[%s16140_s9 + $0x140] sm:$0xff]  }
 0x4ff   : > { %9416 = vmatpush.msra.mxu1 %v15439_v8  ;;  %9436 = vmatpush.msra.mxu2 %v15471_v47  ;;  %v15583_v8 = vunpack.c.l.bf16 %v15640_v46  ;;  %v15580_v47 = vunpack.c.h.bf16 %v15639_v63 }
 0x500   : > { %9456 = vmatpush.msra.mxu3 %v15503_v56  ;;  %9397 = vmatmul.f32.vlgmr.msra.gmra.mxu0 %v9183_v3  ;;  %v15579_v3 = vunpack.c.l.bf16 %v15639_v63 }
 0x501   : > { %9417 = vmatmul.f32.vlgmr.msra.gmra.mxu1 %v9184_v31  ;;  %9437 = vmatmul.f32.vlgmr.msra.gmra.mxu2 %v9185_v49 }
 0x502   : > { %9457 = vmatmul.f32.vlgmr.msra.gmra.mxu3 %v9186_v11  ;;  %9461 = vmatpush.msrb.mxu0 %v15564_v40  ;;  %v15638_v40 = vld [vmem:[%s16140_s9 + $0x150] sm:$0xff]  }
 0x503   : > { %v9010_v19 = vpop.f32.mrf.mxu2  ;;  %v8986_v14 = vpop.f32.mrf.mxu0  ;;  %9481 = vmatpush.msrb.mxu1 %v15596_v57  ;;  %v15576_v31 = vunpack.c.h.bf16 %v15638_v40  ;;  %v15575_v49 = vunpack.c.l.bf16 %v15638_v40 }
 0x504   : > { %9462 = vmatpush.msrb.mxu0 %v15563_v12  ;;  %v9011_v16 = vadd.f32 %v9010_v19, %v8998_v6  ;;  %v9023_v29 = vpop.f32.mrf.mxu3  ;;  %v8999_v20 = vpop.f32.mrf.mxu1  ;;  %v15572_v12 = vunpack.c.h.bf16 %v15637_v32  ;;  %v15567_v6 = vunpack.c.l.bf16 %v15636_v9 }
 0x505   : > { %9482 = vmatpush.msrb.mxu1 %v15595_v2 }
 0x506   : > { %9463 = vmatpush.msrb.mxu0 %v15560_v59  ;;  %v18731_v10 = vadd.f32 %v9023_v29, %v9011_v16 }
 0x507   : > { %9483 = vmatpush.msrb.mxu1 %v15592_v58 }
 0x508   : > { %9464 = vmatpush.msrb.mxu0 %v15559_v62 }
 0x509   : > { %9484 = vmatpush.msrb.mxu1 %v15591_v0 }
 0x50a   : > { %9465 = vmatpush.msrb.mxu0 %v15556_v15  ;;  %v15568_v15 = vunpack.c.h.bf16 %v15636_v9 }
 0x50b   : > { %v9012_v28 = vpop.f32.mrf.mxu2  ;;  %9485 = vmatpush.msrb.mxu1 %v15588_v34 }
 0x50c   : > { %9466 = vmatpush.msrb.mxu0 %v15555_v38  ;;  %v9025_v35 = vpop.f32.mrf.mxu3 }
 0x50d   : > { %9486 = vmatpush.msrb.mxu1 %v15587_v60 }
 0x50e   : > { %9467 = vmatpush.msrb.mxu0 %v15552_v17 }
 0x50f   : > { %9487 = vmatpush.msrb.mxu1 %v15584_v61 }
 0x510   : > { %9468 = vmatpush.msrb.mxu0 %v15551_v18 }
 0x511   : > { %9488 = vmatpush.msrb.mxu1 %v15583_v8 }
 0x512   : > { %9469 = vmatpush.msrb.mxu0 %v15548_v23 }
 0x513   : > { %9489 = vmatpush.msrb.mxu1 %v15580_v47 }
 0x514   : > { %9470 = vmatpush.msrb.mxu0 %v15547_v42 }
 0x515   : > { %9490 = vmatpush.msrb.mxu1 %v15579_v3 }
 0x516   : > { %9471 = vmatpush.msrb.mxu0 %v15544_v41 }
 0x517   : > { %9491 = vmatpush.msrb.mxu1 %v15576_v31 }
 0x518   : > { %9472 = vmatpush.msrb.mxu0 %v15543_v53 }
 0x519   : > { %9492 = vmatpush.msrb.mxu1 %v15575_v49 }
 0x51a   : > { %9473 = vmatpush.msrb.mxu0 %v15540_v26 }
 0x51b   : > { %v9036_v44 = vpop.f32.mrf.mxu0  ;;  %9493 = vmatpush.msrb.mxu1 %v15572_v12 }
 0x51c   : > { %9474 = vmatpush.msrb.mxu0 %v15539_v22  ;;  %v9049_v39 = vpop.f32.mrf.mxu1  ;;  %v9037_v59 = vadd.f32 %v9036_v44, %v18731_v10 }
 0x51d   : > { %9494 = vmatpush.msrb.mxu1 %v15571_v24 }
 0x51e   : > { %9475 = vmatpush.msrb.mxu0 %v15536_v36  ;;  %v9050_v21 = vadd.f32 %v9049_v39, %v9037_v59 }
 0x51f   : > { %9495 = vmatpush.msrb.mxu1 %v15568_v15 }
 0x520   : > { %9476 = vmatpush.msrb.mxu0 %v15535_v37 }
 0x521   : > { %9477 = vmatmul.f32.vlgmr.msrb.gmra.mxu0 %v9187_v43  ;;  %9496 = vmatpush.msrb.mxu1 %v15567_v6 }
 0x523   : > { %v9062_v50 = vpop.f32.mrf.mxu2  ;;  %v9038_v52 = vpop.f32.mrf.mxu0 }
 0x524   : > { %v9075_v51 = vpop.f32.mrf.mxu3  ;;  %v9051_v54 = vpop.f32.mrf.mxu1  ;;  %v9063_v38 = vadd.f32 %v9062_v50, %v9050_v21 }
 0x526   : > { %v9076_v16 = vadd.f32 %v9075_v51, %v9063_v38 }
 0x52b   : > { %v9064_v4 = vpop.f32.mrf.mxu2 }
 0x52c   : > { %v9077_v25 = vpop.f32.mrf.mxu3 }
 0x53b   : > { %v9088_v48 = vpop.f32.mrf.mxu0 }
 0x53c   : > { %v9101_v56 = vpop.f32.mrf.mxu1  ;;  %v9089_v13 = vadd.f32 %v9088_v48, %v9076_v16 }
 0x53e   : > { %v9102_v29 = vadd.f32 %v9101_v56, %v9089_v13 }
 0x543   : > { %v9114_v11 = vpop.f32.mrf.mxu2  ;;  %v9090_v7 = vpop.f32.mrf.mxu0 }
 0x544   : > { %v9127_v5 = vpop.f32.mrf.mxu3  ;;  %v9103_v62 = vpop.f32.mrf.mxu1  ;;  %v9115_v14 = vadd.f32 %v9114_v11, %v9102_v29 }
 0x546   : > { %v9128_v18 = vadd.f32 %v9127_v5, %v9115_v14 }
 0x54b   : > { %v9116_v17 = vpop.f32.mrf.mxu2 }
 0x54c   : > { %v9129_v19 = vpop.f32.mrf.mxu3 }
 0x55b   : > { %v9140_v20 = vpop.f32.mrf.mxu0 }
 0x55c   : > { %v9153_v10 = vpop.f32.mrf.mxu1  ;;  %v9141_v23 = vadd.f32 %v9140_v20, %v9128_v18 }
 0x55e   : > { %v9154_v30 = vadd.f32 %v9153_v10, %v9141_v23 }
 0x563   : > { %v9166_v42 = vpop.f32.mrf.mxu2  ;;  %v9142_v33 = vpop.f32.mrf.mxu0 }
 0x564   : > { %v9167_v41 = vadd.f32 %v9166_v42, %v9154_v30  ;;  %v9179_v28 = vpop.f32.mrf.mxu3  ;;  %v9155_v35 = vpop.f32.mrf.mxu1 }
 0x566   : > { %v9180_v53 = vadd.f32 %v9179_v28, %v9167_v41 }
 0x568   : > { %v9188_v26 = vmax.f32 %v9180_v53, 0.0 }
 0x56a   : > { %9497 = vmatmul.f32.vlgmr.msrb.gmra.mxu1 %v9188_v26 }
 0x56b   : > { %v9168_v1 = vpop.f32.mrf.mxu2 }
 0x56c   : > { %v9181_v22 = vpop.f32.mrf.mxu3 }
 0x57d   : > { %v9398_v36 = vpop.f32.mrf.mxu0 }
 0x57e   : > { %v9418_v37 = vpop.f32.mrf.mxu1 }
 0x57f   : > { %v9419_v44 = vadd.f32 %v9418_v37, %v9398_v36 }
 0x584   : > { %v9438_v43 = vpop.f32.mrf.mxu2 }
 0x585   : > { %v9439_v39 = vadd.f32 %v9438_v43, %v9419_v44  ;;  %v9458_v50 = vpop.f32.mrf.mxu3 }
 0x587   : > { %v9459_v52 = vadd.f32 %v9458_v50, %v9439_v39 }
 0x59e   : > { %v9478_v51 = vpop.f32.mrf.mxu0 }
 0x59f   : > { %v9479_v27 = vadd.f32 %v9478_v51, %v9459_v52 }
 0x5e4   : > { %9504 = sbr.rel (%p9632_p6) target bundleno = 1517 (0x5ed), region = 60 }
 0x5e7   : > { %v9498_v55 = vpop.f32.mrf.mxu1 }
 0x5e8   : > { %v9499_v54 = vadd.f32 %v9498_v55, %v9479_v27 }
 0x5e9   : > { %v15767_v57 = vld [vmem:[#allocation8] ss:$0 sm:$0xff] }
 0x5ea   : > { %v9509_v2 = vadd.f32 %v15767_v57, %v9499_v54 }
 0x5ec   : > { %9510 = vst [vmem:[#allocation10] sm:$0x3] %v9509_v2 }
 0x5ed PF: > { %p14247_p5 = scmp.le.s32.totalorder %s16064_s27, 0 }
 0x5ef   : > { %9514 = sbr.rel (%p14247_p5) target bundleno = 1528 (0x5f8), region = 64 }
 0x5f4   : > { %v9515_v58 = vld [vmem:[#allocation10] sm:$0x3] }
 0x5f5   : > { %v9516_v0 = vadd.f32 %v9515_v58, %v9499_v54 }
 0x5f7   : > { %9517 = vst [vmem:[#allocation10] sm:$0x3] %v9516_v0 }
 0x5f8 PF: > { %p15682_p7 = scmp.eq.s32.totalorder %s16064_s27, 1  ;;  %s9526_s28 = sshll.u32 %s18771_s5, 4  ;;  %s9527_s28 = int_to_ptr.hbm [resolvable:$true] %s9526_s28 }
 0x5f9   : > { %s15969_s7 = smov [#allocation10]  }
 0x5fa   : > { %s9524_s2 = sshll.u32 %s15969_s7, 4  ;;  %s9525_s2 = int_to_ptr.vmem [resolvable:$true] %s9524_s2 }
 0x5fb   : > { %15662 = dma.vmem_to_hbm [thread:$0]  (%p15682_p7), %s9525_s2, 32, %s9527_s28, [#allocation4]  }
 0x5fc   : > { %15945 = dma.done.wait (%p15682_p7), [#allocation4], 32  }
 0x5fd   : > { %15947 = vsyncadd (%p15682_p7), [#allocation4], 4294967264 }
 0x5fe PF: > { %p20_p1 = scmp.ge.s32.totalorder %s16021_s22, 4   ;;  %s18780_s18 = smov %s15954_s19 }
 0x5ff   : > { %s18781_s19 = smov %s15958_s20  ;;  %s18782_s20 = smov %s16031_s25 }
 0x600   : > { %s18783_s21 = smov %s16021_s22  ;;  %22 = sbr.rel (!%p20_p1) target bundleno = 10 (0xa), region = 113 }
 0x605   :  { %9540 = vsyncpa [#allocation3], 1 }
 0x606   :  { %9542 = vsyncpa [#allocation3 + $0x1], 1 }
 0x607   :  { %9543 = vsyncpa [#allocation6], 1 }
 0x608   :  { %9545 = vsyncpa [#allocation6 + $0x1], 1 }
 0x609   :  { %9546 = vsyncpa [#allocation9], 1 }
 0x60a   :  { %9547 = vsyncpa [#allocation4], 1 }
 0x60b   :  { %9549 = vsyncpa [#allocation4 + $0x1], 1 }

</bundles_post_ra>
